<compile_context>
chip_gen: v6e
topology: v6e:2x2x1
jax: 0.10.0
libtpu: 0.0.40
codegen_flags: <defaults>
</compile_context>

<pallas_src>
import functools

import jax
import jax.numpy as jnp
from jax import lax
from jax.experimental import pallas as pl
from jax.experimental.pallas import tpu as pltpu


def _vmem_limit_bytes():
    """Generation-aware scoped-VMEM budget: physical VMEM minus ~16 MiB headroom
    (v5e/v6e ≈ 112 MiB, v7x ≈ 48 MiB).  Falls back to 64 MiB if the query fails."""
    try:
        info = pltpu.get_tpu_info()
        cap = int(getattr(info, "vmem_capacity_bytes", 0))
        if cap > 0:
            return max(32 * 1024 * 1024, cap - 16 * 1024 * 1024)
    except Exception:
        pass
    return 64 * 1024 * 1024


def _tile(dim, preferred):
    """Pick a tile size: `preferred` if it divides `dim`, else the largest
    smaller divisor from a power-of-two ladder, else the full dim."""
    if dim % preferred == 0:
        return preferred
    for t in (1024, 512, 256, 128, 64, 32, 16, 8):
        if t < preferred and dim % t == 0:
            return t
    return dim


# ---------------------------------------------------------------------------
# Kernel 1: tiled dense (matmul [+ bias]) for the qkv and proj linear layers.
# Grid = (M//tm, Nout//tn, K//tk); f32 accumulator lives in VMEM scratch and
# the output block stays resident across the K ("arbitrary") axis.
# ---------------------------------------------------------------------------
def _matmul_kernel(x_ref, w_ref, o_ref, acc_ref):
    @pl.when(pl.program_id(2) == 0)
    def _():
        acc_ref[...] = jnp.zeros_like(acc_ref)

    acc_ref[...] += jnp.dot(x_ref[...], w_ref[...],
                            preferred_element_type=jnp.float32)

    @pl.when(pl.program_id(2) == pl.num_programs(2) - 1)
    def _():
        o_ref[...] = acc_ref[...].astype(o_ref.dtype)


def _matmul_bias_kernel(x_ref, w_ref, b_ref, o_ref, acc_ref):
    @pl.when(pl.program_id(2) == 0)
    def _():
        acc_ref[...] = jnp.zeros_like(acc_ref)

    acc_ref[...] += jnp.dot(x_ref[...], w_ref[...],
                            preferred_element_type=jnp.float32)

    @pl.when(pl.program_id(2) == pl.num_programs(2) - 1)
    def _():
        o_ref[...] = (acc_ref[...] + b_ref[...].astype(jnp.float32)).astype(o_ref.dtype)


def pallas_linear(x2d, w, b=None, *, tm=512, tn=1024, tk=512):
    """x2d: (M, K), w: (K, Nout), optional b: (Nout,) -> (M, Nout)."""
    M, K = x2d.shape
    Kw, Nout = w.shape
    assert K == Kw

    tm = _tile(M, tm)
    tn = _tile(Nout, tn)
    tk = _tile(K, tk)
    grid = (M // tm, Nout // tn, K // tk)

    itemsize = jnp.dtype(x2d.dtype).itemsize
    cost = pl.CostEstimate(
        flops=2 * M * K * Nout,
        transcendentals=0,
        bytes_accessed=(M * K + K * Nout + M * Nout) * itemsize,
    )
    cparams = pltpu.CompilerParams(
        dimension_semantics=("parallel", "parallel", "arbitrary"),
        vmem_limit_bytes=_vmem_limit_bytes(),
    )

    x_spec = pl.BlockSpec((tm, tk), lambda i, j, k: (i, k))
    w_spec = pl.BlockSpec((tk, tn), lambda i, j, k: (k, j))
    o_spec = pl.BlockSpec((tm, tn), lambda i, j, k: (i, j))
    scratch = [pltpu.VMEM((tm, tn), jnp.float32)]

    if b is None:
        return pl.pallas_call(
            _matmul_kernel,
            out_shape=jax.ShapeDtypeStruct((M, Nout), x2d.dtype),
            grid=grid,
            in_specs=[x_spec, w_spec],
            out_specs=o_spec,
            scratch_shapes=scratch,
            compiler_params=cparams,
            cost_estimate=cost,
        )(x2d, w)

    b_spec = pl.BlockSpec((1, tn), lambda i, j, k: (0, j))
    return pl.pallas_call(
        _matmul_bias_kernel,
        out_shape=jax.ShapeDtypeStruct((M, Nout), x2d.dtype),
        grid=grid,
        in_specs=[x_spec, w_spec, b_spec],
        out_specs=o_spec,
        scratch_shapes=scratch,
        compiler_params=cparams,
        cost_estimate=cost,
    )(x2d, w, b.reshape(1, Nout))


# ---------------------------------------------------------------------------
# Kernel 2: flash-style multi-head attention reading the raw (B, N, 3C) qkv
# buffer (Q / K / V arrive as separate C-wide streams) and writing lane-dense
# (B, N, C) output.  Grid = (B, N//tq, N//tk); the KV axis is "arbitrary"
# (online softmax, output block resident across it), (b, qi) are "parallel".
# ---------------------------------------------------------------------------
def _flash_attn_kernel(q_ref, k_ref, v_ref, o_ref, m_sc, l_sc, acc_sc,
                       *, num_heads, scale):
    ki = pl.program_id(2)

    @pl.when(ki == 0)
    def _():
        m_sc[...] = jnp.full_like(m_sc, -jnp.inf)
        l_sc[...] = jnp.zeros_like(l_sc)
        acc_sc[...] = jnp.zeros_like(acc_sc)

    C = o_ref.shape[-1]
    hd = C // num_heads

    q = q_ref[0]    # (tq, C)
    k = k_ref[0]    # (tk, C)
    v = v_ref[0]    # (tk, C)

    for h in range(num_heads):
        # Fold the softmax scale into the small (tq, hd) q tile (not the
        # (tq, tk) score tile).
        qh = q[:, h * hd:(h + 1) * hd] * scale
        kh = k[:, h * hd:(h + 1) * hd]
        vh = v[:, h * hd:(h + 1) * hd]

        # Contract dim 1 of both operands directly on the MXU — no
        # materialized K transpose.  f32 accumulation.
        s = lax.dot_general(qh, kh, (((1,), (1,)), ((), ())),
                            preferred_element_type=jnp.float32)     # (tq, tk)

        m_prev = m_sc[h]                                            # (tq, 1)
        m_new = jnp.maximum(m_prev, jnp.max(s, axis=-1, keepdims=True))
        alpha = jnp.exp(m_prev - m_new)
        p = jnp.exp(s - m_new)                                      # un-normalized

        l_sc[h] = alpha * l_sc[h] + jnp.sum(p, axis=-1, keepdims=True)
        acc_sc[h] = alpha * acc_sc[h] + jnp.dot(
            p.astype(vh.dtype), vh, preferred_element_type=jnp.float32)
        m_sc[h] = m_new

    @pl.when(ki == pl.num_programs(2) - 1)
    def _():
        outs = []
        for h in range(num_heads):
            # Deferred normalization on the (tq, hd) accumulator; EUP
            # approximate reciprocal (free slot).
            inv_l = pl.reciprocal(l_sc[h], approx=True)
            outs.append(acc_sc[h] * inv_l)
        # Lane-dense (tq, C) store matching the (B, N, C) output layout.
        o_ref[0] = jnp.concatenate(outs, axis=-1).astype(o_ref.dtype)


def pallas_attention(qkv, num_heads, scale, out_dtype):
    """qkv: (B, N, 3C) -> attention output (B, N, C) (heads concatenated along
    channels, as in the PyTorch transpose(1,2).reshape(B,N,C))."""
    B, N, C3 = qkv.shape
    C = C3 // 3
    hd = C // num_heads

    # NOTE: the split Q/K/V BlockSpecs require C to be a multiple of the
    # 128-lane width (true for all realistic transformer widths).
    tq = _tile(N, 256)
    tk = _tile(N, 256)
    grid = (B, N // tq, N // tk)

    itemsize = jnp.dtype(qkv.dtype).itemsize
    cost = pl.CostEstimate(
        flops=4 * B * num_heads * N * N * hd,          # q@k^T and attn@v
        transcendentals=B * num_heads * N * N,         # exp
        bytes_accessed=(B * N * C                      # q stream
                        + B * (N // tq) * N * 2 * C    # k/v re-streamed per q tile
                        + B * N * C) * itemsize,       # output
    )

    kern = functools.partial(_flash_attn_kernel, num_heads=num_heads, scale=scale)
    return pl.pallas_call(
        kern,
        out_shape=jax.ShapeDtypeStruct((B, N, C), out_dtype),
        grid=grid,
        in_specs=[
            # Q: columns [0:C) of qkv, streamed over qi, resident across ki.
            pl.BlockSpec((1, tq, C), lambda b, qi, ki: (b, qi, 0)),
            # K: columns [C:2C), streamed over ki.
            pl.BlockSpec((1, tk, C), lambda b, qi, ki: (b, ki, 1)),
            # V: columns [2C:3C), streamed over ki.
            pl.BlockSpec((1, tk, C), lambda b, qi, ki: (b, ki, 2)),
        ],
        out_specs=pl.BlockSpec((1, tq, C), lambda b, qi, ki: (b, qi, 0)),
        scratch_shapes=[
            pltpu.VMEM((num_heads, tq, 1), jnp.float32),    # running max
            pltpu.VMEM((num_heads, tq, 1), jnp.float32),    # running sum
            pltpu.VMEM((num_heads, tq, hd), jnp.float32),   # accumulator
        ],
        compiler_params=pltpu.CompilerParams(
            dimension_semantics=("parallel", "parallel", "arbitrary"),
            vmem_limit_bytes=_vmem_limit_bytes()),
        cost_estimate=cost,
    )(qkv, qkv, qkv)


# ---------------------------------------------------------------------------
# Full module forward (glue in plain JAX; no HBM transposes).
# ---------------------------------------------------------------------------
def attention_forward(x, params, num_heads):
    B, N, C = x.shape
    hd = C // num_heads
    scale = hd ** (-0.5)

    # qkv projection (bias=False)
    qkv = pallas_linear(x.reshape(B * N, C), params["qkv_w"])        # (B*N, 3C)
    qkv = qkv.reshape(B, N, 3 * C)                                   # free reshape

    # fused flash-style multi-head attention on the qkv buffer -> (B, N, C)
    o = pallas_attention(qkv, num_heads, scale, x.dtype)

    # output projection (bias=True)
    out = pallas_linear(o.reshape(B * N, C), params["proj_w"], params["proj_b"])
    return out.reshape(B, N, C)


# ---------------------------------------------------------------------------
# Deterministic parameter init (shapes per nn.Linear in __init__).
# ---------------------------------------------------------------------------
def init_params(key, dim):
    k1, k2, k3 = jax.random.split(key, 3)
    # nn.Linear(dim, 3*dim, bias=False): weight stored transposed (C, 3C)
    qkv_w = jax.random.normal(k1, (dim, 3 * dim), jnp.float32) * 0.02
    # nn.Linear(dim, dim): weight stored transposed (C, C), bias (C,)
    proj_w = jax.random.normal(k2, (dim, dim), jnp.float32) * 0.02
    proj_b = jax.random.normal(k3, (dim,), jnp.float32) * 0.02
    return {"qkv_w": qkv_w, "proj_w": proj_w, "proj_b": proj_b}


if __name__ == "__main__":
    B, N, C = 2, 64, 128
    num_heads = 8  # head_dim = 16

    key = jax.random.PRNGKey(0)
    kx, kp = jax.random.split(key)
    x = jax.random.normal(kx, (B, N, C), jnp.float32)
    params = init_params(kp, C)

    fwd = jax.jit(functools.partial(attention_forward, num_heads=num_heads))
    out = jax.block_until_ready(fwd(x, params))

    # pure-JAX reference of the same math
    q, k, v = jnp.split(x.reshape(B * N, C) @ params["qkv_w"], 3, axis=-1)
    hd = C // num_heads
    q = q.reshape(B, N, num_heads, hd).transpose(0, 2, 1, 3)
    k = k.reshape(B, N, num_heads, hd).transpose(0, 2, 1, 3)
    v = v.reshape(B, N, num_heads, hd).transpose(0, 2, 1, 3)
    s = jnp.einsum("bhqd,bhkd->bhqk", q, k) * hd ** (-0.5)
    p = jax.nn.softmax(s, axis=-1)
    ref = jnp.einsum("bhqk,bhkd->bhqd", p, v).transpose(0, 2, 1, 3).reshape(B, N, C)
    ref = ref @ params["proj_w"] + params["proj_b"]

    assert out.shape == (B, N, C)
    # tolerance accounts for the EUP approximate reciprocal in the softmax
    assert jnp.allclose(out, ref, atol=5e-3, rtol=5e-3), (
        float(jnp.max(jnp.abs(out - ref))))
    print("KERNEL_OK")
</pallas_src>

<mosaic_0001>
module attributes {stable_mosaic.version = 11 : i64} {
  func.func @_matmul_bias_kernel(%arg0: i32, %arg1: i32, %arg2: i32, %arg3: memref<128x128xf32, #tpu.memory_space<vmem>>, %arg4: memref<128x128xf32, #tpu.memory_space<vmem>>, %arg5: memref<1x128xf32, #tpu.memory_space<vmem>>, %arg6: memref<128x128xf32, #tpu.memory_space<vmem>>, %arg7: memref<128x128xf32, #tpu.memory_space<vmem>>) attributes {dimension_semantics = [#tpu.dimension_semantics<parallel>, #tpu.dimension_semantics<parallel>, #tpu.dimension_semantics<arbitrary>], iteration_bounds = array<i64: 1, 1, 1>, scalar_prefetch = 0 : i64, scratch_operands = 1 : i64, tpu.core_type = #tpu.core_type<tc>, window_params = [{transform_indices = @transform_0, window_bounds = array<i64: 128, 128>}, {transform_indices = @transform_1, window_bounds = array<i64: 128, 128>}, {transform_indices = @transform_2, window_bounds = array<i64: 1, 128>}, {transform_indices = @transform_3, window_bounds = array<i64: 128, 128>}]} {
    %c0_i32 = arith.constant 0 : i32
    %0 = arith.cmpi eq, %arg2, %c0_i32 : i32
    %1 = arith.extui %0 : i1 to i32
    %c0_i32_0 = arith.constant 0 : i32
    %2 = arith.cmpi ne, %1, %c0_i32_0 : i32
    scf.if %2 {
      %cst_10 = arith.constant 0.000000e+00 : f32
      %12 = vector.broadcast %cst_10 : f32 to vector<128x128xf32>
      %c0_11 = arith.constant 0 : index
      %c0_12 = arith.constant 0 : index
      %13 = vector.load %arg7[%c0_11, %c0_12] : memref<128x128xf32, #tpu.memory_space<vmem>>, vector<128x128xf32>
      tpu.vector_store %arg7[%c0_11, %c0_12], %12 {strides = array<i32>} : memref<128x128xf32, #tpu.memory_space<vmem>>, vector<128x128xf32>,
    } else {
    }
    %c0 = arith.constant 0 : index
    %c0_1 = arith.constant 0 : index
    %3 = vector.load %arg7[%c0, %c0_1] : memref<128x128xf32, #tpu.memory_space<vmem>>, vector<128x128xf32>
    %c0_2 = arith.constant 0 : index
    %c0_3 = arith.constant 0 : index
    %4 = vector.load %arg3[%c0_2, %c0_3] : memref<128x128xf32, #tpu.memory_space<vmem>>, vector<128x128xf32>
    %c0_4 = arith.constant 0 : index
    %c0_5 = arith.constant 0 : index
    %5 = vector.load %arg4[%c0_4, %c0_5] : memref<128x128xf32, #tpu.memory_space<vmem>>, vector<128x128xf32>
    %cst = arith.constant dense<0.000000e+00> : vector<128x128xf32>
    %6 = tpu.matmul %4, %5, %cst {dimension_numbers = #tpu.dot_dimension_numbers<[1], [0], [0], [1], [0, 0, 1, 1], [], []>} : vector<128x128xf32>, vector<128x128xf32>, vector<128x128xf32> -> vector<128x128xf32>
    %7 = arith.addf %3, %6 : vector<128x128xf32>
    %c0_6 = arith.constant 0 : index
    %c0_7 = arith.constant 0 : index
    %8 = vector.load %arg7[%c0_6, %c0_7] : memref<128x128xf32, #tpu.memory_space<vmem>>, vector<128x128xf32>
    tpu.vector_store %arg7[%c0_6, %c0_7], %7 {strides = array<i32>} : memref<128x128xf32, #tpu.memory_space<vmem>>, vector<128x128xf32>,
    %c0_i32_8 = arith.constant 0 : i32
    %9 = arith.cmpi eq, %arg2, %c0_i32_8 : i32
    %10 = arith.extui %9 : i1 to i32
    %c0_i32_9 = arith.constant 0 : i32
    %11 = arith.cmpi ne, %10, %c0_i32_9 : i32
    scf.if %11 {
      %c0_10 = arith.constant 0 : index
      %c0_11 = arith.constant 0 : index
      %12 = vector.load %arg7[%c0_10, %c0_11] : memref<128x128xf32, #tpu.memory_space<vmem>>, vector<128x128xf32>
      %c0_12 = arith.constant 0 : index
      %c0_13 = arith.constant 0 : index
      %13 = vector.load %arg5[%c0_12, %c0_13] : memref<1x128xf32, #tpu.memory_space<vmem>>, vector<1x128xf32>
      %14 = vector.broadcast %13 : vector<1x128xf32> to vector<128x128xf32>
      %15 = arith.addf %12, %14 : vector<128x128xf32>
      %c0_14 = arith.constant 0 : index
      %c0_15 = arith.constant 0 : index
      %16 = vector.load %arg6[%c0_14, %c0_15] : memref<128x128xf32, #tpu.memory_space<vmem>>, vector<128x128xf32>
      tpu.vector_store %arg6[%c0_14, %c0_15], %15 {strides = array<i32>} : memref<128x128xf32, #tpu.memory_space<vmem>>, vector<128x128xf32>,
    } else {
    }
    return
  }
  func.func @transform_0(%arg0: i32, %arg1: i32, %arg2: i32) -> (i32, i32) {
    %c0_i32 = arith.constant 0 : i32
    return %arg0, %arg2 : i32, i32
  }
  func.func @transform_1(%arg0: i32, %arg1: i32, %arg2: i32) -> (i32, i32) {
    %c0_i32 = arith.constant 0 : i32
    return %arg2, %arg1 : i32, i32
  }
  func.func @transform_2(%arg0: i32, %arg1: i32, %arg2: i32) -> (i32, i32) {
    %c0_i32 = arith.constant 0 : i32
    %c0_i32_0 = arith.constant 0 : i32
    return %c0_i32, %arg1 : i32, i32
  }
  func.func @transform_3(%arg0: i32, %arg1: i32, %arg2: i32) -> (i32, i32) {
    %c0_i32 = arith.constant 0 : i32
    return %arg0, %arg1 : i32, i32
  }
}

module attributes {stable_mosaic.version = 11 : i64} {
  func.func @_matmul_kernel(%arg0: i32, %arg1: i32, %arg2: i32, %arg3: memref<128x128xf32, #tpu.memory_space<vmem>>, %arg4: memref<128x128xf32, #tpu.memory_space<vmem>>, %arg5: memref<128x128xf32, #tpu.memory_space<vmem>>, %arg6: memref<128x128xf32, #tpu.memory_space<vmem>>) attributes {dimension_semantics = [#tpu.dimension_semantics<parallel>, #tpu.dimension_semantics<parallel>, #tpu.dimension_semantics<arbitrary>], iteration_bounds = array<i64: 1, 3, 1>, scalar_prefetch = 0 : i64, scratch_operands = 1 : i64, tpu.core_type = #tpu.core_type<tc>, window_params = [{transform_indices = @transform_0, window_bounds = array<i64: 128, 128>}, {transform_indices = @transform_1, window_bounds = array<i64: 128, 128>}, {transform_indices = @transform_2, window_bounds = array<i64: 128, 128>}]} {
    %c0_i32 = arith.constant 0 : i32
    %0 = arith.cmpi eq, %arg2, %c0_i32 : i32
    %1 = arith.extui %0 : i1 to i32
    %c0_i32_0 = arith.constant 0 : i32
    %2 = arith.cmpi ne, %1, %c0_i32_0 : i32
    scf.if %2 {
      %cst_10 = arith.constant 0.000000e+00 : f32
      %12 = vector.broadcast %cst_10 : f32 to vector<128x128xf32>
      %c0_11 = arith.constant 0 : index
      %c0_12 = arith.constant 0 : index
      %13 = vector.load %arg6[%c0_11, %c0_12] : memref<128x128xf32, #tpu.memory_space<vmem>>, vector<128x128xf32>
      tpu.vector_store %arg6[%c0_11, %c0_12], %12 {strides = array<i32>} : memref<128x128xf32, #tpu.memory_space<vmem>>, vector<128x128xf32>,
    } else {
    }
    %c0 = arith.constant 0 : index
    %c0_1 = arith.constant 0 : index
    %3 = vector.load %arg6[%c0, %c0_1] : memref<128x128xf32, #tpu.memory_space<vmem>>, vector<128x128xf32>
    %c0_2 = arith.constant 0 : index
    %c0_3 = arith.constant 0 : index
    %4 = vector.load %arg3[%c0_2, %c0_3] : memref<128x128xf32, #tpu.memory_space<vmem>>, vector<128x128xf32>
    %c0_4 = arith.constant 0 : index
    %c0_5 = arith.constant 0 : index
    %5 = vector.load %arg4[%c0_4, %c0_5] : memref<128x128xf32, #tpu.memory_space<vmem>>, vector<128x128xf32>
    %cst = arith.constant dense<0.000000e+00> : vector<128x128xf32>
    %6 = tpu.matmul %4, %5, %cst {dimension_numbers = #tpu.dot_dimension_numbers<[1], [0], [0], [1], [0, 0, 1, 1], [], []>} : vector<128x128xf32>, vector<128x128xf32>, vector<128x128xf32> -> vector<128x128xf32>
    %7 = arith.addf %3, %6 : vector<128x128xf32>
    %c0_6 = arith.constant 0 : index
    %c0_7 = arith.constant 0 : index
    %8 = vector.load %arg6[%c0_6, %c0_7] : memref<128x128xf32, #tpu.memory_space<vmem>>, vector<128x128xf32>
    tpu.vector_store %arg6[%c0_6, %c0_7], %7 {strides = array<i32>} : memref<128x128xf32, #tpu.memory_space<vmem>>, vector<128x128xf32>,
    %c0_i32_8 = arith.constant 0 : i32
    %9 = arith.cmpi eq, %arg2, %c0_i32_8 : i32
    %10 = arith.extui %9 : i1 to i32
    %c0_i32_9 = arith.constant 0 : i32
    %11 = arith.cmpi ne, %10, %c0_i32_9 : i32
    scf.if %11 {
      %c0_10 = arith.constant 0 : index
      %c0_11 = arith.constant 0 : index
      %12 = vector.load %arg6[%c0_10, %c0_11] : memref<128x128xf32, #tpu.memory_space<vmem>>, vector<128x128xf32>
      %c0_12 = arith.constant 0 : index
      %c0_13 = arith.constant 0 : index
      %13 = vector.load %arg5[%c0_12, %c0_13] : memref<128x128xf32, #tpu.memory_space<vmem>>, vector<128x128xf32>
      tpu.vector_store %arg5[%c0_12, %c0_13], %12 {strides = array<i32>} : memref<128x128xf32, #tpu.memory_space<vmem>>, vector<128x128xf32>,
    } else {
    }
    return
  }
  func.func @transform_0(%arg0: i32, %arg1: i32, %arg2: i32) -> (i32, i32) {
    %c0_i32 = arith.constant 0 : i32
    return %arg0, %arg2 : i32, i32
  }
  func.func @transform_1(%arg0: i32, %arg1: i32, %arg2: i32) -> (i32, i32) {
    %c0_i32 = arith.constant 0 : i32
    return %arg2, %arg1 : i32, i32
  }
  func.func @transform_2(%arg0: i32, %arg1: i32, %arg2: i32) -> (i32, i32) {
    %c0_i32 = arith.constant 0 : i32
    return %arg0, %arg1 : i32, i32
  }
}

module attributes {stable_mosaic.version = 11 : i64} {
  func.func @_flash_attn_kernel(%arg0: i32, %arg1: i32, %arg2: i32, %arg3: memref<1x64x128xf32, #tpu.memory_space<vmem>>, %arg4: memref<1x64x128xf32, #tpu.memory_space<vmem>>, %arg5: memref<1x64x128xf32, #tpu.memory_space<vmem>>, %arg6: memref<1x64x128xf32, #tpu.memory_space<vmem>>, %arg7: memref<8x64x1xf32, #tpu.memory_space<vmem>>, %arg8: memref<8x64x1xf32, #tpu.memory_space<vmem>>, %arg9: memref<8x64x16xf32, #tpu.memory_space<vmem>>) attributes {dimension_semantics = [#tpu.dimension_semantics<parallel>, #tpu.dimension_semantics<parallel>, #tpu.dimension_semantics<arbitrary>], iteration_bounds = array<i64: 2, 1, 1>, scalar_prefetch = 0 : i64, scratch_operands = 3 : i64, tpu.core_type = #tpu.core_type<tc>, window_params = [{transform_indices = @transform_0, window_bounds = array<i64: 1, 64, 128>}, {transform_indices = @transform_1, window_bounds = array<i64: 1, 64, 128>}, {transform_indices = @transform_2, window_bounds = array<i64: 1, 64, 128>}, {transform_indices = @transform_3, window_bounds = array<i64: 1, 64, 128>}]} {
    %c0_i32 = arith.constant 0 : i32
    %0 = arith.cmpi eq, %arg2, %c0_i32 : i32
    %1 = arith.extui %0 : i1 to i32
    %c0_i32_0 = arith.constant 0 : i32
    %2 = arith.cmpi ne, %1, %c0_i32_0 : i32
    scf.if %2 {
      %cst_187 = arith.constant 0xFF800000 : f32
      %308 = vector.broadcast %cst_187 : f32 to vector<8x64x1xf32>
      %c0_188 = arith.constant 0 : index
      %c0_189 = arith.constant 0 : index
      %c0_190 = arith.constant 0 : index
      %309 = vector.load %arg7[%c0_188, %c0_189, %c0_190] : memref<8x64x1xf32, #tpu.memory_space<vmem>>, vector<8x64x1xf32>
      tpu.vector_store %arg7[%c0_188, %c0_189, %c0_190], %308 {strides = array<i32>} : memref<8x64x1xf32, #tpu.memory_space<vmem>>, vector<8x64x1xf32>,
      %cst_191 = arith.constant 0.000000e+00 : f32
      %310 = vector.broadcast %cst_191 : f32 to vector<8x64x1xf32>
      %c0_192 = arith.constant 0 : index
      %c0_193 = arith.constant 0 : index
      %c0_194 = arith.constant 0 : index
      %311 = vector.load %arg8[%c0_192, %c0_193, %c0_194] : memref<8x64x1xf32, #tpu.memory_space<vmem>>, vector<8x64x1xf32>
      tpu.vector_store %arg8[%c0_192, %c0_193, %c0_194], %310 {strides = array<i32>} : memref<8x64x1xf32, #tpu.memory_space<vmem>>, vector<8x64x1xf32>,
      %cst_195 = arith.constant 0.000000e+00 : f32
      %312 = vector.broadcast %cst_195 : f32 to vector<8x64x16xf32>
      %c0_196 = arith.constant 0 : index
      %c0_197 = arith.constant 0 : index
      %c0_198 = arith.constant 0 : index
      %313 = vector.load %arg9[%c0_196, %c0_197, %c0_198] : memref<8x64x16xf32, #tpu.memory_space<vmem>>, vector<8x64x16xf32>
      tpu.vector_store %arg9[%c0_196, %c0_197, %c0_198], %312 {strides = array<i32>} : memref<8x64x16xf32, #tpu.memory_space<vmem>>, vector<8x64x16xf32>,
    } else {
    }
    %c0 = arith.constant 0 : index
    %c0_1 = arith.constant 0 : index
    %c0_2 = arith.constant 0 : index
    %3 = vector.load %arg3[%c0, %c0_1, %c0_2] : memref<1x64x128xf32, #tpu.memory_space<vmem>>, vector<1x64x128xf32>
    %4 = vector.shape_cast %3 : vector<1x64x128xf32> to vector<64x128xf32>
    %c0_3 = arith.constant 0 : index
    %c0_4 = arith.constant 0 : index
    %c0_5 = arith.constant 0 : index
    %5 = vector.load %arg4[%c0_3, %c0_4, %c0_5] : memref<1x64x128xf32, #tpu.memory_space<vmem>>, vector<1x64x128xf32>
    %6 = vector.shape_cast %5 : vector<1x64x128xf32> to vector<64x128xf32>
    %c0_6 = arith.constant 0 : index
    %c0_7 = arith.constant 0 : index
    %c0_8 = arith.constant 0 : index
    %7 = vector.load %arg5[%c0_6, %c0_7, %c0_8] : memref<1x64x128xf32, #tpu.memory_space<vmem>>, vector<1x64x128xf32>
    %8 = vector.shape_cast %7 : vector<1x64x128xf32> to vector<64x128xf32>
    %9 = vector.extract_strided_slice %4 {offsets = [0, 0], sizes = [64, 16], strides = [1, 1]} : vector<64x128xf32> to vector<64x16xf32>
    %cst = arith.constant 2.500000e-01 : f32
    %10 = vector.broadcast %cst : f32 to vector<64x16xf32>
    %11 = arith.mulf %9, %10 : vector<64x16xf32>
    %12 = vector.extract_strided_slice %6 {offsets = [0, 0], sizes = [64, 16], strides = [1, 1]} : vector<64x128xf32> to vector<64x16xf32>
    %13 = vector.extract_strided_slice %8 {offsets = [0, 0], sizes = [64, 16], strides = [1, 1]} : vector<64x128xf32> to vector<64x16xf32>
    %cst_9 = arith.constant dense<0.000000e+00> : vector<64x64xf32>
    %14 = tpu.matmul %11, %12, %cst_9 {dimension_numbers = #tpu.dot_dimension_numbers<[1], [1], [0], [0], [0, 0, 1, 0], [], []>} : vector<64x16xf32>, vector<64x16xf32>, vector<64x64xf32> -> vector<64x64xf32>
    %c0_10 = arith.constant 0 : index
    %c0_11 = arith.constant 0 : index
    %c0_12 = arith.constant 0 : index
    %15 = vector.load %arg7[%c0_10, %c0_11, %c0_12] : memref<8x64x1xf32, #tpu.memory_space<vmem>>, vector<1x64x1xf32>
    %16 = vector.shape_cast %15 : vector<1x64x1xf32> to vector<64x1xf32>
    %cst_13 = arith.constant dense<0xFF800000> : vector<64xf32>
    %17 = vector.multi_reduction <maximumf>, %14, %cst_13 [1] : vector<64x64xf32> to vector<64xf32>
    %18 = vector.shape_cast %17 : vector<64xf32> to vector<64x1xf32>
    %19 = arith.maximumf %16, %18 : vector<64x1xf32>
    %20 = arith.subf %16, %19 : vector<64x1xf32>
    %21 = math.exp %20 : vector<64x1xf32>
    %22 = vector.broadcast %19 : vector<64x1xf32> to vector<64x64xf32>
    %23 = arith.subf %14, %22 : vector<64x64xf32>
    %24 = math.exp %23 : vector<64x64xf32>
    %c0_14 = arith.constant 0 : index
    %c0_15 = arith.constant 0 : index
    %c0_16 = arith.constant 0 : index
    %25 = vector.load %arg8[%c0_14, %c0_15, %c0_16] : memref<8x64x1xf32, #tpu.memory_space<vmem>>, vector<1x64x1xf32>
    %26 = vector.shape_cast %25 : vector<1x64x1xf32> to vector<64x1xf32>
    %27 = arith.mulf %21, %26 : vector<64x1xf32>
    %cst_17 = arith.constant dense<0.000000e+00> : vector<64xf32>
    %28 = vector.multi_reduction <add>, %24, %cst_17 [1] : vector<64x64xf32> to vector<64xf32>
    %29 = vector.shape_cast %28 : vector<64xf32> to vector<64x1xf32>
    %30 = arith.addf %27, %29 : vector<64x1xf32>
    %c0_18 = arith.constant 0 : index
    %c0_19 = arith.constant 0 : index
    %c0_20 = arith.constant 0 : index
    %31 = vector.load %arg8[%c0_18, %c0_19, %c0_20] : memref<8x64x1xf32, #tpu.memory_space<vmem>>, vector<1x64x1xf32>
    %32 = vector.shape_cast %31 : vector<1x64x1xf32> to vector<64x1xf32>
    %33 = vector.shape_cast %30 : vector<64x1xf32> to vector<1x64x1xf32>
    tpu.vector_store %arg8[%c0_18, %c0_19, %c0_20], %33 {strides = array<i32>} : memref<8x64x1xf32, #tpu.memory_space<vmem>>, vector<1x64x1xf32>,
    %c0_21 = arith.constant 0 : index
    %c0_22 = arith.constant 0 : index
    %c0_23 = arith.constant 0 : index
    %34 = vector.load %arg9[%c0_21, %c0_22, %c0_23] : memref<8x64x16xf32, #tpu.memory_space<vmem>>, vector<1x64x16xf32>
    %35 = vector.shape_cast %34 : vector<1x64x16xf32> to vector<64x16xf32>
    %36 = vector.broadcast %21 : vector<64x1xf32> to vector<64x16xf32>
    %37 = arith.mulf %36, %35 : vector<64x16xf32>
    %cst_24 = arith.constant dense<0.000000e+00> : vector<64x16xf32>
    %38 = tpu.matmul %24, %13, %cst_24 {dimension_numbers = #tpu.dot_dimension_numbers<[1], [0], [0], [1], [0, 0, 1, 1], [], []>} : vector<64x64xf32>, vector<64x16xf32>, vector<64x16xf32> -> vector<64x16xf32>
    %39 = arith.addf %37, %38 : vector<64x16xf32>
    %c0_25 = arith.constant 0 : index
    %c0_26 = arith.constant 0 : index
    %c0_27 = arith.constant 0 : index
    %40 = vector.load %arg9[%c0_25, %c0_26, %c0_27] : memref<8x64x16xf32, #tpu.memory_space<vmem>>, vector<1x64x16xf32>
    %41 = vector.shape_cast %40 : vector<1x64x16xf32> to vector<64x16xf32>
    %42 = vector.shape_cast %39 : vector<64x16xf32> to vector<1x64x16xf32>
    tpu.vector_store %arg9[%c0_25, %c0_26, %c0_27], %42 {strides = array<i32>} : memref<8x64x16xf32, #tpu.memory_space<vmem>>, vector<1x64x16xf32>,
    %c0_28 = arith.constant 0 : index
    %c0_29 = arith.constant 0 : index
    %c0_30 = arith.constant 0 : index
    %43 = vector.load %arg7[%c0_28, %c0_29, %c0_30] : memref<8x64x1xf32, #tpu.memory_space<vmem>>, vector<1x64x1xf32>
    %44 = vector.shape_cast %43 : vector<1x64x1xf32> to vector<64x1xf32>
    %45 = vector.shape_cast %19 : vector<64x1xf32> to vector<1x64x1xf32>
    tpu.vector_store %arg7[%c0_28, %c0_29, %c0_30], %45 {strides = array<i32>} : memref<8x64x1xf32, #tpu.memory_space<vmem>>, vector<1x64x1xf32>,
    %46 = vector.extract_strided_slice %4 {offsets = [0, 16], sizes = [64, 16], strides = [1, 1]} : vector<64x128xf32> to vector<64x16xf32>
    %cst_31 = arith.constant 2.500000e-01 : f32
    %47 = vector.broadcast %cst_31 : f32 to vector<64x16xf32>
    %48 = arith.mulf %46, %47 : vector<64x16xf32>
    %49 = vector.extract_strided_slice %6 {offsets = [0, 16], sizes = [64, 16], strides = [1, 1]} : vector<64x128xf32> to vector<64x16xf32>
    %50 = vector.extract_strided_slice %8 {offsets = [0, 16], sizes = [64, 16], strides = [1, 1]} : vector<64x128xf32> to vector<64x16xf32>
    %cst_32 = arith.constant dense<0.000000e+00> : vector<64x64xf32>
    %51 = tpu.matmul %48, %49, %cst_32 {dimension_numbers = #tpu.dot_dimension_numbers<[1], [1], [0], [0], [0, 0, 1, 0], [], []>} : vector<64x16xf32>, vector<64x16xf32>, vector<64x64xf32> -> vector<64x64xf32>
    %c1 = arith.constant 1 : index
    %c0_33 = arith.constant 0 : index
    %c0_34 = arith.constant 0 : index
    %52 = vector.load %arg7[%c1, %c0_33, %c0_34] : memref<8x64x1xf32, #tpu.memory_space<vmem>>, vector<1x64x1xf32>
    %53 = vector.shape_cast %52 : vector<1x64x1xf32> to vector<64x1xf32>
    %cst_35 = arith.constant dense<0xFF800000> : vector<64xf32>
    %54 = vector.multi_reduction <maximumf>, %51, %cst_35 [1] : vector<64x64xf32> to vector<64xf32>
    %55 = vector.shape_cast %54 : vector<64xf32> to vector<64x1xf32>
    %56 = arith.maximumf %53, %55 : vector<64x1xf32>
    %57 = arith.subf %53, %56 : vector<64x1xf32>
    %58 = math.exp %57 : vector<64x1xf32>
    %59 = vector.broadcast %56 : vector<64x1xf32> to vector<64x64xf32>
    %60 = arith.subf %51, %59 : vector<64x64xf32>
    %61 = math.exp %60 : vector<64x64xf32>
    %c1_36 = arith.constant 1 : index
    %c0_37 = arith.constant 0 : index
    %c0_38 = arith.constant 0 : index
    %62 = vector.load %arg8[%c1_36, %c0_37, %c0_38] : memref<8x64x1xf32, #tpu.memory_space<vmem>>, vector<1x64x1xf32>
    %63 = vector.shape_cast %62 : vector<1x64x1xf32> to vector<64x1xf32>
    %64 = arith.mulf %58, %63 : vector<64x1xf32>
    %cst_39 = arith.constant dense<0.000000e+00> : vector<64xf32>
    %65 = vector.multi_reduction <add>, %61, %cst_39 [1] : vector<64x64xf32> to vector<64xf32>
    %66 = vector.shape_cast %65 : vector<64xf32> to vector<64x1xf32>
    %67 = arith.addf %64, %66 : vector<64x1xf32>
    %c1_40 = arith.constant 1 : index
    %c0_41 = arith.constant 0 : index
    %c0_42 = arith.constant 0 : index
    %68 = vector.load %arg8[%c1_40, %c0_41, %c0_42] : memref<8x64x1xf32, #tpu.memory_space<vmem>>, vector<1x64x1xf32>
    %69 = vector.shape_cast %68 : vector<1x64x1xf32> to vector<64x1xf32>
    %70 = vector.shape_cast %67 : vector<64x1xf32> to vector<1x64x1xf32>
    tpu.vector_store %arg8[%c1_40, %c0_41, %c0_42], %70 {strides = array<i32>} : memref<8x64x1xf32, #tpu.memory_space<vmem>>, vector<1x64x1xf32>,
    %c1_43 = arith.constant 1 : index
    %c0_44 = arith.constant 0 : index
    %c0_45 = arith.constant 0 : index
    %71 = vector.load %arg9[%c1_43, %c0_44, %c0_45] : memref<8x64x16xf32, #tpu.memory_space<vmem>>, vector<1x64x16xf32>
    %72 = vector.shape_cast %71 : vector<1x64x16xf32> to vector<64x16xf32>
    %73 = vector.broadcast %58 : vector<64x1xf32> to vector<64x16xf32>
    %74 = arith.mulf %73, %72 : vector<64x16xf32>
    %cst_46 = arith.constant dense<0.000000e+00> : vector<64x16xf32>
    %75 = tpu.matmul %61, %50, %cst_46 {dimension_numbers = #tpu.dot_dimension_numbers<[1], [0], [0], [1], [0, 0, 1, 1], [], []>} : vector<64x64xf32>, vector<64x16xf32>, vector<64x16xf32> -> vector<64x16xf32>
    %76 = arith.addf %74, %75 : vector<64x16xf32>
    %c1_47 = arith.constant 1 : index
    %c0_48 = arith.constant 0 : index
    %c0_49 = arith.constant 0 : index
    %77 = vector.load %arg9[%c1_47, %c0_48, %c0_49] : memref<8x64x16xf32, #tpu.memory_space<vmem>>, vector<1x64x16xf32>
    %78 = vector.shape_cast %77 : vector<1x64x16xf32> to vector<64x16xf32>
    %79 = vector.shape_cast %76 : vector<64x16xf32> to vector<1x64x16xf32>
    tpu.vector_store %arg9[%c1_47, %c0_48, %c0_49], %79 {strides = array<i32>} : memref<8x64x16xf32, #tpu.memory_space<vmem>>, vector<1x64x16xf32>,
    %c1_50 = arith.constant 1 : index
    %c0_51 = arith.constant 0 : index
    %c0_52 = arith.constant 0 : index
    %80 = vector.load %arg7[%c1_50, %c0_51, %c0_52] : memref<8x64x1xf32, #tpu.memory_space<vmem>>, vector<1x64x1xf32>
    %81 = vector.shape_cast %80 : vector<1x64x1xf32> to vector<64x1xf32>
    %82 = vector.shape_cast %56 : vector<64x1xf32> to vector<1x64x1xf32>
    tpu.vector_store %arg7[%c1_50, %c0_51, %c0_52], %82 {strides = array<i32>} : memref<8x64x1xf32, #tpu.memory_space<vmem>>, vector<1x64x1xf32>,
    %83 = vector.extract_strided_slice %4 {offsets = [0, 32], sizes = [64, 16], strides = [1, 1]} : vector<64x128xf32> to vector<64x16xf32>
    %cst_53 = arith.constant 2.500000e-01 : f32
    %84 = vector.broadcast %cst_53 : f32 to vector<64x16xf32>
    %85 = arith.mulf %83, %84 : vector<64x16xf32>
    %86 = vector.extract_strided_slice %6 {offsets = [0, 32], sizes = [64, 16], strides = [1, 1]} : vector<64x128xf32> to vector<64x16xf32>
    %87 = vector.extract_strided_slice %8 {offsets = [0, 32], sizes = [64, 16], strides = [1, 1]} : vector<64x128xf32> to vector<64x16xf32>
    %cst_54 = arith.constant dense<0.000000e+00> : vector<64x64xf32>
    %88 = tpu.matmul %85, %86, %cst_54 {dimension_numbers = #tpu.dot_dimension_numbers<[1], [1], [0], [0], [0, 0, 1, 0], [], []>} : vector<64x16xf32>, vector<64x16xf32>, vector<64x64xf32> -> vector<64x64xf32>
    %c2 = arith.constant 2 : index
    %c0_55 = arith.constant 0 : index
    %c0_56 = arith.constant 0 : index
    %89 = vector.load %arg7[%c2, %c0_55, %c0_56] : memref<8x64x1xf32, #tpu.memory_space<vmem>>, vector<1x64x1xf32>
    %90 = vector.shape_cast %89 : vector<1x64x1xf32> to vector<64x1xf32>
    %cst_57 = arith.constant dense<0xFF800000> : vector<64xf32>
    %91 = vector.multi_reduction <maximumf>, %88, %cst_57 [1] : vector<64x64xf32> to vector<64xf32>
    %92 = vector.shape_cast %91 : vector<64xf32> to vector<64x1xf32>
    %93 = arith.maximumf %90, %92 : vector<64x1xf32>
    %94 = arith.subf %90, %93 : vector<64x1xf32>
    %95 = math.exp %94 : vector<64x1xf32>
    %96 = vector.broadcast %93 : vector<64x1xf32> to vector<64x64xf32>
    %97 = arith.subf %88, %96 : vector<64x64xf32>
    %98 = math.exp %97 : vector<64x64xf32>
    %c2_58 = arith.constant 2 : index
    %c0_59 = arith.constant 0 : index
    %c0_60 = arith.constant 0 : index
    %99 = vector.load %arg8[%c2_58, %c0_59, %c0_60] : memref<8x64x1xf32, #tpu.memory_space<vmem>>, vector<1x64x1xf32>
    %100 = vector.shape_cast %99 : vector<1x64x1xf32> to vector<64x1xf32>
    %101 = arith.mulf %95, %100 : vector<64x1xf32>
    %cst_61 = arith.constant dense<0.000000e+00> : vector<64xf32>
    %102 = vector.multi_reduction <add>, %98, %cst_61 [1] : vector<64x64xf32> to vector<64xf32>
    %103 = vector.shape_cast %102 : vector<64xf32> to vector<64x1xf32>
    %104 = arith.addf %101, %103 : vector<64x1xf32>
    %c2_62 = arith.constant 2 : index
    %c0_63 = arith.constant 0 : index
    %c0_64 = arith.constant 0 : index
    %105 = vector.load %arg8[%c2_62, %c0_63, %c0_64] : memref<8x64x1xf32, #tpu.memory_space<vmem>>, vector<1x64x1xf32>
    %106 = vector.shape_cast %105 : vector<1x64x1xf32> to vector<64x1xf32>
    %107 = vector.shape_cast %104 : vector<64x1xf32> to vector<1x64x1xf32>
    tpu.vector_store %arg8[%c2_62, %c0_63, %c0_64], %107 {strides = array<i32>} : memref<8x64x1xf32, #tpu.memory_space<vmem>>, vector<1x64x1xf32>,
    %c2_65 = arith.constant 2 : index
    %c0_66 = arith.constant 0 : index
    %c0_67 = arith.constant 0 : index
    %108 = vector.load %arg9[%c2_65, %c0_66, %c0_67] : memref<8x64x16xf32, #tpu.memory_space<vmem>>, vector<1x64x16xf32>
    %109 = vector.shape_cast %108 : vector<1x64x16xf32> to vector<64x16xf32>
    %110 = vector.broadcast %95 : vector<64x1xf32> to vector<64x16xf32>
    %111 = arith.mulf %110, %109 : vector<64x16xf32>
    %cst_68 = arith.constant dense<0.000000e+00> : vector<64x16xf32>
    %112 = tpu.matmul %98, %87, %cst_68 {dimension_numbers = #tpu.dot_dimension_numbers<[1], [0], [0], [1], [0, 0, 1, 1], [], []>} : vector<64x64xf32>, vector<64x16xf32>, vector<64x16xf32> -> vector<64x16xf32>
    %113 = arith.addf %111, %112 : vector<64x16xf32>
    %c2_69 = arith.constant 2 : index
    %c0_70 = arith.constant 0 : index
    %c0_71 = arith.constant 0 : index
    %114 = vector.load %arg9[%c2_69, %c0_70, %c0_71] : memref<8x64x16xf32, #tpu.memory_space<vmem>>, vector<1x64x16xf32>
    %115 = vector.shape_cast %114 : vector<1x64x16xf32> to vector<64x16xf32>
    %116 = vector.shape_cast %113 : vector<64x16xf32> to vector<1x64x16xf32>
    tpu.vector_store %arg9[%c2_69, %c0_70, %c0_71], %116 {strides = array<i32>} : memref<8x64x16xf32, #tpu.memory_space<vmem>>, vector<1x64x16xf32>,
    %c2_72 = arith.constant 2 : index
    %c0_73 = arith.constant 0 : index
    %c0_74 = arith.constant 0 : index
    %117 = vector.load %arg7[%c2_72, %c0_73, %c0_74] : memref<8x64x1xf32, #tpu.memory_space<vmem>>, vector<1x64x1xf32>
    %118 = vector.shape_cast %117 : vector<1x64x1xf32> to vector<64x1xf32>
    %119 = vector.shape_cast %93 : vector<64x1xf32> to vector<1x64x1xf32>
    tpu.vector_store %arg7[%c2_72, %c0_73, %c0_74], %119 {strides = array<i32>} : memref<8x64x1xf32, #tpu.memory_space<vmem>>, vector<1x64x1xf32>,
    %120 = vector.extract_strided_slice %4 {offsets = [0, 48], sizes = [64, 16], strides = [1, 1]} : vector<64x128xf32> to vector<64x16xf32>
    %cst_75 = arith.constant 2.500000e-01 : f32
    %121 = vector.broadcast %cst_75 : f32 to vector<64x16xf32>
    %122 = arith.mulf %120, %121 : vector<64x16xf32>
    %123 = vector.extract_strided_slice %6 {offsets = [0, 48], sizes = [64, 16], strides = [1, 1]} : vector<64x128xf32> to vector<64x16xf32>
    %124 = vector.extract_strided_slice %8 {offsets = [0, 48], sizes = [64, 16], strides = [1, 1]} : vector<64x128xf32> to vector<64x16xf32>
    %cst_76 = arith.constant dense<0.000000e+00> : vector<64x64xf32>
    %125 = tpu.matmul %122, %123, %cst_76 {dimension_numbers = #tpu.dot_dimension_numbers<[1], [1], [0], [0], [0, 0, 1, 0], [], []>} : vector<64x16xf32>, vector<64x16xf32>, vector<64x64xf32> -> vector<64x64xf32>
    %c3 = arith.constant 3 : index
    %c0_77 = arith.constant 0 : index
    %c0_78 = arith.constant 0 : index
    %126 = vector.load %arg7[%c3, %c0_77, %c0_78] : memref<8x64x1xf32, #tpu.memory_space<vmem>>, vector<1x64x1xf32>
    %127 = vector.shape_cast %126 : vector<1x64x1xf32> to vector<64x1xf32>
    %cst_79 = arith.constant dense<0xFF800000> : vector<64xf32>
    %128 = vector.multi_reduction <maximumf>, %125, %cst_79 [1] : vector<64x64xf32> to vector<64xf32>
    %129 = vector.shape_cast %128 : vector<64xf32> to vector<64x1xf32>
    %130 = arith.maximumf %127, %129 : vector<64x1xf32>
    %131 = arith.subf %127, %130 : vector<64x1xf32>
    %132 = math.exp %131 : vector<64x1xf32>
    %133 = vector.broadcast %130 : vector<64x1xf32> to vector<64x64xf32>
    %134 = arith.subf %125, %133 : vector<64x64xf32>
    %135 = math.exp %134 : vector<64x64xf32>
    %c3_80 = arith.constant 3 : index
    %c0_81 = arith.constant 0 : index
    %c0_82 = arith.constant 0 : index
    %136 = vector.load %arg8[%c3_80, %c0_81, %c0_82] : memref<8x64x1xf32, #tpu.memory_space<vmem>>, vector<1x64x1xf32>
    %137 = vector.shape_cast %136 : vector<1x64x1xf32> to vector<64x1xf32>
    %138 = arith.mulf %132, %137 : vector<64x1xf32>
    %cst_83 = arith.constant dense<0.000000e+00> : vector<64xf32>
    %139 = vector.multi_reduction <add>, %135, %cst_83 [1] : vector<64x64xf32> to vector<64xf32>
    %140 = vector.shape_cast %139 : vector<64xf32> to vector<64x1xf32>
    %141 = arith.addf %138, %140 : vector<64x1xf32>
    %c3_84 = arith.constant 3 : index
    %c0_85 = arith.constant 0 : index
    %c0_86 = arith.constant 0 : index
    %142 = vector.load %arg8[%c3_84, %c0_85, %c0_86] : memref<8x64x1xf32, #tpu.memory_space<vmem>>, vector<1x64x1xf32>
    %143 = vector.shape_cast %142 : vector<1x64x1xf32> to vector<64x1xf32>
    %144 = vector.shape_cast %141 : vector<64x1xf32> to vector<1x64x1xf32>
    tpu.vector_store %arg8[%c3_84, %c0_85, %c0_86], %144 {strides = array<i32>} : memref<8x64x1xf32, #tpu.memory_space<vmem>>, vector<1x64x1xf32>,
    %c3_87 = arith.constant 3 : index
    %c0_88 = arith.constant 0 : index
    %c0_89 = arith.constant 0 : index
    %145 = vector.load %arg9[%c3_87, %c0_88, %c0_89] : memref<8x64x16xf32, #tpu.memory_space<vmem>>, vector<1x64x16xf32>
    %146 = vector.shape_cast %145 : vector<1x64x16xf32> to vector<64x16xf32>
    %147 = vector.broadcast %132 : vector<64x1xf32> to vector<64x16xf32>
    %148 = arith.mulf %147, %146 : vector<64x16xf32>
    %cst_90 = arith.constant dense<0.000000e+00> : vector<64x16xf32>
    %149 = tpu.matmul %135, %124, %cst_90 {dimension_numbers = #tpu.dot_dimension_numbers<[1], [0], [0], [1], [0, 0, 1, 1], [], []>} : vector<64x64xf32>, vector<64x16xf32>, vector<64x16xf32> -> vector<64x16xf32>
    %150 = arith.addf %148, %149 : vector<64x16xf32>
    %c3_91 = arith.constant 3 : index
    %c0_92 = arith.constant 0 : index
    %c0_93 = arith.constant 0 : index
    %151 = vector.load %arg9[%c3_91, %c0_92, %c0_93] : memref<8x64x16xf32, #tpu.memory_space<vmem>>, vector<1x64x16xf32>
    %152 = vector.shape_cast %151 : vector<1x64x16xf32> to vector<64x16xf32>
    %153 = vector.shape_cast %150 : vector<64x16xf32> to vector<1x64x16xf32>
    tpu.vector_store %arg9[%c3_91, %c0_92, %c0_93], %153 {strides = array<i32>} : memref<8x64x16xf32, #tpu.memory_space<vmem>>, vector<1x64x16xf32>,
    %c3_94 = arith.constant 3 : index
    %c0_95 = arith.constant 0 : index
    %c0_96 = arith.constant 0 : index
    %154 = vector.load %arg7[%c3_94, %c0_95, %c0_96] : memref<8x64x1xf32, #tpu.memory_space<vmem>>, vector<1x64x1xf32>
    %155 = vector.shape_cast %154 : vector<1x64x1xf32> to vector<64x1xf32>
    %156 = vector.shape_cast %130 : vector<64x1xf32> to vector<1x64x1xf32>
    tpu.vector_store %arg7[%c3_94, %c0_95, %c0_96], %156 {strides = array<i32>} : memref<8x64x1xf32, #tpu.memory_space<vmem>>, vector<1x64x1xf32>,
    %157 = vector.extract_strided_slice %4 {offsets = [0, 64], sizes = [64, 16], strides = [1, 1]} : vector<64x128xf32> to vector<64x16xf32>
    %cst_97 = arith.constant 2.500000e-01 : f32
    %158 = vector.broadcast %cst_97 : f32 to vector<64x16xf32>
    %159 = arith.mulf %157, %158 : vector<64x16xf32>
    %160 = vector.extract_strided_slice %6 {offsets = [0, 64], sizes = [64, 16], strides = [1, 1]} : vector<64x128xf32> to vector<64x16xf32>
    %161 = vector.extract_strided_slice %8 {offsets = [0, 64], sizes = [64, 16], strides = [1, 1]} : vector<64x128xf32> to vector<64x16xf32>
    %cst_98 = arith.constant dense<0.000000e+00> : vector<64x64xf32>
    %162 = tpu.matmul %159, %160, %cst_98 {dimension_numbers = #tpu.dot_dimension_numbers<[1], [1], [0], [0], [0, 0, 1, 0], [], []>} : vector<64x16xf32>, vector<64x16xf32>, vector<64x64xf32> -> vector<64x64xf32>
    %c4 = arith.constant 4 : index
    %c0_99 = arith.constant 0 : index
    %c0_100 = arith.constant 0 : index
    %163 = vector.load %arg7[%c4, %c0_99, %c0_100] : memref<8x64x1xf32, #tpu.memory_space<vmem>>, vector<1x64x1xf32>
    %164 = vector.shape_cast %163 : vector<1x64x1xf32> to vector<64x1xf32>
    %cst_101 = arith.constant dense<0xFF800000> : vector<64xf32>
    %165 = vector.multi_reduction <maximumf>, %162, %cst_101 [1] : vector<64x64xf32> to vector<64xf32>
    %166 = vector.shape_cast %165 : vector<64xf32> to vector<64x1xf32>
    %167 = arith.maximumf %164, %166 : vector<64x1xf32>
    %168 = arith.subf %164, %167 : vector<64x1xf32>
    %169 = math.exp %168 : vector<64x1xf32>
    %170 = vector.broadcast %167 : vector<64x1xf32> to vector<64x64xf32>
    %171 = arith.subf %162, %170 : vector<64x64xf32>
    %172 = math.exp %171 : vector<64x64xf32>
    %c4_102 = arith.constant 4 : index
    %c0_103 = arith.constant 0 : index
    %c0_104 = arith.constant 0 : index
    %173 = vector.load %arg8[%c4_102, %c0_103, %c0_104] : memref<8x64x1xf32, #tpu.memory_space<vmem>>, vector<1x64x1xf32>
    %174 = vector.shape_cast %173 : vector<1x64x1xf32> to vector<64x1xf32>
    %175 = arith.mulf %169, %174 : vector<64x1xf32>
    %cst_105 = arith.constant dense<0.000000e+00> : vector<64xf32>
    %176 = vector.multi_reduction <add>, %172, %cst_105 [1] : vector<64x64xf32> to vector<64xf32>
    %177 = vector.shape_cast %176 : vector<64xf32> to vector<64x1xf32>
    %178 = arith.addf %175, %177 : vector<64x1xf32>
    %c4_106 = arith.constant 4 : index
    %c0_107 = arith.constant 0 : index
    %c0_108 = arith.constant 0 : index
    %179 = vector.load %arg8[%c4_106, %c0_107, %c0_108] : memref<8x64x1xf32, #tpu.memory_space<vmem>>, vector<1x64x1xf32>
    %180 = vector.shape_cast %179 : vector<1x64x1xf32> to vector<64x1xf32>
    %181 = vector.shape_cast %178 : vector<64x1xf32> to vector<1x64x1xf32>
    tpu.vector_store %arg8[%c4_106, %c0_107, %c0_108], %181 {strides = array<i32>} : memref<8x64x1xf32, #tpu.memory_space<vmem>>, vector<1x64x1xf32>,
    %c4_109 = arith.constant 4 : index
    %c0_110 = arith.constant 0 : index
    %c0_111 = arith.constant 0 : index
    %182 = vector.load %arg9[%c4_109, %c0_110, %c0_111] : memref<8x64x16xf32, #tpu.memory_space<vmem>>, vector<1x64x16xf32>
    %183 = vector.shape_cast %182 : vector<1x64x16xf32> to vector<64x16xf32>
    %184 = vector.broadcast %169 : vector<64x1xf32> to vector<64x16xf32>
    %185 = arith.mulf %184, %183 : vector<64x16xf32>
    %cst_112 = arith.constant dense<0.000000e+00> : vector<64x16xf32>
    %186 = tpu.matmul %172, %161, %cst_112 {dimension_numbers = #tpu.dot_dimension_numbers<[1], [0], [0], [1], [0, 0, 1, 1], [], []>} : vector<64x64xf32>, vector<64x16xf32>, vector<64x16xf32> -> vector<64x16xf32>
    %187 = arith.addf %185, %186 : vector<64x16xf32>
    %c4_113 = arith.constant 4 : index
    %c0_114 = arith.constant 0 : index
    %c0_115 = arith.constant 0 : index
    %188 = vector.load %arg9[%c4_113, %c0_114, %c0_115] : memref<8x64x16xf32, #tpu.memory_space<vmem>>, vector<1x64x16xf32>
    %189 = vector.shape_cast %188 : vector<1x64x16xf32> to vector<64x16xf32>
    %190 = vector.shape_cast %187 : vector<64x16xf32> to vector<1x64x16xf32>
    tpu.vector_store %arg9[%c4_113, %c0_114, %c0_115], %190 {strides = array<i32>} : memref<8x64x16xf32, #tpu.memory_space<vmem>>, vector<1x64x16xf32>,
    %c4_116 = arith.constant 4 : index
    %c0_117 = arith.constant 0 : index
    %c0_118 = arith.constant 0 : index
    %191 = vector.load %arg7[%c4_116, %c0_117, %c0_118] : memref<8x64x1xf32, #tpu.memory_space<vmem>>, vector<1x64x1xf32>
    %192 = vector.shape_cast %191 : vector<1x64x1xf32> to vector<64x1xf32>
    %193 = vector.shape_cast %167 : vector<64x1xf32> to vector<1x64x1xf32>
    tpu.vector_store %arg7[%c4_116, %c0_117, %c0_118], %193 {strides = array<i32>} : memref<8x64x1xf32, #tpu.memory_space<vmem>>, vector<1x64x1xf32>,
    %194 = vector.extract_strided_slice %4 {offsets = [0, 80], sizes = [64, 16], strides = [1, 1]} : vector<64x128xf32> to vector<64x16xf32>
    %cst_119 = arith.constant 2.500000e-01 : f32
    %195 = vector.broadcast %cst_119 : f32 to vector<64x16xf32>
    %196 = arith.mulf %194, %195 : vector<64x16xf32>
    %197 = vector.extract_strided_slice %6 {offsets = [0, 80], sizes = [64, 16], strides = [1, 1]} : vector<64x128xf32> to vector<64x16xf32>
    %198 = vector.extract_strided_slice %8 {offsets = [0, 80], sizes = [64, 16], strides = [1, 1]} : vector<64x128xf32> to vector<64x16xf32>
    %cst_120 = arith.constant dense<0.000000e+00> : vector<64x64xf32>
    %199 = tpu.matmul %196, %197, %cst_120 {dimension_numbers = #tpu.dot_dimension_numbers<[1], [1], [0], [0], [0, 0, 1, 0], [], []>} : vector<64x16xf32>, vector<64x16xf32>, vector<64x64xf32> -> vector<64x64xf32>
    %c5 = arith.constant 5 : index
    %c0_121 = arith.constant 0 : index
    %c0_122 = arith.constant 0 : index
    %200 = vector.load %arg7[%c5, %c0_121, %c0_122] : memref<8x64x1xf32, #tpu.memory_space<vmem>>, vector<1x64x1xf32>
    %201 = vector.shape_cast %200 : vector<1x64x1xf32> to vector<64x1xf32>
    %cst_123 = arith.constant dense<0xFF800000> : vector<64xf32>
    %202 = vector.multi_reduction <maximumf>, %199, %cst_123 [1] : vector<64x64xf32> to vector<64xf32>
    %203 = vector.shape_cast %202 : vector<64xf32> to vector<64x1xf32>
    %204 = arith.maximumf %201, %203 : vector<64x1xf32>
    %205 = arith.subf %201, %204 : vector<64x1xf32>
    %206 = math.exp %205 : vector<64x1xf32>
    %207 = vector.broadcast %204 : vector<64x1xf32> to vector<64x64xf32>
    %208 = arith.subf %199, %207 : vector<64x64xf32>
    %209 = math.exp %208 : vector<64x64xf32>
    %c5_124 = arith.constant 5 : index
    %c0_125 = arith.constant 0 : index
    %c0_126 = arith.constant 0 : index
    %210 = vector.load %arg8[%c5_124, %c0_125, %c0_126] : memref<8x64x1xf32, #tpu.memory_space<vmem>>, vector<1x64x1xf32>
    %211 = vector.shape_cast %210 : vector<1x64x1xf32> to vector<64x1xf32>
    %212 = arith.mulf %206, %211 : vector<64x1xf32>
    %cst_127 = arith.constant dense<0.000000e+00> : vector<64xf32>
    %213 = vector.multi_reduction <add>, %209, %cst_127 [1] : vector<64x64xf32> to vector<64xf32>
    %214 = vector.shape_cast %213 : vector<64xf32> to vector<64x1xf32>
    %215 = arith.addf %212, %214 : vector<64x1xf32>
    %c5_128 = arith.constant 5 : index
    %c0_129 = arith.constant 0 : index
    %c0_130 = arith.constant 0 : index
    %216 = vector.load %arg8[%c5_128, %c0_129, %c0_130] : memref<8x64x1xf32, #tpu.memory_space<vmem>>, vector<1x64x1xf32>
    %217 = vector.shape_cast %216 : vector<1x64x1xf32> to vector<64x1xf32>
    %218 = vector.shape_cast %215 : vector<64x1xf32> to vector<1x64x1xf32>
    tpu.vector_store %arg8[%c5_128, %c0_129, %c0_130], %218 {strides = array<i32>} : memref<8x64x1xf32, #tpu.memory_space<vmem>>, vector<1x64x1xf32>,
    %c5_131 = arith.constant 5 : index
    %c0_132 = arith.constant 0 : index
    %c0_133 = arith.constant 0 : index
    %219 = vector.load %arg9[%c5_131, %c0_132, %c0_133] : memref<8x64x16xf32, #tpu.memory_space<vmem>>, vector<1x64x16xf32>
    %220 = vector.shape_cast %219 : vector<1x64x16xf32> to vector<64x16xf32>
    %221 = vector.broadcast %206 : vector<64x1xf32> to vector<64x16xf32>
    %222 = arith.mulf %221, %220 : vector<64x16xf32>
    %cst_134 = arith.constant dense<0.000000e+00> : vector<64x16xf32>
    %223 = tpu.matmul %209, %198, %cst_134 {dimension_numbers = #tpu.dot_dimension_numbers<[1], [0], [0], [1], [0, 0, 1, 1], [], []>} : vector<64x64xf32>, vector<64x16xf32>, vector<64x16xf32> -> vector<64x16xf32>
    %224 = arith.addf %222, %223 : vector<64x16xf32>
    %c5_135 = arith.constant 5 : index
    %c0_136 = arith.constant 0 : index
    %c0_137 = arith.constant 0 : index
    %225 = vector.load %arg9[%c5_135, %c0_136, %c0_137] : memref<8x64x16xf32, #tpu.memory_space<vmem>>, vector<1x64x16xf32>
    %226 = vector.shape_cast %225 : vector<1x64x16xf32> to vector<64x16xf32>
    %227 = vector.shape_cast %224 : vector<64x16xf32> to vector<1x64x16xf32>
    tpu.vector_store %arg9[%c5_135, %c0_136, %c0_137], %227 {strides = array<i32>} : memref<8x64x16xf32, #tpu.memory_space<vmem>>, vector<1x64x16xf32>,
    %c5_138 = arith.constant 5 : index
    %c0_139 = arith.constant 0 : index
    %c0_140 = arith.constant 0 : index
    %228 = vector.load %arg7[%c5_138, %c0_139, %c0_140] : memref<8x64x1xf32, #tpu.memory_space<vmem>>, vector<1x64x1xf32>
    %229 = vector.shape_cast %228 : vector<1x64x1xf32> to vector<64x1xf32>
    %230 = vector.shape_cast %204 : vector<64x1xf32> to vector<1x64x1xf32>
    tpu.vector_store %arg7[%c5_138, %c0_139, %c0_140], %230 {strides = array<i32>} : memref<8x64x1xf32, #tpu.memory_space<vmem>>, vector<1x64x1xf32>,
    %231 = vector.extract_strided_slice %4 {offsets = [0, 96], sizes = [64, 16], strides = [1, 1]} : vector<64x128xf32> to vector<64x16xf32>
    %cst_141 = arith.constant 2.500000e-01 : f32
    %232 = vector.broadcast %cst_141 : f32 to vector<64x16xf32>
    %233 = arith.mulf %231, %232 : vector<64x16xf32>
    %234 = vector.extract_strided_slice %6 {offsets = [0, 96], sizes = [64, 16], strides = [1, 1]} : vector<64x128xf32> to vector<64x16xf32>
    %235 = vector.extract_strided_slice %8 {offsets = [0, 96], sizes = [64, 16], strides = [1, 1]} : vector<64x128xf32> to vector<64x16xf32>
    %cst_142 = arith.constant dense<0.000000e+00> : vector<64x64xf32>
    %236 = tpu.matmul %233, %234, %cst_142 {dimension_numbers = #tpu.dot_dimension_numbers<[1], [1], [0], [0], [0, 0, 1, 0], [], []>} : vector<64x16xf32>, vector<64x16xf32>, vector<64x64xf32> -> vector<64x64xf32>
    %c6 = arith.constant 6 : index
    %c0_143 = arith.constant 0 : index
    %c0_144 = arith.constant 0 : index
    %237 = vector.load %arg7[%c6, %c0_143, %c0_144] : memref<8x64x1xf32, #tpu.memory_space<vmem>>, vector<1x64x1xf32>
    %238 = vector.shape_cast %237 : vector<1x64x1xf32> to vector<64x1xf32>
    %cst_145 = arith.constant dense<0xFF800000> : vector<64xf32>
    %239 = vector.multi_reduction <maximumf>, %236, %cst_145 [1] : vector<64x64xf32> to vector<64xf32>
    %240 = vector.shape_cast %239 : vector<64xf32> to vector<64x1xf32>
    %241 = arith.maximumf %238, %240 : vector<64x1xf32>
    %242 = arith.subf %238, %241 : vector<64x1xf32>
    %243 = math.exp %242 : vector<64x1xf32>
    %244 = vector.broadcast %241 : vector<64x1xf32> to vector<64x64xf32>
    %245 = arith.subf %236, %244 : vector<64x64xf32>
    %246 = math.exp %245 : vector<64x64xf32>
    %c6_146 = arith.constant 6 : index
    %c0_147 = arith.constant 0 : index
    %c0_148 = arith.constant 0 : index
    %247 = vector.load %arg8[%c6_146, %c0_147, %c0_148] : memref<8x64x1xf32, #tpu.memory_space<vmem>>, vector<1x64x1xf32>
    %248 = vector.shape_cast %247 : vector<1x64x1xf32> to vector<64x1xf32>
    %249 = arith.mulf %243, %248 : vector<64x1xf32>
    %cst_149 = arith.constant dense<0.000000e+00> : vector<64xf32>
    %250 = vector.multi_reduction <add>, %246, %cst_149 [1] : vector<64x64xf32> to vector<64xf32>
    %251 = vector.shape_cast %250 : vector<64xf32> to vector<64x1xf32>
    %252 = arith.addf %249, %251 : vector<64x1xf32>
    %c6_150 = arith.constant 6 : index
    %c0_151 = arith.constant 0 : index
    %c0_152 = arith.constant 0 : index
    %253 = vector.load %arg8[%c6_150, %c0_151, %c0_152] : memref<8x64x1xf32, #tpu.memory_space<vmem>>, vector<1x64x1xf32>
    %254 = vector.shape_cast %253 : vector<1x64x1xf32> to vector<64x1xf32>
    %255 = vector.shape_cast %252 : vector<64x1xf32> to vector<1x64x1xf32>
    tpu.vector_store %arg8[%c6_150, %c0_151, %c0_152], %255 {strides = array<i32>} : memref<8x64x1xf32, #tpu.memory_space<vmem>>, vector<1x64x1xf32>,
    %c6_153 = arith.constant 6 : index
    %c0_154 = arith.constant 0 : index
    %c0_155 = arith.constant 0 : index
    %256 = vector.load %arg9[%c6_153, %c0_154, %c0_155] : memref<8x64x16xf32, #tpu.memory_space<vmem>>, vector<1x64x16xf32>
    %257 = vector.shape_cast %256 : vector<1x64x16xf32> to vector<64x16xf32>
    %258 = vector.broadcast %243 : vector<64x1xf32> to vector<64x16xf32>
    %259 = arith.mulf %258, %257 : vector<64x16xf32>
    %cst_156 = arith.constant dense<0.000000e+00> : vector<64x16xf32>
    %260 = tpu.matmul %246, %235, %cst_156 {dimension_numbers = #tpu.dot_dimension_numbers<[1], [0], [0], [1], [0, 0, 1, 1], [], []>} : vector<64x64xf32>, vector<64x16xf32>, vector<64x16xf32> -> vector<64x16xf32>
    %261 = arith.addf %259, %260 : vector<64x16xf32>
    %c6_157 = arith.constant 6 : index
    %c0_158 = arith.constant 0 : index
    %c0_159 = arith.constant 0 : index
    %262 = vector.load %arg9[%c6_157, %c0_158, %c0_159] : memref<8x64x16xf32, #tpu.memory_space<vmem>>, vector<1x64x16xf32>
    %263 = vector.shape_cast %262 : vector<1x64x16xf32> to vector<64x16xf32>
    %264 = vector.shape_cast %261 : vector<64x16xf32> to vector<1x64x16xf32>
    tpu.vector_store %arg9[%c6_157, %c0_158, %c0_159], %264 {strides = array<i32>} : memref<8x64x16xf32, #tpu.memory_space<vmem>>, vector<1x64x16xf32>,
    %c6_160 = arith.constant 6 : index
    %c0_161 = arith.constant 0 : index
    %c0_162 = arith.constant 0 : index
    %265 = vector.load %arg7[%c6_160, %c0_161, %c0_162] : memref<8x64x1xf32, #tpu.memory_space<vmem>>, vector<1x64x1xf32>
    %266 = vector.shape_cast %265 : vector<1x64x1xf32> to vector<64x1xf32>
    %267 = vector.shape_cast %241 : vector<64x1xf32> to vector<1x64x1xf32>
    tpu.vector_store %arg7[%c6_160, %c0_161, %c0_162], %267 {strides = array<i32>} : memref<8x64x1xf32, #tpu.memory_space<vmem>>, vector<1x64x1xf32>,
    %268 = vector.extract_strided_slice %4 {offsets = [0, 112], sizes = [64, 16], strides = [1, 1]} : vector<64x128xf32> to vector<64x16xf32>
    %cst_163 = arith.constant 2.500000e-01 : f32
    %269 = vector.broadcast %cst_163 : f32 to vector<64x16xf32>
    %270 = arith.mulf %268, %269 : vector<64x16xf32>
    %271 = vector.extract_strided_slice %6 {offsets = [0, 112], sizes = [64, 16], strides = [1, 1]} : vector<64x128xf32> to vector<64x16xf32>
    %272 = vector.extract_strided_slice %8 {offsets = [0, 112], sizes = [64, 16], strides = [1, 1]} : vector<64x128xf32> to vector<64x16xf32>
    %cst_164 = arith.constant dense<0.000000e+00> : vector<64x64xf32>
    %273 = tpu.matmul %270, %271, %cst_164 {dimension_numbers = #tpu.dot_dimension_numbers<[1], [1], [0], [0], [0, 0, 1, 0], [], []>} : vector<64x16xf32>, vector<64x16xf32>, vector<64x64xf32> -> vector<64x64xf32>
    %c7 = arith.constant 7 : index
    %c0_165 = arith.constant 0 : index
    %c0_166 = arith.constant 0 : index
    %274 = vector.load %arg7[%c7, %c0_165, %c0_166] : memref<8x64x1xf32, #tpu.memory_space<vmem>>, vector<1x64x1xf32>
    %275 = vector.shape_cast %274 : vector<1x64x1xf32> to vector<64x1xf32>
    %cst_167 = arith.constant dense<0xFF800000> : vector<64xf32>
    %276 = vector.multi_reduction <maximumf>, %273, %cst_167 [1] : vector<64x64xf32> to vector<64xf32>
    %277 = vector.shape_cast %276 : vector<64xf32> to vector<64x1xf32>
    %278 = arith.maximumf %275, %277 : vector<64x1xf32>
    %279 = arith.subf %275, %278 : vector<64x1xf32>
    %280 = math.exp %279 : vector<64x1xf32>
    %281 = vector.broadcast %278 : vector<64x1xf32> to vector<64x64xf32>
    %282 = arith.subf %273, %281 : vector<64x64xf32>
    %283 = math.exp %282 : vector<64x64xf32>
    %c7_168 = arith.constant 7 : index
    %c0_169 = arith.constant 0 : index
    %c0_170 = arith.constant 0 : index
    %284 = vector.load %arg8[%c7_168, %c0_169, %c0_170] : memref<8x64x1xf32, #tpu.memory_space<vmem>>, vector<1x64x1xf32>
    %285 = vector.shape_cast %284 : vector<1x64x1xf32> to vector<64x1xf32>
    %286 = arith.mulf %280, %285 : vector<64x1xf32>
    %cst_171 = arith.constant dense<0.000000e+00> : vector<64xf32>
    %287 = vector.multi_reduction <add>, %283, %cst_171 [1] : vector<64x64xf32> to vector<64xf32>
    %288 = vector.shape_cast %287 : vector<64xf32> to vector<64x1xf32>
    %289 = arith.addf %286, %288 : vector<64x1xf32>
    %c7_172 = arith.constant 7 : index
    %c0_173 = arith.constant 0 : index
    %c0_174 = arith.constant 0 : index
    %290 = vector.load %arg8[%c7_172, %c0_173, %c0_174] : memref<8x64x1xf32, #tpu.memory_space<vmem>>, vector<1x64x1xf32>
    %291 = vector.shape_cast %290 : vector<1x64x1xf32> to vector<64x1xf32>
    %292 = vector.shape_cast %289 : vector<64x1xf32> to vector<1x64x1xf32>
    tpu.vector_store %arg8[%c7_172, %c0_173, %c0_174], %292 {strides = array<i32>} : memref<8x64x1xf32, #tpu.memory_space<vmem>>, vector<1x64x1xf32>,
    %c7_175 = arith.constant 7 : index
    %c0_176 = arith.constant 0 : index
    %c0_177 = arith.constant 0 : index
    %293 = vector.load %arg9[%c7_175, %c0_176, %c0_177] : memref<8x64x16xf32, #tpu.memory_space<vmem>>, vector<1x64x16xf32>
    %294 = vector.shape_cast %293 : vector<1x64x16xf32> to vector<64x16xf32>
    %295 = vector.broadcast %280 : vector<64x1xf32> to vector<64x16xf32>
    %296 = arith.mulf %295, %294 : vector<64x16xf32>
    %cst_178 = arith.constant dense<0.000000e+00> : vector<64x16xf32>
    %297 = tpu.matmul %283, %272, %cst_178 {dimension_numbers = #tpu.dot_dimension_numbers<[1], [0], [0], [1], [0, 0, 1, 1], [], []>} : vector<64x64xf32>, vector<64x16xf32>, vector<64x16xf32> -> vector<64x16xf32>
    %298 = arith.addf %296, %297 : vector<64x16xf32>
    %c7_179 = arith.constant 7 : index
    %c0_180 = arith.constant 0 : index
    %c0_181 = arith.constant 0 : index
    %299 = vector.load %arg9[%c7_179, %c0_180, %c0_181] : memref<8x64x16xf32, #tpu.memory_space<vmem>>, vector<1x64x16xf32>
    %300 = vector.shape_cast %299 : vector<1x64x16xf32> to vector<64x16xf32>
    %301 = vector.shape_cast %298 : vector<64x16xf32> to vector<1x64x16xf32>
    tpu.vector_store %arg9[%c7_179, %c0_180, %c0_181], %301 {strides = array<i32>} : memref<8x64x16xf32, #tpu.memory_space<vmem>>, vector<1x64x16xf32>,
    %c7_182 = arith.constant 7 : index
    %c0_183 = arith.constant 0 : index
    %c0_184 = arith.constant 0 : index
    %302 = vector.load %arg7[%c7_182, %c0_183, %c0_184] : memref<8x64x1xf32, #tpu.memory_space<vmem>>, vector<1x64x1xf32>
    %303 = vector.shape_cast %302 : vector<1x64x1xf32> to vector<64x1xf32>
    %304 = vector.shape_cast %278 : vector<64x1xf32> to vector<1x64x1xf32>
    tpu.vector_store %arg7[%c7_182, %c0_183, %c0_184], %304 {strides = array<i32>} : memref<8x64x1xf32, #tpu.memory_space<vmem>>, vector<1x64x1xf32>,
    %c0_i32_185 = arith.constant 0 : i32
    %305 = arith.cmpi eq, %arg2, %c0_i32_185 : i32
    %306 = arith.extui %305 : i1 to i32
    %c0_i32_186 = arith.constant 0 : i32
    %307 = arith.cmpi ne, %306, %c0_i32_186 : i32
    scf.if %307 {
      %c0_187 = arith.constant 0 : index
      %c0_188 = arith.constant 0 : index
      %c0_189 = arith.constant 0 : index
      %308 = vector.load %arg8[%c0_187, %c0_188, %c0_189] : memref<8x64x1xf32, #tpu.memory_space<vmem>>, vector<1x64x1xf32>
      %309 = vector.shape_cast %308 : vector<1x64x1xf32> to vector<64x1xf32>
      %310 = tpu.reciprocal %309 {approx = true} : vector<64x1xf32> -> vector<64x1xf32>
      %c0_190 = arith.constant 0 : index
      %c0_191 = arith.constant 0 : index
      %c0_192 = arith.constant 0 : index
      %311 = vector.load %arg9[%c0_190, %c0_191, %c0_192] : memref<8x64x16xf32, #tpu.memory_space<vmem>>, vector<1x64x16xf32>
      %312 = vector.shape_cast %311 : vector<1x64x16xf32> to vector<64x16xf32>
      %313 = vector.broadcast %310 : vector<64x1xf32> to vector<64x16xf32>
      %314 = arith.mulf %312, %313 : vector<64x16xf32>
      %c1_193 = arith.constant 1 : index
      %c0_194 = arith.constant 0 : index
      %c0_195 = arith.constant 0 : index
      %315 = vector.load %arg8[%c1_193, %c0_194, %c0_195] : memref<8x64x1xf32, #tpu.memory_space<vmem>>, vector<1x64x1xf32>
      %316 = vector.shape_cast %315 : vector<1x64x1xf32> to vector<64x1xf32>
      %317 = tpu.reciprocal %316 {approx = true} : vector<64x1xf32> -> vector<64x1xf32>
      %c1_196 = arith.constant 1 : index
      %c0_197 = arith.constant 0 : index
      %c0_198 = arith.constant 0 : index
      %318 = vector.load %arg9[%c1_196, %c0_197, %c0_198] : memref<8x64x16xf32, #tpu.memory_space<vmem>>, vector<1x64x16xf32>
      %319 = vector.shape_cast %318 : vector<1x64x16xf32> to vector<64x16xf32>
      %320 = vector.broadcast %317 : vector<64x1xf32> to vector<64x16xf32>
      %321 = arith.mulf %319, %320 : vector<64x16xf32>
      %c2_199 = arith.constant 2 : index
      %c0_200 = arith.constant 0 : index
      %c0_201 = arith.constant 0 : index
      %322 = vector.load %arg8[%c2_199, %c0_200, %c0_201] : memref<8x64x1xf32, #tpu.memory_space<vmem>>, vector<1x64x1xf32>
      %323 = vector.shape_cast %322 : vector<1x64x1xf32> to vector<64x1xf32>
      %324 = tpu.reciprocal %323 {approx = true} : vector<64x1xf32> -> vector<64x1xf32>
      %c2_202 = arith.constant 2 : index
      %c0_203 = arith.constant 0 : index
      %c0_204 = arith.constant 0 : index
      %325 = vector.load %arg9[%c2_202, %c0_203, %c0_204] : memref<8x64x16xf32, #tpu.memory_space<vmem>>, vector<1x64x16xf32>
      %326 = vector.shape_cast %325 : vector<1x64x16xf32> to vector<64x16xf32>
      %327 = vector.broadcast %324 : vector<64x1xf32> to vector<64x16xf32>
      %328 = arith.mulf %326, %327 : vector<64x16xf32>
      %c3_205 = arith.constant 3 : index
      %c0_206 = arith.constant 0 : index
      %c0_207 = arith.constant 0 : index
      %329 = vector.load %arg8[%c3_205, %c0_206, %c0_207] : memref<8x64x1xf32, #tpu.memory_space<vmem>>, vector<1x64x1xf32>
      %330 = vector.shape_cast %329 : vector<1x64x1xf32> to vector<64x1xf32>
      %331 = tpu.reciprocal %330 {approx = true} : vector<64x1xf32> -> vector<64x1xf32>
      %c3_208 = arith.constant 3 : index
      %c0_209 = arith.constant 0 : index
      %c0_210 = arith.constant 0 : index
      %332 = vector.load %arg9[%c3_208, %c0_209, %c0_210] : memref<8x64x16xf32, #tpu.memory_space<vmem>>, vector<1x64x16xf32>
      %333 = vector.shape_cast %332 : vector<1x64x16xf32> to vector<64x16xf32>
      %334 = vector.broadcast %331 : vector<64x1xf32> to vector<64x16xf32>
      %335 = arith.mulf %333, %334 : vector<64x16xf32>
      %c4_211 = arith.constant 4 : index
      %c0_212 = arith.constant 0 : index
      %c0_213 = arith.constant 0 : index
      %336 = vector.load %arg8[%c4_211, %c0_212, %c0_213] : memref<8x64x1xf32, #tpu.memory_space<vmem>>, vector<1x64x1xf32>
      %337 = vector.shape_cast %336 : vector<1x64x1xf32> to vector<64x1xf32>
      %338 = tpu.reciprocal %337 {approx = true} : vector<64x1xf32> -> vector<64x1xf32>
      %c4_214 = arith.constant 4 : index
      %c0_215 = arith.constant 0 : index
      %c0_216 = arith.constant 0 : index
      %339 = vector.load %arg9[%c4_214, %c0_215, %c0_216] : memref<8x64x16xf32, #tpu.memory_space<vmem>>, vector<1x64x16xf32>
      %340 = vector.shape_cast %339 : vector<1x64x16xf32> to vector<64x16xf32>
      %341 = vector.broadcast %338 : vector<64x1xf32> to vector<64x16xf32>
      %342 = arith.mulf %340, %341 : vector<64x16xf32>
      %c5_217 = arith.constant 5 : index
      %c0_218 = arith.constant 0 : index
      %c0_219 = arith.constant 0 : index
      %343 = vector.load %arg8[%c5_217, %c0_218, %c0_219] : memref<8x64x1xf32, #tpu.memory_space<vmem>>, vector<1x64x1xf32>
      %344 = vector.shape_cast %343 : vector<1x64x1xf32> to vector<64x1xf32>
      %345 = tpu.reciprocal %344 {approx = true} : vector<64x1xf32> -> vector<64x1xf32>
      %c5_220 = arith.constant 5 : index
      %c0_221 = arith.constant 0 : index
      %c0_222 = arith.constant 0 : index
      %346 = vector.load %arg9[%c5_220, %c0_221, %c0_222] : memref<8x64x16xf32, #tpu.memory_space<vmem>>, vector<1x64x16xf32>
      %347 = vector.shape_cast %346 : vector<1x64x16xf32> to vector<64x16xf32>
      %348 = vector.broadcast %345 : vector<64x1xf32> to vector<64x16xf32>
      %349 = arith.mulf %347, %348 : vector<64x16xf32>
      %c6_223 = arith.constant 6 : index
      %c0_224 = arith.constant 0 : index
      %c0_225 = arith.constant 0 : index
      %350 = vector.load %arg8[%c6_223, %c0_224, %c0_225] : memref<8x64x1xf32, #tpu.memory_space<vmem>>, vector<1x64x1xf32>
      %351 = vector.shape_cast %350 : vector<1x64x1xf32> to vector<64x1xf32>
      %352 = tpu.reciprocal %351 {approx = true} : vector<64x1xf32> -> vector<64x1xf32>
      %c6_226 = arith.constant 6 : index
      %c0_227 = arith.constant 0 : index
      %c0_228 = arith.constant 0 : index
      %353 = vector.load %arg9[%c6_226, %c0_227, %c0_228] : memref<8x64x16xf32, #tpu.memory_space<vmem>>, vector<1x64x16xf32>
      %354 = vector.shape_cast %353 : vector<1x64x16xf32> to vector<64x16xf32>
      %355 = vector.broadcast %352 : vector<64x1xf32> to vector<64x16xf32>
      %356 = arith.mulf %354, %355 : vector<64x16xf32>
      %c7_229 = arith.constant 7 : index
      %c0_230 = arith.constant 0 : index
      %c0_231 = arith.constant 0 : index
      %357 = vector.load %arg8[%c7_229, %c0_230, %c0_231] : memref<8x64x1xf32, #tpu.memory_space<vmem>>, vector<1x64x1xf32>
      %358 = vector.shape_cast %357 : vector<1x64x1xf32> to vector<64x1xf32>
      %359 = tpu.reciprocal %358 {approx = true} : vector<64x1xf32> -> vector<64x1xf32>
      %c7_232 = arith.constant 7 : index
      %c0_233 = arith.constant 0 : index
      %c0_234 = arith.constant 0 : index
      %360 = vector.load %arg9[%c7_232, %c0_233, %c0_234] : memref<8x64x16xf32, #tpu.memory_space<vmem>>, vector<1x64x16xf32>
      %361 = vector.shape_cast %360 : vector<1x64x16xf32> to vector<64x16xf32>
      %362 = vector.broadcast %359 : vector<64x1xf32> to vector<64x16xf32>
      %363 = arith.mulf %361, %362 : vector<64x16xf32>
      %364 = tpu.concatenate %314, %321, %328, %335, %342, %349, %356, %363 in 1 : vector<64x16xf32>, vector<64x16xf32>, vector<64x16xf32>, vector<64x16xf32>, vector<64x16xf32>, vector<64x16xf32>, vector<64x16xf32>, vector<64x16xf32> -> vector<64x128xf32>
      %c0_235 = arith.constant 0 : index
      %c0_236 = arith.constant 0 : index
      %c0_237 = arith.constant 0 : index
      %365 = vector.load %arg6[%c0_235, %c0_236, %c0_237] : memref<1x64x128xf32, #tpu.memory_space<vmem>>, vector<1x64x128xf32>
      %366 = vector.shape_cast %365 : vector<1x64x128xf32> to vector<64x128xf32>
      %367 = vector.shape_cast %364 : vector<64x128xf32> to vector<1x64x128xf32>
      tpu.vector_store %arg6[%c0_235, %c0_236, %c0_237], %367 {strides = array<i32>} : memref<1x64x128xf32, #tpu.memory_space<vmem>>, vector<1x64x128xf32>,
    } else {
    }
    return
  }
  func.func @transform_0(%arg0: i32, %arg1: i32, %arg2: i32) -> (i32, i32, i32) {
    %c0_i32 = arith.constant 0 : i32
    %c0_i32_0 = arith.constant 0 : i32
    return %arg0, %arg1, %c0_i32 : i32, i32, i32
  }
  func.func @transform_1(%arg0: i32, %arg1: i32, %arg2: i32) -> (i32, i32, i32) {
    %c1_i32 = arith.constant 1 : i32
    %c0_i32 = arith.constant 0 : i32
    return %arg0, %arg2, %c1_i32 : i32, i32, i32
  }
  func.func @transform_2(%arg0: i32, %arg1: i32, %arg2: i32) -> (i32, i32, i32) {
    %c2_i32 = arith.constant 2 : i32
    %c0_i32 = arith.constant 0 : i32
    return %arg0, %arg2, %c2_i32 : i32, i32, i32
  }
  func.func @transform_3(%arg0: i32, %arg1: i32, %arg2: i32) -> (i32, i32, i32) {
    %c0_i32 = arith.constant 0 : i32
    %c0_i32_0 = arith.constant 0 : i32
    return %arg0, %arg1, %c0_i32 : i32, i32, i32
  }
}

</mosaic_0001>

<bundles_post_ra>
// kernel: attention_forward.5
= control target key start
LH: loop header
LB: loop body
LE: loop exit
PB: predicated region body
PF: predicated region fallthrough
CT: control target
= control target key end

     0   :  { %s605_s0 = inlined_call_operand.vmem [shape: f32[128,128], index: 0, kind: input, shape index: {}]   ;;  %s606_s1 = inlined_call_operand.vmem [shape: f32[128,128], index: 1, kind: input, shape index: {}]   ;;  %s607_s2 = inlined_call_operand.vmem [shape: f32[1,128], index: 2, kind: input, shape index: {}]   ;;  %s608_s3 = inlined_call_operand.hbm [shape: f32[128,128], index: 3, kind: output, shape index: {}]  }
   0x1   :  { %v82_v0 = vld [vmem:[%s606_s1 + $0x78] sm:$0xff]  ;;  %v81_v1 = vld [vmem:[%s606_s1 + $0x70] sm:$0xff]  ;;  %v80_v2 = vld [vmem:[%s606_s1 + $0x68] sm:$0xff] }
   0x2   :  { %367 = vmatprep.subr.mxu0 %v82_v0  ;;  %423 = vmatprep.subr.mxu1 %v82_v0  ;;  %v79_v3 = vld [vmem:[%s606_s1 + $0x60] sm:$0xff]  ;;  %v78_v4 = vld [vmem:[%s606_s1 + $0x58] sm:$0xff]  ;;  %v77_v5 = vld [vmem:[%s606_s1 + $0x50] sm:$0xff] }
   0x3   :  { %368 = vmatpush3.msra.mxu0 %v82_v0  ;;  %439 = vmatpush3.msra.mxu1 %v82_v0  ;;  %v76_v6 = vld [vmem:[%s606_s1 + $0x48] sm:$0xff] }
   0x4   :  { %369 = vmatprep.subr.mxu0 %v81_v1  ;;  %424 = vmatprep.subr.mxu1 %v81_v1 }
   0x5   :  { %370 = vmatpush3.msra.mxu0 %v81_v1  ;;  %440 = vmatpush3.msra.mxu1 %v81_v1 }
   0x6   :  { %371 = vmatprep.subr.mxu0 %v80_v2  ;;  %425 = vmatprep.subr.mxu1 %v80_v2 }
   0x7   :  { %372 = vmatpush3.msra.mxu0 %v80_v2  ;;  %441 = vmatpush3.msra.mxu1 %v80_v2 }
   0x8   :  { %373 = vmatprep.subr.mxu0 %v79_v3  ;;  %426 = vmatprep.subr.mxu1 %v79_v3 }
   0x9   :  { %374 = vmatpush3.msra.mxu0 %v79_v3  ;;  %442 = vmatpush3.msra.mxu1 %v79_v3 }
   0xa   :  { %375 = vmatprep.subr.mxu0 %v78_v4  ;;  %427 = vmatprep.subr.mxu1 %v78_v4 }
   0xb   :  { %376 = vmatpush3.msra.mxu0 %v78_v4  ;;  %443 = vmatpush3.msra.mxu1 %v78_v4 }
   0xc   :  { %8 = vsyncpa [#allocation4], 0  ;;  %377 = vmatprep.subr.mxu0 %v77_v5  ;;  %428 = vmatprep.subr.mxu1 %v77_v5  ;;  %v75_v7 = vld [vmem:[%s606_s1 + $0x40] sm:$0xff]  ;;  %v74_v8 = vld [vmem:[%s606_s1 + $0x38] sm:$0xff] }
   0xd   :  { %378 = vmatpush3.msra.mxu0 %v77_v5  ;;  %444 = vmatpush3.msra.mxu1 %v77_v5  ;;  %v73_v9 = vld [vmem:[%s606_s1 + $0x30] sm:$0xff]  ;;  %v72_v10 = vld [vmem:[%s606_s1 + $0x28] sm:$0xff]  ;;  %v71_v11 = vld [vmem:[%s606_s1 + $0x20] sm:$0xff] }
   0xe   :  { %379 = vmatprep.subr.mxu0 %v76_v6  ;;  %429 = vmatprep.subr.mxu1 %v76_v6  ;;  %v70_v12 = vld [vmem:[%s606_s1 + $0x18] sm:$0xff]  ;;  %v69_v13 = vld [vmem:[%s606_s1 + $0x10] sm:$0xff]  ;;  %v68_v14 = vld [vmem:[%s606_s1 + $0x8] sm:$0xff] }
   0xf   :  { %380 = vmatpush3.msra.mxu0 %v76_v6  ;;  %445 = vmatpush3.msra.mxu1 %v76_v6  ;;  %v67_v15 = vld [vmem:[%s606_s1] sm:$0xff]  ;;  %v52_v18 = vld [vmem:[%s605_s0 + $0x8] sm:$0xff]  ;;  %v53_v20 = vld [vmem:[%s605_s0 + $0x10] sm:$0xff] }
  0x10   :  { %381 = vmatprep.subr.mxu0 %v75_v7  ;;  %430 = vmatprep.subr.mxu1 %v75_v7  ;;  %v51_v16 = vld [vmem:[%s605_s0] sm:$0xff]  ;;  %v60_v19 = vld [vmem:[%s605_s0 + $0x48] sm:$0xff]  ;;  %v61_v21 = vld [vmem:[%s605_s0 + $0x50] sm:$0xff] }
  0x11   :  { %382 = vmatpush3.msra.mxu0 %v75_v7  ;;  %446 = vmatpush3.msra.mxu1 %v75_v7  ;;  %v59_v17 = vld [vmem:[%s605_s0 + $0x40] sm:$0xff]  ;;  %v54_v22 = vld [vmem:[%s605_s0 + $0x18] sm:$0xff]  ;;  %v56_v26 = vld [vmem:[%s605_s0 + $0x28] sm:$0xff] }
  0x12   :  { %383 = vmatprep.subr.mxu0 %v74_v8  ;;  %431 = vmatprep.subr.mxu1 %v74_v8  ;;  %v62_v23 = vld [vmem:[%s605_s0 + $0x58] sm:$0xff]  ;;  %v55_v24 = vld [vmem:[%s605_s0 + $0x20] sm:$0xff]  ;;  %v64_v27 = vld [vmem:[%s605_s0 + $0x68] sm:$0xff] }
  0x13   :  { %384 = vmatpush3.msra.mxu0 %v74_v8  ;;  %447 = vmatpush3.msra.mxu1 %v74_v8  ;;  %v63_v25 = vld [vmem:[%s605_s0 + $0x60] sm:$0xff]  ;;  %v57_v28 = vld [vmem:[%s605_s0 + $0x30] sm:$0xff]  ;;  %v58_v30 = vld [vmem:[%s605_s0 + $0x38] sm:$0xff] }
  0x14   :  { %385 = vmatprep.subr.mxu0 %v73_v9  ;;  %432 = vmatprep.subr.mxu1 %v73_v9  ;;  %v65_v29 = vld [vmem:[%s605_s0 + $0x70] sm:$0xff]  ;;  %v66_v31 = vld [vmem:[%s605_s0 + $0x78] sm:$0xff]  ;;  %v334_v32 = vld [vmem:[%s607_s2] ss:$0 sm:$0xff]  ;;  %s480_s0 = smov [#allocation3]  }
  0x15   :  { %386 = vmatpush3.msra.mxu0 %v73_v9  ;;  %448 = vmatpush3.msra.mxu1 %v73_v9  ;;  %s323_s2 = sshll.u32 %s480_s0, 4  ;;  %s324_s2 = int_to_ptr.vmem [resolvable:$true] %s323_s2 }
  0x16   :  { %387 = vmatprep.subr.mxu0 %v72_v10  ;;  %433 = vmatprep.subr.mxu1 %v72_v10  ;;  %s458_s23 = scalar_lea.vmem %s324_s2, 2048  ;;  %p463_p1 = scmp.lt.s32.totalorder %s324_s2, %s324_s2 }
  0x17   :  { %388 = vmatpush3.msra.mxu0 %v72_v10  ;;  %449 = vmatpush3.msra.mxu1 %v72_v10  ;;  %p459_p0 = scmp.ne.s32.totalorder %s324_s2, %s458_s23  ;;  %p464_p2 = scmp.lt.s32.totalorder %s458_s23, %s458_s23 }
  0x18   :  { %389 = vmatprep.subr.mxu0 %v71_v11  ;;  %434 = vmatprep.subr.mxu1 %v71_v11 }
  0x19   :  { %390 = vmatpush3.msra.mxu0 %v71_v11  ;;  %450 = vmatpush3.msra.mxu1 %v71_v11  ;;  %p465_p3 = por %p464_p2, %p463_p1 }
  0x1a   :  { %391 = vmatprep.subr.mxu0 %v70_v12  ;;  %435 = vmatprep.subr.mxu1 %v70_v12 }
  0x1b   :  { %392 = vmatpush3.msra.mxu0 %v70_v12  ;;  %451 = vmatpush3.msra.mxu1 %v70_v12  ;;  %p466_p4 = pnand %p465_p3, %p459_p0 }
  0x1c   :  { %393 = vmatprep.subr.mxu0 %v69_v13  ;;  %436 = vmatprep.subr.mxu1 %v69_v13 }
  0x1d   :  { %394 = vmatpush3.msra.mxu0 %v69_v13  ;;  %452 = vmatpush3.msra.mxu1 %v69_v13 }
  0x1e   :  { %395 = vmatprep.subr.mxu0 %v68_v14  ;;  %437 = vmatprep.subr.mxu1 %v68_v14 }
  0x1f   :  { %396 = vmatpush3.msra.mxu0 %v68_v14  ;;  %453 = vmatpush3.msra.mxu1 %v68_v14 }
  0x20   :  { %397 = vmatprep.subr.mxu0 %v67_v15  ;;  %438 = vmatprep.subr.mxu1 %v67_v15 }
  0x21   :  { %398 = vmatpush3.msra.mxu0 %v67_v15  ;;  %454 = vmatpush3.msra.mxu1 %v67_v15 }
  0x22   :  { %399 = vmatprep.mubr.f32.mxu0 %v51_v16  ;;  %411 = vmatprep.mubr.f32.mxu1 %v59_v17 }
  0x23   :  { %400 = vmatmul.mubr.f32.vlgmr.msra.gmra.mxu0 %v52_v18  ;;  %412 = vmatmul.mubr.f32.vlgmr.msra.gmra.mxu1 %v60_v19 }
  0x24   :  { %402 = vmatprep.mubr.f32.mxu0 %v53_v20  ;;  %414 = vmatprep.mubr.f32.mxu1 %v61_v21 }
  0x27   :  { %403 = vmatmul.mubr.f32.gmra.mxu0 %v54_v22  ;;  %415 = vmatmul.mubr.f32.gmra.mxu1 %v62_v23 }
  0x28   :  { %405 = vmatprep.mubr.f32.mxu0 %v55_v24  ;;  %417 = vmatprep.mubr.f32.mxu1 %v63_v25 }
  0x2b   :  { %406 = vmatmul.mubr.f32.gmra.mxu0 %v56_v26  ;;  %418 = vmatmul.mubr.f32.gmra.mxu1 %v64_v27 }
  0x2c   :  { %408 = vmatprep.mubr.f32.mxu0 %v57_v28  ;;  %420 = vmatprep.mubr.f32.mxu1 %v65_v29 }
  0x2f   :  { %409 = vmatmul.mubr.f32.gmra.mxu0 %v58_v30  ;;  %421 = vmatmul.mubr.f32.gmra.mxu1 %v66_v31 }
  0xe3   :  { %v401_v33 = vpop.f32.mrf.mxu0  ;;  %v413_v34 = vpop.f32.mrf.mxu1 }
  0xe4   :  { %v287_v35 = vadd.f32 %v401_v33, %v334_v32  ;;  %v295_v36 = vadd.f32 %v413_v34, %v334_v32 }
  0xe5   :  { %v149_v37 = vpop.f32.mrf.mxu0  ;;  %v189_v38 = vpop.f32.mrf.mxu1 }
  0xe6   :  { %303 = vst [vmem:[#allocation3 + $0x8] sm:$0xff] %v287_v35  ;;  %311 = vst [vmem:[#allocation3 + $0x48] sm:$0xff] %v295_v36  ;;  %v286_v39 = vadd.f32 %v334_v32, %v149_v37  ;;  %v294_v40 = vadd.f32 %v334_v32, %v189_v38 }
  0xe7   :  { %v404_v41 = vpop.f32.mrf.mxu0  ;;  %v416_v42 = vpop.f32.mrf.mxu1 }
  0xe8   :  { %302 = vst [vmem:[#allocation3] sm:$0xff] %v286_v39  ;;  %310 = vst [vmem:[#allocation3 + $0x40] sm:$0xff] %v294_v40  ;;  %v289_v43 = vadd.f32 %v404_v41, %v334_v32  ;;  %v297_v44 = vadd.f32 %v416_v42, %v334_v32 }
  0xe9   :  { %v159_v45 = vpop.f32.mrf.mxu0  ;;  %v199_v46 = vpop.f32.mrf.mxu1 }
  0xea   :  { %305 = vst [vmem:[#allocation3 + $0x18] sm:$0xff] %v289_v43  ;;  %313 = vst [vmem:[#allocation3 + $0x58] sm:$0xff] %v297_v44  ;;  %v288_v47 = vadd.f32 %v334_v32, %v159_v45  ;;  %v296_v48 = vadd.f32 %v334_v32, %v199_v46 }
  0xeb   :  { %v407_v49 = vpop.f32.mrf.mxu0  ;;  %v419_v50 = vpop.f32.mrf.mxu1 }
  0xec   :  { %304 = vst [vmem:[#allocation3 + $0x10] sm:$0xff] %v288_v47  ;;  %312 = vst [vmem:[#allocation3 + $0x50] sm:$0xff] %v296_v48  ;;  %v291_v51 = vadd.f32 %v407_v49, %v334_v32  ;;  %v299_v52 = vadd.f32 %v419_v50, %v334_v32 }
  0xed   :  { %v169_v53 = vpop.f32.mrf.mxu0  ;;  %v209_v54 = vpop.f32.mrf.mxu1 }
  0xee   :  { %307 = vst [vmem:[#allocation3 + $0x28] sm:$0xff] %v291_v51  ;;  %315 = vst [vmem:[#allocation3 + $0x68] sm:$0xff] %v299_v52  ;;  %v290_v55 = vadd.f32 %v334_v32, %v169_v53  ;;  %v298_v56 = vadd.f32 %v334_v32, %v209_v54 }
  0xef   :  { %v410_v57 = vpop.f32.mrf.mxu0  ;;  %v422_v58 = vpop.f32.mrf.mxu1 }
  0xf0   :  { %306 = vst [vmem:[#allocation3 + $0x20] sm:$0xff] %v290_v55  ;;  %314 = vst [vmem:[#allocation3 + $0x60] sm:$0xff] %v298_v56  ;;  %v293_v59 = vadd.f32 %v410_v57, %v334_v32  ;;  %v301_v60 = vadd.f32 %v422_v58, %v334_v32 }
  0xf1   :  { %v179_v61 = vpop.f32.mrf.mxu0  ;;  %v219_v62 = vpop.f32.mrf.mxu1 }
  0xf2   :  { %309 = vst [vmem:[#allocation3 + $0x38] sm:$0xff] %v293_v59  ;;  %317 = vst [vmem:[#allocation3 + $0x78] sm:$0xff] %v301_v60  ;;  %v292_v63 = vadd.f32 %v334_v32, %v179_v61  ;;  %v300_v0 = vadd.f32 %v334_v32, %v219_v62 }
  0xf4   :  { %308 = vst [vmem:[#allocation3 + $0x30] sm:$0xff] %v292_v63  ;;  %316 = vst [vmem:[#allocation3 + $0x70] sm:$0xff] %v300_v0 }
  0xf5   :  { %469 = shalt.err (!%p466_p4)
}
  0xf6   :  { %s481_s1 = smov 128   ;;  %s482_s24 = smov 8  }
  0xf7   :  { %329 = dma.vmem_to_hbm [thread:$0]  %s324_s2, 2048, %s608_s3, [#allocation4], %s481_s1, %s481_s1, %s482_s24  }
  0xf8   :  { %478 = dma.done.wait [#allocation4], 2048  }
  0xf9   :  { %479 = vsyncadd [#allocation4], 4294965248 }
  0xfa   :  { %333 = vsyncpa [#allocation4], 1 }

// kernel: attention_forward.3
= control target key start
LH: loop header
LB: loop body
LE: loop exit
PB: predicated region body
PF: predicated region fallthrough
CT: control target
= control target key end

     0   :  { %7 = vsyncpa [#allocation4], 0  ;;  %s1217_s0 = inlined_call_operand.hbm [shape: f32[128,128], index: 0, kind: input, shape index: {}]   ;;  %s1218_s1 = inlined_call_operand.hbm [shape: f32[128,384], index: 1, kind: input, shape index: {}]   ;;  %s1219_s2 = inlined_call_operand.vmem [shape: f32[128,384], index: 2, kind: output, shape index: {}]  }
   0x1   :  { %8 = vsyncpa [#allocation6], 0 }
   0x2   :  { %10 = vsyncpa [#allocation6 + $0x1], 0  ;;  %s1024_s9 = smov 0   ;;  %s1026_s10 = smov 0  }
   0x3   :  { %s1028_s11 = smov 0   ;;  %s1030_s12 = smov 0  }
   0x4   :  { %s1032_s13 = smov 0   ;;  %s1034_s14 = smov 0  }
   0x5 LB: > { %s690_s15 = sadd.s32 4294967295, %s1002_s14   ;;  %p79_p0 = scmp.ne.s32.totalorder %s990_s11, %s986_s10  ;;  %s1002_s14 = sphi %s1034_s14, %s16_s14   ;;  %s998_s13 = sphi %s1032_s13, %s1237_s13   ;;  %s994_s12 = sphi %s1030_s12, %s1236_s12   ;;  %s990_s11 = sphi %s1028_s11, %s1235_s11   ;;  %s986_s10 = sphi %s1026_s10, %s1234_s10   ;;  %s982_s9 = sphi %s1024_s9, %s1233_s9  }
   0x6   : > { %p80_p1 = scmp.eq.s32.totalorder %s1002_s14, 0  ;;  %p85_p2 = scmp.ne.s32.totalorder %s986_s10, %s982_s9 }
   0x7   : > { %p1057_p3 = scmp.eq.s32.totalorder %s690_s15, 0  ;;  %p111_p4 = scmp.eq.s32.totalorder %s690_s15, 2 }
   0x8   : > { %p81_p5 = por %p80_p1, %p79_p0  ;;  %p692_p6 = scmp.ge.s32.totalorder %s1002_s14, 1 }
   0x9   : > { %s1223_s16 = scalar_select %p1057_p3, 1, 0 }
   0xa   : > { %p1064_p7 = por %p1057_p3, %p85_p2  ;;  %p1068_p8 = por %p111_p4, %p79_p0 }
   0xb   : > { %p124_p9 = scmp.lt.s32.totalorder %s1002_s14, 4  ;;  %s1004_s20 = smov [#allocation3]  }
   0xc   : > { %s1224_s17 = scalar_select %p1064_p7, 1, 0 }
   0xd   : > { %s1225_s18 = scalar_select %p1068_p8, 1, 0 }
   0xe   : > { %p1073_p10 = pnand %p692_p6, %p124_p9  ;;  %s140_s21 = sshll.u32 %s1004_s20, 4  ;;  %s141_s21 = int_to_ptr.vmem [resolvable:$true] %s140_s21 }
   0xf   : > { %p840_p12 = scmp.lt.s32.totalorder %s1002_s14, 3  ;;  %s31_s24 = sadd.s32 1, %s998_s13 }
  0x10   : > { %p831_p11 = pneg %p1073_p10  ;;  %p1091_p1 = scmp.ge.s32.totalorder %s31_s24, 3 }
  0x11   : > { %p1086_p0 = pnand %p840_p12, %p81_p5  ;;  %s905_s26 = scalar_lea.vmem %s141_s21, 2048 }
  0x12   : > { %p1082_p13 = pnand %p831_p11, %p1057_p3  ;;  %p906_p4 = scmp.ne.s32.totalorder %s141_s21, %s905_s26 }
  0x13   : > { %p913_p11 = scmp.lt.s32.totalorder %s141_s21, %s141_s21  ;;  %p914_p8 = scmp.lt.s32.totalorder %s905_s26, %s905_s26 }
  0x14   : > { %p896_p2 = pneg %p1082_p13 }
  0x15   : > { %p915_p7 = por %p914_p8, %p913_p11 }
  0x16   : > { %p908_p6 = pnand %p906_p4, %p896_p2 }
  0x18   : > { %p909_p9 = pneg %p908_p6 }
  0x1a   : > { %p916_p3 = pnand %p915_p7, %p909_p9 }
  0x1c   : > { %919 = shalt.err (!%p916_p3)
}
  0x1d   : > { %s1005_s27 = smov 128   ;;  %s1006_s28 = smov 8  }
  0x1e   : > { %834 = dma.hbm_to_vmem [thread:$0]  (!%p1082_p13), %s1217_s0, 2048, %s141_s21, [#allocation4], %s1005_s27, %s1005_s27, %s1006_s28  }
  0x1f   : > { %s72_s3 = sadd.s32 1, %s990_s11  ;;  %s1239_s24 = smov (%p1091_p1, %s31_s24), 0 }
  0x20   : > { %s154_s4 = sand.u32 1, %s990_s11   ;;  %s696_s5 = sshll.u32 %s998_s13, 7 }
  0x21   : > { %s68_s6 = ssub.s32 %s998_s13, %s1239_s24  ;;  %s695_s7 = sshll.u32 %s154_s4, 7 }
  0x22   : > { %p70_p3 = scmp.eq.s32.totalorder %s68_s6, 0  ;;  %s166_s15 = scalar_lea.hbm %s1218_s1, %s696_s5 }
  0x23   : > { %s158_s22 = scalar_lea.vmem [#allocation5], %s695_s7  ;;  %s155_s21 = scalar_lea.sflag [#allocation6], %s154_s4 }
  0x24   : > { %s1118_s20 = scalar_select %p70_p3, %s990_s11, %s72_s3  }
  0x25   : > { %s167_s26 = sshll.u32 %s158_s22, 4  ;;  %p922_p5 = pneg %p1086_p0  ;;  %s168_s26 = int_to_ptr.vmem [resolvable:$true] %s167_s26 }
  0x26   : > { %s933_s25 = scalar_lea.vmem %s168_s26, 2048  ;;  %s1007_s29 = smov [#allocation5]  }
  0x27   : > { %p934_p7 = scmp.ne.s32.totalorder %s168_s26, %s933_s25  ;;  %s938_s30 = sshll.u32 %s1007_s29, 4  ;;  %s939_s30 = int_to_ptr.vmem [resolvable:$false] %s938_s30 }
  0x28   : > { %s940_s6 = scalar_lea.vmem %s939_s30, 4096  ;;  %p941_p13 = scmp.lt.s32.totalorder %s168_s26, %s939_s30 }
  0x29   : > { %p936_p8 = pnand %p934_p7, %p922_p5  ;;  %p942_p1 = scmp.lt.s32.totalorder %s940_s6, %s933_s25 }
  0x2b   : > { %p937_p12 = pneg %p936_p8  ;;  %p943_p2 = por %p942_p1, %p941_p13 }
  0x2d   : > { %p944_p4 = pnand %p943_p2, %p937_p12 }
  0x2f   : > { %947 = shalt.err (!%p944_p4)
}
  0x30   : > { %s1008_s3 = smov 384   ;;  %179 = sbr.rel (%p1073_p10) target bundleno = 309 (0x135), region = 28 }
  0x31   : > { %838 = dma.hbm_to_vmem [thread:$0]  (!%p1086_p0), %s166_s15, 2048, %s168_s26, %s155_s21, %s1008_s3, %s1005_s27, %s1006_s28  }
  0x32   : > { %p1230_p6 = scmp.ne.s32.totalorder (!%p1073_p10), %s1223_s16, 0 }
  0x35   : > { %973 = dma.done.wait (%p1230_p6), [#allocation4], 2048  }
  0x36   : > { %975 = vsyncadd (%p1230_p6), [#allocation4], 4294965248  ;;  %s185_s4 = sand.u32 1, %s986_s10   ;;  %p1231_p9 = scmp.ne.s32.totalorder %s1224_s17, 0 }
  0x37   : > { %s1133_s5 = sshll.u32 %s185_s4, 7  ;;  %s186_s7 = scalar_lea.sflag [#allocation6], %s185_s4 }
  0x38   : > { %s1136_s23 = scalar_lea.vmem [#allocation5], %s1133_s5 }
  0x39   : > { %977 = dma.done.wait (%p1231_p9), %s186_s7, 2048  }
  0x3a   : > { %979 = vsyncadd (%p1231_p9), %s186_s7, 4294965248  ;;  %v279_v0 = vld [vmem:[%s1136_s23 + $0x78] sm:$0xff]  ;;  %v278_v1 = vld [vmem:[%s1136_s23 + $0x70] sm:$0xff]  ;;  %s1159_s16 = scalar_lea.vmem [#allocation7], %s1133_s5  ;;  %p1232_p10 = scmp.ne.s32.totalorder %s1225_s18, 0 }
  0x3b   : > { %737 = vmatprep.subr.mxu0 %v279_v0  ;;  %793 = vmatprep.subr.mxu1 %v279_v0  ;;  %v277_v2 = vld [vmem:[%s1136_s23 + $0x68] sm:$0xff]  ;;  %v276_v3 = vld [vmem:[%s1136_s23 + $0x60] sm:$0xff]  ;;  %v275_v4 = vld [vmem:[%s1136_s23 + $0x58] sm:$0xff]  ;;  %s702_s17 = sshll.u32 (%p1232_p10), %s994_s12, 3 }
  0x3c   : > { %738 = vmatpush3.msra.mxu0 %v279_v0  ;;  %809 = vmatpush3.msra.mxu1 %v279_v0  ;;  %v274_v5 = vld [vmem:[%s1136_s23 + $0x50] sm:$0xff]  ;;  %v273_v6 = vld [vmem:[%s1136_s23 + $0x48] sm:$0xff]  ;;  %v272_v7 = vld [vmem:[%s1136_s23 + $0x40] sm:$0xff]  ;;  %s503_s28 = scalar_lea.vmem (%p1232_p10), %s1219_s2, %s702_s17 }
  0x3d   : > { %739 = vmatprep.subr.mxu0 %v278_v1  ;;  %794 = vmatprep.subr.mxu1 %v278_v1  ;;  %v271_v8 = vld [vmem:[%s1136_s23 + $0x38] sm:$0xff]  ;;  %v270_v9 = vld [vmem:[%s1136_s23 + $0x30] sm:$0xff]  ;;  %v269_v10 = vld [vmem:[%s1136_s23 + $0x28] sm:$0xff] }
  0x3e   : > { %740 = vmatpush3.msra.mxu0 %v278_v1  ;;  %810 = vmatpush3.msra.mxu1 %v278_v1  ;;  %v268_v11 = vld [vmem:[%s1136_s23 + $0x20] sm:$0xff]  ;;  %v267_v12 = vld [vmem:[%s1136_s23 + $0x18] sm:$0xff]  ;;  %v266_v13 = vld [vmem:[%s1136_s23 + $0x10] sm:$0xff] }
  0x3f   : > { %741 = vmatprep.subr.mxu0 %v277_v2  ;;  %795 = vmatprep.subr.mxu1 %v277_v2  ;;  %v265_v14 = vld [vmem:[%s1136_s23 + $0x8] sm:$0xff]  ;;  %v264_v15 = vld [vmem:[%s1136_s23] sm:$0xff]  ;;  %v250_v20 = vld [vmem:[#allocation3 + $0x10] sm:$0xff] }
  0x40   : > { %742 = vmatpush3.msra.mxu0 %v277_v2  ;;  %811 = vmatpush3.msra.mxu1 %v277_v2  ;;  %v248_v16 = vld [vmem:[#allocation3] sm:$0xff]  ;;  %v249_v18 = vld [vmem:[#allocation3 + $0x8] sm:$0xff]  ;;  %v258_v21 = vld [vmem:[#allocation3 + $0x50] sm:$0xff] }
  0x41   : > { %743 = vmatprep.subr.mxu0 %v276_v3  ;;  %796 = vmatprep.subr.mxu1 %v276_v3  ;;  %v256_v17 = vld [vmem:[#allocation3 + $0x40] sm:$0xff]  ;;  %v257_v19 = vld [vmem:[#allocation3 + $0x48] sm:$0xff]  ;;  %v251_v22 = vld [vmem:[#allocation3 + $0x18] sm:$0xff] }
  0x42   : > { %744 = vmatpush3.msra.mxu0 %v276_v3  ;;  %812 = vmatpush3.msra.mxu1 %v276_v3  ;;  %v259_v23 = vld [vmem:[#allocation3 + $0x58] sm:$0xff]  ;;  %v252_v24 = vld [vmem:[#allocation3 + $0x20] sm:$0xff]  ;;  %v253_v26 = vld [vmem:[#allocation3 + $0x28] sm:$0xff] }
  0x43   : > { %745 = vmatprep.subr.mxu0 %v275_v4  ;;  %797 = vmatprep.subr.mxu1 %v275_v4  ;;  %v260_v25 = vld [vmem:[#allocation3 + $0x60] sm:$0xff]  ;;  %v261_v27 = vld [vmem:[#allocation3 + $0x68] sm:$0xff]  ;;  %v254_v28 = vld [vmem:[#allocation3 + $0x30] sm:$0xff] }
  0x44   : > { %746 = vmatpush3.msra.mxu0 %v275_v4  ;;  %813 = vmatpush3.msra.mxu1 %v275_v4  ;;  %v262_v29 = vld [vmem:[#allocation3 + $0x70] sm:$0xff]  ;;  %v255_v30 = vld [vmem:[#allocation3 + $0x38] sm:$0xff] }
  0x45   : > { %747 = vmatprep.subr.mxu0 %v274_v5  ;;  %798 = vmatprep.subr.mxu1 %v274_v5  ;;  %v263_v31 = vld [vmem:[#allocation3 + $0x78] sm:$0xff] }
  0x46   : > { %748 = vmatpush3.msra.mxu0 %v274_v5  ;;  %814 = vmatpush3.msra.mxu1 %v274_v5 }
  0x47   : > { %749 = vmatprep.subr.mxu0 %v273_v6  ;;  %799 = vmatprep.subr.mxu1 %v273_v6 }
  0x48   : > { %750 = vmatpush3.msra.mxu0 %v273_v6  ;;  %815 = vmatpush3.msra.mxu1 %v273_v6 }
  0x49   : > { %751 = vmatprep.subr.mxu0 %v272_v7  ;;  %800 = vmatprep.subr.mxu1 %v272_v7 }
  0x4a   : > { %752 = vmatpush3.msra.mxu0 %v272_v7  ;;  %816 = vmatpush3.msra.mxu1 %v272_v7 }
  0x4b   : > { %753 = vmatprep.subr.mxu0 %v271_v8  ;;  %801 = vmatprep.subr.mxu1 %v271_v8 }
  0x4c   : > { %754 = vmatpush3.msra.mxu0 %v271_v8  ;;  %817 = vmatpush3.msra.mxu1 %v271_v8 }
  0x4d   : > { %755 = vmatprep.subr.mxu0 %v270_v9  ;;  %802 = vmatprep.subr.mxu1 %v270_v9 }
  0x4e   : > { %756 = vmatpush3.msra.mxu0 %v270_v9  ;;  %818 = vmatpush3.msra.mxu1 %v270_v9 }
  0x4f   : > { %757 = vmatprep.subr.mxu0 %v269_v10  ;;  %803 = vmatprep.subr.mxu1 %v269_v10 }
  0x50   : > { %758 = vmatpush3.msra.mxu0 %v269_v10  ;;  %819 = vmatpush3.msra.mxu1 %v269_v10 }
  0x51   : > { %759 = vmatprep.subr.mxu0 %v268_v11  ;;  %804 = vmatprep.subr.mxu1 %v268_v11 }
  0x52   : > { %760 = vmatpush3.msra.mxu0 %v268_v11  ;;  %820 = vmatpush3.msra.mxu1 %v268_v11 }
  0x53   : > { %761 = vmatprep.subr.mxu0 %v267_v12  ;;  %805 = vmatprep.subr.mxu1 %v267_v12 }
  0x54   : > { %762 = vmatpush3.msra.mxu0 %v267_v12  ;;  %821 = vmatpush3.msra.mxu1 %v267_v12 }
  0x55   : > { %763 = vmatprep.subr.mxu0 %v266_v13  ;;  %806 = vmatprep.subr.mxu1 %v266_v13 }
  0x56   : > { %764 = vmatpush3.msra.mxu0 %v266_v13  ;;  %822 = vmatpush3.msra.mxu1 %v266_v13 }
  0x57   : > { %765 = vmatprep.subr.mxu0 %v265_v14  ;;  %807 = vmatprep.subr.mxu1 %v265_v14 }
  0x58   : > { %766 = vmatpush3.msra.mxu0 %v265_v14  ;;  %823 = vmatpush3.msra.mxu1 %v265_v14 }
  0x59   : > { %767 = vmatprep.subr.mxu0 %v264_v15  ;;  %808 = vmatprep.subr.mxu1 %v264_v15 }
  0x5a   : > { %768 = vmatpush3.msra.mxu0 %v264_v15  ;;  %824 = vmatpush3.msra.mxu1 %v264_v15 }
  0x5b   : > { %769 = vmatprep.mubr.f32.mxu0 %v248_v16  ;;  %781 = vmatprep.mubr.f32.mxu1 %v256_v17 }
  0x5c   : > { %770 = vmatmul.mubr.f32.vlgmr.msra.gmra.mxu0 %v249_v18  ;;  %782 = vmatmul.mubr.f32.vlgmr.msra.gmra.mxu1 %v257_v19 }
  0x5d   : > { %772 = vmatprep.mubr.f32.mxu0 %v250_v20  ;;  %784 = vmatprep.mubr.f32.mxu1 %v258_v21 }
  0x60   : > { %773 = vmatmul.mubr.f32.gmra.mxu0 %v251_v22  ;;  %785 = vmatmul.mubr.f32.gmra.mxu1 %v259_v23 }
  0x61   : > { %775 = vmatprep.mubr.f32.mxu0 %v252_v24  ;;  %787 = vmatprep.mubr.f32.mxu1 %v260_v25 }
  0x64   : > { %776 = vmatmul.mubr.f32.gmra.mxu0 %v253_v26  ;;  %788 = vmatmul.mubr.f32.gmra.mxu1 %v261_v27 }
  0x65   : > { %778 = vmatprep.mubr.f32.mxu0 %v254_v28  ;;  %790 = vmatprep.mubr.f32.mxu1 %v262_v29 }
  0x68   : > { %779 = vmatmul.mubr.f32.gmra.mxu0 %v255_v30  ;;  %791 = vmatmul.mubr.f32.gmra.mxu1 %v263_v31 }
 0x11c   : > { %v771_v32 = vpop.f32.mrf.mxu0  ;;  %v783_v33 = vpop.f32.mrf.mxu1 }
 0x11d   : > { %477 = vst [vmem:[%s1159_s16 + $0x8] sm:$0xff] %v771_v32  ;;  %485 = vst [vmem:[%s1159_s16 + $0x48] sm:$0xff] %v783_v33 }
 0x11e   : > { %v346_v34 = vpop.f32.mrf.mxu0  ;;  %v386_v35 = vpop.f32.mrf.mxu1 }
 0x11f   : > { %476 = vst [vmem:[%s1159_s16] sm:$0xff] %v346_v34  ;;  %484 = vst [vmem:[%s1159_s16 + $0x40] sm:$0xff] %v386_v35 }
 0x120   : > { %v774_v36 = vpop.f32.mrf.mxu0  ;;  %v786_v37 = vpop.f32.mrf.mxu1 }
 0x121   : > { %479 = vst [vmem:[%s1159_s16 + $0x18] sm:$0xff] %v774_v36  ;;  %487 = vst [vmem:[%s1159_s16 + $0x58] sm:$0xff] %v786_v37 }
 0x122   : > { %v356_v38 = vpop.f32.mrf.mxu0  ;;  %v396_v39 = vpop.f32.mrf.mxu1 }
 0x123   : > { %478 = vst [vmem:[%s1159_s16 + $0x10] sm:$0xff] %v356_v38  ;;  %486 = vst [vmem:[%s1159_s16 + $0x50] sm:$0xff] %v396_v39 }
 0x124   : > { %v777_v40 = vpop.f32.mrf.mxu0  ;;  %v789_v41 = vpop.f32.mrf.mxu1  ;;  %v564_v49 = vld [vmem:[%s1159_s16 + $0x8] sm:$0xff] (%p1232_p10) }
 0x125   : > { %481 = vst [vmem:[%s1159_s16 + $0x28] sm:$0xff] %v777_v40  ;;  %489 = vst [vmem:[%s1159_s16 + $0x68] sm:$0xff] %v789_v41  ;;  %v580_v57 = vld [vmem:[%s1159_s16 + $0x48] sm:$0xff] (%p1232_p10) }
 0x126   : > { %v366_v42 = vpop.f32.mrf.mxu0  ;;  %v406_v43 = vpop.f32.mrf.mxu1  ;;  %v562_v48 = vld [vmem:[%s1159_s16] sm:$0xff] (%p1232_p10)  ;;  %565 = vst [vmem:[%s503_s28 + $0x18] sm:$0xff] (%p1232_p10), %v564_v49  ;;  %581 = vst [vmem:[%s503_s28 + $0xd8] sm:$0xff] (%p1232_p10), %v580_v57 }
 0x127   : > { %480 = vst [vmem:[%s1159_s16 + $0x20] sm:$0xff] %v366_v42  ;;  %488 = vst [vmem:[%s1159_s16 + $0x60] sm:$0xff] %v406_v43  ;;  %498 = sbr.rel (!%p1232_p10) target bundleno = 309 (0x135), region = 48  ;;  %v578_v56 = vld [vmem:[%s1159_s16 + $0x40] sm:$0xff] (%p1232_p10) }
 0x128   : > { %v780_v44 = vpop.f32.mrf.mxu0  ;;  %v792_v45 = vpop.f32.mrf.mxu1  ;;  %v568_v51 = vld [vmem:[%s1159_s16 + $0x18] sm:$0xff] (%p1232_p10)  ;;  %563 = vst [vmem:[%s503_s28] sm:$0xff] (%p1232_p10), %v562_v48  ;;  %579 = vst [vmem:[%s503_s28 + $0xc0] sm:$0xff] (%p1232_p10), %v578_v56 }
 0x129   : > { %483 = vst [vmem:[%s1159_s16 + $0x38] sm:$0xff] %v780_v44  ;;  %491 = vst [vmem:[%s1159_s16 + $0x78] sm:$0xff] %v792_v45  ;;  %v584_v59 = vld [vmem:[%s1159_s16 + $0x58] sm:$0xff] (%p1232_p10) }
 0x12a   : > { %v376_v46 = vpop.f32.mrf.mxu0  ;;  %v416_v47 = vpop.f32.mrf.mxu1  ;;  %v566_v50 = vld [vmem:[%s1159_s16 + $0x10] sm:$0xff] (%p1232_p10)  ;;  %569 = vst [vmem:[%s503_s28 + $0x48] sm:$0xff] (%p1232_p10), %v568_v51  ;;  %585 = vst [vmem:[%s503_s28 + $0x108] sm:$0xff] (%p1232_p10), %v584_v59 }
 0x12b   : > { %482 = vst [vmem:[%s1159_s16 + $0x30] sm:$0xff] %v376_v46  ;;  %490 = vst [vmem:[%s1159_s16 + $0x70] sm:$0xff] %v416_v47  ;;  %v582_v58 = vld [vmem:[%s1159_s16 + $0x50] sm:$0xff] (%p1232_p10) }
 0x12c   : > { %v572_v53 = vld [vmem:[%s1159_s16 + $0x28] sm:$0xff]  ;;  %567 = vst [vmem:[%s503_s28 + $0x30] sm:$0xff] %v566_v50  ;;  %583 = vst [vmem:[%s503_s28 + $0xf0] sm:$0xff] %v582_v58 }
 0x12d   : > { %573 = vst [vmem:[%s503_s28 + $0x78] sm:$0xff] %v572_v53  ;;  %v588_v61 = vld [vmem:[%s1159_s16 + $0x68] sm:$0xff] }
 0x12e   : > { %v570_v52 = vld [vmem:[%s1159_s16 + $0x20] sm:$0xff]  ;;  %589 = vst [vmem:[%s503_s28 + $0x138] sm:$0xff] %v588_v61 }
 0x12f   : > { %571 = vst [vmem:[%s503_s28 + $0x60] sm:$0xff] %v570_v52  ;;  %v586_v60 = vld [vmem:[%s1159_s16 + $0x60] sm:$0xff] }
 0x130   : > { %v576_v55 = vld [vmem:[%s1159_s16 + $0x38] sm:$0xff]  ;;  %587 = vst [vmem:[%s503_s28 + $0x120] sm:$0xff] %v586_v60 }
 0x131   : > { %577 = vst [vmem:[%s503_s28 + $0xa8] sm:$0xff] %v576_v55  ;;  %v592_v63 = vld [vmem:[%s1159_s16 + $0x78] sm:$0xff] }
 0x132   : > { %v574_v54 = vld [vmem:[%s1159_s16 + $0x30] sm:$0xff]  ;;  %593 = vst [vmem:[%s503_s28 + $0x168] sm:$0xff] %v592_v63 }
 0x133   : > { %575 = vst [vmem:[%s503_s28 + $0x90] sm:$0xff] %v574_v54  ;;  %v590_v62 = vld [vmem:[%s1159_s16 + $0x70] sm:$0xff] }
 0x134   : > { %591 = vst [vmem:[%s503_s28 + $0x150] sm:$0xff] %v590_v62 }
 0x135 PF: > { %s16_s14 = sadd.s32 1, %s1002_s14   ;;  %s1233_s9 = smov %s986_s10 }
 0x136   : > { %p13_p0 = scmp.ge.s32.totalorder %s16_s14, 5   ;;  %s1234_s10 = smov %s990_s11 }
 0x137   : > { %s1235_s11 = smov %s1118_s20  ;;  %s1236_s12 = smov %s998_s13 }
 0x138   : > { %s1237_s13 = smov %s1239_s24  ;;  %15 = sbr.rel (!%p13_p0) target bundleno = 5 (0x5), region = 120 }
 0x13d   :  { %609 = vsyncpa [#allocation4], 1 }
 0x13e   :  { %611 = vsyncpa [#allocation4 + $0x1], 1 }
 0x13f   :  { %612 = vsyncpa [#allocation6], 1 }
 0x140   :  { %614 = vsyncpa [#allocation6 + $0x1], 1 }

// kernel: attention_forward.4
= control target key start
LH: loop header
LB: loop body
LE: loop exit
PB: predicated region body
PF: predicated region fallthrough
CT: control target
= control target key end

     0   :  { %s7866_s12 = smov 0   ;;  %s7868_s13 = smov 0   ;;  %s11371_s0 = inlined_call_operand.vmem [shape: f32[2,64,384], index: 0, kind: input, shape index: {}, may-alias: {0,1,2}]   ;;  %s11372_s1 = inlined_call_operand.vmem [shape: f32[2,64,384], index: 1, kind: input, shape index: {}, may-alias: {0,1,2}]   ;;  %s11373_s2 = inlined_call_operand.vmem [shape: f32[2,64,384], index: 2, kind: input, shape index: {}, may-alias: {0,1,2}]   ;;  %s11374_s3 = inlined_call_operand.vmem [shape: f32[2,64,128], index: 3, kind: output, shape index: {}]  }
   0x1   :  { %s7870_s14 = smov 0   ;;  %s7872_s15 = smov 0  }
   0x2   :  { %s7874_s16 = smov 0  }
   0x3 LB: > { %s32_s17 = sadd.s32 1, %s7830_s15  ;;  %p48_p1 = scmp.ne.s32.totalorder %s7822_s13, %s7818_s12  ;;  %s7834_s16 = sphi %s7874_s16, %s13_s16   ;;  %s7830_s15 = sphi %s7872_s15, %s11777_s15   ;;  %s7826_s14 = sphi %s7870_s14, %s11776_s14   ;;  %s7822_s13 = sphi %s7868_s13, %s11775_s13   ;;  %s7818_s12 = sphi %s7866_s12, %s11774_s12  }
   0x4   : > { %p34_p0 = scmp.ge.s32.totalorder %s32_s17, 2  ;;  %p49_p2 = scmp.eq.s32.totalorder %s7834_s16, 0 }
   0x5   : > { %s41_s20 = sadd.s32 1, %s7822_s13  ;;  %p6375_p5 = scmp.ge.s32.totalorder %s7834_s16, 2 }
   0x6   : > { %s11779_s17 = smov (%p34_p0, %s32_s17), 0  ;;  %p7897_p3 = por %p49_p2, %p48_p1 }
   0x7   : > { %s36_s19 = ssub.s32 %s7830_s15, %s11779_s17  ;;  %158 = sbr.rel (%p6375_p5) target bundleno = 39 (0x27), region = 16 }
   0x8   : > { %p39_p4 = scmp.eq.s32.totalorder %s36_s19, 0 }
   0xa   : > { %s7905_s21 = scalar_select %p39_p4, %s7822_s13, %s41_s20  }
   0xc   : > { %161 = sbr.rel (!%p7897_p3) target bundleno = 21 (0x15), region = 20  ;;  %s163_s22 = sand.u32 (%p7897_p3), 1, %s7822_s13  }
   0xd   : > { %s7303_s23 = smul.u32 (%p7897_p3), 192, %s7830_s15  ;;  %s6376_s24 = sshll.u32 (%p7897_p3), %s163_s22, 6 }
   0xe   : > { %s165_s28 = scalar_lea.vmem (%p7897_p3), [#allocation5], %s6376_s24 }
   0xf   : > { %s171_s27 = scalar_lea.vmem (%p7897_p3), %s11371_s0, %s7303_s23 }
  0x10   : > { %v214_v0 = vld [vmem:[%s171_s27] sm:$0xff] (%p7897_p3)  ;;  %v216_v1 = vld [vmem:[%s171_s27 + $0x18] sm:$0xff] (%p7897_p3)  ;;  %v218_v2 = vld [vmem:[%s171_s27 + $0x30] sm:$0xff] (%p7897_p3) }
  0x11   : > { %215 = vst [vmem:[%s165_s28] sm:$0xff] %v214_v0  ;;  %217 = vst [vmem:[%s165_s28 + $0x8] sm:$0xff] %v216_v1  ;;  %v220_v3 = vld [vmem:[%s171_s27 + $0x48] sm:$0xff]  ;;  %v222_v4 = vld [vmem:[%s171_s27 + $0x60] sm:$0xff] }
  0x12   : > { %219 = vst [vmem:[%s165_s28 + $0x10] sm:$0xff] %v218_v2  ;;  %v224_v5 = vld [vmem:[%s171_s27 + $0x78] sm:$0xff]  ;;  %221 = vst [vmem:[%s165_s28 + $0x18] sm:$0xff] %v220_v3  ;;  %v226_v6 = vld [vmem:[%s171_s27 + $0x90] sm:$0xff] }
  0x13   : > { %223 = vst [vmem:[%s165_s28 + $0x20] sm:$0xff] %v222_v4  ;;  %225 = vst [vmem:[%s165_s28 + $0x28] sm:$0xff] %v224_v5  ;;  %v228_v7 = vld [vmem:[%s171_s27 + $0xa8] sm:$0xff] }
  0x14   : > { %227 = vst [vmem:[%s165_s28 + $0x30] sm:$0xff] %v226_v6  ;;  %229 = vst [vmem:[%s165_s28 + $0x38] sm:$0xff] %v228_v7 }
  0x15 PF: > { %235 = sbr.rel (!%p7897_p3) target bundleno = 30 (0x1e), region = 58  ;;  %s237_s29 = sand.u32 (%p7897_p3), 1, %s7822_s13  }
  0x16   : > { %s6379_s30 = smul.u32 (%p7897_p3), 192, %s7830_s15  ;;  %s6378_s4 = sshll.u32 (%p7897_p3), %s237_s29, 6 }
  0x17   : > { %s239_s8 = scalar_lea.vmem (%p7897_p3), [#allocation6], %s6378_s4 }
  0x18   : > { %s6278_s7 = scalar_lea.vmem (%p7897_p3), %s11372_s1, %s6379_s30 }
  0x19   : > { %v6380_v8 = vld [vmem:[%s6278_s7 + $0x8] sm:$0xff] (%p7897_p3)  ;;  %v6381_v9 = vld [vmem:[%s6278_s7 + $0x20] sm:$0xff] (%p7897_p3)  ;;  %v6382_v10 = vld [vmem:[%s6278_s7 + $0x38] sm:$0xff] (%p7897_p3) }
  0x1a   : > { %290 = vst [vmem:[%s239_s8] sm:$0xff] %v6380_v8  ;;  %292 = vst [vmem:[%s239_s8 + $0x8] sm:$0xff] %v6381_v9  ;;  %v6383_v11 = vld [vmem:[%s6278_s7 + $0x50] sm:$0xff]  ;;  %v6384_v12 = vld [vmem:[%s6278_s7 + $0x68] sm:$0xff] }
  0x1b   : > { %294 = vst [vmem:[%s239_s8 + $0x10] sm:$0xff] %v6382_v10  ;;  %v6385_v13 = vld [vmem:[%s6278_s7 + $0x80] sm:$0xff]  ;;  %296 = vst [vmem:[%s239_s8 + $0x18] sm:$0xff] %v6383_v11  ;;  %v6386_v14 = vld [vmem:[%s6278_s7 + $0x98] sm:$0xff] }
  0x1c   : > { %298 = vst [vmem:[%s239_s8 + $0x20] sm:$0xff] %v6384_v12  ;;  %300 = vst [vmem:[%s239_s8 + $0x28] sm:$0xff] %v6385_v13  ;;  %v6387_v15 = vld [vmem:[%s6278_s7 + $0xb0] sm:$0xff] }
  0x1d   : > { %302 = vst [vmem:[%s239_s8 + $0x30] sm:$0xff] %v6386_v14  ;;  %304 = vst [vmem:[%s239_s8 + $0x38] sm:$0xff] %v6387_v15 }
  0x1e PF: > { %310 = sbr.rel (!%p7897_p3) target bundleno = 39 (0x27), region = 96  ;;  %s312_s9 = sand.u32 (%p7897_p3), 1, %s7822_s13  }
  0x1f   : > { %s6389_s10 = smul.u32 (%p7897_p3), 192, %s7830_s15  ;;  %s6388_s11 = sshll.u32 (%p7897_p3), %s312_s9, 6 }
  0x20   : > { %s314_s23 = scalar_lea.vmem (%p7897_p3), [#allocation7], %s6388_s11 }
  0x21   : > { %s6286_s22 = scalar_lea.vmem (%p7897_p3), %s11373_s2, %s6389_s10 }
  0x22   : > { %v6390_v16 = vld [vmem:[%s6286_s22 + $0x10] sm:$0xff] (%p7897_p3)  ;;  %v6391_v17 = vld [vmem:[%s6286_s22 + $0x28] sm:$0xff] (%p7897_p3)  ;;  %v6392_v18 = vld [vmem:[%s6286_s22 + $0x40] sm:$0xff] (%p7897_p3) }
  0x23   : > { %365 = vst [vmem:[%s314_s23] sm:$0xff] %v6390_v16  ;;  %367 = vst [vmem:[%s314_s23 + $0x8] sm:$0xff] %v6391_v17  ;;  %v6393_v19 = vld [vmem:[%s6286_s22 + $0x58] sm:$0xff]  ;;  %v6394_v20 = vld [vmem:[%s6286_s22 + $0x70] sm:$0xff] }
  0x24   : > { %369 = vst [vmem:[%s314_s23 + $0x10] sm:$0xff] %v6392_v18  ;;  %v6395_v21 = vld [vmem:[%s6286_s22 + $0x88] sm:$0xff]  ;;  %371 = vst [vmem:[%s314_s23 + $0x18] sm:$0xff] %v6393_v19  ;;  %v6396_v22 = vld [vmem:[%s6286_s22 + $0xa0] sm:$0xff] }
  0x25   : > { %373 = vst [vmem:[%s314_s23 + $0x20] sm:$0xff] %v6394_v20  ;;  %375 = vst [vmem:[%s314_s23 + $0x28] sm:$0xff] %v6395_v21  ;;  %v6397_v23 = vld [vmem:[%s6286_s22 + $0xb8] sm:$0xff] }
  0x26   : > { %377 = vst [vmem:[%s314_s23 + $0x30] sm:$0xff] %v6396_v22  ;;  %379 = vst [vmem:[%s314_s23 + $0x38] sm:$0xff] %v6397_v23 }
  0x27 PF: > { %p6398_p6 = scmp.ge.s32.totalorder %s7834_s16, 1  ;;  %p384_p7 = scmp.lt.s32.totalorder %s7834_s16, 3 }
  0x29   : > { %p385_p8 = pnand %p6398_p6, %p384_p7 }
  0x2b   : > { %388 = sbr.rel (%p385_p8) target bundleno = 4748 (0x128c), region = 134 }
  0x30   : > { %s391_s18 = sand.u32 1, %s7818_s12   ;;  %vm586_vm0 = vcmask 130048   ;;  %vm457_vm1 = vcmask 7168   ;;  %v7836_v48 = vmov -inf   ;;  %vm845_vm2 = vcmask 523264   ;;  %s7839_s27 = smov 112  }
  0x31   : > { %s7932_s24 = sshll.u32 %s391_s18, 6  ;;  %458 = vst.msk [vmem:[#allocation2] sm:$0xff] %vm457_vm1, %v7836_v48  ;;  %459 = vst.msk [vmem:[#allocation2 + $0x8] sm:$0xff] %vm457_vm1, %v7836_v48  ;;  %v7837_v0 = vmov 0   ;;  %v7838_v2 = vmov 0.0   ;;  %s7840_s28 = smov 96  }
  0x32   : > { %s7935_s25 = scalar_lea.vmem [#allocation6], %s7932_s24  ;;  %s7948_s12 = scalar_lea.vmem [#allocation5], %s7932_s24  ;;  %460 = vst.msk [vmem:[#allocation2 + $0x10] sm:$0xff] %vm457_vm1, %v7836_v48  ;;  %461 = vst.msk [vmem:[#allocation2 + $0x18] sm:$0xff] %vm457_vm1, %v7836_v48  ;;  %7354 = vset.pattern.permute.xlu0 %v7837_v0  ;;  %7355 = vset.pattern.permute.xlu1 %v7837_v0  ;;  %vm6174_vm3 = vcmask 261120   ;;  %vm6183_vm4 = vcmask 392192  }
  0x33   : > { %v7938_v24 = vld [vmem:[%s7935_s25 + $0x38] sm:$0xff]  ;;  %v7941_v25 = vld [vmem:[%s7935_s25 + $0x30] sm:$0xff]  ;;  %v651_v26 = vld [vmem:[%s7948_s12] sm:$0xff]  ;;  %462 = vst.msk [vmem:[#allocation2 + $0x20] sm:$0xff] %vm457_vm1, %v7836_v48  ;;  %s8453_s26 = scalar_lea.vmem [#allocation7], %s7932_s24  ;;  %s7841_s29 = smov 80  }
  0x34   : > { %6855 = vmatprep.subr.msk.mxu0 %vm586_vm0, %v7938_v24  ;;  %v7953_v27 = vmul.f32 0.25, %v651_v26  ;;  %v7956_v28 = vld [vmem:[%s7935_s25 + $0x28] sm:$0xff]  ;;  %v7965_v29 = vld [vmem:[%s7935_s25 + $0x20] sm:$0xff]  ;;  %v7972_v30 = vld [vmem:[%s7935_s25 + $0x18] sm:$0xff]  ;;  %463 = vst.msk [vmem:[#allocation2 + $0x28] sm:$0xff] %vm457_vm1, %v7836_v48  ;;  %s7842_s30 = smov 64  }
  0x35   : > { %6856 = vmatpush3.xpose.msk.msra.mxu0 %vm586_vm0, %v7938_v24  ;;  %v7979_v31 = vld [vmem:[%s7935_s25 + $0x10] sm:$0xff]  ;;  %v7986_v32 = vld [vmem:[%s7935_s25 + $0x8] sm:$0xff]  ;;  %v7993_v33 = vld [vmem:[%s7935_s25] sm:$0xff]  ;;  %464 = vst.msk [vmem:[#allocation2 + $0x30] sm:$0xff] %vm457_vm1, %v7836_v48  ;;  %s7843_s4 = smov 48   ;;  %s7844_s5 = smov 32  }
  0x36   : > { %6857 = vmatprep.subr.msk.mxu0 %vm586_vm0, %v7941_v25  ;;  %6871 = vmatprep.mubr.msk.f32.mxu0 %vm586_vm0, %v7953_v27  ;;  %v652_v34 = vld [vmem:[%s7948_s12 + $0x8] sm:$0xff]  ;;  %v653_v35 = vld [vmem:[%s7948_s12 + $0x10] sm:$0xff]  ;;  %v654_v38 = vld [vmem:[%s7948_s12 + $0x18] sm:$0xff]  ;;  %465 = vst.msk [vmem:[#allocation2 + $0x38] sm:$0xff] %vm457_vm1, %v7836_v48  ;;  %s7845_s6 = smov 16   ;;  %p444_p9 = scmp.lt.s32.totalorder %s7826_s14, 1 }
  0x37   : > { %v8001_v36 = vmul.f32 0.25, %v652_v34  ;;  %v8005_v37 = vmul.f32 0.25, %v653_v35  ;;  %v655_v39 = vld [vmem:[%s7948_s12 + $0x20] sm:$0xff]  ;;  %v8011_v40 = vmul.f32 0.25, %v654_v38  ;;  %v656_v42 = vld [vmem:[%s7948_s12 + $0x28] sm:$0xff]  ;;  %v657_v43 = vld [vmem:[%s7948_s12 + $0x30] sm:$0xff] }
  0x38   : > { %v8015_v41 = vmul.f32 0.25, %v655_v39  ;;  %v8021_v44 = vmul.f32 0.25, %v656_v42  ;;  %v8025_v45 = vmul.f32 0.25, %v657_v43  ;;  %v658_v46 = vld [vmem:[%s7948_s12 + $0x38] sm:$0xff]  ;;  %466 = vst.msk [vmem:[#allocation2 + $0x40] sm:$0xff] %vm457_vm1, %v7836_v48  ;;  %467 = vst.msk [vmem:[#allocation2 + $0x48] sm:$0xff] %vm457_vm1, %v7836_v48 }
  0x39   : > { %6858 = vmatpush3.xpose.msk.msra.mxu0 %vm586_vm0, %v7941_v25  ;;  %v8030_v47 = vmul.f32 0.25, %v658_v46  ;;  %468 = vst.msk [vmem:[#allocation2 + $0x50] sm:$0xff] %vm457_vm1, %v7836_v48  ;;  %469 = vst.msk [vmem:[#allocation2 + $0x58] sm:$0xff] %vm457_vm1, %v7836_v48  ;;  %v8456_v3 = vld [vmem:[%s8453_s26 + $0x38] sm:$0xff]  ;;  %v8459_v4 = vld [vmem:[%s8453_s26 + $0x30] sm:$0xff]  ;;  %s11781_s14 = smov (!%p444_p9, %s7826_s14), 1 }
  0x3a   : > { %6859 = vmatprep.subr.msk.mxu0 %vm586_vm0, %v7956_v28  ;;  %470 = vst.msk [vmem:[#allocation2 + $0x60] sm:$0xff] %vm457_vm1, %v7836_v48  ;;  %471 = vst.msk [vmem:[#allocation2 + $0x68] sm:$0xff] %vm457_vm1, %v7836_v48  ;;  %6883 = vmatprep.subr.mxu1 %v8456_v3  ;;  %v8464_v5 = vld [vmem:[%s8453_s26 + $0x28] sm:$0xff]  ;;  %v8469_v6 = vld [vmem:[%s8453_s26 + $0x20] sm:$0xff]  ;;  %vm6200_vm5 = vcmask 654336   ;;  %s6598_s7 = sshll.u32 %s11781_s14, 6 }
  0x3b   : > { %472 = vst.msk [vmem:[#allocation2 + $0x70] sm:$0xff] %vm457_vm1, %v7836_v48  ;;  %473 = vst.msk [vmem:[#allocation2 + $0x78] sm:$0xff] %vm457_vm1, %v7836_v48  ;;  %6884 = vmatpush3.msra.mxu1 %v8456_v3  ;;  %v8475_v7 = vld [vmem:[#allocation2] sm:$0xff]  ;;  %v8478_v8 = vld [vmem:[%s8453_s26 + $0x18] sm:$0xff]  ;;  %vm6209_vm6 = vcmask 785408   ;;  %vm6218_vm7 = vcmask 916480   ;;  %s11312_s10 = scalar_lea.vmem %s11374_s3, %s6598_s7 }
  0x3c   : > { %474 = vst.msk [vmem:[#allocation2 + $0x80] sm:$0xff] %vm457_vm1, %v7836_v48  ;;  %475 = vst.msk [vmem:[#allocation2 + $0x88] sm:$0xff] %vm457_vm1, %v7836_v48  ;;  %6885 = vmatprep.subr.mxu1 %v8459_v4  ;;  %v8483_v10 = vld [vmem:[%s8453_s26 + $0x10] sm:$0xff]  ;;  %v8489_v12 = vld [vmem:[#allocation2 + $0x8] sm:$0xff] }
  0x3d   : > { %6860 = vmatpush3.xpose.msk.msra.mxu0 %vm586_vm0, %v7956_v28  ;;  %476 = vst.msk [vmem:[#allocation2 + $0x90] sm:$0xff] %vm457_vm1, %v7836_v48  ;;  %477 = vst.msk [vmem:[#allocation2 + $0x98] sm:$0xff] %vm457_vm1, %v7836_v48  ;;  %6886 = vmatpush3.msra.mxu1 %v8459_v4  ;;  %v8491_v13 = vld [vmem:[#allocation2 + $0x10] sm:$0xff]  ;;  %v8495_v14 = vld [vmem:[%s8453_s26 + $0x8] sm:$0xff] }
  0x3e   : > { %6861 = vmatprep.subr.msk.mxu0 %vm586_vm0, %v7965_v29  ;;  %478 = vst.msk [vmem:[#allocation2 + $0xa0] sm:$0xff] %vm457_vm1, %v7836_v48  ;;  %479 = vst.msk [vmem:[#allocation2 + $0xa8] sm:$0xff] %vm457_vm1, %v7836_v48  ;;  %6887 = vmatprep.subr.mxu1 %v8464_v5  ;;  %v8505_v18 = vld [vmem:[%s8453_s26] sm:$0xff]  ;;  %v8514_v21 = vld [vmem:[#allocation2 + $0x18] sm:$0xff] }
  0x3f   : > { %480 = vst.msk [vmem:[#allocation2 + $0xb0] sm:$0xff] %vm457_vm1, %v7836_v48  ;;  %481 = vst.msk [vmem:[#allocation2 + $0xb8] sm:$0xff] %vm457_vm1, %v7836_v48  ;;  %6888 = vmatpush3.msra.mxu1 %v8464_v5  ;;  %v8516_v22 = vld [vmem:[#allocation2 + $0x20] sm:$0xff]  ;;  %v8534_v42 = vld [vmem:[#allocation2 + $0x28] sm:$0xff] }
  0x40   : > { %482 = vst.msk [vmem:[#allocation2 + $0xc0] sm:$0xff] %vm457_vm1, %v7836_v48  ;;  %483 = vst.msk [vmem:[#allocation2 + $0xc8] sm:$0xff] %vm457_vm1, %v7836_v48  ;;  %6889 = vmatprep.subr.mxu1 %v8469_v6  ;;  %v8536_v43 = vld [vmem:[#allocation2 + $0x30] sm:$0xff] }
  0x41   : > { %6862 = vmatpush3.xpose.msk.msra.mxu0 %vm586_vm0, %v7965_v29  ;;  %484 = vst.msk [vmem:[#allocation2 + $0xd0] sm:$0xff] %vm457_vm1, %v7836_v48  ;;  %485 = vst.msk [vmem:[#allocation2 + $0xd8] sm:$0xff] %vm457_vm1, %v7836_v48  ;;  %6890 = vmatpush3.msra.mxu1 %v8469_v6 }
  0x42   : > { %6863 = vmatprep.subr.msk.mxu0 %vm586_vm0, %v7972_v30  ;;  %486 = vst.msk [vmem:[#allocation2 + $0xe0] sm:$0xff] %vm457_vm1, %v7836_v48  ;;  %487 = vst.msk [vmem:[#allocation2 + $0xe8] sm:$0xff] %vm457_vm1, %v7836_v48  ;;  %6891 = vmatprep.subr.mxu1 %v8478_v8 }
  0x43   : > { %488 = vst.msk [vmem:[#allocation2 + $0xf0] sm:$0xff] %vm457_vm1, %v7836_v48  ;;  %489 = vst.msk [vmem:[#allocation2 + $0xf8] sm:$0xff] %vm457_vm1, %v7836_v48  ;;  %6892 = vmatpush3.msra.mxu1 %v8478_v8 }
  0x44   : > { %490 = vst.msk [vmem:[#allocation2 + $0x100] sm:$0xff] %vm457_vm1, %v7836_v48  ;;  %491 = vst.msk [vmem:[#allocation2 + $0x108] sm:$0xff] %vm457_vm1, %v7836_v48  ;;  %6893 = vmatprep.subr.mxu1 %v8483_v10 }
  0x45   : > { %6864 = vmatpush3.xpose.msk.msra.mxu0 %vm586_vm0, %v7972_v30  ;;  %492 = vst.msk [vmem:[#allocation2 + $0x110] sm:$0xff] %vm457_vm1, %v7836_v48  ;;  %493 = vst.msk [vmem:[#allocation2 + $0x118] sm:$0xff] %vm457_vm1, %v7836_v48  ;;  %6894 = vmatpush3.msra.mxu1 %v8483_v10 }
  0x46   : > { %6865 = vmatprep.subr.msk.mxu0 %vm586_vm0, %v7979_v31  ;;  %494 = vst.msk [vmem:[#allocation2 + $0x120] sm:$0xff] %vm457_vm1, %v7836_v48  ;;  %495 = vst.msk [vmem:[#allocation2 + $0x128] sm:$0xff] %vm457_vm1, %v7836_v48  ;;  %6895 = vmatprep.subr.mxu1 %v8495_v14 }
  0x47   : > { %496 = vst.msk [vmem:[#allocation2 + $0x130] sm:$0xff] %vm457_vm1, %v7836_v48  ;;  %497 = vst.msk [vmem:[#allocation2 + $0x138] sm:$0xff] %vm457_vm1, %v7836_v48  ;;  %6896 = vmatpush3.msra.mxu1 %v8495_v14 }
  0x48   : > { %498 = vst.msk [vmem:[#allocation2 + $0x140] sm:$0xff] %vm457_vm1, %v7836_v48  ;;  %499 = vst.msk [vmem:[#allocation2 + $0x148] sm:$0xff] %vm457_vm1, %v7836_v48  ;;  %6897 = vmatprep.subr.mxu1 %v8505_v18 }
  0x49   : > { %6866 = vmatpush3.xpose.msk.msra.mxu0 %vm586_vm0, %v7979_v31  ;;  %500 = vst.msk [vmem:[#allocation2 + $0x150] sm:$0xff] %vm457_vm1, %v7836_v48  ;;  %501 = vst.msk [vmem:[#allocation2 + $0x158] sm:$0xff] %vm457_vm1, %v7836_v48  ;;  %6898 = vmatpush3.msra.mxu1 %v8505_v18 }
  0x4a   : > { %6867 = vmatprep.subr.msk.mxu0 %vm586_vm0, %v7986_v32  ;;  %502 = vst.msk [vmem:[#allocation2 + $0x160] sm:$0xff] %vm457_vm1, %v7836_v48  ;;  %503 = vst.msk [vmem:[#allocation2 + $0x168] sm:$0xff] %vm457_vm1, %v7836_v48 }
  0x4b   : > { %504 = vst.msk [vmem:[#allocation2 + $0x170] sm:$0xff] %vm457_vm1, %v7836_v48  ;;  %505 = vst.msk [vmem:[#allocation2 + $0x178] sm:$0xff] %vm457_vm1, %v7836_v48 }
  0x4c   : > { %506 = vst.msk [vmem:[#allocation2 + $0x180] sm:$0xff] %vm457_vm1, %v7836_v48  ;;  %507 = vst.msk [vmem:[#allocation2 + $0x188] sm:$0xff] %vm457_vm1, %v7836_v48 }
  0x4d   : > { %6868 = vmatpush3.xpose.msk.msra.mxu0 %vm586_vm0, %v7986_v32  ;;  %508 = vst.msk [vmem:[#allocation2 + $0x190] sm:$0xff] %vm457_vm1, %v7836_v48  ;;  %509 = vst.msk [vmem:[#allocation2 + $0x198] sm:$0xff] %vm457_vm1, %v7836_v48 }
  0x4e   : > { %6869 = vmatprep.subr.msk.mxu0 %vm586_vm0, %v7993_v33  ;;  %510 = vst.msk [vmem:[#allocation2 + $0x1a0] sm:$0xff] %vm457_vm1, %v7836_v48  ;;  %511 = vst.msk [vmem:[#allocation2 + $0x1a8] sm:$0xff] %vm457_vm1, %v7836_v48 }
  0x4f   : > { %512 = vst.msk [vmem:[#allocation2 + $0x1b0] sm:$0xff] %vm457_vm1, %v7836_v48  ;;  %513 = vst.msk [vmem:[#allocation2 + $0x1b8] sm:$0xff] %vm457_vm1, %v7836_v48 }
  0x50   : > { %514 = vst.msk [vmem:[#allocation2 + $0x1c0] sm:$0xff] %vm457_vm1, %v7836_v48  ;;  %515 = vst.msk [vmem:[#allocation2 + $0x1c8] sm:$0xff] %vm457_vm1, %v7836_v48 }
  0x51   : > { %6870 = vmatpush3.xpose.msk.msra.mxu0 %vm586_vm0, %v7993_v33  ;;  %516 = vst.msk [vmem:[#allocation2 + $0x1d0] sm:$0xff] %vm457_vm1, %v7836_v48  ;;  %517 = vst.msk [vmem:[#allocation2 + $0x1d8] sm:$0xff] %vm457_vm1, %v7836_v48 }
  0x52   : > { %518 = vst.msk [vmem:[#allocation2 + $0x1e0] sm:$0xff] %vm457_vm1, %v7836_v48  ;;  %519 = vst.msk [vmem:[#allocation2 + $0x1e8] sm:$0xff] %vm457_vm1, %v7836_v48 }
  0x53   : > { %520 = vst.msk [vmem:[#allocation2 + $0x1f0] sm:$0xff] %vm457_vm1, %v7836_v48  ;;  %521 = vst.msk [vmem:[#allocation2 + $0x1f8] sm:$0xff] %vm457_vm1, %v7836_v48 }
  0x54   : > { %6872 = vmatmul.mubr.msk.f32.vlgmr.msra.gmra.mxu0 %vm586_vm0, %v8001_v36  ;;  %523 = vst.msk [vmem:[#allocation3 + $0x8] sm:$0xff] %vm457_vm1, %v7838_v2  ;;  %522 = vst.msk [vmem:[#allocation3] sm:$0xff] %vm457_vm1, %v7838_v2 }
  0x55   : > { %6874 = vmatprep.mubr.msk.f32.mxu0 %vm586_vm0, %v8005_v37  ;;  %524 = vst.msk [vmem:[#allocation3 + $0x10] sm:$0xff] %vm457_vm1, %v7838_v2  ;;  %525 = vst.msk [vmem:[#allocation3 + $0x18] sm:$0xff] %vm457_vm1, %v7838_v2 }
  0x56   : > { %526 = vst.msk [vmem:[#allocation3 + $0x20] sm:$0xff] %vm457_vm1, %v7838_v2  ;;  %527 = vst.msk [vmem:[#allocation3 + $0x28] sm:$0xff] %vm457_vm1, %v7838_v2 }
  0x57   : > { %528 = vst.msk [vmem:[#allocation3 + $0x30] sm:$0xff] %vm457_vm1, %v7838_v2  ;;  %529 = vst.msk [vmem:[#allocation3 + $0x38] sm:$0xff] %vm457_vm1, %v7838_v2 }
  0x58   : > { %6875 = vmatmul.mubr.msk.f32.gmra.mxu0 %vm586_vm0, %v8011_v40  ;;  %530 = vst.msk [vmem:[#allocation3 + $0x40] sm:$0xff] %vm457_vm1, %v7838_v2  ;;  %531 = vst.msk [vmem:[#allocation3 + $0x48] sm:$0xff] %vm457_vm1, %v7838_v2 }
  0x59   : > { %6877 = vmatprep.mubr.msk.f32.mxu0 %vm586_vm0, %v8015_v41  ;;  %532 = vst.msk [vmem:[#allocation3 + $0x50] sm:$0xff] %vm457_vm1, %v7838_v2  ;;  %533 = vst.msk [vmem:[#allocation3 + $0x58] sm:$0xff] %vm457_vm1, %v7838_v2 }
  0x5a   : > { %534 = vst.msk [vmem:[#allocation3 + $0x60] sm:$0xff] %vm457_vm1, %v7838_v2  ;;  %535 = vst.msk [vmem:[#allocation3 + $0x68] sm:$0xff] %vm457_vm1, %v7838_v2 }
  0x5b   : > { %536 = vst.msk [vmem:[#allocation3 + $0x70] sm:$0xff] %vm457_vm1, %v7838_v2  ;;  %537 = vst.msk [vmem:[#allocation3 + $0x78] sm:$0xff] %vm457_vm1, %v7838_v2 }
  0x5c   : > { %6878 = vmatmul.mubr.msk.f32.gmra.mxu0 %vm586_vm0, %v8021_v44  ;;  %538 = vst.msk [vmem:[#allocation3 + $0x80] sm:$0xff] %vm457_vm1, %v7838_v2  ;;  %539 = vst.msk [vmem:[#allocation3 + $0x88] sm:$0xff] %vm457_vm1, %v7838_v2 }
  0x5d   : > { %6880 = vmatprep.mubr.msk.f32.mxu0 %vm586_vm0, %v8025_v45  ;;  %540 = vst.msk [vmem:[#allocation3 + $0x90] sm:$0xff] %vm457_vm1, %v7838_v2  ;;  %541 = vst.msk [vmem:[#allocation3 + $0x98] sm:$0xff] %vm457_vm1, %v7838_v2 }
  0x5e   : > { %542 = vst.msk [vmem:[#allocation3 + $0xa0] sm:$0xff] %vm457_vm1, %v7838_v2  ;;  %543 = vst.msk [vmem:[#allocation3 + $0xa8] sm:$0xff] %vm457_vm1, %v7838_v2 }
  0x5f   : > { %544 = vst.msk [vmem:[#allocation3 + $0xb0] sm:$0xff] %vm457_vm1, %v7838_v2  ;;  %545 = vst.msk [vmem:[#allocation3 + $0xb8] sm:$0xff] %vm457_vm1, %v7838_v2 }
  0x60   : > { %6881 = vmatmul.mubr.msk.f32.gmra.mxu0 %vm586_vm0, %v8030_v47  ;;  %546 = vst.msk [vmem:[#allocation3 + $0xc0] sm:$0xff] %vm457_vm1, %v7838_v2  ;;  %547 = vst.msk [vmem:[#allocation3 + $0xc8] sm:$0xff] %vm457_vm1, %v7838_v2 }
  0x61   : > { %548 = vst.msk [vmem:[#allocation3 + $0xd0] sm:$0xff] %vm457_vm1, %v7838_v2  ;;  %549 = vst.msk [vmem:[#allocation3 + $0xd8] sm:$0xff] %vm457_vm1, %v7838_v2 }
  0x62   : > { %550 = vst.msk [vmem:[#allocation3 + $0xe0] sm:$0xff] %vm457_vm1, %v7838_v2  ;;  %551 = vst.msk [vmem:[#allocation3 + $0xe8] sm:$0xff] %vm457_vm1, %v7838_v2 }
  0x63   : > { %552 = vst.msk [vmem:[#allocation3 + $0xf0] sm:$0xff] %vm457_vm1, %v7838_v2  ;;  %553 = vst.msk [vmem:[#allocation3 + $0xf8] sm:$0xff] %vm457_vm1, %v7838_v2 }
  0x64   : > { %554 = vst.msk [vmem:[#allocation3 + $0x100] sm:$0xff] %vm457_vm1, %v7838_v2  ;;  %555 = vst.msk [vmem:[#allocation3 + $0x108] sm:$0xff] %vm457_vm1, %v7838_v2 }
  0x65   : > { %556 = vst.msk [vmem:[#allocation3 + $0x110] sm:$0xff] %vm457_vm1, %v7838_v2  ;;  %557 = vst.msk [vmem:[#allocation3 + $0x118] sm:$0xff] %vm457_vm1, %v7838_v2 }
  0x66   : > { %558 = vst.msk [vmem:[#allocation3 + $0x120] sm:$0xff] %vm457_vm1, %v7838_v2  ;;  %559 = vst.msk [vmem:[#allocation3 + $0x128] sm:$0xff] %vm457_vm1, %v7838_v2 }
  0x67   : > { %560 = vst.msk [vmem:[#allocation3 + $0x130] sm:$0xff] %vm457_vm1, %v7838_v2  ;;  %561 = vst.msk [vmem:[#allocation3 + $0x138] sm:$0xff] %vm457_vm1, %v7838_v2 }
  0x68   : > { %562 = vst.msk [vmem:[#allocation3 + $0x140] sm:$0xff] %vm457_vm1, %v7838_v2  ;;  %563 = vst.msk [vmem:[#allocation3 + $0x148] sm:$0xff] %vm457_vm1, %v7838_v2 }
  0x69   : > { %564 = vst.msk [vmem:[#allocation3 + $0x150] sm:$0xff] %vm457_vm1, %v7838_v2  ;;  %565 = vst.msk [vmem:[#allocation3 + $0x158] sm:$0xff] %vm457_vm1, %v7838_v2 }
  0x6a   : > { %566 = vst.msk [vmem:[#allocation3 + $0x160] sm:$0xff] %vm457_vm1, %v7838_v2  ;;  %567 = vst.msk [vmem:[#allocation3 + $0x168] sm:$0xff] %vm457_vm1, %v7838_v2 }
  0x6b   : > { %568 = vst.msk [vmem:[#allocation3 + $0x170] sm:$0xff] %vm457_vm1, %v7838_v2  ;;  %569 = vst.msk [vmem:[#allocation3 + $0x178] sm:$0xff] %vm457_vm1, %v7838_v2 }
  0x6c   : > { %570 = vst.msk [vmem:[#allocation3 + $0x180] sm:$0xff] %vm457_vm1, %v7838_v2  ;;  %571 = vst.msk [vmem:[#allocation3 + $0x188] sm:$0xff] %vm457_vm1, %v7838_v2 }
  0x6d   : > { %572 = vst.msk [vmem:[#allocation3 + $0x190] sm:$0xff] %vm457_vm1, %v7838_v2  ;;  %573 = vst.msk [vmem:[#allocation3 + $0x198] sm:$0xff] %vm457_vm1, %v7838_v2 }
  0x6e   : > { %574 = vst.msk [vmem:[#allocation3 + $0x1a0] sm:$0xff] %vm457_vm1, %v7838_v2  ;;  %575 = vst.msk [vmem:[#allocation3 + $0x1a8] sm:$0xff] %vm457_vm1, %v7838_v2 }
  0x6f   : > { %576 = vst.msk [vmem:[#allocation3 + $0x1b0] sm:$0xff] %vm457_vm1, %v7838_v2  ;;  %577 = vst.msk [vmem:[#allocation3 + $0x1b8] sm:$0xff] %vm457_vm1, %v7838_v2 }
  0x70   : > { %578 = vst.msk [vmem:[#allocation3 + $0x1c0] sm:$0xff] %vm457_vm1, %v7838_v2  ;;  %579 = vst.msk [vmem:[#allocation3 + $0x1c8] sm:$0xff] %vm457_vm1, %v7838_v2 }
  0x71   : > { %580 = vst.msk [vmem:[#allocation3 + $0x1d0] sm:$0xff] %vm457_vm1, %v7838_v2  ;;  %581 = vst.msk [vmem:[#allocation3 + $0x1d8] sm:$0xff] %vm457_vm1, %v7838_v2 }
  0x72   : > { %582 = vst.msk [vmem:[#allocation3 + $0x1e0] sm:$0xff] %vm457_vm1, %v7838_v2  ;;  %583 = vst.msk [vmem:[#allocation3 + $0x1e8] sm:$0xff] %vm457_vm1, %v7838_v2 }
  0x73   : > { %584 = vst.msk [vmem:[#allocation3 + $0x1f0] sm:$0xff] %vm457_vm1, %v7838_v2  ;;  %585 = vst.msk [vmem:[#allocation3 + $0x1f8] sm:$0xff] %vm457_vm1, %v7838_v2 }
  0x74   : > { %587 = vst.msk [vmem:[#allocation4] sm:$0xff] %vm586_vm0, %v7838_v2  ;;  %588 = vst.msk [vmem:[#allocation4 + $0x8] sm:$0xff] %vm586_vm0, %v7838_v2 }
  0x75   : > { %589 = vst.msk [vmem:[#allocation4 + $0x10] sm:$0xff] %vm586_vm0, %v7838_v2  ;;  %590 = vst.msk [vmem:[#allocation4 + $0x18] sm:$0xff] %vm586_vm0, %v7838_v2 }
  0x76   : > { %591 = vst.msk [vmem:[#allocation4 + $0x20] sm:$0xff] %vm586_vm0, %v7838_v2  ;;  %592 = vst.msk [vmem:[#allocation4 + $0x28] sm:$0xff] %vm586_vm0, %v7838_v2 }
  0x77   : > { %593 = vst.msk [vmem:[#allocation4 + $0x30] sm:$0xff] %vm586_vm0, %v7838_v2  ;;  %594 = vst.msk [vmem:[#allocation4 + $0x38] sm:$0xff] %vm586_vm0, %v7838_v2 }
  0x78   : > { %595 = vst.msk [vmem:[#allocation4 + $0x40] sm:$0xff] %vm586_vm0, %v7838_v2  ;;  %596 = vst.msk [vmem:[#allocation4 + $0x48] sm:$0xff] %vm586_vm0, %v7838_v2 }
  0x79   : > { %597 = vst.msk [vmem:[#allocation4 + $0x50] sm:$0xff] %vm586_vm0, %v7838_v2  ;;  %598 = vst.msk [vmem:[#allocation4 + $0x58] sm:$0xff] %vm586_vm0, %v7838_v2 }
  0x7a   : > { %599 = vst.msk [vmem:[#allocation4 + $0x60] sm:$0xff] %vm586_vm0, %v7838_v2  ;;  %600 = vst.msk [vmem:[#allocation4 + $0x68] sm:$0xff] %vm586_vm0, %v7838_v2 }
  0x7b   : > { %601 = vst.msk [vmem:[#allocation4 + $0x70] sm:$0xff] %vm586_vm0, %v7838_v2  ;;  %602 = vst.msk [vmem:[#allocation4 + $0x78] sm:$0xff] %vm586_vm0, %v7838_v2 }
  0x7c   : > { %603 = vst.msk [vmem:[#allocation4 + $0x80] sm:$0xff] %vm586_vm0, %v7838_v2  ;;  %604 = vst.msk [vmem:[#allocation4 + $0x88] sm:$0xff] %vm586_vm0, %v7838_v2 }
  0x7d   : > { %605 = vst.msk [vmem:[#allocation4 + $0x90] sm:$0xff] %vm586_vm0, %v7838_v2  ;;  %606 = vst.msk [vmem:[#allocation4 + $0x98] sm:$0xff] %vm586_vm0, %v7838_v2 }
  0x7e   : > { %607 = vst.msk [vmem:[#allocation4 + $0xa0] sm:$0xff] %vm586_vm0, %v7838_v2  ;;  %608 = vst.msk [vmem:[#allocation4 + $0xa8] sm:$0xff] %vm586_vm0, %v7838_v2 }
  0x7f   : > { %609 = vst.msk [vmem:[#allocation4 + $0xb0] sm:$0xff] %vm586_vm0, %v7838_v2  ;;  %610 = vst.msk [vmem:[#allocation4 + $0xb8] sm:$0xff] %vm586_vm0, %v7838_v2 }
  0x80   : > { %611 = vst.msk [vmem:[#allocation4 + $0xc0] sm:$0xff] %vm586_vm0, %v7838_v2  ;;  %612 = vst.msk [vmem:[#allocation4 + $0xc8] sm:$0xff] %vm586_vm0, %v7838_v2 }
  0x81   : > { %613 = vst.msk [vmem:[#allocation4 + $0xd0] sm:$0xff] %vm586_vm0, %v7838_v2  ;;  %614 = vst.msk [vmem:[#allocation4 + $0xd8] sm:$0xff] %vm586_vm0, %v7838_v2 }
  0x82   : > { %615 = vst.msk [vmem:[#allocation4 + $0xe0] sm:$0xff] %vm586_vm0, %v7838_v2  ;;  %616 = vst.msk [vmem:[#allocation4 + $0xe8] sm:$0xff] %vm586_vm0, %v7838_v2 }
  0x83   : > { %617 = vst.msk [vmem:[#allocation4 + $0xf0] sm:$0xff] %vm586_vm0, %v7838_v2  ;;  %618 = vst.msk [vmem:[#allocation4 + $0xf8] sm:$0xff] %vm586_vm0, %v7838_v2 }
  0x84   : > { %619 = vst.msk [vmem:[#allocation4 + $0x100] sm:$0xff] %vm586_vm0, %v7838_v2  ;;  %620 = vst.msk [vmem:[#allocation4 + $0x108] sm:$0xff] %vm586_vm0, %v7838_v2 }
  0x85   : > { %621 = vst.msk [vmem:[#allocation4 + $0x110] sm:$0xff] %vm586_vm0, %v7838_v2  ;;  %622 = vst.msk [vmem:[#allocation4 + $0x118] sm:$0xff] %vm586_vm0, %v7838_v2 }
  0x86   : > { %623 = vst.msk [vmem:[#allocation4 + $0x120] sm:$0xff] %vm586_vm0, %v7838_v2  ;;  %624 = vst.msk [vmem:[#allocation4 + $0x128] sm:$0xff] %vm586_vm0, %v7838_v2 }
  0x87   : > { %625 = vst.msk [vmem:[#allocation4 + $0x130] sm:$0xff] %vm586_vm0, %v7838_v2  ;;  %626 = vst.msk [vmem:[#allocation4 + $0x138] sm:$0xff] %vm586_vm0, %v7838_v2 }
  0x88   : > { %627 = vst.msk [vmem:[#allocation4 + $0x140] sm:$0xff] %vm586_vm0, %v7838_v2  ;;  %628 = vst.msk [vmem:[#allocation4 + $0x148] sm:$0xff] %vm586_vm0, %v7838_v2 }
  0x89   : > { %629 = vst.msk [vmem:[#allocation4 + $0x150] sm:$0xff] %vm586_vm0, %v7838_v2  ;;  %630 = vst.msk [vmem:[#allocation4 + $0x158] sm:$0xff] %vm586_vm0, %v7838_v2 }
  0x8a   : > { %631 = vst.msk [vmem:[#allocation4 + $0x160] sm:$0xff] %vm586_vm0, %v7838_v2  ;;  %632 = vst.msk [vmem:[#allocation4 + $0x168] sm:$0xff] %vm586_vm0, %v7838_v2 }
  0x8b   : > { %633 = vst.msk [vmem:[#allocation4 + $0x170] sm:$0xff] %vm586_vm0, %v7838_v2  ;;  %634 = vst.msk [vmem:[#allocation4 + $0x178] sm:$0xff] %vm586_vm0, %v7838_v2 }
  0x8c   : > { %635 = vst.msk [vmem:[#allocation4 + $0x180] sm:$0xff] %vm586_vm0, %v7838_v2  ;;  %636 = vst.msk [vmem:[#allocation4 + $0x188] sm:$0xff] %vm586_vm0, %v7838_v2 }
  0x8d   : > { %637 = vst.msk [vmem:[#allocation4 + $0x190] sm:$0xff] %vm586_vm0, %v7838_v2  ;;  %638 = vst.msk [vmem:[#allocation4 + $0x198] sm:$0xff] %vm586_vm0, %v7838_v2 }
  0x8e   : > { %639 = vst.msk [vmem:[#allocation4 + $0x1a0] sm:$0xff] %vm586_vm0, %v7838_v2  ;;  %640 = vst.msk [vmem:[#allocation4 + $0x1a8] sm:$0xff] %vm586_vm0, %v7838_v2 }
  0x8f   : > { %641 = vst.msk [vmem:[#allocation4 + $0x1b0] sm:$0xff] %vm586_vm0, %v7838_v2  ;;  %642 = vst.msk [vmem:[#allocation4 + $0x1b8] sm:$0xff] %vm586_vm0, %v7838_v2 }
  0x90   : > { %643 = vst.msk [vmem:[#allocation4 + $0x1c0] sm:$0xff] %vm586_vm0, %v7838_v2  ;;  %644 = vst.msk [vmem:[#allocation4 + $0x1c8] sm:$0xff] %vm586_vm0, %v7838_v2 }
  0x91   : > { %645 = vst.msk [vmem:[#allocation4 + $0x1d0] sm:$0xff] %vm586_vm0, %v7838_v2  ;;  %646 = vst.msk [vmem:[#allocation4 + $0x1d8] sm:$0xff] %vm586_vm0, %v7838_v2 }
  0x92   : > { %647 = vst.msk [vmem:[#allocation4 + $0x1e0] sm:$0xff] %vm586_vm0, %v7838_v2  ;;  %648 = vst.msk [vmem:[#allocation4 + $0x1e8] sm:$0xff] %vm586_vm0, %v7838_v2 }
  0x93   : > { %649 = vst.msk [vmem:[#allocation4 + $0x1f0] sm:$0xff] %vm586_vm0, %v7838_v2  ;;  %650 = vst.msk [vmem:[#allocation4 + $0x1f8] sm:$0xff] %vm586_vm0, %v7838_v2 }
  0x94   : > { %11467 = vst [vmem:[#allocation8_spill] sm:$0xff] %v8489_v12  ;;  %11468 = vst [vmem:[#allocation9_spill] sm:$0xff] %v8491_v13 }
  0x95   : > { %11471 = vst [vmem:[#allocation12_spill] sm:$0xff] %v8516_v22  ;;  %11474 = vst [vmem:[#allocation15_spill] sm:$0xff] %v8534_v42 }
  0x96   : > { %11475 = vst [vmem:[#allocation16_spill] sm:$0xff] %v8536_v43 }
 0x114   : > { %v8164_v49 = vpop.f32.mrf.mxu0 }
 0x115   : > { %v849_v54 = vsel %vm845_vm2, %v8164_v49, -inf }
 0x116   : > { %v8166_v50 = vpop.f32.mrf.mxu0 }
 0x117   : > { %v846_v51 = vsel %vm845_vm2, %v8166_v50, -inf }
 0x118   : > { %847 = vmax.xlane.f32.xlu0 %v846_v51  ;;  %v8170_v52 = vpop.f32.mrf.mxu0 }
 0x119   : > { %v855_v57 = vsel %vm845_vm2, %v8170_v52, -inf }
 0x11a   : > { %v8172_v53 = vpop.f32.mrf.mxu0 }
 0x11b   : > { %v852_v55 = vsel %vm845_vm2, %v8172_v53, -inf }
 0x11c   : > { %850 = vmax.xlane.f32.xlu0 %v849_v54  ;;  %853 = vmax.xlane.f32.xlu1 %v852_v55  ;;  %v8178_v56 = vpop.f32.mrf.mxu0 }
 0x11d   : > { %v861_v61 = vsel %vm845_vm2, %v8178_v56, -inf }
 0x11e   : > { %v8182_v58 = vpop.f32.mrf.mxu0 }
 0x11f   : > { %v858_v59 = vsel %vm845_vm2, %v8182_v58, -inf }
 0x120   : > { %856 = vmax.xlane.f32.xlu1 %v855_v57  ;;  %v8186_v60 = vpop.f32.mrf.mxu0  ;;  %859 = vmax.xlane.f32.xlu0 %v858_v59  ;;  %v8554_v59 = vld [vmem:[#allocation2 + $0x38] sm:$0xff] }
 0x121   : > { %v867_v1 = vsel %vm845_vm2, %v8186_v60, -inf  ;;  %11478 = vst [vmem:[#allocation19_spill] sm:$0xff] %v8554_v59 }
 0x122   : > { %v8190_v62 = vpop.f32.mrf.mxu0 }
 0x123   : > { %v864_v63 = vsel %vm845_vm2, %v8190_v62, -inf }
 0x124   : > { %862 = vmax.xlane.f32.xlu1 %v861_v61  ;;  %865 = vmax.xlane.f32.xlu0 %v864_v63 }
 0x128   : > { %868 = vmax.xlane.f32.xlu1 %v867_v1 }
 0x1a1   : > { %v848_v9 = vpop.xlane.xlu0 %847 }
 0x1a2   : > { %v8486_v11 = vmax.f32 %v8475_v7, %v848_v9 }
 0x1a4   : > { %1224 = vst.msk [vmem:[#allocation2] sm:$0xff] %vm457_vm1, %v8486_v11  ;;  %904 = vperm.xlu0 %7354, %v8486_v11  }
 0x1a5   : > { %v851_v16 = vpop.xlane.xlu0 %850  ;;  %v854_v17 = vpop.xlane.xlu1 %853 }
 0x1a6   : > { %v8508_v19 = vmax.f32 %v8489_v12, %v851_v16  ;;  %v8511_v20 = vmax.f32 %v8491_v13, %v854_v17 }
 0x1a8   : > { %11469 = vst [vmem:[#allocation10_spill] sm:$0xff] %v8508_v19  ;;  %11470 = vst [vmem:[#allocation11_spill] sm:$0xff] %v8511_v20  ;;  %909 = vperm.xlu1 %7355, %v8508_v19  }
 0x1a9   : > { %1225 = vst.msk [vmem:[#allocation2 + $0x8] sm:$0xff] %vm457_vm1, %v8508_v19  ;;  %1226 = vst.msk [vmem:[#allocation2 + $0x10] sm:$0xff] %vm457_vm1, %v8511_v20  ;;  %v857_v34 = vpop.xlane.xlu1 %856  ;;  %v860_v35 = vpop.xlane.xlu0 %859 }
 0x1aa   : > { %v8529_v38 = vmax.f32 %v8514_v21, %v857_v34  ;;  %v8532_v39 = vmax.f32 %v8516_v22, %v860_v35 }
 0x1ac   : > { %11472 = vst [vmem:[#allocation13_spill] sm:$0xff] %v8529_v38  ;;  %11473 = vst [vmem:[#allocation14_spill] sm:$0xff] %v8532_v39  ;;  %1262 = vrot.lane.b32.xlu1 %v7938_v24, %s7839_s27 }
 0x1ad   : > { %1227 = vst.msk [vmem:[#allocation2 + $0x18] sm:$0xff] %vm457_vm1, %v8529_v38  ;;  %1228 = vst.msk [vmem:[#allocation2 + $0x20] sm:$0xff] %vm457_vm1, %v8532_v39  ;;  %v863_v51 = vpop.xlane.xlu1 %862  ;;  %v866_v54 = vpop.xlane.xlu0 %865 }
 0x1ae   : > { %v8549_v55 = vmax.f32 %v8534_v42, %v863_v51  ;;  %v8552_v57 = vmax.f32 %v8536_v43, %v866_v54 }
 0x1b0   : > { %11476 = vst [vmem:[#allocation17_spill] sm:$0xff] %v8549_v55  ;;  %11477 = vst [vmem:[#allocation18_spill] sm:$0xff] %v8552_v57  ;;  %1260 = vrot.lane.b32.xlu1 %v7941_v25, %s7839_s27 }
 0x1b1   : > { %1229 = vst.msk [vmem:[#allocation2 + $0x28] sm:$0xff] %vm457_vm1, %v8549_v55  ;;  %1230 = vst.msk [vmem:[#allocation2 + $0x30] sm:$0xff] %vm457_vm1, %v8552_v57  ;;  %v869_v63 = vpop.xlane.xlu1 %868 }
 0x1b2   : > { %v8567_v0 = vmax.f32 %v8554_v59, %v869_v63  ;;  %v9286_v59 = vld [vmem:[%s8453_s26 + $0x18] sm:$0xff] }
 0x1b4   : > { %11479 = vst [vmem:[#allocation20_spill] sm:$0xff] %v8567_v0  ;;  %1231 = vst.msk [vmem:[#allocation2 + $0x38] sm:$0xff] %vm457_vm1, %v8567_v0  ;;  %919 = vperm.xlu1 %7355, %v8529_v38   ;;  %939 = vperm.xlu0 %7354, %v8567_v0   ;;  %v9021_v0 = vld [vmem:[#allocation2 + $0xa0] sm:$0xff] }
 0x1b5   : > { %11521 = vst [vmem:[#allocation62_spill] sm:$0xff] %v9021_v0 }
 0x1b8   : > { %914 = vperm.xlu1 %7355, %v8511_v20   ;;  %1256 = vrot.lane.b32.xlu0 %v7965_v29, %s7839_s27 }
 0x1bc   : > { %929 = vperm.xlu1 %7355, %v8549_v55   ;;  %1252 = vrot.lane.b32.xlu0 %v7979_v31, %s7839_s27  ;;  %v9321_v55 = vld [vmem:[%s8453_s26 + $0x8] sm:$0xff] }
 0x1c0   : > { %924 = vperm.xlu1 %7355, %v8532_v39   ;;  %1248 = vrot.lane.b32.xlu0 %v7993_v33, %s7839_s27 }
 0x1c4   : > { %934 = vperm.xlu1 %7355, %v8552_v57   ;;  %1234 = vrot.lane.b32.xlu0 %v8001_v36, %s7839_s27 }
 0x1c8   : > { %1258 = vrot.lane.b32.xlu1 %v7956_v28, %s7839_s27  ;;  %1238 = vrot.lane.b32.xlu0 %v8011_v40, %s7839_s27 }
 0x1cc   : > { %1254 = vrot.lane.b32.xlu1 %v7972_v30, %s7839_s27  ;;  %1242 = vrot.lane.b32.xlu0 %v8021_v44, %s7839_s27 }
 0x1d0   : > { %1250 = vrot.lane.b32.xlu1 %v7986_v32, %s7839_s27  ;;  %1246 = vrot.lane.b32.xlu0 %v8030_v47, %s7839_s27 }
 0x1d4   : > { %1232 = vrot.lane.b32.xlu1 %v7953_v27, %s7839_s27 }
 0x1d8   : > { %1236 = vrot.lane.b32.xlu1 %v8005_v37, %s7839_s27 }
 0x1dc   : > { %1240 = vrot.lane.b32.xlu1 %v8015_v41, %s7839_s27 }
 0x1e0   : > { %1244 = vrot.lane.b32.xlu1 %v8025_v45, %s7839_s27 }
 0x21f   : > { %v905_v25 = vpop.permute.xlu0 %904 }
 0x220   : > { %v942_v28 = vsub.f32 %v8166_v50, %v905_v25 }
 0x222   : > { %v950_v29 = vmul.f32 1.442695, %v942_v28 }
 0x223   : > { %v910_v30 = vpop.permute.xlu1 %909 }
 0x224   : > { %7356 = vpow2.f32 %v950_v29  ;;  %v943_v31 = vsub.f32 %v8164_v49, %v910_v30 }
 0x226   : > { %v952_v32 = vmul.f32 1.442695, %v943_v31 }
 0x227   : > { %v1263_v33 = vpop.permute.xlu1 %1262 }
 0x228   : > { %7358 = vpow2.f32 %v952_v32  ;;  %6911 = vmatprep.subr.msk.mxu1 %vm586_vm0, %v1263_v33 }
 0x22b   : > { %v1261_v2 = vpop.permute.xlu1 %1260 }
 0x22f   : > { %v920_v9 = vpop.permute.xlu1 %919  ;;  %v940_v63 = vpop.permute.xlu0 %939 }
 0x230   : > { %v945_v17 = vsub.f32 %v8170_v52, %v920_v9  ;;  %v949_v28 = vsub.f32 %v8186_v60, %v940_v63 }
 0x231   : > { %v8610_v16 = vpop.eup %7356 }
 0x232   : > { %6899 = vmatprep.mubr.msk.f32.mxu1 %vm845_vm2, %v8610_v16  ;;  %v956_v49 = vmul.f32 1.442695, %v945_v17 }
 0x233   : > { %v915_v50 = vpop.permute.xlu1 %914 }
 0x234   : > { %v944_v34 = vsub.f32 %v8172_v53, %v915_v50  ;;  %v1257_v50 = vpop.permute.xlu0 %1256 }
 0x235   : > { %v8616_v35 = vpop.eup %7358 }
 0x236   : > { %v954_v51 = vmul.f32 1.442695, %v944_v34  ;;  %6900 = vmatmul.mubr.msk.f32.vlgmr.msra.gmra.mxu1 %vm845_vm2, %v8616_v35 }
 0x237   : > { %6912 = vmatpush3.xpose.msk.msra.mxu1 %vm586_vm0, %v1263_v33  ;;  %v930_v54 = vpop.permute.xlu1 %929  ;;  %v964_v33 = vmul.f32 1.442695, %v949_v28 }
 0x238   : > { %7360 = vpow2.f32 %v954_v51  ;;  %6913 = vmatprep.subr.msk.mxu1 %vm586_vm0, %v1261_v2  ;;  %v947_v52 = vsub.f32 %v8178_v56, %v930_v54 }
 0x239   : > { %7362 = vpow2.f32 %v956_v49 }
 0x23a   : > { %v960_v29 = vmul.f32 1.442695, %v947_v52 }
 0x23b   : > { %6914 = vmatpush3.xpose.msk.msra.mxu1 %vm586_vm0, %v1261_v2  ;;  %v925_v53 = vpop.permute.xlu1 %924 }
 0x23c   : > { %v946_v25 = vsub.f32 %v8182_v58, %v925_v53 }
 0x23e   : > { %v958_v30 = vmul.f32 1.442695, %v946_v25 }
 0x23f   : > { %v935_v31 = vpop.permute.xlu1 %934 }
 0x240   : > { %7364 = vpow2.f32 %v958_v30  ;;  %v948_v32 = vsub.f32 %v8190_v62, %v935_v31  ;;  %v1253_v62 = vpop.permute.xlu0 %1252 }
 0x241   : > { %7366 = vpow2.f32 %v960_v29 }
 0x242   : > { %v962_v9 = vmul.f32 1.442695, %v948_v32 }
 0x243   : > { %v1259_v17 = vpop.permute.xlu1 %1258 }
 0x244   : > { %7368 = vpow2.f32 %v962_v9  ;;  %6915 = vmatprep.subr.msk.mxu1 %vm586_vm0, %v1259_v17  ;;  %v1249_v63 = vpop.permute.xlu0 %1248 }
 0x245   : > { %v8628_v56 = vpop.eup %7360  ;;  %7370 = vpow2.f32 %v964_v33  ;;  %6916 = vmatpush3.xpose.msk.msra.mxu1 %vm586_vm0, %v1259_v17 }
 0x246   : > { %v8631_v58 = vpop.eup %7362  ;;  %6902 = vmatprep.mubr.msk.f32.mxu1 %vm845_vm2, %v8628_v56  ;;  %6917 = vmatprep.subr.msk.mxu1 %vm586_vm0, %v1257_v50 }
 0x247   : > { %6903 = vmatmul.mubr.msk.f32.gmra.mxu1 %vm845_vm2, %v8631_v58  ;;  %v1255_v60 = vpop.permute.xlu1 %1254 }
 0x248   : > { %v1235_v53 = vpop.permute.xlu0 %1234 }
 0x249   : > { %6918 = vmatpush3.xpose.msk.msra.mxu1 %vm586_vm0, %v1257_v50 }
 0x24a   : > { %6919 = vmatprep.subr.msk.mxu1 %vm586_vm0, %v1255_v60 }
 0x24b   : > { %v1251_v34 = vpop.permute.xlu1 %1250 }
 0x24c   : > { %v1239_v28 = vpop.permute.xlu0 %1238 }
 0x24d   : > { %v8640_v2 = vpop.eup %7364  ;;  %6920 = vmatpush3.xpose.msk.msra.mxu1 %vm586_vm0, %v1255_v60 }
 0x24e   : > { %v8643_v49 = vpop.eup %7366  ;;  %6905 = vmatprep.mubr.msk.f32.mxu1 %vm845_vm2, %v8640_v2  ;;  %6921 = vmatprep.subr.msk.mxu1 %vm586_vm0, %v1253_v62 }
 0x24f   : > { %6906 = vmatmul.mubr.msk.f32.gmra.mxu1 %vm845_vm2, %v8643_v49  ;;  %v1233_v54 = vpop.permute.xlu1 %1232 }
 0x250   : > { %v1243_v30 = vpop.permute.xlu0 %1242 }
 0x251   : > { %v8650_v51 = vpop.eup %7368  ;;  %6922 = vmatpush3.xpose.msk.msra.mxu1 %vm586_vm0, %v1253_v62 }
 0x252   : > { %v8653_v52 = vpop.eup %7370  ;;  %6908 = vmatprep.mubr.msk.f32.mxu1 %vm845_vm2, %v8650_v51  ;;  %6923 = vmatprep.subr.msk.mxu1 %vm586_vm0, %v1251_v34 }
 0x253   : > { %6909 = vmatmul.mubr.msk.f32.gmra.mxu1 %vm845_vm2, %v8653_v52  ;;  %v1237_v25 = vpop.permute.xlu1 %1236 }
 0x254   : > { %6927 = vmatprep.mubr.msk.f32.mxu1 %vm586_vm0, %v1233_v54  ;;  %v1247_v32 = vpop.permute.xlu0 %1246 }
 0x255   : > { %6924 = vmatpush3.xpose.msk.msra.mxu1 %vm586_vm0, %v1251_v34 }
 0x256   : > { %6925 = vmatprep.subr.msk.mxu1 %vm586_vm0, %v1249_v63 }
 0x257   : > { %v1241_v29 = vpop.permute.xlu1 %1240 }
 0x259   : > { %6926 = vmatpush3.xpose.msk.msra.mxu1 %vm586_vm0, %v1249_v63 }
 0x25b   : > { %v1245_v31 = vpop.permute.xlu1 %1244 }
 0x25c   : > { %6928 = vmatmul.mubr.msk.f32.vlgmr.msra.gmra.mxu1 %vm586_vm0, %v1235_v53 }
 0x25d   : > { %6930 = vmatprep.mubr.msk.f32.mxu1 %vm586_vm0, %v1237_v25 }
 0x260   : > { %6931 = vmatmul.mubr.msk.f32.gmra.mxu1 %vm586_vm0, %v1239_v28 }
 0x261   : > { %6933 = vmatprep.mubr.msk.f32.mxu1 %vm586_vm0, %v1241_v29 }
 0x264   : > { %6934 = vmatmul.mubr.msk.f32.gmra.mxu1 %vm586_vm0, %v1243_v30 }
 0x265   : > { %6936 = vmatprep.mubr.msk.f32.mxu1 %vm586_vm0, %v1245_v31 }
 0x268   : > { %6937 = vmatmul.mubr.msk.f32.gmra.mxu1 %vm586_vm0, %v1247_v32 }
 0x2f6   : > { %v8671_v33 = vpop.f32.mrf.mxu1 }
 0x2f7   : > { %11480 = vst [vmem:[#allocation21_spill] sm:$0xff] %v8671_v33  ;;  %v8755_v33 = vld [vmem:[#allocation2 + $0x68] sm:$0xff] }
 0x2f8   : > { %v8673_v9 = vpop.f32.mrf.mxu1  ;;  %11496 = vst [vmem:[#allocation37_spill] sm:$0xff] %v8755_v33 }
 0x2f9   : > { %11481 = vst [vmem:[#allocation22_spill] sm:$0xff] %v8673_v9 }
 0x307   : > { %v8675_v17 = vpop.f32.mrf.mxu1 }
 0x308   : > { %11482 = vst [vmem:[#allocation23_spill] sm:$0xff] %v8675_v17 }
 0x309   : > { %v8677_v50 = vpop.f32.mrf.mxu1 }
 0x30a   : > { %11483 = vst [vmem:[#allocation24_spill] sm:$0xff] %v8677_v50 }
 0x30f   : > { %v8679_v60 = vpop.f32.mrf.mxu1 }
 0x310   : > { %11484 = vst [vmem:[#allocation25_spill] sm:$0xff] %v8679_v60 }
 0x311   : > { %v8681_v62 = vpop.f32.mrf.mxu1 }
 0x312   : > { %11485 = vst [vmem:[#allocation26_spill] sm:$0xff] %v8681_v62 }
 0x313   : > { %v8683_v34 = vpop.f32.mrf.mxu1 }
 0x314   : > { %11486 = vst [vmem:[#allocation27_spill] sm:$0xff] %v8683_v34  ;;  %v8757_v34 = vld [vmem:[#allocation2 + $0x60] sm:$0xff] }
 0x315   : > { %v8685_v54 = vpop.f32.mrf.mxu1  ;;  %11497 = vst [vmem:[#allocation38_spill] sm:$0xff] %v8757_v34 }
 0x316   : > { %11487 = vst [vmem:[#allocation28_spill] sm:$0xff] %v8685_v54  ;;  %v8740_v54 = vld [vmem:[#allocation2 + $0x50] sm:$0xff] }
 0x317   : > { %11493 = vst [vmem:[#allocation34_spill] sm:$0xff] %v8740_v54 }
 0x31c   : > { %v8687_v63 = vpop.f32.mrf.mxu1 }
 0x31d   : > { %v1413_v53 = vsel %vm845_vm2, %v8687_v63, -inf }
 0x31e   : > { %1414 = vmax.xlane.f32.xlu0 %v1413_v53  ;;  %v8691_v25 = vpop.f32.mrf.mxu1 }
 0x31f   : > { %v1410_v28 = vsel %vm845_vm2, %v8691_v25, -inf }
 0x320   : > { %1411 = vmax.xlane.f32.xlu1 %v1410_v28  ;;  %v8695_v29 = vpop.f32.mrf.mxu1 }
 0x321   : > { %v1419_v30 = vsel %vm845_vm2, %v8695_v29, -inf }
 0x322   : > { %v8699_v31 = vpop.f32.mrf.mxu1 }
 0x323   : > { %v1416_v32 = vsel %vm845_vm2, %v8699_v31, -inf }
 0x324   : > { %1420 = vmax.xlane.f32.xlu1 %v1419_v30  ;;  %1417 = vmax.xlane.f32.xlu0 %v1416_v32  ;;  %v8703_v24 = vpop.f32.mrf.mxu1  ;;  %v8723_v32 = vld [vmem:[#allocation2 + $0x48] sm:$0xff] }
 0x325   : > { %v1425_v53 = vsel %vm845_vm2, %v8703_v24, -inf  ;;  %11488 = vst [vmem:[#allocation29_spill] sm:$0xff] %v8723_v32 }
 0x326   : > { %v8707_v48 = vpop.f32.mrf.mxu1 }
 0x327   : > { %v1422_v28 = vsel %vm845_vm2, %v8707_v48, -inf }
 0x328   : > { %1426 = vmax.xlane.f32.xlu1 %v1425_v53  ;;  %1423 = vmax.xlane.f32.xlu0 %v1422_v28  ;;  %v8711_v26 = vpop.f32.mrf.mxu1  ;;  %v8725_v28 = vld [vmem:[#allocation2 + $0x40] sm:$0xff] }
 0x329   : > { %v1431_v23 = vsel %vm845_vm2, %v8711_v26, -inf  ;;  %11489 = vst [vmem:[#allocation30_spill] sm:$0xff] %v8725_v28 }
 0x32a   : > { %v8715_v1 = vpop.f32.mrf.mxu1 }
 0x32b   : > { %v1428_v30 = vsel %vm845_vm2, %v8715_v1, -inf }
 0x32c   : > { %1432 = vmax.xlane.f32.xlu1 %v1431_v23  ;;  %1429 = vmax.xlane.f32.xlu0 %v1428_v30  ;;  %v8738_v30 = vld [vmem:[#allocation2 + $0x58] sm:$0xff] }
 0x32d   : > { %11492 = vst [vmem:[#allocation33_spill] sm:$0xff] %v8738_v30 }
 0x33d   : > { %1666 = vrot.lane.b32.xlu1 %v8456_v3, %s7839_s27 }
 0x342   : > { %1664 = vrot.lane.b32.xlu0 %v8459_v4, %s7839_s27 }
 0x3a7   : > { %v1415_v53 = vpop.xlane.xlu0 %1414 }
 0x3a8   : > { %v8728_v61 = vmax.f32 %v8723_v32, %v1415_v53  ;;  %v8777_v53 = vld [vmem:[#allocation2 + $0x78] sm:$0xff] }
 0x3a9   : > { %v1412_v46 = vpop.xlane.xlu1 %1411  ;;  %11500 = vst [vmem:[#allocation41_spill] sm:$0xff] %v8777_v53 }
 0x3aa   : > { %11490 = vst [vmem:[#allocation31_spill] sm:$0xff] %v8728_v61  ;;  %1822 = vst.msk [vmem:[#allocation2 + $0x48] sm:$0xff] %vm457_vm1, %v8728_v61  ;;  %v8735_v23 = vmax.f32 %v8725_v28, %v1412_v46  ;;  %1473 = vperm.xlu1 %7355, %v8728_v61   ;;  %v8779_v61 = vld [vmem:[#allocation2 + $0x70] sm:$0xff] }
 0x3ab   : > { %11501 = vst [vmem:[#allocation42_spill] sm:$0xff] %v8779_v61 }
 0x3ac   : > { %11491 = vst [vmem:[#allocation32_spill] sm:$0xff] %v8735_v23  ;;  %1821 = vst.msk [vmem:[#allocation2 + $0x40] sm:$0xff] %vm457_vm1, %v8735_v23  ;;  %1468 = vperm.xlu0 %7354, %v8735_v23  }
 0x3ad   : > { %v1421_v15 = vpop.xlane.xlu1 %1420  ;;  %v1418_v62 = vpop.xlane.xlu0 %1417 }
 0x3ae   : > { %1662 = vrot.lane.b32.xlu1 %v8464_v5, %s7839_s27  ;;  %v8750_v46 = vmax.f32 %v8738_v30, %v1421_v15  ;;  %v8753_v50 = vmax.f32 %v8740_v54, %v1418_v62  ;;  %v8836_v15 = vld [vmem:[%s7935_s25 + $0x18] sm:$0xff] }
 0x3b0   : > { %11494 = vst [vmem:[#allocation35_spill] sm:$0xff] %v8750_v46  ;;  %11495 = vst [vmem:[#allocation36_spill] sm:$0xff] %v8753_v50  ;;  %1660 = vrot.lane.b32.xlu0 %v8469_v6, %s7839_s27 }
 0x3b1   : > { %1824 = vst.msk [vmem:[#allocation2 + $0x58] sm:$0xff] %vm457_vm1, %v8750_v46  ;;  %1823 = vst.msk [vmem:[#allocation2 + $0x50] sm:$0xff] %vm457_vm1, %v8753_v50  ;;  %v1427_v62 = vpop.xlane.xlu1 %1426  ;;  %v1424_v60 = vpop.xlane.xlu0 %1423 }
 0x3b2   : > { %1658 = vrot.lane.b32.xlu1 %v8478_v8, %s7839_s27  ;;  %v8772_v17 = vmax.f32 %v8755_v33, %v1427_v62  ;;  %v8775_v9 = vmax.f32 %v8757_v34, %v1424_v60  ;;  %v8831_v62 = vld [vmem:[%s7935_s25 + $0x20] sm:$0xff] }
 0x3b4   : > { %11498 = vst [vmem:[#allocation39_spill] sm:$0xff] %v8772_v17  ;;  %11499 = vst [vmem:[#allocation40_spill] sm:$0xff] %v8775_v9  ;;  %1656 = vrot.lane.b32.xlu0 %v8483_v10, %s7839_s27 }
 0x3b5   : > { %1826 = vst.msk [vmem:[#allocation2 + $0x68] sm:$0xff] %vm457_vm1, %v8772_v17  ;;  %1825 = vst.msk [vmem:[#allocation2 + $0x60] sm:$0xff] %vm457_vm1, %v8775_v9  ;;  %v1433_v60 = vpop.xlane.xlu1 %1432  ;;  %v1430_v54 = vpop.xlane.xlu0 %1429 }
 0x3b6   : > { %1483 = vperm.xlu1 %7355, %v8750_v46   ;;  %v8793_v32 = vmax.f32 %v8777_v53, %v1433_v60  ;;  %v8796_v57 = vmax.f32 %v8779_v61, %v1430_v54  ;;  %v8813_v54 = vld [vmem:[%s7935_s25 + $0x38] sm:$0xff]  ;;  %v8841_v53 = vld [vmem:[%s7935_s25 + $0x10] sm:$0xff] }
 0x3b8   : > { %11502 = vst [vmem:[#allocation43_spill] sm:$0xff] %v8793_v32  ;;  %11503 = vst [vmem:[#allocation44_spill] sm:$0xff] %v8796_v57  ;;  %1654 = vrot.lane.b32.xlu0 %v8495_v14, %s7839_s27 }
 0x3b9   : > { %1828 = vst.msk [vmem:[#allocation2 + $0x78] sm:$0xff] %vm457_vm1, %v8793_v32  ;;  %1827 = vst.msk [vmem:[#allocation2 + $0x70] sm:$0xff] %vm457_vm1, %v8796_v57  ;;  %v1667_v60 = vpop.permute.xlu1 %1666  ;;  %v1665_v34 = vpop.permute.xlu0 %1664 }
 0x3ba   : > { %1478 = vperm.xlu1 %7355, %v8753_v50   ;;  %6939 = vmatprep.subr.mxu0 %v1667_v60 }
 0x3bb   : > { %6940 = vmatpush3.msra.mxu0 %v1667_v60  ;;  %v8820_v60 = vld [vmem:[%s7935_s25 + $0x30] sm:$0xff] }
 0x3bc   : > { %1652 = vrot.lane.b32.xlu0 %v8505_v18, %s7839_s27  ;;  %6941 = vmatprep.subr.mxu0 %v1665_v34 }
 0x3bd   : > { %6942 = vmatpush3.msra.mxu0 %v1665_v34  ;;  %v8826_v34 = vld [vmem:[%s7935_s25 + $0x28] sm:$0xff] }
 0x3be   : > { %1493 = vperm.xlu1 %7355, %v8772_v17  }
 0x3c0   : > { %1859 = vrot.lane.b32.xlu0 %v8813_v54, %s7840_s28 }
 0x3c2   : > { %1488 = vperm.xlu1 %7355, %v8775_v9  }
 0x3c4   : > { %1498 = vperm.xlu0 %7354, %v8796_v57   ;;  %v8851_v57 = vld [vmem:[%s7935_s25] sm:$0xff] }
 0x3c6   : > { %1857 = vrot.lane.b32.xlu1 %v8820_v60, %s7840_s28 }
 0x3c8   : > { %1503 = vperm.xlu0 %7354, %v8793_v32   ;;  %v8846_v32 = vld [vmem:[%s7935_s25 + $0x8] sm:$0xff] }
 0x3ca   : > { %1855 = vrot.lane.b32.xlu1 %v8826_v34, %s7840_s28 }
 0x3cc   : > { %1853 = vrot.lane.b32.xlu0 %v8831_v62, %s7840_s28 }
 0x3ce   : > { %1851 = vrot.lane.b32.xlu1 %v8836_v15, %s7840_s28 }
 0x3d0   : > { %1849 = vrot.lane.b32.xlu0 %v8841_v53, %s7840_s28 }
 0x3d2   : > { %1847 = vrot.lane.b32.xlu1 %v8846_v32, %s7840_s28 }
 0x3d4   : > { %1845 = vrot.lane.b32.xlu0 %v8851_v57, %s7840_s28 }
 0x3d6   : > { %1829 = vrot.lane.b32.xlu1 %v7953_v27, %s7840_s28 }
 0x3d8   : > { %1831 = vrot.lane.b32.xlu0 %v8001_v36, %s7840_s28 }
 0x3da   : > { %1833 = vrot.lane.b32.xlu1 %v8005_v37, %s7840_s28 }
 0x3dc   : > { %1835 = vrot.lane.b32.xlu0 %v8011_v40, %s7840_s28 }
 0x3de   : > { %1837 = vrot.lane.b32.xlu1 %v8015_v41, %s7840_s28 }
 0x3e0   : > { %1839 = vrot.lane.b32.xlu0 %v8021_v44, %s7840_s28 }
 0x3e2   : > { %1841 = vrot.lane.b32.xlu1 %v8025_v45, %s7840_s28 }
 0x3e4   : > { %1843 = vrot.lane.b32.xlu0 %v8030_v47, %s7840_s28 }
 0x425   : > { %v1474_v61 = vpop.permute.xlu1 %1473 }
 0x426   : > { %v1507_v9 = vsub.f32 %v8687_v63, %v1474_v61 }
 0x427   : > { %v1469_v50 = vpop.permute.xlu0 %1468 }
 0x428   : > { %v1506_v43 = vsub.f32 %v8691_v25, %v1469_v50  ;;  %v1516_v39 = vmul.f32 1.442695, %v1507_v9 }
 0x429   : > { %v1663_v22 = vpop.permute.xlu1 %1662 }
 0x42a   : > { %v1514_v20 = vmul.f32 1.442695, %v1506_v43  ;;  %6943 = vmatprep.subr.mxu0 %v1663_v22 }
 0x42b   : > { %6944 = vmatpush3.msra.mxu0 %v1663_v22  ;;  %v1661_v13 = vpop.permute.xlu0 %1660 }
 0x42c   : > { %7372 = vpow2.f32 %v1514_v20  ;;  %6945 = vmatprep.subr.mxu0 %v1661_v13 }
 0x42d   : > { %7374 = vpow2.f32 %v1516_v39  ;;  %v1659_v19 = vpop.permute.xlu1 %1658  ;;  %6946 = vmatpush3.msra.mxu0 %v1661_v13 }
 0x42e   : > { %6947 = vmatprep.subr.mxu0 %v1659_v19 }
 0x42f   : > { %6948 = vmatpush3.msra.mxu0 %v1659_v19  ;;  %v1657_v12 = vpop.permute.xlu0 %1656 }
 0x430   : > { %6949 = vmatprep.subr.mxu0 %v1657_v12 }
 0x431   : > { %v1484_v17 = vpop.permute.xlu1 %1483  ;;  %6950 = vmatpush3.msra.mxu0 %v1657_v12 }
 0x432   : > { %v1509_v61 = vsub.f32 %v8695_v29, %v1484_v17 }
 0x433   : > { %v1655_v50 = vpop.permute.xlu0 %1654 }
 0x434   : > { %6951 = vmatprep.subr.mxu0 %v1655_v50  ;;  %v1520_v43 = vmul.f32 1.442695, %v1509_v61 }
 0x435   : > { %v1479_v9 = vpop.permute.xlu1 %1478  ;;  %6952 = vmatpush3.msra.mxu0 %v1655_v50 }
 0x436   : > { %v1508_v22 = vsub.f32 %v8699_v31, %v1479_v9 }
 0x437   : > { %v1653_v20 = vpop.permute.xlu0 %1652 }
 0x438   : > { %v1518_v63 = vmul.f32 1.442695, %v1508_v22  ;;  %6953 = vmatprep.subr.mxu0 %v1653_v20 }
 0x439   : > { %v8875_v39 = vpop.eup %7372  ;;  %v1494_v13 = vpop.permute.xlu1 %1493  ;;  %6954 = vmatpush3.msra.mxu0 %v1653_v20 }
 0x43a   : > { %v8877_v19 = vpop.eup %7374  ;;  %7376 = vpow2.f32 %v1518_v63  ;;  %6955 = vmatprep.mubr.msk.f32.mxu0 %vm845_vm2, %v8875_v39  ;;  %v1511_v12 = vsub.f32 %v8703_v24, %v1494_v13 }
 0x43b   : > { %7378 = vpow2.f32 %v1520_v43  ;;  %6956 = vmatmul.mubr.msk.f32.vlgmr.msra.gmra.mxu0 %vm845_vm2, %v8877_v19  ;;  %v1860_v17 = vpop.permute.xlu0 %1859 }
 0x43c   : > { %6967 = vmatprep.subr.msk.mxu0 %vm586_vm0, %v1860_v17  ;;  %v1524_v31 = vmul.f32 1.442695, %v1511_v12 }
 0x43d   : > { %v1489_v25 = vpop.permute.xlu1 %1488  ;;  %6968 = vmatpush3.xpose.msk.msra.mxu0 %vm586_vm0, %v1860_v17 }
 0x43e   : > { %v1510_v29 = vsub.f32 %v8707_v48, %v1489_v25 }
 0x43f   : > { %v1499_v61 = vpop.permute.xlu0 %1498 }
 0x440   : > { %v1522_v50 = vmul.f32 1.442695, %v1510_v29  ;;  %v1512_v9 = vsub.f32 %v8715_v1, %v1499_v61 }
 0x441   : > { %v1858_v22 = vpop.permute.xlu1 %1857 }
 0x442   : > { %7380 = vpow2.f32 %v1522_v50  ;;  %v1526_v43 = vmul.f32 1.442695, %v1512_v9  ;;  %6969 = vmatprep.subr.msk.mxu0 %vm586_vm0, %v1858_v22 }
 0x443   : > { %7382 = vpow2.f32 %v1524_v31  ;;  %6970 = vmatpush3.xpose.msk.msra.mxu0 %vm586_vm0, %v1858_v22  ;;  %v1504_v24 = vpop.permute.xlu0 %1503 }
 0x444   : > { %7384 = vpow2.f32 %v1526_v43  ;;  %v1513_v20 = vsub.f32 %v8711_v26, %v1504_v24 }
 0x445   : > { %v1856_v63 = vpop.permute.xlu1 %1855 }
 0x446   : > { %v1528_v13 = vmul.f32 1.442695, %v1513_v20  ;;  %6971 = vmatprep.subr.msk.mxu0 %vm586_vm0, %v1856_v63 }
 0x447   : > { %v8892_v48 = vpop.eup %7376  ;;  %6972 = vmatpush3.xpose.msk.msra.mxu0 %vm586_vm0, %v1856_v63  ;;  %v1854_v1 = vpop.permute.xlu0 %1853 }
 0x448   : > { %v8895_v12 = vpop.eup %7378  ;;  %7386 = vpow2.f32 %v1528_v13  ;;  %6958 = vmatprep.mubr.msk.f32.mxu0 %vm845_vm2, %v8892_v48  ;;  %6973 = vmatprep.subr.msk.mxu0 %vm586_vm0, %v1854_v1 }
 0x449   : > { %6959 = vmatmul.mubr.msk.f32.gmra.mxu0 %vm845_vm2, %v8895_v12  ;;  %v1852_v26 = vpop.permute.xlu1 %1851 }
 0x44b   : > { %6974 = vmatpush3.xpose.msk.msra.mxu0 %vm586_vm0, %v1854_v1  ;;  %v1850_v17 = vpop.permute.xlu0 %1849 }
 0x44c   : > { %6975 = vmatprep.subr.msk.mxu0 %vm586_vm0, %v1852_v26 }
 0x44d   : > { %v1848_v31 = vpop.permute.xlu1 %1847 }
 0x44f   : > { %v8904_v25 = vpop.eup %7380  ;;  %6976 = vmatpush3.xpose.msk.msra.mxu0 %vm586_vm0, %v1852_v26  ;;  %v1846_v22 = vpop.permute.xlu0 %1845 }
 0x450   : > { %v8907_v29 = vpop.eup %7382  ;;  %6961 = vmatprep.mubr.msk.f32.mxu0 %vm845_vm2, %v8904_v25  ;;  %6977 = vmatprep.subr.msk.mxu0 %vm586_vm0, %v1850_v17 }
 0x451   : > { %v8912_v61 = vpop.eup %7384  ;;  %6962 = vmatmul.mubr.msk.f32.gmra.mxu0 %vm845_vm2, %v8907_v29  ;;  %v1830_v50 = vpop.permute.xlu1 %1829 }
 0x452   : > { %6964 = vmatprep.mubr.msk.f32.mxu0 %vm845_vm2, %v8912_v61 }
 0x453   : > { %6978 = vmatpush3.xpose.msk.msra.mxu0 %vm586_vm0, %v1850_v17  ;;  %v1832_v43 = vpop.permute.xlu0 %1831 }
 0x454   : > { %6979 = vmatprep.subr.msk.mxu0 %vm586_vm0, %v1848_v31 }
 0x455   : > { %v8920_v9 = vpop.eup %7386  ;;  %v1834_v24 = vpop.permute.xlu1 %1833 }
 0x456   : > { %6965 = vmatmul.mubr.msk.f32.gmra.mxu0 %vm845_vm2, %v8920_v9 }
 0x457   : > { %6980 = vmatpush3.xpose.msk.msra.mxu0 %vm586_vm0, %v1848_v31  ;;  %6983 = vmatprep.mubr.msk.f32.mxu0 %vm586_vm0, %v1830_v50  ;;  %v1836_v20 = vpop.permute.xlu0 %1835 }
 0x458   : > { %6981 = vmatprep.subr.msk.mxu0 %vm586_vm0, %v1846_v22 }
 0x459   : > { %v1838_v63 = vpop.permute.xlu1 %1837 }
 0x45b   : > { %6982 = vmatpush3.xpose.msk.msra.mxu0 %vm586_vm0, %v1846_v22  ;;  %v1840_v13 = vpop.permute.xlu0 %1839 }
 0x45d   : > { %v1842_v1 = vpop.permute.xlu1 %1841 }
 0x45e   : > { %6984 = vmatmul.mubr.msk.f32.vlgmr.msra.gmra.mxu0 %vm586_vm0, %v1832_v43 }
 0x45f   : > { %6986 = vmatprep.mubr.msk.f32.mxu0 %vm586_vm0, %v1834_v24  ;;  %v1844_v26 = vpop.permute.xlu0 %1843 }
 0x462   : > { %6987 = vmatmul.mubr.msk.f32.gmra.mxu0 %vm586_vm0, %v1836_v20 }
 0x463   : > { %6989 = vmatprep.mubr.msk.f32.mxu0 %vm586_vm0, %v1838_v63 }
 0x466   : > { %6990 = vmatmul.mubr.msk.f32.gmra.mxu0 %vm586_vm0, %v1840_v13 }
 0x467   : > { %6992 = vmatprep.mubr.msk.f32.mxu0 %vm586_vm0, %v1842_v1 }
 0x46a   : > { %6993 = vmatmul.mubr.msk.f32.gmra.mxu0 %vm586_vm0, %v1844_v26 }
 0x4fb   : > { %v8935_v17 = vpop.f32.mrf.mxu0 }
 0x4fc   : > { %11504 = vst [vmem:[#allocation45_spill] sm:$0xff] %v8935_v17 }
 0x4fd   : > { %v8937_v31 = vpop.f32.mrf.mxu0 }
 0x4fe   : > { %11505 = vst [vmem:[#allocation46_spill] sm:$0xff] %v8937_v31 }
 0x509   : > { %v8939_v50 = vpop.f32.mrf.mxu0 }
 0x50a   : > { %11506 = vst [vmem:[#allocation47_spill] sm:$0xff] %v8939_v50 }
 0x50b   : > { %v8941_v22 = vpop.f32.mrf.mxu0 }
 0x50c   : > { %11507 = vst [vmem:[#allocation48_spill] sm:$0xff] %v8941_v22 }
 0x511   : > { %v8943_v43 = vpop.f32.mrf.mxu0 }
 0x512   : > { %11508 = vst [vmem:[#allocation49_spill] sm:$0xff] %v8943_v43 }
 0x513   : > { %v8945_v24 = vpop.f32.mrf.mxu0 }
 0x514   : > { %11509 = vst [vmem:[#allocation50_spill] sm:$0xff] %v8945_v24 }
 0x516   : > { %v8947_v20 = vpop.f32.mrf.mxu0 }
 0x517   : > { %11510 = vst [vmem:[#allocation51_spill] sm:$0xff] %v8947_v20 }
 0x518   : > { %v8949_v63 = vpop.f32.mrf.mxu0 }
 0x519   : > { %11511 = vst [vmem:[#allocation52_spill] sm:$0xff] %v8949_v63 }
 0x51e   : > { %v8951_v13 = vpop.f32.mrf.mxu0 }
 0x51f   : > { %v2010_v1 = vsel %vm845_vm2, %v8951_v13, -inf }
 0x520   : > { %2011 = vmax.xlane.f32.xlu0 %v2010_v1  ;;  %v8955_v26 = vpop.f32.mrf.mxu0 }
 0x521   : > { %v2007_v17 = vsel %vm845_vm2, %v8955_v26, -inf }
 0x522   : > { %2008 = vmax.xlane.f32.xlu1 %v2007_v17  ;;  %v8959_v22 = vpop.f32.mrf.mxu0 }
 0x523   : > { %v2016_v24 = vsel %vm845_vm2, %v8959_v22, -inf }
 0x524   : > { %v8963_v20 = vpop.f32.mrf.mxu0 }
 0x525   : > { %v2013_v63 = vsel %vm845_vm2, %v8963_v20, -inf }
 0x526   : > { %2017 = vmax.xlane.f32.xlu1 %v2016_v24  ;;  %2014 = vmax.xlane.f32.xlu0 %v2013_v63  ;;  %v8967_v43 = vpop.f32.mrf.mxu0  ;;  %v8987_v63 = vld [vmem:[#allocation2 + $0x88] sm:$0xff] }
 0x527   : > { %v2022_v1 = vsel %vm845_vm2, %v8967_v43, -inf  ;;  %11512 = vst [vmem:[#allocation53_spill] sm:$0xff] %v8987_v63 }
 0x528   : > { %v8971_v50 = vpop.f32.mrf.mxu0 }
 0x529   : > { %v2019_v17 = vsel %vm845_vm2, %v8971_v50, -inf }
 0x52a   : > { %2023 = vmax.xlane.f32.xlu1 %v2022_v1  ;;  %2020 = vmax.xlane.f32.xlu0 %v2019_v17  ;;  %v8975_v31 = vpop.f32.mrf.mxu0  ;;  %v8989_v17 = vld [vmem:[#allocation2 + $0x80] sm:$0xff] }
 0x52b   : > { %v2028_v33 = vsel %vm845_vm2, %v8975_v31, -inf  ;;  %11513 = vst [vmem:[#allocation54_spill] sm:$0xff] %v8989_v17 }
 0x52c   : > { %v8979_v46 = vpop.f32.mrf.mxu0 }
 0x52d   : > { %v2025_v24 = vsel %vm845_vm2, %v8979_v46, -inf }
 0x52e   : > { %2029 = vmax.xlane.f32.xlu1 %v2028_v33  ;;  %2026 = vmax.xlane.f32.xlu0 %v2025_v24  ;;  %v9004_v33 = vld [vmem:[#allocation2 + $0x90] sm:$0xff]  ;;  %v9041_v24 = vld [vmem:[#allocation2 + $0xb8] sm:$0xff] }
 0x52f   : > { %11517 = vst [vmem:[#allocation58_spill] sm:$0xff] %v9004_v33  ;;  %11524 = vst [vmem:[#allocation65_spill] sm:$0xff] %v9041_v24 }
 0x53f   : > { %2255 = vrot.lane.b32.xlu1 %v8456_v3, %s7840_s28 }
 0x544   : > { %2253 = vrot.lane.b32.xlu0 %v8459_v4, %s7840_s28  ;;  %v9002_v4 = vld [vmem:[#allocation2 + $0x98] sm:$0xff] }
 0x545   : > { %11516 = vst [vmem:[#allocation57_spill] sm:$0xff] %v9002_v4 }
 0x5a9   : > { %v2012_v1 = vpop.xlane.xlu0 %2011 }
 0x5aa   : > { %v8992_v30 = vmax.f32 %v8987_v63, %v2012_v1  ;;  %v9019_v63 = vld [vmem:[#allocation2 + $0xa8] sm:$0xff] }
 0x5ab   : > { %v2009_v23 = vpop.xlane.xlu1 %2008  ;;  %11520 = vst [vmem:[#allocation61_spill] sm:$0xff] %v9019_v63 }
 0x5ac   : > { %11514 = vst [vmem:[#allocation55_spill] sm:$0xff] %v8992_v30  ;;  %2411 = vst.msk [vmem:[#allocation2 + $0x88] sm:$0xff] %vm457_vm1, %v8992_v30  ;;  %v8999_v3 = vmax.f32 %v8989_v17, %v2009_v23  ;;  %2070 = vperm.xlu1 %7355, %v8992_v30  }
 0x5ae   : > { %11515 = vst [vmem:[#allocation56_spill] sm:$0xff] %v8999_v3  ;;  %2410 = vst.msk [vmem:[#allocation2 + $0x80] sm:$0xff] %vm457_vm1, %v8999_v3  ;;  %2065 = vperm.xlu0 %7354, %v8999_v3  }
 0x5af   : > { %v2018_v1 = vpop.xlane.xlu1 %2017  ;;  %v2015_v28 = vpop.xlane.xlu0 %2014 }
 0x5b0   : > { %2251 = vrot.lane.b32.xlu1 %v8464_v5, %s7840_s28  ;;  %v9014_v23 = vmax.f32 %v9002_v4, %v2018_v1  ;;  %v9017_v30 = vmax.f32 %v9004_v33, %v2015_v28  ;;  %v9043_v4 = vld [vmem:[#allocation2 + $0xb0] sm:$0xff] }
 0x5b1   : > { %11525 = vst [vmem:[#allocation66_spill] sm:$0xff] %v9043_v4 }
 0x5b2   : > { %11518 = vst [vmem:[#allocation59_spill] sm:$0xff] %v9014_v23  ;;  %11519 = vst [vmem:[#allocation60_spill] sm:$0xff] %v9017_v30  ;;  %2249 = vrot.lane.b32.xlu0 %v8469_v6, %s7840_s28 }
 0x5b3   : > { %2413 = vst.msk [vmem:[#allocation2 + $0x98] sm:$0xff] %vm457_vm1, %v9014_v23  ;;  %2412 = vst.msk [vmem:[#allocation2 + $0x90] sm:$0xff] %vm457_vm1, %v9017_v30  ;;  %v2024_v28 = vpop.xlane.xlu1 %2023  ;;  %v2021_v1 = vpop.xlane.xlu0 %2020 }
 0x5b4   : > { %2247 = vrot.lane.b32.xlu1 %v8478_v8, %s7840_s28  ;;  %v9036_v3 = vmax.f32 %v9019_v63, %v2024_v28  ;;  %v9039_v6 = vmax.f32 %v9021_v0, %v2021_v1  ;;  %v9250_v63 = vld [vmem:[#allocation2 + $0xd0] sm:$0xff] }
 0x5b5   : > { %11548 = vst [vmem:[#allocation89_spill] sm:$0xff] %v9250_v63 }
 0x5b6   : > { %11522 = vst [vmem:[#allocation63_spill] sm:$0xff] %v9036_v3  ;;  %11523 = vst [vmem:[#allocation64_spill] sm:$0xff] %v9039_v6  ;;  %2245 = vrot.lane.b32.xlu0 %v8483_v10, %s7840_s28 }
 0x5b7   : > { %2415 = vst.msk [vmem:[#allocation2 + $0xa8] sm:$0xff] %vm457_vm1, %v9036_v3  ;;  %2414 = vst.msk [vmem:[#allocation2 + $0xa0] sm:$0xff] %vm457_vm1, %v9039_v6  ;;  %v2030_v28 = vpop.xlane.xlu1 %2029  ;;  %v2027_v1 = vpop.xlane.xlu0 %2026 }
 0x5b8   : > { %2080 = vperm.xlu1 %7355, %v9014_v23   ;;  %v9057_v33 = vmax.f32 %v9041_v24, %v2030_v28  ;;  %v9060_v10 = vmax.f32 %v9043_v4, %v2027_v1  ;;  %v9258_v23 = vld [vmem:[%s8453_s26 + $0x28] sm:$0xff] }
 0x5ba   : > { %11526 = vst [vmem:[#allocation67_spill] sm:$0xff] %v9057_v33  ;;  %11527 = vst [vmem:[#allocation68_spill] sm:$0xff] %v9060_v10  ;;  %2243 = vrot.lane.b32.xlu0 %v8495_v14, %s7840_s28 }
 0x5bb   : > { %2417 = vst.msk [vmem:[#allocation2 + $0xb8] sm:$0xff] %vm457_vm1, %v9057_v33  ;;  %2416 = vst.msk [vmem:[#allocation2 + $0xb0] sm:$0xff] %vm457_vm1, %v9060_v10  ;;  %v2256_v28 = vpop.permute.xlu1 %2255  ;;  %v2254_v0 = vpop.permute.xlu0 %2253 }
 0x5bc   : > { %2075 = vperm.xlu1 %7355, %v9017_v30   ;;  %6995 = vmatprep.subr.mxu1 %v2256_v28  ;;  %v9224_v30 = vld [vmem:[%s8453_s26 + $0x38] sm:$0xff] }
 0x5bd   : > { %6996 = vmatpush3.msra.mxu1 %v2256_v28 }
 0x5be   : > { %2241 = vrot.lane.b32.xlu0 %v8505_v18, %s7840_s28  ;;  %6997 = vmatprep.subr.mxu1 %v2254_v0 }
 0x5bf   : > { %6998 = vmatpush3.msra.mxu1 %v2254_v0 }
 0x5c0   : > { %2090 = vperm.xlu1 %7355, %v9036_v3   ;;  %v9248_v3 = vld [vmem:[#allocation2 + $0xd8] sm:$0xff] }
 0x5c1   : > { %11547 = vst [vmem:[#allocation88_spill] sm:$0xff] %v9248_v3 }
 0x5c2   : > { %2448 = vrot.lane.b32.xlu0 %v8813_v54, %s7841_s29 }
 0x5c4   : > { %2085 = vperm.xlu1 %7355, %v9039_v6  }
 0x5c6   : > { %2095 = vperm.xlu0 %7354, %v9060_v10  }
 0x5c8   : > { %2446 = vrot.lane.b32.xlu1 %v8820_v60, %s7841_s29 }
 0x5ca   : > { %2100 = vperm.xlu0 %7354, %v9057_v33  }
 0x5cc   : > { %2444 = vrot.lane.b32.xlu1 %v8826_v34, %s7841_s29 }
 0x5ce   : > { %2442 = vrot.lane.b32.xlu0 %v8831_v62, %s7841_s29 }
 0x5d0   : > { %2440 = vrot.lane.b32.xlu1 %v8836_v15, %s7841_s29 }
 0x5d2   : > { %2438 = vrot.lane.b32.xlu0 %v8841_v53, %s7841_s29 }
 0x5d4   : > { %2436 = vrot.lane.b32.xlu1 %v8846_v32, %s7841_s29 }
 0x5d6   : > { %2434 = vrot.lane.b32.xlu0 %v8851_v57, %s7841_s29 }
 0x5d8   : > { %2418 = vrot.lane.b32.xlu1 %v7953_v27, %s7841_s29 }
 0x5da   : > { %2420 = vrot.lane.b32.xlu0 %v8001_v36, %s7841_s29 }
 0x5dc   : > { %2422 = vrot.lane.b32.xlu1 %v8005_v37, %s7841_s29 }
 0x5de   : > { %2424 = vrot.lane.b32.xlu0 %v8011_v40, %s7841_s29 }
 0x5e0   : > { %2426 = vrot.lane.b32.xlu1 %v8015_v41, %s7841_s29 }
 0x5e2   : > { %2428 = vrot.lane.b32.xlu0 %v8021_v44, %s7841_s29 }
 0x5e4   : > { %2430 = vrot.lane.b32.xlu1 %v8025_v45, %s7841_s29 }
 0x5e6   : > { %2432 = vrot.lane.b32.xlu0 %v8030_v47, %s7841_s29 }
 0x627   : > { %v2071_v14 = vpop.permute.xlu1 %2070 }
 0x628   : > { %v2104_v18 = vsub.f32 %v8951_v13, %v2071_v14 }
 0x629   : > { %v2066_v0 = vpop.permute.xlu0 %2065 }
 0x62a   : > { %v2103_v1 = vsub.f32 %v8955_v26, %v2066_v0  ;;  %v2113_v28 = vmul.f32 1.442695, %v2104_v18 }
 0x62b   : > { %v2252_v8 = vpop.permute.xlu1 %2251 }
 0x62c   : > { %v2111_v5 = vmul.f32 1.442695, %v2103_v1  ;;  %6999 = vmatprep.subr.mxu1 %v2252_v8 }
 0x62d   : > { %7000 = vmatpush3.msra.mxu1 %v2252_v8  ;;  %v2250_v10 = vpop.permute.xlu0 %2249 }
 0x62e   : > { %7388 = vpow2.f32 %v2111_v5  ;;  %7001 = vmatprep.subr.mxu1 %v2250_v10 }
 0x62f   : > { %7390 = vpow2.f32 %v2113_v28  ;;  %v2248_v4 = vpop.permute.xlu1 %2247  ;;  %7002 = vmatpush3.msra.mxu1 %v2250_v10 }
 0x630   : > { %7003 = vmatprep.subr.mxu1 %v2248_v4 }
 0x631   : > { %7004 = vmatpush3.msra.mxu1 %v2248_v4  ;;  %v2246_v33 = vpop.permute.xlu0 %2245 }
 0x632   : > { %7005 = vmatprep.subr.mxu1 %v2246_v33 }
 0x633   : > { %v2081_v24 = vpop.permute.xlu1 %2080  ;;  %7006 = vmatpush3.msra.mxu1 %v2246_v33 }
 0x634   : > { %v2106_v13 = vsub.f32 %v8959_v22, %v2081_v24 }
 0x635   : > { %v2244_v26 = vpop.permute.xlu0 %2243 }
 0x636   : > { %7007 = vmatprep.subr.mxu1 %v2244_v26  ;;  %v2117_v18 = vmul.f32 1.442695, %v2106_v13 }
 0x637   : > { %v2076_v14 = vpop.permute.xlu1 %2075  ;;  %7008 = vmatpush3.msra.mxu1 %v2244_v26 }
 0x638   : > { %v2105_v8 = vsub.f32 %v8963_v20, %v2076_v14 }
 0x639   : > { %v2242_v5 = vpop.permute.xlu0 %2241 }
 0x63a   : > { %v2115_v0 = vmul.f32 1.442695, %v2105_v8  ;;  %7009 = vmatprep.subr.mxu1 %v2242_v5 }
 0x63b   : > { %v9115_v1 = vpop.eup %7388  ;;  %v2091_v10 = vpop.permute.xlu1 %2090  ;;  %7010 = vmatpush3.msra.mxu1 %v2242_v5 }
 0x63c   : > { %v9117_v4 = vpop.eup %7390  ;;  %7392 = vpow2.f32 %v2115_v0  ;;  %7011 = vmatprep.mubr.msk.f32.mxu1 %vm845_vm2, %v9115_v1  ;;  %v2108_v22 = vsub.f32 %v8967_v43, %v2091_v10 }
 0x63d   : > { %11528 = vst [vmem:[#allocation69_spill] sm:$0xff] %v9117_v4  ;;  %7394 = vpow2.f32 %v2117_v18  ;;  %7012 = vmatmul.mubr.msk.f32.vlgmr.msra.gmra.mxu1 %vm845_vm2, %v9117_v4  ;;  %v2449_v20 = vpop.permute.xlu0 %2448 }
 0x63e   : > { %7023 = vmatprep.subr.msk.mxu1 %vm586_vm0, %v2449_v20  ;;  %v2121_v28 = vmul.f32 1.442695, %v2108_v22 }
 0x63f   : > { %v2086_v33 = vpop.permute.xlu1 %2085  ;;  %7024 = vmatpush3.xpose.msk.msra.mxu1 %vm586_vm0, %v2449_v20 }
 0x640   : > { %v2107_v24 = vsub.f32 %v8971_v50, %v2086_v33 }
 0x641   : > { %v2096_v13 = vpop.permute.xlu0 %2095 }
 0x642   : > { %v2119_v26 = vmul.f32 1.442695, %v2107_v24  ;;  %v2109_v14 = vsub.f32 %v8979_v46, %v2096_v13 }
 0x643   : > { %v2447_v8 = vpop.permute.xlu1 %2446 }
 0x644   : > { %7396 = vpow2.f32 %v2119_v26  ;;  %v2123_v18 = vmul.f32 1.442695, %v2109_v14  ;;  %7025 = vmatprep.subr.msk.mxu1 %vm586_vm0, %v2447_v8 }
 0x645   : > { %7398 = vpow2.f32 %v2121_v28  ;;  %7026 = vmatpush3.xpose.msk.msra.mxu1 %vm586_vm0, %v2447_v8  ;;  %v2101_v43 = vpop.permute.xlu0 %2100 }
 0x646   : > { %7400 = vpow2.f32 %v2123_v18  ;;  %v2110_v5 = vsub.f32 %v8975_v31, %v2101_v43 }
 0x647   : > { %v2445_v0 = vpop.permute.xlu1 %2444 }
 0x648   : > { %v2125_v10 = vmul.f32 1.442695, %v2110_v5  ;;  %7027 = vmatprep.subr.msk.mxu1 %vm586_vm0, %v2445_v0 }
 0x649   : > { %v9132_v50 = vpop.eup %7392  ;;  %7028 = vmatpush3.xpose.msk.msra.mxu1 %vm586_vm0, %v2445_v0  ;;  %v2443_v46 = vpop.permute.xlu0 %2442 }
 0x64a   : > { %11529 = vst [vmem:[#allocation70_spill] sm:$0xff] %v9132_v50  ;;  %v9135_v22 = vpop.eup %7394  ;;  %7402 = vpow2.f32 %v2125_v10  ;;  %7014 = vmatprep.mubr.msk.f32.mxu1 %vm845_vm2, %v9132_v50  ;;  %7029 = vmatprep.subr.msk.mxu1 %vm586_vm0, %v2443_v46 }
 0x64b   : > { %11530 = vst [vmem:[#allocation71_spill] sm:$0xff] %v9135_v22  ;;  %7015 = vmatmul.mubr.msk.f32.gmra.mxu1 %vm845_vm2, %v9135_v22  ;;  %v2441_v31 = vpop.permute.xlu1 %2440 }
 0x64d   : > { %7030 = vmatpush3.xpose.msk.msra.mxu1 %vm586_vm0, %v2443_v46  ;;  %v2439_v20 = vpop.permute.xlu0 %2438 }
 0x64e   : > { %7031 = vmatprep.subr.msk.mxu1 %vm586_vm0, %v2441_v31 }
 0x64f   : > { %v2437_v28 = vpop.permute.xlu1 %2436 }
 0x651   : > { %v9144_v33 = vpop.eup %7396  ;;  %7032 = vmatpush3.xpose.msk.msra.mxu1 %vm586_vm0, %v2441_v31  ;;  %v2435_v8 = vpop.permute.xlu0 %2434 }
 0x652   : > { %11531 = vst [vmem:[#allocation72_spill] sm:$0xff] %v9144_v33  ;;  %v9147_v24 = vpop.eup %7398  ;;  %7017 = vmatprep.mubr.msk.f32.mxu1 %vm845_vm2, %v9144_v33  ;;  %7033 = vmatprep.subr.msk.mxu1 %vm586_vm0, %v2439_v20 }
 0x653   : > { %11532 = vst [vmem:[#allocation73_spill] sm:$0xff] %v9147_v24  ;;  %v9152_v13 = vpop.eup %7400  ;;  %7018 = vmatmul.mubr.msk.f32.gmra.mxu1 %vm845_vm2, %v9147_v24  ;;  %v2419_v26 = vpop.permute.xlu1 %2418 }
 0x654   : > { %11533 = vst [vmem:[#allocation74_spill] sm:$0xff] %v9152_v13  ;;  %7020 = vmatprep.mubr.msk.f32.mxu1 %vm845_vm2, %v9152_v13  ;;  %v9229_v13 = vld [vmem:[%s8453_s26 + $0x30] sm:$0xff] }
 0x655   : > { %7034 = vmatpush3.xpose.msk.msra.mxu1 %vm586_vm0, %v2439_v20  ;;  %v2421_v18 = vpop.permute.xlu0 %2420 }
 0x656   : > { %7035 = vmatprep.subr.msk.mxu1 %vm586_vm0, %v2437_v28 }
 0x657   : > { %v9160_v14 = vpop.eup %7402  ;;  %v2423_v43 = vpop.permute.xlu1 %2422 }
 0x658   : > { %11534 = vst [vmem:[#allocation75_spill] sm:$0xff] %v9160_v14  ;;  %7021 = vmatmul.mubr.msk.f32.gmra.mxu1 %vm845_vm2, %v9160_v14  ;;  %v9235_v14 = vld [vmem:[#allocation2 + $0xc0] sm:$0xff] }
 0x659   : > { %7036 = vmatpush3.xpose.msk.msra.mxu1 %vm586_vm0, %v2437_v28  ;;  %7039 = vmatprep.mubr.msk.f32.mxu1 %vm586_vm0, %v2419_v26  ;;  %v2425_v5 = vpop.permute.xlu0 %2424  ;;  %11544 = vst [vmem:[#allocation85_spill] sm:$0xff] %v9235_v14 }
 0x65a   : > { %7037 = vmatprep.subr.msk.mxu1 %vm586_vm0, %v2435_v8 }
 0x65b   : > { %v2427_v0 = vpop.permute.xlu1 %2426 }
 0x65d   : > { %7038 = vmatpush3.xpose.msk.msra.mxu1 %vm586_vm0, %v2435_v8  ;;  %v2429_v10 = vpop.permute.xlu0 %2428 }
 0x65f   : > { %v2431_v46 = vpop.permute.xlu1 %2430 }
 0x660   : > { %7040 = vmatmul.mubr.msk.f32.vlgmr.msra.gmra.mxu1 %vm586_vm0, %v2421_v18 }
 0x661   : > { %7042 = vmatprep.mubr.msk.f32.mxu1 %vm586_vm0, %v2423_v43  ;;  %v2433_v31 = vpop.permute.xlu0 %2432 }
 0x664   : > { %7043 = vmatmul.mubr.msk.f32.gmra.mxu1 %vm586_vm0, %v2425_v5 }
 0x665   : > { %7045 = vmatprep.mubr.msk.f32.mxu1 %vm586_vm0, %v2427_v0 }
 0x668   : > { %7046 = vmatmul.mubr.msk.f32.gmra.mxu1 %vm586_vm0, %v2429_v10 }
 0x669   : > { %7048 = vmatprep.mubr.msk.f32.mxu1 %vm586_vm0, %v2431_v46 }
 0x66c   : > { %7049 = vmatmul.mubr.msk.f32.gmra.mxu1 %vm586_vm0, %v2433_v31 }
 0x6fd   : > { %v9175_v20 = vpop.f32.mrf.mxu1 }
 0x6fe   : > { %11535 = vst [vmem:[#allocation76_spill] sm:$0xff] %v9175_v20 }
 0x6ff   : > { %v9177_v28 = vpop.f32.mrf.mxu1 }
 0x700   : > { %11536 = vst [vmem:[#allocation77_spill] sm:$0xff] %v9177_v28 }
 0x70b   : > { %v9179_v26 = vpop.f32.mrf.mxu1 }
 0x70c   : > { %11537 = vst [vmem:[#allocation78_spill] sm:$0xff] %v9179_v26 }
 0x70d   : > { %v9181_v8 = vpop.f32.mrf.mxu1 }
 0x70e   : > { %11538 = vst [vmem:[#allocation79_spill] sm:$0xff] %v9181_v8 }
 0x713   : > { %v9183_v18 = vpop.f32.mrf.mxu1 }
 0x714   : > { %11539 = vst [vmem:[#allocation80_spill] sm:$0xff] %v9183_v18 }
 0x715   : > { %v9185_v43 = vpop.f32.mrf.mxu1 }
 0x716   : > { %11540 = vst [vmem:[#allocation81_spill] sm:$0xff] %v9185_v43 }
 0x718   : > { %v9187_v5 = vpop.f32.mrf.mxu1 }
 0x719   : > { %11541 = vst [vmem:[#allocation82_spill] sm:$0xff] %v9187_v5 }
 0x71a   : > { %v9189_v0 = vpop.f32.mrf.mxu1 }
 0x71b   : > { %11542 = vst [vmem:[#allocation83_spill] sm:$0xff] %v9189_v0 }
 0x720   : > { %v9191_v10 = vpop.f32.mrf.mxu1 }
 0x721   : > { %v2599_v46 = vsel %vm845_vm2, %v9191_v10, -inf }
 0x722   : > { %2600 = vmax.xlane.f32.xlu0 %v2599_v46  ;;  %v9195_v31 = vpop.f32.mrf.mxu1 }
 0x723   : > { %v2596_v20 = vsel %vm845_vm2, %v9195_v31, -inf }
 0x724   : > { %2597 = vmax.xlane.f32.xlu1 %v2596_v20  ;;  %v9199_v8 = vpop.f32.mrf.mxu1 }
 0x725   : > { %v2605_v43 = vsel %vm845_vm2, %v9199_v8, -inf }
 0x726   : > { %v9203_v5 = vpop.f32.mrf.mxu1 }
 0x727   : > { %v2602_v0 = vsel %vm845_vm2, %v9203_v5, -inf }
 0x728   : > { %2606 = vmax.xlane.f32.xlu1 %v2605_v43  ;;  %2603 = vmax.xlane.f32.xlu0 %v2602_v0  ;;  %v9207_v46 = vpop.f32.mrf.mxu1 }
 0x729   : > { %v2611_v18 = vsel %vm845_vm2, %v9207_v46, -inf }
 0x72a   : > { %v9211_v20 = vpop.f32.mrf.mxu1 }
 0x72b   : > { %v2608_v26 = vsel %vm845_vm2, %v9211_v20, -inf }
 0x72c   : > { %2612 = vmax.xlane.f32.xlu1 %v2611_v18  ;;  %2609 = vmax.xlane.f32.xlu0 %v2608_v26  ;;  %v9215_v28 = vpop.f32.mrf.mxu1  ;;  %v9233_v26 = vld [vmem:[#allocation2 + $0xc8] sm:$0xff] }
 0x72d   : > { %v2617_v6 = vsel %vm845_vm2, %v9215_v28, -inf  ;;  %11543 = vst [vmem:[#allocation84_spill] sm:$0xff] %v9233_v26 }
 0x72e   : > { %v9219_v43 = vpop.f32.mrf.mxu1 }
 0x72f   : > { %v2614_v0 = vsel %vm845_vm2, %v9219_v43, -inf }
 0x730   : > { %2618 = vmax.xlane.f32.xlu1 %v2617_v6  ;;  %2615 = vmax.xlane.f32.xlu0 %v2614_v0 }
 0x741   : > { %2844 = vrot.lane.b32.xlu1 %v9224_v30, %s7841_s29 }
 0x746   : > { %2842 = vrot.lane.b32.xlu0 %v9229_v13, %s7841_s29 }
 0x7ab   : > { %v2601_v18 = vpop.xlane.xlu0 %2600 }
 0x7ac   : > { %v9238_v33 = vmax.f32 %v9233_v26, %v2601_v18  ;;  %v9268_v18 = vld [vmem:[#allocation2 + $0xe8] sm:$0xff] }
 0x7ad   : > { %v2598_v6 = vpop.xlane.xlu1 %2597  ;;  %11549 = vst [vmem:[#allocation90_spill] sm:$0xff] %v9268_v18 }
 0x7ae   : > { %11545 = vst [vmem:[#allocation86_spill] sm:$0xff] %v9238_v33  ;;  %3000 = vst.msk [vmem:[#allocation2 + $0xc8] sm:$0xff] %vm457_vm1, %v9238_v33  ;;  %v9245_v50 = vmax.f32 %v9235_v14, %v2598_v6  ;;  %2659 = vperm.xlu1 %7355, %v9238_v33   ;;  %v9270_v14 = vld [vmem:[#allocation2 + $0xe0] sm:$0xff] }
 0x7af   : > { %11550 = vst [vmem:[#allocation91_spill] sm:$0xff] %v9270_v14 }
 0x7b0   : > { %11546 = vst [vmem:[#allocation87_spill] sm:$0xff] %v9245_v50  ;;  %2999 = vst.msk [vmem:[#allocation2 + $0xc0] sm:$0xff] %vm457_vm1, %v9245_v50  ;;  %2654 = vperm.xlu0 %7354, %v9245_v50   ;;  %v9273_v50 = vld [vmem:[%s8453_s26 + $0x20] sm:$0xff] }
 0x7b1   : > { %v2607_v0 = vpop.xlane.xlu1 %2606  ;;  %v2604_v26 = vpop.xlane.xlu0 %2603 }
 0x7b2   : > { %2840 = vrot.lane.b32.xlu1 %v9258_v23, %s7841_s29  ;;  %v9263_v6 = vmax.f32 %v9248_v3, %v2607_v0  ;;  %v9266_v33 = vmax.f32 %v9250_v63, %v2604_v26  ;;  %v9296_v3 = vld [vmem:[#allocation2 + $0xf8] sm:$0xff]  ;;  %v9298_v26 = vld [vmem:[#allocation2 + $0xf0] sm:$0xff] }
 0x7b3   : > { %11552 = vst [vmem:[#allocation93_spill] sm:$0xff] %v9296_v3  ;;  %11553 = vst [vmem:[#allocation94_spill] sm:$0xff] %v9298_v26  ;;  %v9301_v63 = vld [vmem:[%s8453_s26 + $0x10] sm:$0xff] }
 0x7b4   : > { %2838 = vrot.lane.b32.xlu0 %v9273_v50, %s7841_s29  ;;  %3002 = vst.msk [vmem:[#allocation2 + $0xd8] sm:$0xff] %vm457_vm1, %v9263_v6  ;;  %3001 = vst.msk [vmem:[#allocation2 + $0xd0] sm:$0xff] %vm457_vm1, %v9266_v33 }
 0x7b5   : > { %v2613_v0 = vpop.xlane.xlu1 %2612  ;;  %v2610_v24 = vpop.xlane.xlu0 %2609 }
 0x7b6   : > { %2836 = vrot.lane.b32.xlu1 %v9286_v59, %s7841_s29  ;;  %v9291_v22 = vmax.f32 %v9268_v18, %v2613_v0  ;;  %v9294_v17 = vmax.f32 %v9270_v14, %v2610_v24  ;;  %v9335_v18 = vld [vmem:[%s8453_s26] sm:$0xff] }
 0x7b8   : > { %11551 = vst [vmem:[#allocation92_spill] sm:$0xff] %v9294_v17  ;;  %2834 = vrot.lane.b32.xlu0 %v9301_v63, %s7841_s29  ;;  %3004 = vst.msk [vmem:[#allocation2 + $0xe8] sm:$0xff] %vm457_vm1, %v9291_v22 }
 0x7b9   : > { %3003 = vst.msk [vmem:[#allocation2 + $0xe0] sm:$0xff] %vm457_vm1, %v9294_v17  ;;  %v2619_v24 = vpop.xlane.xlu1 %2618  ;;  %v2616_v42 = vpop.xlane.xlu0 %2615 }
 0x7ba   : > { %2669 = vperm.xlu1 %7355, %v9263_v6   ;;  %v9315_v4 = vmax.f32 %v9296_v3, %v2619_v24  ;;  %v9318_v38 = vmax.f32 %v9298_v26, %v2616_v42 }
 0x7bc   : > { %11554 = vst [vmem:[#allocation95_spill] sm:$0xff] %v9315_v4  ;;  %11555 = vst [vmem:[#allocation96_spill] sm:$0xff] %v9318_v38  ;;  %2832 = vrot.lane.b32.xlu0 %v9321_v55, %s7841_s29 }
 0x7bd   : > { %3006 = vst.msk [vmem:[#allocation2 + $0xf8] sm:$0xff] %vm457_vm1, %v9315_v4  ;;  %3005 = vst.msk [vmem:[#allocation2 + $0xf0] sm:$0xff] %vm457_vm1, %v9318_v38  ;;  %v2845_v24 = vpop.permute.xlu1 %2844  ;;  %v2843_v42 = vpop.permute.xlu0 %2842 }
 0x7be   : > { %2664 = vperm.xlu1 %7355, %v9266_v33   ;;  %7051 = vmatprep.subr.mxu0 %v2845_v24 }
 0x7bf   : > { %7052 = vmatpush3.msra.mxu0 %v2845_v24 }
 0x7c0   : > { %2830 = vrot.lane.b32.xlu0 %v9335_v18, %s7841_s29  ;;  %7053 = vmatprep.subr.mxu0 %v2843_v42 }
 0x7c1   : > { %7054 = vmatpush3.msra.mxu0 %v2843_v42 }
 0x7c2   : > { %2679 = vperm.xlu1 %7355, %v9291_v22  }
 0x7c4   : > { %3037 = vrot.lane.b32.xlu0 %v8813_v54, %s7842_s30 }
 0x7c6   : > { %2674 = vperm.xlu1 %7355, %v9294_v17   ;;  %v9525_v17 = vld [vmem:[#allocation2 + $0x120] sm:$0xff] }
 0x7c8   : > { %2684 = vperm.xlu0 %7354, %v9318_v38  }
 0x7ca   : > { %3035 = vrot.lane.b32.xlu1 %v8820_v60, %s7842_s30 }
 0x7cc   : > { %2689 = vperm.xlu0 %7354, %v9315_v4  }
 0x7ce   : > { %3033 = vrot.lane.b32.xlu1 %v8826_v34, %s7842_s30 }
 0x7d0   : > { %3031 = vrot.lane.b32.xlu0 %v8831_v62, %s7842_s30 }
 0x7d2   : > { %3029 = vrot.lane.b32.xlu1 %v8836_v15, %s7842_s30 }
 0x7d4   : > { %3027 = vrot.lane.b32.xlu0 %v8841_v53, %s7842_s30 }
 0x7d6   : > { %3025 = vrot.lane.b32.xlu1 %v8846_v32, %s7842_s30 }
 0x7d8   : > { %3023 = vrot.lane.b32.xlu0 %v8851_v57, %s7842_s30 }
 0x7da   : > { %3007 = vrot.lane.b32.xlu1 %v7953_v27, %s7842_s30 }
 0x7dc   : > { %3009 = vrot.lane.b32.xlu0 %v8001_v36, %s7842_s30 }
 0x7de   : > { %3011 = vrot.lane.b32.xlu1 %v8005_v37, %s7842_s30 }
 0x7e0   : > { %3013 = vrot.lane.b32.xlu0 %v8011_v40, %s7842_s30 }
 0x7e2   : > { %3015 = vrot.lane.b32.xlu1 %v8015_v41, %s7842_s30 }
 0x7e4   : > { %3017 = vrot.lane.b32.xlu0 %v8021_v44, %s7842_s30 }
 0x7e6   : > { %3019 = vrot.lane.b32.xlu1 %v8025_v45, %s7842_s30 }
 0x7e8   : > { %3021 = vrot.lane.b32.xlu0 %v8030_v47, %s7842_s30 }
 0x829   : > { %v2660_v57 = vpop.permute.xlu1 %2659 }
 0x82a   : > { %v2693_v32 = vsub.f32 %v9191_v10, %v2660_v57 }
 0x82b   : > { %v2655_v53 = vpop.permute.xlu0 %2654 }
 0x82c   : > { %v2692_v15 = vsub.f32 %v9195_v31, %v2655_v53  ;;  %v2702_v62 = vmul.f32 1.442695, %v2693_v32 }
 0x82d   : > { %v2841_v54 = vpop.permute.xlu1 %2840 }
 0x82e   : > { %v2700_v60 = vmul.f32 1.442695, %v2692_v15  ;;  %7055 = vmatprep.subr.mxu0 %v2841_v54 }
 0x82f   : > { %7056 = vmatpush3.msra.mxu0 %v2841_v54  ;;  %v2839_v34 = vpop.permute.xlu0 %2838 }
 0x830   : > { %7404 = vpow2.f32 %v2700_v60  ;;  %7057 = vmatprep.subr.mxu0 %v2839_v34 }
 0x831   : > { %7406 = vpow2.f32 %v2702_v62  ;;  %v2837_v24 = vpop.permute.xlu1 %2836  ;;  %7058 = vmatpush3.msra.mxu0 %v2839_v34 }
 0x832   : > { %7059 = vmatprep.subr.mxu0 %v2837_v24 }
 0x833   : > { %7060 = vmatpush3.msra.mxu0 %v2837_v24  ;;  %v2835_v42 = vpop.permute.xlu0 %2834 }
 0x834   : > { %7061 = vmatprep.subr.mxu0 %v2835_v42 }
 0x835   : > { %v2670_v14 = vpop.permute.xlu1 %2669  ;;  %7062 = vmatpush3.msra.mxu0 %v2835_v42 }
 0x836   : > { %v2695_v10 = vsub.f32 %v9199_v8, %v2670_v14 }
 0x837   : > { %v2833_v31 = vpop.permute.xlu0 %2832 }
 0x838   : > { %7063 = vmatprep.subr.mxu0 %v2833_v31  ;;  %v2706_v53 = vmul.f32 1.442695, %v2695_v10 }
 0x839   : > { %v2665_v57 = vpop.permute.xlu1 %2664  ;;  %7064 = vmatpush3.msra.mxu0 %v2833_v31 }
 0x83a   : > { %v2694_v32 = vsub.f32 %v9203_v5, %v2665_v57 }
 0x83b   : > { %v2831_v15 = vpop.permute.xlu0 %2830 }
 0x83c   : > { %v2704_v54 = vmul.f32 1.442695, %v2694_v32  ;;  %7065 = vmatprep.subr.mxu0 %v2831_v15 }
 0x83d   : > { %v9379_v62 = vpop.eup %7404  ;;  %v2680_v60 = vpop.permute.xlu1 %2679  ;;  %7066 = vmatpush3.msra.mxu0 %v2831_v15 }
 0x83e   : > { %v9381_v34 = vpop.eup %7406  ;;  %7408 = vpow2.f32 %v2704_v54  ;;  %7067 = vmatprep.mubr.msk.f32.mxu0 %vm845_vm2, %v9379_v62  ;;  %v2697_v14 = vsub.f32 %v9207_v46, %v2680_v60 }
 0x83f   : > { %7410 = vpow2.f32 %v2706_v53  ;;  %7068 = vmatmul.mubr.msk.f32.vlgmr.msra.gmra.mxu0 %vm845_vm2, %v9381_v34  ;;  %v3038_v8 = vpop.permute.xlu0 %3037 }
 0x840   : > { %7079 = vmatprep.subr.msk.mxu0 %vm586_vm0, %v3038_v8  ;;  %v2710_v42 = vmul.f32 1.442695, %v2697_v14 }
 0x841   : > { %v2675_v5 = vpop.permute.xlu1 %2674  ;;  %7080 = vmatpush3.xpose.msk.msra.mxu0 %vm586_vm0, %v3038_v8 }
 0x842   : > { %v2696_v24 = vsub.f32 %v9211_v20, %v2675_v5 }
 0x843   : > { %v2685_v10 = vpop.permute.xlu0 %2684 }
 0x844   : > { %v2708_v31 = vmul.f32 1.442695, %v2696_v24  ;;  %v2698_v57 = vsub.f32 %v9219_v43, %v2685_v10 }
 0x845   : > { %v3036_v32 = vpop.permute.xlu1 %3035 }
 0x846   : > { %7412 = vpow2.f32 %v2708_v31  ;;  %v2712_v53 = vmul.f32 1.442695, %v2698_v57  ;;  %7081 = vmatprep.subr.msk.mxu0 %vm586_vm0, %v3036_v32 }
 0x847   : > { %7414 = vpow2.f32 %v2710_v42  ;;  %7082 = vmatpush3.xpose.msk.msra.mxu0 %vm586_vm0, %v3036_v32  ;;  %v2690_v46 = vpop.permute.xlu0 %2689 }
 0x848   : > { %7416 = vpow2.f32 %v2712_v53  ;;  %v2699_v15 = vsub.f32 %v9215_v28, %v2690_v46 }
 0x849   : > { %v3034_v54 = vpop.permute.xlu1 %3033 }
 0x84a   : > { %v2714_v60 = vmul.f32 1.442695, %v2699_v15  ;;  %7083 = vmatprep.subr.msk.mxu0 %vm586_vm0, %v3034_v54 }
 0x84b   : > { %v9396_v20 = vpop.eup %7408  ;;  %7084 = vmatpush3.xpose.msk.msra.mxu0 %vm586_vm0, %v3034_v54  ;;  %v3032_v43 = vpop.permute.xlu0 %3031 }
 0x84c   : > { %v9399_v14 = vpop.eup %7410  ;;  %7418 = vpow2.f32 %v2714_v60  ;;  %7070 = vmatprep.mubr.msk.f32.mxu0 %vm845_vm2, %v9396_v20  ;;  %7085 = vmatprep.subr.msk.mxu0 %vm586_vm0, %v3032_v43 }
 0x84d   : > { %7071 = vmatmul.mubr.msk.f32.gmra.mxu0 %vm845_vm2, %v9399_v14  ;;  %v3030_v28 = vpop.permute.xlu1 %3029 }
 0x84f   : > { %7086 = vmatpush3.xpose.msk.msra.mxu0 %vm586_vm0, %v3032_v43  ;;  %v3028_v8 = vpop.permute.xlu0 %3027 }
 0x850   : > { %7087 = vmatprep.subr.msk.mxu0 %vm586_vm0, %v3030_v28 }
 0x851   : > { %v3026_v42 = vpop.permute.xlu1 %3025 }
 0x853   : > { %v9408_v5 = vpop.eup %7412  ;;  %7088 = vmatpush3.xpose.msk.msra.mxu0 %vm586_vm0, %v3030_v28  ;;  %v3024_v32 = vpop.permute.xlu0 %3023 }
 0x854   : > { %v9411_v24 = vpop.eup %7414  ;;  %7073 = vmatprep.mubr.msk.f32.mxu0 %vm845_vm2, %v9408_v5  ;;  %7089 = vmatprep.subr.msk.mxu0 %vm586_vm0, %v3028_v8 }
 0x855   : > { %v9416_v10 = vpop.eup %7416  ;;  %7074 = vmatmul.mubr.msk.f32.gmra.mxu0 %vm845_vm2, %v9411_v24  ;;  %v3008_v31 = vpop.permute.xlu1 %3007 }
 0x856   : > { %7076 = vmatprep.mubr.msk.f32.mxu0 %vm845_vm2, %v9416_v10 }
 0x857   : > { %7090 = vmatpush3.xpose.msk.msra.mxu0 %vm586_vm0, %v3028_v8  ;;  %v3010_v53 = vpop.permute.xlu0 %3009 }
 0x858   : > { %7091 = vmatprep.subr.msk.mxu0 %vm586_vm0, %v3026_v42 }
 0x859   : > { %v9424_v57 = vpop.eup %7418  ;;  %v3012_v46 = vpop.permute.xlu1 %3011 }
 0x85a   : > { %7077 = vmatmul.mubr.msk.f32.gmra.mxu0 %vm845_vm2, %v9424_v57 }
 0x85b   : > { %7092 = vmatpush3.xpose.msk.msra.mxu0 %vm586_vm0, %v3026_v42  ;;  %7095 = vmatprep.mubr.msk.f32.mxu0 %vm586_vm0, %v3008_v31  ;;  %v3014_v15 = vpop.permute.xlu0 %3013 }
 0x85c   : > { %7093 = vmatprep.subr.msk.mxu0 %vm586_vm0, %v3024_v32 }
 0x85d   : > { %v3016_v54 = vpop.permute.xlu1 %3015 }
 0x85f   : > { %7094 = vmatpush3.xpose.msk.msra.mxu0 %vm586_vm0, %v3024_v32  ;;  %v3018_v60 = vpop.permute.xlu0 %3017 }
 0x861   : > { %v3020_v43 = vpop.permute.xlu1 %3019 }
 0x862   : > { %7096 = vmatmul.mubr.msk.f32.vlgmr.msra.gmra.mxu0 %vm586_vm0, %v3010_v53 }
 0x863   : > { %7098 = vmatprep.mubr.msk.f32.mxu0 %vm586_vm0, %v3012_v46  ;;  %v3022_v28 = vpop.permute.xlu0 %3021 }
 0x866   : > { %7099 = vmatmul.mubr.msk.f32.gmra.mxu0 %vm586_vm0, %v3014_v15 }
 0x867   : > { %7101 = vmatprep.mubr.msk.f32.mxu0 %vm586_vm0, %v3016_v54 }
 0x86a   : > { %7102 = vmatmul.mubr.msk.f32.gmra.mxu0 %vm586_vm0, %v3018_v60 }
 0x86b   : > { %7104 = vmatprep.mubr.msk.f32.mxu0 %vm586_vm0, %v3020_v43 }
 0x86e   : > { %7105 = vmatmul.mubr.msk.f32.gmra.mxu0 %vm586_vm0, %v3022_v28 }
 0x8ff   : > { %v9439_v8 = vpop.f32.mrf.mxu0 }
 0x900   : > { %11556 = vst [vmem:[#allocation97_spill] sm:$0xff] %v9439_v8 }
 0x901   : > { %v9441_v42 = vpop.f32.mrf.mxu0 }
 0x902   : > { %11557 = vst [vmem:[#allocation98_spill] sm:$0xff] %v9441_v42 }
 0x90d   : > { %v9443_v31 = vpop.f32.mrf.mxu0 }
 0x90e   : > { %11558 = vst [vmem:[#allocation99_spill] sm:$0xff] %v9443_v31 }
 0x90f   : > { %v9445_v32 = vpop.f32.mrf.mxu0 }
 0x910   : > { %11559 = vst [vmem:[#allocation100_spill] sm:$0xff] %v9445_v32 }
 0x915   : > { %v9447_v53 = vpop.f32.mrf.mxu0 }
 0x916   : > { %11560 = vst [vmem:[#allocation101_spill] sm:$0xff] %v9447_v53 }
 0x917   : > { %v9449_v46 = vpop.f32.mrf.mxu0 }
 0x918   : > { %11561 = vst [vmem:[#allocation102_spill] sm:$0xff] %v9449_v46 }
 0x91a   : > { %v9451_v15 = vpop.f32.mrf.mxu0 }
 0x91b   : > { %11562 = vst [vmem:[#allocation103_spill] sm:$0xff] %v9451_v15 }
 0x91c   : > { %v9453_v54 = vpop.f32.mrf.mxu0 }
 0x91d   : > { %11563 = vst [vmem:[#allocation104_spill] sm:$0xff] %v9453_v54 }
 0x922   : > { %v9455_v60 = vpop.f32.mrf.mxu0 }
 0x923   : > { %v3188_v43 = vsel %vm845_vm2, %v9455_v60, -inf }
 0x924   : > { %3189 = vmax.xlane.f32.xlu0 %v3188_v43  ;;  %v9459_v28 = vpop.f32.mrf.mxu0 }
 0x925   : > { %v3185_v0 = vsel %vm845_vm2, %v9459_v28, -inf }
 0x926   : > { %3186 = vmax.xlane.f32.xlu1 %v3185_v0  ;;  %v9463_v32 = vpop.f32.mrf.mxu0 }
 0x927   : > { %v3194_v46 = vsel %vm845_vm2, %v9463_v32, -inf }
 0x928   : > { %v9467_v15 = vpop.f32.mrf.mxu0 }
 0x929   : > { %v3191_v54 = vsel %vm845_vm2, %v9467_v15, -inf }
 0x92a   : > { %3195 = vmax.xlane.f32.xlu1 %v3194_v46  ;;  %3192 = vmax.xlane.f32.xlu0 %v3191_v54  ;;  %v9471_v53 = vpop.f32.mrf.mxu0  ;;  %v9491_v54 = vld [vmem:[#allocation2 + $0x108] sm:$0xff] }
 0x92b   : > { %v3200_v43 = vsel %vm845_vm2, %v9471_v53, -inf  ;;  %11564 = vst [vmem:[#allocation105_spill] sm:$0xff] %v9491_v54 }
 0x92c   : > { %v9475_v31 = vpop.f32.mrf.mxu0 }
 0x92d   : > { %v3197_v0 = vsel %vm845_vm2, %v9475_v31, -inf }
 0x92e   : > { %3201 = vmax.xlane.f32.xlu1 %v3200_v43  ;;  %3198 = vmax.xlane.f32.xlu0 %v3197_v0  ;;  %v9479_v8 = vpop.f32.mrf.mxu0  ;;  %v9493_v0 = vld [vmem:[#allocation2 + $0x100] sm:$0xff] }
 0x92f   : > { %v3206_v42 = vsel %vm845_vm2, %v9479_v8, -inf }
 0x930   : > { %v9483_v38 = vpop.f32.mrf.mxu0 }
 0x931   : > { %v3203_v46 = vsel %vm845_vm2, %v9483_v38, -inf }
 0x932   : > { %3207 = vmax.xlane.f32.xlu1 %v3206_v42  ;;  %3204 = vmax.xlane.f32.xlu0 %v3203_v46  ;;  %v9508_v42 = vld [vmem:[#allocation2 + $0x110] sm:$0xff]  ;;  %v9545_v46 = vld [vmem:[#allocation2 + $0x138] sm:$0xff] }
 0x933   : > { %11568 = vst [vmem:[#allocation109_spill] sm:$0xff] %v9508_v42  ;;  %11572 = vst [vmem:[#allocation113_spill] sm:$0xff] %v9545_v46 }
 0x943   : > { %3433 = vrot.lane.b32.xlu1 %v9224_v30, %s7842_s30 }
 0x948   : > { %3431 = vrot.lane.b32.xlu0 %v9229_v13, %s7842_s30  ;;  %v9506_v13 = vld [vmem:[#allocation2 + $0x118] sm:$0xff] }
 0x949   : > { %11567 = vst [vmem:[#allocation108_spill] sm:$0xff] %v9506_v13 }
 0x9ad   : > { %v3190_v43 = vpop.xlane.xlu0 %3189 }
 0x9ae   : > { %v9496_v26 = vmax.f32 %v9491_v54, %v3190_v43  ;;  %v9523_v54 = vld [vmem:[#allocation2 + $0x128] sm:$0xff] }
 0x9af   : > { %v3187_v4 = vpop.xlane.xlu1 %3186  ;;  %11570 = vst [vmem:[#allocation111_spill] sm:$0xff] %v9523_v54 }
 0x9b0   : > { %11565 = vst [vmem:[#allocation106_spill] sm:$0xff] %v9496_v26  ;;  %3589 = vst.msk [vmem:[#allocation2 + $0x108] sm:$0xff] %vm457_vm1, %v9496_v26  ;;  %v9503_v30 = vmax.f32 %v9493_v0, %v3187_v4  ;;  %3248 = vperm.xlu1 %7355, %v9496_v26  }
 0x9b2   : > { %11566 = vst [vmem:[#allocation107_spill] sm:$0xff] %v9503_v30  ;;  %3588 = vst.msk [vmem:[#allocation2 + $0x100] sm:$0xff] %vm457_vm1, %v9503_v30  ;;  %3243 = vperm.xlu0 %7354, %v9503_v30  }
 0x9b3   : > { %v3196_v43 = vpop.xlane.xlu1 %3195  ;;  %v3193_v3 = vpop.xlane.xlu0 %3192 }
 0x9b4   : > { %3429 = vrot.lane.b32.xlu1 %v9258_v23, %s7842_s30  ;;  %v9518_v4 = vmax.f32 %v9506_v13, %v3196_v43  ;;  %v9521_v26 = vmax.f32 %v9508_v42, %v3193_v3  ;;  %v9547_v13 = vld [vmem:[#allocation2 + $0x130] sm:$0xff]  ;;  %v7762_v23 = vld [vmem:[%s7935_s25 + $0x8] sm:$0xff] }
 0x9b6   : > { %11569 = vst [vmem:[#allocation110_spill] sm:$0xff] %v9518_v4  ;;  %3427 = vrot.lane.b32.xlu0 %v9273_v50, %s7842_s30  ;;  %3591 = vst.msk [vmem:[#allocation2 + $0x118] sm:$0xff] %vm457_vm1, %v9518_v4 }
 0x9b7   : > { %3590 = vst.msk [vmem:[#allocation2 + $0x110] sm:$0xff] %vm457_vm1, %v9521_v26  ;;  %v3202_v3 = vpop.xlane.xlu1 %3201  ;;  %v3199_v43 = vpop.xlane.xlu0 %3198 }
 0x9b8   : > { %3425 = vrot.lane.b32.xlu1 %v9286_v59, %s7842_s30  ;;  %v9540_v30 = vmax.f32 %v9523_v54, %v3202_v3  ;;  %v9543_v50 = vmax.f32 %v9525_v17, %v3199_v43  ;;  %v7763_v59 = vld [vmem:[%s7935_s25] sm:$0xff] }
 0x9ba   : > { %11571 = vst [vmem:[#allocation112_spill] sm:$0xff] %v9540_v30  ;;  %3423 = vrot.lane.b32.xlu0 %v9301_v63, %s7842_s30  ;;  %3593 = vst.msk [vmem:[#allocation2 + $0x128] sm:$0xff] %vm457_vm1, %v9540_v30 }
 0x9bb   : > { %3592 = vst.msk [vmem:[#allocation2 + $0x120] sm:$0xff] %vm457_vm1, %v9543_v50  ;;  %v3208_v3 = vpop.xlane.xlu1 %3207  ;;  %v3205_v43 = vpop.xlane.xlu0 %3204 }
 0x9bc   : > { %3258 = vperm.xlu1 %7355, %v9518_v4   ;;  %v9561_v42 = vmax.f32 %v9545_v46, %v3208_v3  ;;  %v9564_v63 = vmax.f32 %v9547_v13, %v3205_v43  ;;  %v7757_v43 = vld [vmem:[%s7935_s25 + $0x30] sm:$0xff]  ;;  %v2133_v46 = vld [vmem:[#allocation3 + $0xa8] sm:$0xff] }
 0x9be   : > { %11573 = vst [vmem:[#allocation114_spill] sm:$0xff] %v9561_v42  ;;  %3421 = vrot.lane.b32.xlu0 %v9321_v55, %s7842_s30  ;;  %3595 = vst.msk [vmem:[#allocation2 + $0x138] sm:$0xff] %vm457_vm1, %v9561_v42  ;;  %v7756_v55 = vld [vmem:[%s7935_s25 + $0x38] sm:$0xff] }
 0x9bf   : > { %3594 = vst.msk [vmem:[#allocation2 + $0x130] sm:$0xff] %vm457_vm1, %v9564_v63  ;;  %v3434_v3 = vpop.permute.xlu1 %3433  ;;  %v3432_v54 = vpop.permute.xlu0 %3431 }
 0x9c0   : > { %3253 = vperm.xlu1 %7355, %v9521_v26   ;;  %7107 = vmatprep.subr.mxu1 %v3434_v3 }
 0x9c1   : > { %7108 = vmatpush3.msra.mxu1 %v3434_v3  ;;  %v7760_v3 = vld [vmem:[%s7935_s25 + $0x18] sm:$0xff] }
 0x9c2   : > { %3419 = vrot.lane.b32.xlu0 %v9335_v18, %s7842_s30  ;;  %7109 = vmatprep.subr.mxu1 %v3432_v54  ;;  %v7758_v18 = vld [vmem:[%s7935_s25 + $0x28] sm:$0xff] }
 0x9c3   : > { %7110 = vmatpush3.msra.mxu1 %v3432_v54  ;;  %v7759_v54 = vld [vmem:[%s7935_s25 + $0x20] sm:$0xff] }
 0x9c4   : > { %3268 = vperm.xlu1 %7355, %v9540_v30  }
 0x9c6   : > { %3626 = vrot.lane.b32.xlu0 %v7756_v55, %s7843_s4  ;;  %v7761_v55 = vld [vmem:[%s7935_s25 + $0x10] sm:$0xff] }
 0x9c8   : > { %3263 = vperm.xlu1 %7355, %v9543_v50  }
 0x9ca   : > { %3273 = vperm.xlu0 %7354, %v9564_v63  }
 0x9cc   : > { %3624 = vrot.lane.b32.xlu1 %v7757_v43, %s7843_s4  ;;  %v988_v43 = vsel %vm845_vm2, %v8628_v56, 0.0  ;;  %v1003_v56 = vsel %vm845_vm2, %v8653_v52, 0.0  ;;  %v1559_v52 = vsel %vm845_vm2, %v8904_v25, 0.0  ;;  %v2144_v25 = vsel %vm845_vm2, %v9115_v1, 0.0  ;;  %v11578_v1 = vld [vmem:[#allocation15_spill] sm:$0xff] }
 0x9ce   : > { %3278 = vperm.xlu0 %7354, %v9561_v42  }
 0x9d0   : > { %3622 = vrot.lane.b32.xlu1 %v7758_v18, %s7843_s4  ;;  %v991_v18 = vsel %vm845_vm2, %v8631_v58, 0.0  ;;  %v1550_v58 = vsel %vm845_vm2, %v8877_v19, 0.0  ;;  %v1562_v19 = vsel %vm845_vm2, %v8907_v29, 0.0  ;;  %v11575_v29 = vld [vmem:[#allocation13_spill] sm:$0xff] }
 0x9d2   : > { %3620 = vrot.lane.b32.xlu0 %v7759_v54, %s7843_s4  ;;  %v994_v54 = vsel %vm845_vm2, %v8640_v2, 0.0  ;;  %v1547_v2 = vsel %vm845_vm2, %v8875_v39, 0.0  ;;  %v1565_v39 = vsel %vm845_vm2, %v8912_v61, 0.0  ;;  %v11576_v61 = vsub.f32 %v8514_v21, %v11575_v29 }
 0x9d4   : > { %3618 = vrot.lane.b32.xlu1 %v7760_v3, %s7843_s4 }
 0x9d6   : > { %3616 = vrot.lane.b32.xlu0 %v7761_v55, %s7843_s4 }
 0x9d8   : > { %3614 = vrot.lane.b32.xlu1 %v7762_v23, %s7843_s4  ;;  %v985_v23 = vsel %vm845_vm2, %v8616_v35, 0.0  ;;  %v997_v35 = vsel %vm845_vm2, %v8643_v49, 0.0  ;;  %v1553_v49 = vsel %vm845_vm2, %v8892_v48, 0.0  ;;  %v1568_v48 = vsel %vm845_vm2, %v8920_v9, 0.0 }
 0x9da   : > { %3612 = vrot.lane.b32.xlu0 %v7763_v59, %s7843_s4  ;;  %v982_v59 = vsel %vm845_vm2, %v8610_v16, 0.0  ;;  %v1000_v16 = vsel %vm845_vm2, %v8650_v51, 0.0  ;;  %v1556_v51 = vsel %vm845_vm2, %v8895_v12, 0.0  ;;  %v11574_v12 = vsub.f32 %v8475_v7, %v8486_v11 }
 0x9dc   : > { %3596 = vrot.lane.b32.xlu1 %v7953_v27, %s7843_s4  ;;  %v886_v3 = vmul.f32 1.442695, %v11574_v12  ;;  %v11585_v12 = vld [vmem:[#allocation73_spill] sm:$0xff] }
 0x9de   : > { %3598 = vrot.lane.b32.xlu0 %v8001_v36, %s7843_s4  ;;  %7420 = vpow2.f32 %v886_v3  ;;  %v2159_v3 = vsel %vm845_vm2, %v11585_v12, 0.0 }
 0x9e0   : > { %3600 = vrot.lane.b32.xlu1 %v8005_v37, %s7843_s4 }
 0x9e2   : > { %3602 = vrot.lane.b32.xlu0 %v8011_v40, %s7843_s4 }
 0x9e4   : > { %3604 = vrot.lane.b32.xlu1 %v8015_v41, %s7843_s4 }
 0x9e6   : > { %3606 = vrot.lane.b32.xlu0 %v8021_v44, %s7843_s4 }
 0x9e8   : > { %3608 = vrot.lane.b32.xlu1 %v8025_v45, %s7843_s4 }
 0x9ea   : > { %3610 = vrot.lane.b32.xlu0 %v8030_v47, %s7843_s4 }
 0xa09   : > { %986 = vadd.xlane.f32.xlu0 %v985_v23 }
 0xa0c   : > { %983 = vadd.xlane.f32.xlu1 %v982_v59  ;;  %v892_v59 = vmul.f32 1.442695, %v11576_v61 }
 0xa0d   : > { %989 = vadd.xlane.f32.xlu0 %v988_v43 }
 0xa0e   : > { %7422 = vpow2.f32 %v892_v59 }
 0xa10   : > { %992 = vadd.xlane.f32.xlu1 %v991_v18 }
 0xa11   : > { %995 = vadd.xlane.f32.xlu0 %v994_v54 }
 0xa14   : > { %998 = vadd.xlane.f32.xlu1 %v997_v35  ;;  %v11577_v35 = vld [vmem:[#allocation69_spill] sm:$0xff] }
 0xa15   : > { %1001 = vadd.xlane.f32.xlu0 %v1000_v16  ;;  %v2147_v7 = vsel %vm845_vm2, %v11577_v35, 0.0 }
 0xa18   : > { %1004 = vadd.xlane.f32.xlu1 %v1003_v56 }
 0xa19   : > { %1551 = vadd.xlane.f32.xlu0 %v1550_v58 }
 0xa1c   : > { %1548 = vadd.xlane.f32.xlu1 %v1547_v2 }
 0xa1d   : > { %1554 = vadd.xlane.f32.xlu0 %v1553_v49  ;;  %v11582_v49 = vld [vmem:[#allocation19_spill] sm:$0xff] }
 0xa20   : > { %1557 = vadd.xlane.f32.xlu1 %v1556_v51  ;;  %v11583_v51 = vld [vmem:[#allocation20_spill] sm:$0xff] }
 0xa21   : > { %1560 = vadd.xlane.f32.xlu0 %v1559_v52  ;;  %v11584_v52 = vsub.f32 %v11582_v49, %v11583_v51 }
 0xa24   : > { %1563 = vadd.xlane.f32.xlu1 %v1562_v19  ;;  %v900_v19 = vmul.f32 1.442695, %v11584_v52 }
 0xa25   : > { %1566 = vadd.xlane.f32.xlu0 %v1565_v39 }
 0xa28   : > { %1569 = vadd.xlane.f32.xlu1 %v1568_v48 }
 0xa2b   : > { %v3249_v55 = vpop.permute.xlu1 %3248 }
 0xa2c   : > { %v3282_v23 = vsub.f32 %v9455_v60, %v3249_v55  ;;  %2145 = vadd.xlane.f32.xlu1 %v2144_v25  ;;  %v11579_v60 = vld [vmem:[#allocation17_spill] sm:$0xff]  ;;  %v11586_v55 = vld [vmem:[#allocation30_spill] sm:$0xff]  ;;  %v11587_v25 = vld [vmem:[#allocation32_spill] sm:$0xff] }
 0xa2d   : > { %v3244_v43 = vpop.permute.xlu0 %3243  ;;  %v11580_v16 = vsub.f32 %v11578_v1, %v11579_v60 }
 0xa2e   : > { %v3281_v9 = vsub.f32 %v9459_v28, %v3244_v43  ;;  %v3291_v18 = vmul.f32 1.442695, %v3282_v23  ;;  %v11581_v28 = vld [vmem:[#allocation71_spill] sm:$0xff]  ;;  %v11588_v23 = vsub.f32 %v11586_v55, %v11587_v25  ;;  %v9673_v43 = vpop.eup %7420 }
 0xa2f   : > { %v3430_v54 = vpop.permute.xlu1 %3429  ;;  %v896_v56 = vmul.f32 1.442695, %v11580_v16  ;;  %v2153_v2 = vsel %vm845_vm2, %v11581_v28, 0.0  ;;  %v9680_v16 = vpop.eup %7422  ;;  %v11593_v28 = vld [vmem:[#allocation39_spill] sm:$0xff] }
 0xa30   : > { %v3289_v11 = vmul.f32 1.442695, %v3281_v9  ;;  %2148 = vadd.xlane.f32.xlu1 %v2147_v7  ;;  %7111 = vmatprep.subr.mxu1 %v3430_v54  ;;  %v1450_v29 = vmul.f32 1.442695, %v11588_v23  ;;  %v11589_v9 = vld [vmem:[#allocation33_spill] sm:$0xff] }
 0xa31   : > { %7112 = vmatpush3.msra.mxu1 %v3430_v54  ;;  %v3428_v58 = vpop.permute.xlu0 %3427 }
 0xa32   : > { %7424 = vpow2.f32 %v3289_v11  ;;  %7113 = vmatprep.subr.mxu1 %v3428_v58 }
 0xa33   : > { %7426 = vpow2.f32 %v3291_v18  ;;  %v3426_v21 = vpop.permute.xlu1 %3425  ;;  %7114 = vmatpush3.msra.mxu1 %v3428_v58  ;;  %v11590_v18 = vld [vmem:[#allocation35_spill] sm:$0xff] }
 0xa34   : > { %2154 = vadd.xlane.f32.xlu1 %v2153_v2  ;;  %7115 = vmatprep.subr.mxu1 %v3426_v21  ;;  %7428 = vpow2.f32 %v896_v56  ;;  %v11591_v54 = vsub.f32 %v11589_v9, %v11590_v18 }
 0xa35   : > { %7116 = vmatpush3.msra.mxu1 %v3426_v21  ;;  %v3424_v39 = vpop.permute.xlu0 %3423  ;;  %7430 = vpow2.f32 %v900_v19 }
 0xa36   : > { %7117 = vmatprep.subr.mxu1 %v3424_v39  ;;  %v1456_v35 = vmul.f32 1.442695, %v11591_v54  ;;  %7432 = vpow2.f32 %v1450_v29 }
 0xa37   : > { %v3259_v48 = vpop.permute.xlu1 %3258  ;;  %7118 = vmatpush3.msra.mxu1 %v3424_v39 }
 0xa38   : > { %2160 = vadd.xlane.f32.xlu1 %v2159_v3  ;;  %v3284_v61 = vsub.f32 %v9463_v32, %v3259_v48  ;;  %7434 = vpow2.f32 %v1456_v35 }
 0xa39   : > { %v3422_v59 = vpop.permute.xlu0 %3421 }
 0xa3a   : > { %7119 = vmatprep.subr.mxu1 %v3422_v59  ;;  %v3295_v1 = vmul.f32 1.442695, %v3284_v61 }
 0xa3b   : > { %v3254_v7 = vpop.permute.xlu1 %3253  ;;  %1033 = vperm.xlu0 %7354, %v9673_v43   ;;  %7120 = vmatpush3.msra.mxu1 %v3422_v59 }
 0xa3c   : > { %v3283_v11 = vsub.f32 %v9467_v15, %v3254_v7  ;;  %v11592_v15 = vld [vmem:[#allocation37_spill] sm:$0xff] }
 0xa3d   : > { %v3420_v60 = vpop.permute.xlu0 %3419  ;;  %v11594_v2 = vsub.f32 %v11592_v15, %v11593_v28 }
 0xa3e   : > { %v3293_v32 = vmul.f32 1.442695, %v3283_v11  ;;  %7121 = vmatprep.subr.mxu1 %v3420_v60 }
 0xa3f   : > { %v9682_v56 = vpop.eup %7424  ;;  %v3269_v58 = vpop.permute.xlu1 %3268  ;;  %1048 = vperm.xlu0 %7354, %v9680_v16   ;;  %7122 = vmatpush3.msra.mxu1 %v3420_v60  ;;  %v1460_v49 = vmul.f32 1.442695, %v11594_v2 }
 0xa40   : > { %v9685_v21 = vpop.eup %7426  ;;  %7436 = vpow2.f32 %v3293_v32  ;;  %7123 = vmatprep.mubr.msk.f32.mxu1 %vm845_vm2, %v9682_v56  ;;  %v3286_v51 = vsub.f32 %v9471_v53, %v3269_v58 }
 0xa41   : > { %7438 = vpow2.f32 %v3295_v1  ;;  %7124 = vmatmul.mubr.msk.f32.vlgmr.msra.gmra.mxu1 %vm845_vm2, %v9685_v21  ;;  %v3627_v52 = vpop.permute.xlu0 %3626  ;;  %v9695_v19 = vpop.eup %7428 }
 0xa42   : > { %7135 = vmatprep.subr.msk.mxu1 %vm586_vm0, %v3627_v52  ;;  %7440 = vpow2.f32 %v1460_v49  ;;  %v3299_v12 = vmul.f32 1.442695, %v3286_v51  ;;  %v9701_v55 = vpop.eup %7430 }
 0xa43   : > { %v3264_v39 = vpop.permute.xlu1 %3263  ;;  %1058 = vperm.xlu0 %7354, %v9695_v19   ;;  %7136 = vmatpush3.xpose.msk.msra.mxu1 %vm586_vm0, %v3627_v52 }
 0xa44   : > { %v3285_v48 = vsub.f32 %v9475_v31, %v3264_v39  ;;  %v9707_v31 = vpop.eup %7432 }
 0xa45   : > { %v3274_v3 = vpop.permute.xlu0 %3273 }
 0xa46   : > { %v3297_v53 = vmul.f32 1.442695, %v3285_v48  ;;  %v3287_v25 = vsub.f32 %v9483_v38, %v3274_v3  ;;  %v9711_v38 = vpop.eup %7434 }
 0xa47   : > { %v3625_v23 = vpop.permute.xlu1 %3624  ;;  %1068 = vperm.xlu0 %7354, %v9701_v55  }
 0xa48   : > { %7442 = vpow2.f32 %v3297_v53  ;;  %v3301_v29 = vmul.f32 1.442695, %v3287_v25  ;;  %7137 = vmatprep.subr.msk.mxu1 %vm586_vm0, %v3625_v23  ;;  %v11595_v25 = vld [vmem:[#allocation8_spill] sm:$0xff] }
 0xa49   : > { %7444 = vpow2.f32 %v3299_v12  ;;  %7138 = vmatpush3.xpose.msk.msra.mxu1 %vm586_vm0, %v3625_v23  ;;  %v3279_v61 = vpop.permute.xlu0 %3278  ;;  %v11596_v23 = vld [vmem:[#allocation10_spill] sm:$0xff] }
 0xa4a   : > { %7446 = vpow2.f32 %v3301_v29  ;;  %v3288_v59 = vsub.f32 %v9479_v8, %v3279_v61  ;;  %v11597_v29 = vsub.f32 %v11595_v25, %v11596_v23  ;;  %v967_v23 = vld [vmem:[#allocation3 + $0x8] sm:$0xff] }
 0xa4b   : > { %v3623_v9 = vpop.permute.xlu1 %3622  ;;  %1598 = vperm.xlu0 %7354, %v9707_v31  }
 0xa4c   : > { %v3303_v18 = vmul.f32 1.442695, %v3288_v59  ;;  %7139 = vmatprep.subr.msk.mxu1 %vm586_vm0, %v3623_v9  ;;  %v888_v61 = vmul.f32 1.442695, %v11597_v29  ;;  %v11598_v59 = vld [vmem:[#allocation9_spill] sm:$0xff]  ;;  %v11610_v29 = vld [vmem:[#allocation34_spill] sm:$0xff] }
 0xa4d   : > { %v9714_v54 = vpop.eup %7436  ;;  %7140 = vmatpush3.xpose.msk.msra.mxu1 %vm586_vm0, %v3623_v9  ;;  %v3621_v35 = vpop.permute.xlu0 %3620  ;;  %v11599_v9 = vld [vmem:[#allocation11_spill] sm:$0xff] }
 0xa4e   : > { %v9717_v7 = vpop.eup %7438  ;;  %7448 = vpow2.f32 %v3303_v18  ;;  %7126 = vmatprep.mubr.msk.f32.mxu1 %vm845_vm2, %v9714_v54  ;;  %7141 = vmatprep.subr.msk.mxu1 %vm586_vm0, %v3621_v35  ;;  %v11600_v18 = vsub.f32 %v11598_v59, %v11599_v9 }
 0xa4f   : > { %1613 = vperm.xlu0 %7354, %v9711_v38   ;;  %7127 = vmatmul.mubr.msk.f32.gmra.mxu1 %vm845_vm2, %v9717_v7  ;;  %v3619_v8 = vpop.permute.xlu1 %3618  ;;  %v9726_v1 = vpop.eup %7440  ;;  %7450 = vpow2.f32 %v888_v61  ;;  %v11611_v61 = vld [vmem:[#allocation36_spill] sm:$0xff] }
 0xa50   : > { %v11612_v59 = vsub.f32 %v11610_v29, %v11611_v61 }
 0xa51   : > { %7142 = vmatpush3.xpose.msk.msra.mxu1 %vm586_vm0, %v3621_v35  ;;  %v3617_v11 = vpop.permute.xlu0 %3616  ;;  %v890_v35 = vmul.f32 1.442695, %v11600_v18 }
 0xa52   : > { %7143 = vmatprep.subr.msk.mxu1 %vm586_vm0, %v3619_v8  ;;  %v1454_v9 = vmul.f32 1.442695, %v11612_v59  ;;  %v970_v59 = vld [vmem:[#allocation3 + $0x20] sm:$0xff] }
 0xa53   : > { %1623 = vperm.xlu0 %7354, %v9726_v1   ;;  %v3615_v60 = vpop.permute.xlu1 %3614  ;;  %7452 = vpow2.f32 %v890_v35  ;;  %v966_v35 = vld [vmem:[#allocation3] sm:$0xff] }
 0xa55   : > { %v9730_v32 = vpop.eup %7442  ;;  %7144 = vmatpush3.xpose.msk.msra.mxu1 %vm586_vm0, %v3619_v8  ;;  %v3613_v58 = vpop.permute.xlu0 %3612  ;;  %v11601_v8 = vld [vmem:[#allocation12_spill] sm:$0xff] }
 0xa56   : > { %v9733_v15 = vpop.eup %7444  ;;  %7129 = vmatprep.mubr.msk.f32.mxu1 %vm845_vm2, %v9730_v32  ;;  %7145 = vmatprep.subr.msk.mxu1 %vm586_vm0, %v3617_v11 }
 0xa57   : > { %v9738_v28 = vpop.eup %7446  ;;  %7130 = vmatmul.mubr.msk.f32.gmra.mxu1 %vm845_vm2, %v9733_v15  ;;  %v3597_v2 = vpop.permute.xlu1 %3596 }
 0xa58   : > { %7132 = vmatprep.mubr.msk.f32.mxu1 %vm845_vm2, %v9738_v28 }
 0xa59   : > { %7146 = vmatpush3.xpose.msk.msra.mxu1 %vm586_vm0, %v3617_v11  ;;  %v3599_v51 = vpop.permute.xlu0 %3598  ;;  %v11602_v11 = vld [vmem:[#allocation14_spill] sm:$0xff] }
 0xa5a   : > { %7147 = vmatprep.subr.msk.mxu1 %vm586_vm0, %v3615_v60 }
 0xa5b   : > { %v9746_v49 = vpop.eup %7448  ;;  %v3601_v52 = vpop.permute.xlu1 %3600 }
 0xa5c   : > { %7133 = vmatmul.mubr.msk.f32.gmra.mxu1 %vm845_vm2, %v9746_v49  ;;  %v9776_v25 = vpop.eup %7450 }
 0xa5d   : > { %7148 = vmatpush3.xpose.msk.msra.mxu1 %vm586_vm0, %v3615_v60  ;;  %7151 = vmatprep.mubr.msk.f32.mxu1 %vm586_vm0, %v3597_v2  ;;  %v3603_v39 = vpop.permute.xlu0 %3602  ;;  %v11603_v60 = vsub.f32 %v11601_v8, %v11602_v11  ;;  %v11604_v2 = vld [vmem:[#allocation16_spill] sm:$0xff]  ;;  %v975_v18 = vmul.f32 %v9776_v25, %v967_v23 }
 0xa5e   : > { %7149 = vmatprep.subr.msk.mxu1 %vm586_vm0, %v3613_v58 }
 0xa5f   : > { %v3605_v48 = vpop.permute.xlu1 %3604 }
 0xa60   : > { %v9782_v8 = vpop.eup %7452 }
 0xa61   : > { %7150 = vmatpush3.xpose.msk.msra.mxu1 %vm586_vm0, %v3613_v58  ;;  %v3607_v12 = vpop.permute.xlu0 %3606  ;;  %v894_v58 = vmul.f32 1.442695, %v11603_v60  ;;  %v968_v60 = vld [vmem:[#allocation3 + $0x10] sm:$0xff] }
 0xa63   : > { %v3609_v3 = vpop.permute.xlu1 %3608  ;;  %7454 = vpow2.f32 %v894_v58 }
 0xa64   : > { %7152 = vmatmul.mubr.msk.f32.vlgmr.msra.gmra.mxu1 %vm586_vm0, %v3599_v51  ;;  %v11605_v51 = vld [vmem:[#allocation18_spill] sm:$0xff] }
 0xa65   : > { %7154 = vmatprep.mubr.msk.f32.mxu1 %vm586_vm0, %v3601_v52  ;;  %v3611_v53 = vpop.permute.xlu0 %3610  ;;  %v11606_v52 = vsub.f32 %v11604_v2, %v11605_v51  ;;  %v974_v2 = vmul.f32 %v9673_v43, %v966_v35  ;;  %v11613_v51 = vld [vmem:[#allocation38_spill] sm:$0xff] }
 0xa68   : > { %7155 = vmatmul.mubr.msk.f32.gmra.mxu1 %vm586_vm0, %v3603_v39  ;;  %v898_v39 = vmul.f32 1.442695, %v11606_v52  ;;  %v11614_v52 = vld [vmem:[#allocation40_spill] sm:$0xff] }
 0xa69   : > { %7157 = vmatprep.mubr.msk.f32.mxu1 %vm586_vm0, %v3605_v48  ;;  %v11607_v48 = vld [vmem:[#allocation29_spill] sm:$0xff] }
 0xa6a   : > { %7456 = vpow2.f32 %v898_v39  ;;  %v11615_v39 = vsub.f32 %v11613_v51, %v11614_v52  ;;  %v971_v51 = vld [vmem:[#allocation3 + $0x28] sm:$0xff] }
 0xa6c   : > { %7158 = vmatmul.mubr.msk.f32.gmra.mxu1 %vm586_vm0, %v3607_v12  ;;  %v11608_v12 = vld [vmem:[#allocation31_spill] sm:$0xff] }
 0xa6d   : > { %7160 = vmatprep.mubr.msk.f32.mxu1 %vm586_vm0, %v3609_v3  ;;  %v11609_v3 = vsub.f32 %v11607_v48, %v11608_v12  ;;  %v1458_v48 = vmul.f32 1.442695, %v11615_v39 }
 0xa70   : > { %7161 = vmatmul.mubr.msk.f32.gmra.mxu1 %vm586_vm0, %v3611_v53  ;;  %v1452_v53 = vmul.f32 1.442695, %v11609_v3  ;;  %v976_v3 = vmul.f32 %v9782_v8, %v968_v60  ;;  %v9790_v23 = vpop.eup %7454 }
 0xa71   : > { %v978_v60 = vmul.f32 %v9790_v23, %v970_v59 }
 0xa72   : > { %7458 = vpow2.f32 %v1452_v53  ;;  %v969_v53 = vld [vmem:[#allocation3 + $0x18] sm:$0xff] }
 0xa73   : > { %7460 = vpow2.f32 %v1454_v9  ;;  %v977_v43 = vmul.f32 %v9680_v16, %v969_v53  ;;  %v11616_v9 = vld [vmem:[#allocation42_spill] sm:$0xff]  ;;  %v979_v53 = vmul.f32 %v9695_v19, %v971_v51 }
 0xa74   : > { %7462 = vpow2.f32 %v1458_v48 }
 0xa77   : > { %v9799_v52 = vpop.eup %7456 }
 0xa92   : > { %v987_v11 = vpop.xlane.xlu0 %986 }
 0xa93   : > { %v1007_v58 = vadd.f32 %v987_v11, %v975_v18  ;;  %v11617_v18 = vld [vmem:[#allocation44_spill] sm:$0xff] }
 0xa94   : > { %v11618_v35 = vsub.f32 %v11616_v9, %v11617_v18  ;;  %v973_v9 = vld [vmem:[#allocation3 + $0x38] sm:$0xff]  ;;  %v9808_v18 = vpop.eup %7458 }
 0xa95   : > { %1016 = vst.msk [vmem:[#allocation3 + $0x8] sm:$0xff] %vm457_vm1, %v1007_v58  ;;  %v984_v12 = vpop.xlane.xlu1 %983  ;;  %v981_v19 = vmul.f32 %v9701_v55, %v973_v9 }
 0xa96   : > { %v1006_v29 = vadd.f32 %v984_v12, %v974_v2  ;;  %v990_v61 = vpop.xlane.xlu0 %989  ;;  %v1462_v11 = vmul.f32 1.442695, %v11618_v35  ;;  %v972_v12 = vld [vmem:[#allocation3 + $0x30] sm:$0xff] }
 0xa97   : > { %v1008_v42 = vadd.f32 %v990_v61, %v976_v3  ;;  %v11620_v61 = vld [vmem:[#allocation43_spill] sm:$0xff]  ;;  %v980_v59 = vmul.f32 %v9799_v52, %v972_v12  ;;  %v1531_v12 = vld [vmem:[#allocation3 + $0x40] sm:$0xff] }
 0xa98   : > { %1015 = vst.msk [vmem:[#allocation3] sm:$0xff] %vm457_vm1, %v1006_v29  ;;  %v11619_v29 = vld [vmem:[#allocation41_spill] sm:$0xff]  ;;  %7464 = vpow2.f32 %v1462_v11  ;;  %v1539_v55 = vmul.f32 %v9707_v31, %v1531_v12 }
 0xa99   : > { %1017 = vst.msk [vmem:[#allocation3 + $0x10] sm:$0xff] %vm457_vm1, %v1008_v42  ;;  %v993_v58 = vpop.xlane.xlu1 %992  ;;  %v11621_v16 = vsub.f32 %v11619_v29, %v11620_v61  ;;  %v11623_v29 = vld [vmem:[#allocation56_spill] sm:$0xff] }
 0xa9a   : > { %v1009_v2 = vadd.f32 %v993_v58, %v977_v43  ;;  %v996_v39 = vpop.xlane.xlu0 %995  ;;  %v1532_v58 = vld [vmem:[#allocation3 + $0x48] sm:$0xff] }
 0xa9b   : > { %v1010_v3 = vadd.f32 %v996_v39, %v978_v60  ;;  %v1464_v48 = vmul.f32 1.442695, %v11621_v16  ;;  %v11622_v39 = vld [vmem:[#allocation54_spill] sm:$0xff]  ;;  %v1540_v51 = vmul.f32 %v9808_v18, %v1532_v58  ;;  %v1534_v58 = vld [vmem:[#allocation3 + $0x58] sm:$0xff] }
 0xa9c   : > { %1018 = vst.msk [vmem:[#allocation3 + $0x18] sm:$0xff] %vm457_vm1, %v1009_v2  ;;  %v11624_v61 = vsub.f32 %v11622_v39, %v11623_v29  ;;  %v1542_v31 = vmul.f32 %v9711_v38, %v1534_v58 }
 0xa9d   : > { %1019 = vst.msk [vmem:[#allocation3 + $0x20] sm:$0xff] %vm457_vm1, %v1010_v3  ;;  %v999_v42 = vpop.xlane.xlu1 %998  ;;  %7466 = vpow2.f32 %v1464_v48  ;;  %v9817_v3 = vpop.eup %7460 }
 0xa9e   : > { %v1011_v43 = vadd.f32 %v999_v42, %v979_v53  ;;  %v1002_v35 = vpop.xlane.xlu0 %1001  ;;  %v2047_v2 = vmul.f32 1.442695, %v11624_v61  ;;  %v1533_v42 = vld [vmem:[#allocation3 + $0x50] sm:$0xff] }
 0xa9f   : > { %v1012_v60 = vadd.f32 %v1002_v35, %v980_v59  ;;  %v11625_v59 = vld [vmem:[#allocation53_spill] sm:$0xff]  ;;  %v11626_v35 = vld [vmem:[#allocation55_spill] sm:$0xff] }
 0xaa0   : > { %1020 = vst.msk [vmem:[#allocation3 + $0x28] sm:$0xff] %vm457_vm1, %v1011_v43  ;;  %v11627_v39 = vsub.f32 %v11625_v59, %v11626_v35  ;;  %7468 = vpow2.f32 %v2047_v2  ;;  %v1541_v43 = vmul.f32 %v9817_v3, %v1533_v42  ;;  %v11629_v59 = vld [vmem:[#allocation59_spill] sm:$0xff]  ;;  %v1536_v42 = vld [vmem:[#allocation3 + $0x68] sm:$0xff] }
 0xaa1   : > { %1021 = vst.msk [vmem:[#allocation3 + $0x30] sm:$0xff] %vm457_vm1, %v1012_v60  ;;  %v1005_v11 = vpop.xlane.xlu1 %1004  ;;  %v9826_v60 = vpop.eup %7462  ;;  %v1544_v38 = vmul.f32 %v9726_v1, %v1536_v42  ;;  %v2128_v42 = vld [vmem:[#allocation3 + $0x80] sm:$0xff] }
 0xaa2   : > { %v1013_v16 = vadd.f32 %v1005_v11, %v981_v19  ;;  %v1552_v53 = vpop.xlane.xlu0 %1551  ;;  %v2049_v29 = vmul.f32 1.442695, %v11627_v39  ;;  %v1535_v11 = vld [vmem:[#allocation3 + $0x60] sm:$0xff] }
 0xaa3   : > { %v1572_v48 = vadd.f32 %v1552_v53, %v1540_v51  ;;  %v11628_v53 = vld [vmem:[#allocation57_spill] sm:$0xff] }
 0xaa4   : > { %1022 = vst.msk [vmem:[#allocation3 + $0x38] sm:$0xff] %vm457_vm1, %v1013_v16  ;;  %7470 = vpow2.f32 %v2049_v29  ;;  %v11630_v2 = vsub.f32 %v11628_v53, %v11629_v59  ;;  %v1543_v16 = vmul.f32 %v9826_v60, %v1535_v11 }
 0xaa5   : > { %1580 = vst.msk [vmem:[#allocation3 + $0x48] sm:$0xff] %vm457_vm1, %v1572_v48  ;;  %v1549_v9 = vpop.xlane.xlu1 %1548  ;;  %v9835_v48 = vpop.eup %7464 }
 0xaa6   : > { %v1571_v61 = vadd.f32 %v1549_v9, %v1539_v55  ;;  %v1555_v19 = vpop.xlane.xlu0 %1554  ;;  %v2053_v35 = vmul.f32 1.442695, %v11630_v2  ;;  %v1537_v9 = vld [vmem:[#allocation3 + $0x70] sm:$0xff] }
 0xaa7   : > { %v1573_v51 = vadd.f32 %v1555_v19, %v1541_v43  ;;  %v11631_v43 = vld [vmem:[#allocation61_spill] sm:$0xff]  ;;  %v11632_v19 = vld [vmem:[#allocation63_spill] sm:$0xff]  ;;  %v1545_v11 = vmul.f32 %v9835_v48, %v1537_v9  ;;  %v1023_v9 = vld [vmem:[#allocation4] sm:$0xff] }
 0xaa8   : > { %1579 = vst.msk [vmem:[#allocation3 + $0x40] sm:$0xff] %vm457_vm1, %v1571_v61  ;;  %7472 = vpow2.f32 %v2053_v35  ;;  %v11633_v53 = vsub.f32 %v11631_v43, %v11632_v19  ;;  %v2129_v19 = vld [vmem:[#allocation3 + $0x88] sm:$0xff] }
 0xaa9   : > { %1581 = vst.msk [vmem:[#allocation3 + $0x50] sm:$0xff] %vm457_vm1, %v1573_v51  ;;  %v1558_v12 = vpop.xlane.xlu1 %1557  ;;  %v1538_v51 = vld [vmem:[#allocation3 + $0x78] sm:$0xff] }
 0xaaa   : > { %v1574_v39 = vadd.f32 %v1558_v12, %v1542_v31  ;;  %v1561_v55 = vpop.xlane.xlu0 %1560  ;;  %v2057_v59 = vmul.f32 1.442695, %v11633_v53  ;;  %v9842_v58 = vpop.eup %7466 }
 0xaab   : > { %v1575_v29 = vadd.f32 %v1561_v55, %v1543_v16  ;;  %v1546_v35 = vmul.f32 %v9842_v58, %v1538_v51 }
 0xaac   : > { %1582 = vst.msk [vmem:[#allocation3 + $0x58] sm:$0xff] %vm457_vm1, %v1574_v39  ;;  %7474 = vpow2.f32 %v2057_v59 }
 0xaad   : > { %1583 = vst.msk [vmem:[#allocation3 + $0x60] sm:$0xff] %vm457_vm1, %v1575_v29  ;;  %v1564_v61 = vpop.xlane.xlu1 %1563  ;;  %v9848_v16 = vpop.eup %7468 }
 0xaae   : > { %v1576_v2 = vadd.f32 %v1564_v61, %v1544_v38  ;;  %v1567_v31 = vpop.xlane.xlu0 %1566  ;;  %v2136_v55 = vmul.f32 %v9848_v16, %v2128_v42 }
 0xaaf   : > { %v1577_v12 = vadd.f32 %v1567_v31, %v1545_v11  ;;  %v1026_v11 = vld [vmem:[#allocation4 + $0x18] sm:$0xff] }
 0xab0   : > { %1584 = vst.msk [vmem:[#allocation3 + $0x68] sm:$0xff] %vm457_vm1, %v1576_v2  ;;  %v11634_v2 = vld [vmem:[#allocation22_spill] sm:$0xff] }
 0xab1   : > { %1585 = vst.msk [vmem:[#allocation3 + $0x70] sm:$0xff] %vm457_vm1, %v1577_v12  ;;  %v1570_v1 = vpop.xlane.xlu1 %1569  ;;  %v9853_v29 = vpop.eup %7470 }
 0xab2   : > { %v1578_v39 = vadd.f32 %v1570_v1, %v1546_v35  ;;  %v2137_v61 = vmul.f32 %v9853_v29, %v2129_v19  ;;  %v2131_v35 = vld [vmem:[#allocation3 + $0x98] sm:$0xff] }
 0xab3   : > { %v11635_v19 = vld [vmem:[#allocation23_spill] sm:$0xff] }
 0xab4   : > { %1586 = vst.msk [vmem:[#allocation3 + $0x78] sm:$0xff] %vm457_vm1, %v1578_v39 }
 0xab5   : > { %v2146_v43 = vpop.xlane.xlu1 %2145  ;;  %v9857_v51 = vpop.eup %7472 }
 0xab6   : > { %v2168_v53 = vadd.f32 %v2146_v43, %v2136_v55  ;;  %v1034_v59 = vpop.permute.xlu0 %1033  ;;  %v2139_v55 = vmul.f32 %v9857_v51, %v2131_v35 }
 0xab7   : > { %v1071_v38 = vmul.f32 %v1034_v59, %v1023_v9  ;;  %v1028_v9 = vld [vmem:[#allocation4 + $0x28] sm:$0xff] }
 0xab8   : > { %2176 = vst.msk [vmem:[#allocation3 + $0x80] sm:$0xff] %vm457_vm1, %v2168_v53 }
 0xab9   : > { %v1208_v31 = vadd.f32 %v11634_v2, %v1071_v38  ;;  %v2149_v12 = vpop.xlane.xlu1 %2148  ;;  %v9863_v43 = vpop.eup %7474  ;;  %v1030_v2 = vld [vmem:[#allocation4 + $0x38] sm:$0xff] }
 0xaba   : > { %v2169_v1 = vadd.f32 %v2149_v12, %v2137_v61  ;;  %v1049_v42 = vpop.permute.xlu0 %1048 }
 0xabb   : > { %1216 = vst.msk [vmem:[#allocation4] sm:$0xff] %vm586_vm0, %v1208_v31  ;;  %v1074_v39 = vmul.f32 %v1049_v42, %v1026_v11  ;;  %v2141_v11 = vmul.f32 %v9863_v43, %v2133_v46  ;;  %v11636_v31 = vld [vmem:[#allocation25_spill] sm:$0xff]  ;;  %v11638_v46 = vld [vmem:[#allocation46_spill] sm:$0xff] }
 0xabc   : > { %2177 = vst.msk [vmem:[#allocation3 + $0x88] sm:$0xff] %vm457_vm1, %v2169_v1 }
 0xabd   : > { %v1211_v53 = vadd.f32 %v11635_v19, %v1074_v39  ;;  %v2155_v59 = vpop.xlane.xlu1 %2154  ;;  %v11637_v19 = vld [vmem:[#allocation27_spill] sm:$0xff] }
 0xabe   : > { %v2171_v30 = vadd.f32 %v2155_v59, %v2139_v55  ;;  %v1059_v38 = vpop.permute.xlu0 %1058  ;;  %v1588_v55 = vld [vmem:[#allocation4 + $0x40] sm:$0xff] }
 0xabf   : > { %1219 = vst.msk [vmem:[#allocation4 + $0x18] sm:$0xff] %vm586_vm0, %v1211_v53  ;;  %v1076_v61 = vmul.f32 %v1059_v38, %v1028_v9  ;;  %v1591_v9 = vld [vmem:[#allocation4 + $0x58] sm:$0xff] }
 0xac0   : > { %2179 = vst.msk [vmem:[#allocation3 + $0x98] sm:$0xff] %vm457_vm1, %v2171_v30 }
 0xac1   : > { %v1213_v12 = vadd.f32 %v11636_v31, %v1076_v61  ;;  %v2161_v35 = vpop.xlane.xlu1 %2160  ;;  %v11639_v31 = vld [vmem:[#allocation47_spill] sm:$0xff] }
 0xac2   : > { %v2173_v1 = vadd.f32 %v2161_v35, %v2141_v11  ;;  %v1069_v42 = vpop.permute.xlu0 %1068  ;;  %v1593_v11 = vld [vmem:[#allocation4 + $0x68] sm:$0xff] }
 0xac3   : > { %1221 = vst.msk [vmem:[#allocation4 + $0x28] sm:$0xff] %vm586_vm0, %v1213_v12  ;;  %v1078_v39 = vmul.f32 %v1069_v42, %v1030_v2 }
 0xac4   : > { %2181 = vst.msk [vmem:[#allocation3 + $0xa8] sm:$0xff] %vm457_vm1, %v2173_v1  ;;  %v11640_v1 = vld [vmem:[#allocation49_spill] sm:$0xff] }
 0xac5   : > { %v1215_v59 = vadd.f32 %v11637_v19, %v1078_v39 }
 0xac6   : > { %v1599_v53 = vpop.permute.xlu0 %1598 }
 0xac7   : > { %1223 = vst.msk [vmem:[#allocation4 + $0x38] sm:$0xff] %vm586_vm0, %v1215_v59  ;;  %v1636_v30 = vmul.f32 %v1599_v53, %v1588_v55 }
 0xac9   : > { %v1805_v38 = vadd.f32 %v11638_v46, %v1636_v30 }
 0xaca   : > { %v1614_v4 = vpop.permute.xlu0 %1613 }
 0xacb   : > { %1813 = vst.msk [vmem:[#allocation4 + $0x40] sm:$0xff] %vm586_vm0, %v1805_v38  ;;  %v1639_v61 = vmul.f32 %v1614_v4, %v1591_v9 }
 0xacd   : > { %v1808_v12 = vadd.f32 %v11639_v31, %v1639_v61 }
 0xace   : > { %v1624_v2 = vpop.permute.xlu0 %1623 }
 0xacf   : > { %1816 = vst.msk [vmem:[#allocation4 + $0x58] sm:$0xff] %vm586_vm0, %v1808_v12  ;;  %v1641_v35 = vmul.f32 %v1624_v2, %v1593_v11 }
 0xad1   : > { %v1810_v42 = vadd.f32 %v11640_v1, %v1641_v35 }
 0xad3   : > { %1818 = vst.msk [vmem:[#allocation4 + $0x68] sm:$0xff] %vm586_vm0, %v1810_v42 }
 0xb01   : > { %v9880_v39 = vpop.f32.mrf.mxu1 }
 0xb03   : > { %v9882_v55 = vpop.f32.mrf.mxu1 }
 0xb0f   : > { %v9884_v19 = vpop.f32.mrf.mxu1 }
 0xb10   : > { %11641 = vst [vmem:[#allocation13_spill] sm:$0xff] %v9884_v19  ;;  %v11648_v19 = vld [vmem:[#allocation72_spill] sm:$0xff] }
 0xb11   : > { %v9886_v59 = vpop.f32.mrf.mxu1 }
 0xb12   : > { %11642 = vst [vmem:[#allocation69_spill] sm:$0xff] %v9886_v59 }
 0xb17   : > { %v9888_v4 = vpop.f32.mrf.mxu1 }
 0xb18   : > { %11643 = vst [vmem:[#allocation15_spill] sm:$0xff] %v9888_v4 }
 0xb19   : > { %v9890_v53 = vpop.f32.mrf.mxu1 }
 0xb1a   : > { %11644 = vst [vmem:[#allocation17_spill] sm:$0xff] %v9890_v53 }
 0xb1c   : > { %v9892_v30 = vpop.f32.mrf.mxu1 }
 0xb1d   : > { %11645 = vst [vmem:[#allocation71_spill] sm:$0xff] %v9892_v30 }
 0xb1e   : > { %v9894_v9 = vpop.f32.mrf.mxu1 }
 0xb1f   : > { %11646 = vst [vmem:[#allocation19_spill] sm:$0xff] %v9894_v9  ;;  %v11649_v9 = vld [vmem:[#allocation75_spill] sm:$0xff] }
 0xb20   : > { %v2165_v53 = vsel %vm845_vm2, %v11649_v9, 0.0 }
 0xb24   : > { %v9896_v46 = vpop.f32.mrf.mxu1 }
 0xb25   : > { %v3777_v2 = vsel %vm845_vm2, %v9896_v46, -inf }
 0xb26   : > { %v9898_v38 = vpop.f32.mrf.mxu1 }
 0xb27   : > { %v3774_v61 = vsel %vm845_vm2, %v9898_v38, -inf }
 0xb28   : > { %3775 = vmax.xlane.f32.xlu0 %v3774_v61  ;;  %v9902_v11 = vpop.f32.mrf.mxu1  ;;  %v11647_v61 = vld [vmem:[#allocation70_spill] sm:$0xff] }
 0xb29   : > { %v3783_v31 = vsel %vm845_vm2, %v9902_v11, -inf  ;;  %v2150_v30 = vsel %vm845_vm2, %v11647_v61, 0.0 }
 0xb2a   : > { %3784 = vmax.xlane.f32.xlu1 %v3783_v31  ;;  %v9906_v12 = vpop.f32.mrf.mxu1 }
 0xb2c   : > { %3778 = vmax.xlane.f32.xlu0 %v3777_v2  ;;  %v9910_v35 = vpop.f32.mrf.mxu1  ;;  %v2156_v2 = vsel %vm845_vm2, %v11648_v19, 0.0 }
 0xb2d   : > { %v3789_v1 = vsel %vm845_vm2, %v9910_v35, -inf }
 0xb2e   : > { %3790 = vmax.xlane.f32.xlu1 %v3789_v1  ;;  %v9914_v42 = vpop.f32.mrf.mxu1  ;;  %v11650_v1 = vld [vmem:[#allocation74_spill] sm:$0xff] }
 0xb2f   : > { %v2162_v59 = vsel %vm845_vm2, %v11650_v1, 0.0  ;;  %v3786_v61 = vsel %vm845_vm2, %v9914_v42, -inf }
 0xb30   : > { %2151 = vadd.xlane.f32.xlu0 %v2150_v30  ;;  %v9918_v4 = vpop.f32.mrf.mxu1  ;;  %v3780_v30 = vsel %vm845_vm2, %v9906_v12, -inf }
 0xb31   : > { %v3795_v31 = vsel %vm845_vm2, %v9918_v4, -inf }
 0xb32   : > { %3796 = vmax.xlane.f32.xlu1 %v3795_v31  ;;  %v9932_v31 = vpop.f32.mrf.mxu1 }
 0xb33   : > { %v3792_v19 = vsel %vm845_vm2, %v9932_v31, -inf }
 0xb34   : > { %2157 = vadd.xlane.f32.xlu0 %v2156_v2 }
 0xb36   : > { %2166 = vadd.xlane.f32.xlu1 %v2165_v53  ;;  %v11652_v53 = vld [vmem:[#allocation60_spill] sm:$0xff] }
 0xb38   : > { %2163 = vadd.xlane.f32.xlu0 %v2162_v59  ;;  %v11651_v59 = vld [vmem:[#allocation58_spill] sm:$0xff] }
 0xb39   : > { %v11653_v9 = vsub.f32 %v11651_v59, %v11652_v53  ;;  %v9966_v53 = vld [vmem:[#allocation2 + $0x158] sm:$0xff] }
 0xb3a   : > { %11664 = vst [vmem:[#allocation73_spill] sm:$0xff] %v9966_v53 }
 0xb3b   : > { %v2051_v2 = vmul.f32 1.442695, %v11653_v9 }
 0xb3c   : > { %3781 = vmax.xlane.f32.xlu0 %v3780_v30  ;;  %v11661_v30 = vld [vmem:[#allocation68_spill] sm:$0xff] }
 0xb3d   : > { %7476 = vpow2.f32 %v2051_v2 }
 0xb40   : > { %3787 = vmax.xlane.f32.xlu0 %v3786_v61 }
 0xb44   : > { %3793 = vmax.xlane.f32.xlu0 %v3792_v19 }
 0xb47   : > { %1038 = vperm.xlu1 %7355, %v9776_v25   ;;  %v7764_v25 = vld [vmem:[%s8453_s26 + $0x30] sm:$0xff] }
 0xb4b   : > { %1043 = vperm.xlu1 %7355, %v9782_v8   ;;  %v7477_v8 = vpop.eup %7476 }
 0xb4f   : > { %1053 = vperm.xlu1 %7355, %v9790_v23   ;;  %v7765_v23 = vld [vmem:[%s8453_s26 + $0x38] sm:$0xff] }
 0xb53   : > { %1063 = vperm.xlu1 %7355, %v9799_v52   ;;  %v11654_v52 = vld [vmem:[#allocation62_spill] sm:$0xff] }
 0xb57   : > { %1603 = vperm.xlu1 %7355, %v9808_v18   ;;  %v11655_v18 = vld [vmem:[#allocation64_spill] sm:$0xff] }
 0xb5a   : > { %1633 = vperm.xlu0 %7354, %v9842_v58  }
 0xb5b   : > { %1608 = vperm.xlu1 %7355, %v9817_v3   ;;  %v11656_v3 = vsub.f32 %v11654_v52, %v11655_v18 }
 0xb5d   : > { %v2055_v58 = vmul.f32 1.442695, %v11656_v3  ;;  %v9981_v3 = vld [vmem:[#allocation2 + $0x168] sm:$0xff] }
 0xb5e   : > { %2195 = vperm.xlu0 %7354, %v9848_v16   ;;  %v11657_v16 = vld [vmem:[#allocation65_spill] sm:$0xff]  ;;  %11668 = vst [vmem:[#allocation35_spill] sm:$0xff] %v9981_v3 }
 0xb5f   : > { %1618 = vperm.xlu1 %7355, %v9826_v60   ;;  %v11658_v60 = vld [vmem:[#allocation67_spill] sm:$0xff]  ;;  %7478 = vpow2.f32 %v2055_v58  ;;  %v2130_v58 = vld [vmem:[#allocation3 + $0x90] sm:$0xff] }
 0xb60   : > { %v11659_v1 = vsub.f32 %v11657_v16, %v11658_v60 }
 0xb62   : > { %2210 = vperm.xlu0 %7354, %v9857_v51   ;;  %v2061_v51 = vmul.f32 1.442695, %v11659_v1 }
 0xb63   : > { %1628 = vperm.xlu1 %7355, %v9835_v48   ;;  %v11660_v48 = vld [vmem:[#allocation66_spill] sm:$0xff] }
 0xb64   : > { %v11662_v61 = vsub.f32 %v11660_v48, %v11661_v30  ;;  %7480 = vpow2.f32 %v2061_v51  ;;  %v7766_v30 = vld [vmem:[%s8453_s26 + $0x28] sm:$0xff]  ;;  %v2135_v51 = vld [vmem:[#allocation3 + $0xb8] sm:$0xff] }
 0xb66   : > { %4020 = vrot.lane.b32.xlu0 %v7764_v25, %s7843_s4  ;;  %v2059_v19 = vmul.f32 1.442695, %v11662_v61  ;;  %v9971_v25 = vld [vmem:[#allocation2 + $0x148] sm:$0xff]  ;;  %v2138_v61 = vmul.f32 %v7477_v8, %v2130_v58  ;;  %v7767_v58 = vld [vmem:[%s8453_s26 + $0x18] sm:$0xff] }
 0xb67   : > { %2200 = vperm.xlu1 %7355, %v9853_v29   ;;  %v9964_v29 = vld [vmem:[#allocation2 + $0x140] sm:$0xff]  ;;  %11666 = vst [vmem:[#allocation32_spill] sm:$0xff] %v9971_v25 }
 0xb68   : > { %11663 = vst [vmem:[#allocation20_spill] sm:$0xff] %v9964_v29  ;;  %7482 = vpow2.f32 %v2059_v19 }
 0xb6b   : > { %2205 = vperm.xlu1 %7355, %v7477_v8  }
 0xb6c   : > { %v10000_v19 = vpop.eup %7478 }
 0xb6f   : > { %4022 = vrot.lane.b32.xlu1 %v7765_v23, %s7843_s4 }
 0xb71   : > { %v10008_v23 = vpop.eup %7480 }
 0xbb1   : > { %v3776_v59 = vpop.xlane.xlu0 %3775 }
 0xbb2   : > { %v9969_v9 = vmax.f32 %v9964_v29, %v3776_v59 }
 0xbb3   : > { %v3785_v2 = vpop.xlane.xlu1 %3784 }
 0xbb4   : > { %11665 = vst [vmem:[#allocation30_spill] sm:$0xff] %v9969_v9  ;;  %4177 = vst.msk [vmem:[#allocation2 + $0x140] sm:$0xff] %vm457_vm1, %v9969_v9  ;;  %v9978_v52 = vmax.f32 %v9966_v53, %v3785_v2  ;;  %3832 = vperm.xlu1 %7355, %v9969_v9   ;;  %v10002_v2 = vld [vmem:[#allocation2 + $0x178] sm:$0xff]  ;;  %v7768_v53 = vld [vmem:[%s8453_s26 + $0x20] sm:$0xff] }
 0xbb5   : > { %v3779_v18 = vpop.xlane.xlu0 %3778  ;;  %11671 = vst [vmem:[#allocation8_spill] sm:$0xff] %v10002_v2  ;;  %v1024_v9 = vld [vmem:[#allocation4 + $0x8] sm:$0xff] }
 0xbb6   : > { %11667 = vst [vmem:[#allocation33_spill] sm:$0xff] %v9978_v52  ;;  %4180 = vst.msk [vmem:[#allocation2 + $0x158] sm:$0xff] %vm457_vm1, %v9978_v52  ;;  %v9988_v60 = vmax.f32 %v9971_v25, %v3779_v18  ;;  %v2132_v18 = vld [vmem:[#allocation3 + $0xa0] sm:$0xff] }
 0xbb7   : > { %v3791_v1 = vpop.xlane.xlu1 %3790  ;;  %v2140_v16 = vmul.f32 %v10000_v19, %v2132_v18  ;;  %v7769_v18 = vld [vmem:[%s8453_s26 + $0x10] sm:$0xff] }
 0xbb8   : > { %11669 = vst [vmem:[#allocation37_spill] sm:$0xff] %v9988_v60  ;;  %4178 = vst.msk [vmem:[#allocation2 + $0x148] sm:$0xff] %vm457_vm1, %v9988_v60  ;;  %v9995_v48 = vmax.f32 %v9981_v3, %v3791_v1  ;;  %4018 = vrot.lane.b32.xlu1 %v7766_v30, %s7843_s4  ;;  %3837 = vperm.xlu0 %7354, %v9988_v60   ;;  %v10019_v3 = vpop.eup %7482 }
 0xbb9   : > { %v2152_v59 = vpop.xlane.xlu0 %2151 }
 0xbba   : > { %11670 = vst [vmem:[#allocation39_spill] sm:$0xff] %v9995_v48  ;;  %4182 = vst.msk [vmem:[#allocation2 + $0x168] sm:$0xff] %vm457_vm1, %v9995_v48  ;;  %v2170_v1 = vadd.f32 %v2152_v59, %v2138_v61  ;;  %v2134_v59 = vld [vmem:[#allocation3 + $0xb0] sm:$0xff] }
 0xbbb   : > { %v3797_v30 = vpop.xlane.xlu1 %3796  ;;  %v2142_v29 = vmul.f32 %v10019_v3, %v2134_v59 }
 0xbbc   : > { %2178 = vst.msk [vmem:[#allocation3 + $0x90] sm:$0xff] %vm457_vm1, %v2170_v1  ;;  %v10012_v8 = vmax.f32 %v10002_v2, %v3797_v30  ;;  %4014 = vrot.lane.b32.xlu1 %v7767_v58, %s7843_s4  ;;  %4016 = vrot.lane.b32.xlu0 %v7768_v53, %s7843_s4  ;;  %v2143_v30 = vmul.f32 %v10008_v23, %v2135_v51  ;;  %v10032_v51 = vld [vmem:[#allocation2 + $0x150] sm:$0xff] }
 0xbbd   : > { %v2158_v61 = vpop.xlane.xlu0 %2157  ;;  %11673 = vst [vmem:[#allocation9_spill] sm:$0xff] %v10032_v51 }
 0xbbe   : > { %11672 = vst [vmem:[#allocation10_spill] sm:$0xff] %v10012_v8  ;;  %4184 = vst.msk [vmem:[#allocation2 + $0x178] sm:$0xff] %vm457_vm1, %v10012_v8  ;;  %v2172_v1 = vadd.f32 %v2158_v61, %v2140_v16 }
 0xbbf   : > { %v2167_v58 = vpop.xlane.xlu1 %2166 }
 0xbc0   : > { %2180 = vst.msk [vmem:[#allocation3 + $0xa0] sm:$0xff] %vm457_vm1, %v2172_v1  ;;  %v2175_v53 = vadd.f32 %v2167_v58, %v2143_v30  ;;  %3847 = vperm.xlu1 %7355, %v9978_v52   ;;  %4012 = vrot.lane.b32.xlu0 %v7769_v18, %s7843_s4  ;;  %v7770_v1 = vld [vmem:[%s8453_s26 + $0x8] sm:$0xff]  ;;  %v1025_v58 = vld [vmem:[#allocation4 + $0x10] sm:$0xff] }
 0xbc1   : > { %v2164_v60 = vpop.xlane.xlu0 %2163  ;;  %v11674_v18 = vld [vmem:[#allocation21_spill] sm:$0xff] }
 0xbc2   : > { %2183 = vst.msk [vmem:[#allocation3 + $0xb8] sm:$0xff] %vm457_vm1, %v2175_v53  ;;  %v2174_v2 = vadd.f32 %v2164_v60, %v2142_v29  ;;  %v10041_v53 = vld [vmem:[#allocation2 + $0x160] sm:$0xff] }
 0xbc3   : > { %v1039_v16 = vpop.permute.xlu1 %1038  ;;  %11676 = vst [vmem:[#allocation12_spill] sm:$0xff] %v10041_v53  ;;  %v7771_v60 = vld [vmem:[%s8453_s26] sm:$0xff] }
 0xbc4   : > { %2182 = vst.msk [vmem:[#allocation3 + $0xb0] sm:$0xff] %vm457_vm1, %v2174_v2  ;;  %v1072_v61 = vmul.f32 %v1039_v16, %v1024_v9  ;;  %4010 = vrot.lane.b32.xlu0 %v7770_v1, %s7843_s4  ;;  %v1027_v16 = vld [vmem:[#allocation4 + $0x20] sm:$0xff] }
 0xbc5   : > { %v3782_v30 = vpop.xlane.xlu0 %3781 }
 0xbc6   : > { %v1209_v52 = vadd.f32 %v11674_v18, %v1072_v61  ;;  %v10039_v59 = vmax.f32 %v10032_v51, %v3782_v30  ;;  %v11677_v61 = vld [vmem:[#allocation24_spill] sm:$0xff]  ;;  %v10055_v18 = vld [vmem:[#allocation2 + $0x170] sm:$0xff]  ;;  %v7774_v51 = vld [vmem:[%s7935_s25 + $0x28] sm:$0xff] }
 0xbc7   : > { %v1044_v25 = vpop.permute.xlu1 %1043  ;;  %11679 = vst [vmem:[#allocation16_spill] sm:$0xff] %v10055_v18 }
 0xbc8   : > { %11675 = vst [vmem:[#allocation11_spill] sm:$0xff] %v10039_v59  ;;  %1217 = vst.msk [vmem:[#allocation4 + $0x8] sm:$0xff] %vm586_vm0, %v1209_v52  ;;  %v1073_v9 = vmul.f32 %v1044_v25, %v1025_v58  ;;  %4008 = vrot.lane.b32.xlu0 %v7771_v60, %s7843_s4  ;;  %3842 = vperm.xlu1 %7355, %v10039_v59   ;;  %v7772_v60 = vld [vmem:[%s7935_s25 + $0x38] sm:$0xff]  ;;  %v11682_v25 = vld [vmem:[#allocation28_spill] sm:$0xff] }
 0xbc9   : > { %4179 = vst.msk [vmem:[#allocation2 + $0x150] sm:$0xff] %vm457_vm1, %v10039_v59  ;;  %v3788_v2 = vpop.xlane.xlu0 %3787 }
 0xbca   : > { %v1210_v1 = vadd.f32 %v11677_v61, %v1073_v9  ;;  %v10053_v30 = vmax.f32 %v10041_v53, %v3788_v2  ;;  %v1029_v2 = vld [vmem:[#allocation4 + $0x30] sm:$0xff]  ;;  %v2185_v53 = vld [vmem:[#allocation4 + $0x80] sm:$0xff] }
 0xbcb   : > { %v1054_v52 = vpop.permute.xlu1 %1053  ;;  %v11680_v61 = vld [vmem:[#allocation26_spill] sm:$0xff] }
 0xbcc   : > { %11678 = vst [vmem:[#allocation14_spill] sm:$0xff] %v10053_v30  ;;  %1218 = vst.msk [vmem:[#allocation4 + $0x10] sm:$0xff] %vm586_vm0, %v1210_v1  ;;  %v1075_v58 = vmul.f32 %v1054_v52, %v1027_v16  ;;  %4215 = vrot.lane.b32.xlu0 %v7772_v60, %s7844_s5  ;;  %3857 = vperm.xlu1 %7355, %v9995_v48   ;;  %v1589_v60 = vld [vmem:[#allocation4 + $0x48] sm:$0xff]  ;;  %v7773_v48 = vld [vmem:[%s7935_s25 + $0x30] sm:$0xff] }
 0xbcd   : > { %4181 = vst.msk [vmem:[#allocation2 + $0x160] sm:$0xff] %vm457_vm1, %v10053_v30  ;;  %v3794_v9 = vpop.xlane.xlu0 %3793  ;;  %v11683_v16 = vld [vmem:[#allocation45_spill] sm:$0xff] }
 0xbce   : > { %v1212_v29 = vadd.f32 %v11680_v61, %v1075_v58  ;;  %v10067_v1 = vmax.f32 %v10055_v18, %v3794_v9  ;;  %v1595_v9 = vld [vmem:[#allocation4 + $0x78] sm:$0xff] }
 0xbcf   : > { %v1064_v59 = vpop.permute.xlu1 %1063 }
 0xbd0   : > { %11681 = vst [vmem:[#allocation18_spill] sm:$0xff] %v10067_v1  ;;  %1220 = vst.msk [vmem:[#allocation4 + $0x20] sm:$0xff] %vm586_vm0, %v1212_v29  ;;  %v1077_v52 = vmul.f32 %v1064_v59, %v1029_v2  ;;  %3852 = vperm.xlu1 %7355, %v10053_v30   ;;  %3862 = vperm.xlu0 %7354, %v10067_v1   ;;  %v1590_v2 = vld [vmem:[#allocation4 + $0x50] sm:$0xff] }
 0xbd1   : > { %4183 = vst.msk [vmem:[#allocation2 + $0x170] sm:$0xff] %vm457_vm1, %v10067_v1 }
 0xbd2   : > { %v1214_v58 = vadd.f32 %v11682_v25, %v1077_v52  ;;  %v11684_v25 = vld [vmem:[#allocation51_spill] sm:$0xff] }
 0xbd3   : > { %v1604_v61 = vpop.permute.xlu1 %1603 }
 0xbd4   : > { %1222 = vst.msk [vmem:[#allocation4 + $0x30] sm:$0xff] %vm586_vm0, %v1214_v58  ;;  %v1637_v29 = vmul.f32 %v1604_v61, %v1589_v60  ;;  %4213 = vrot.lane.b32.xlu1 %v7773_v48, %s7844_s5  ;;  %3867 = vperm.xlu0 %7354, %v10012_v8   ;;  %v7775_v48 = vld [vmem:[%s7935_s25 + $0x20] sm:$0xff] }
 0xbd5   : > { %v1634_v59 = vpop.permute.xlu0 %1633  ;;  %v1592_v61 = vld [vmem:[#allocation4 + $0x60] sm:$0xff] }
 0xbd6   : > { %v1806_v18 = vadd.f32 %v11683_v16, %v1637_v29  ;;  %v1643_v1 = vmul.f32 %v1634_v59, %v1595_v9  ;;  %v11685_v16 = vld [vmem:[#allocation48_spill] sm:$0xff] }
 0xbd7   : > { %v1609_v30 = vpop.permute.xlu1 %1608 }
 0xbd8   : > { %1814 = vst.msk [vmem:[#allocation4 + $0x48] sm:$0xff] %vm586_vm0, %v1806_v18  ;;  %v1812_v52 = vadd.f32 %v11684_v25, %v1643_v1  ;;  %v1638_v58 = vmul.f32 %v1609_v30, %v1590_v2  ;;  %4211 = vrot.lane.b32.xlu1 %v7774_v51, %s7844_s5  ;;  %4209 = vrot.lane.b32.xlu0 %v7775_v48, %s7844_s5  ;;  %v2188_v18 = vld [vmem:[#allocation4 + $0x98] sm:$0xff]  ;;  %v11686_v1 = vld [vmem:[#allocation77_spill] sm:$0xff]  ;;  %v7777_v25 = vld [vmem:[%s7935_s25 + $0x10] sm:$0xff] }
 0xbd9   : > { %v2196_v60 = vpop.permute.xlu0 %2195  ;;  %v7776_v51 = vld [vmem:[%s7935_s25 + $0x18] sm:$0xff] }
 0xbda   : > { %1820 = vst.msk [vmem:[#allocation4 + $0x78] sm:$0xff] %vm586_vm0, %v1812_v52  ;;  %v1807_v9 = vadd.f32 %v11685_v16, %v1638_v58  ;;  %v2233_v29 = vmul.f32 %v2196_v60, %v2185_v53  ;;  %v1594_v52 = vld [vmem:[#allocation4 + $0x70] sm:$0xff] }
 0xbdb   : > { %v1619_v59 = vpop.permute.xlu1 %1618  ;;  %v11687_v53 = vld [vmem:[#allocation50_spill] sm:$0xff] }
 0xbdc   : > { %1815 = vst.msk [vmem:[#allocation4 + $0x50] sm:$0xff] %vm586_vm0, %v1807_v9  ;;  %v2394_v30 = vadd.f32 %v11686_v1, %v2233_v29  ;;  %v1640_v2 = vmul.f32 %v1619_v59, %v1592_v61  ;;  %4207 = vrot.lane.b32.xlu1 %v7776_v51, %s7844_s5  ;;  %4205 = vrot.lane.b32.xlu0 %v7777_v25, %s7844_s5  ;;  %v11688_v9 = vld [vmem:[#allocation78_spill] sm:$0xff]  ;;  %v7778_v59 = vld [vmem:[%s7935_s25 + $0x8] sm:$0xff]  ;;  %v7779_v1 = vld [vmem:[%s7935_s25] sm:$0xff] }
 0xbdd   : > { %v2211_v48 = vpop.permute.xlu0 %2210  ;;  %v2186_v51 = vld [vmem:[#allocation4 + $0x88] sm:$0xff]  ;;  %v11689_v25 = vld [vmem:[#allocation52_spill] sm:$0xff] }
 0xbde   : > { %2402 = vst.msk [vmem:[#allocation4 + $0x80] sm:$0xff] %vm586_vm0, %v2394_v30  ;;  %v1809_v58 = vadd.f32 %v11687_v53, %v1640_v2  ;;  %v2236_v60 = vmul.f32 %v2211_v48, %v2188_v18  ;;  %v2187_v2 = vld [vmem:[#allocation4 + $0x90] sm:$0xff]  ;;  %v11690_v48 = vld [vmem:[#allocation76_spill] sm:$0xff] }
 0xbdf   : > { %v1629_v16 = vpop.permute.xlu1 %1628 }
 0xbe0   : > { %1817 = vst.msk [vmem:[#allocation4 + $0x60] sm:$0xff] %vm586_vm0, %v1809_v58  ;;  %v2397_v29 = vadd.f32 %v11688_v9, %v2236_v60  ;;  %v1642_v61 = vmul.f32 %v1629_v16, %v1594_v52  ;;  %4203 = vrot.lane.b32.xlu1 %v7778_v59, %s7844_s5  ;;  %4201 = vrot.lane.b32.xlu0 %v7779_v1, %s7844_s5  ;;  %v2733_v59 = vsel %vm845_vm2, %v9379_v62, 0.0  ;;  %v2745_v1 = vsel %vm845_vm2, %v9408_v5, 0.0 }
 0xbe1   : > { %v4021_v9 = vpop.permute.xlu0 %4020  ;;  %v3325_v62 = vsel %vm845_vm2, %v9685_v21, 0.0  ;;  %v2754_v5 = vsel %vm845_vm2, %v9424_v57, 0.0  ;;  %v3331_v21 = vsel %vm845_vm2, %v9717_v7, 0.0  ;;  %v3340_v57 = vsel %vm845_vm2, %v9738_v28, 0.0  ;;  %v11692_v28 = vld [vmem:[#allocation84_spill] sm:$0xff] }
 0xbe2   : > { %2405 = vst.msk [vmem:[#allocation4 + $0x98] sm:$0xff] %vm586_vm0, %v2397_v29  ;;  %v1811_v30 = vadd.f32 %v11689_v25, %v1642_v61  ;;  %v2736_v29 = vsel %vm845_vm2, %v9381_v34, 0.0  ;;  %v2739_v61 = vsel %vm845_vm2, %v9396_v20, 0.0  ;;  %v2751_v34 = vsel %vm845_vm2, %v9416_v10, 0.0 }
 0xbe3   : > { %v2201_v8 = vpop.permute.xlu1 %2200  ;;  %v2748_v20 = vsel %vm845_vm2, %v9411_v24, 0.0  ;;  %v3322_v10 = vsel %vm845_vm2, %v9682_v56, 0.0  ;;  %v3334_v24 = vsel %vm845_vm2, %v9730_v32, 0.0  ;;  %v3343_v56 = vsel %vm845_vm2, %v9746_v49, 0.0 }
 0xbe4   : > { %1819 = vst.msk [vmem:[#allocation4 + $0x70] sm:$0xff] %vm586_vm0, %v1811_v30  ;;  %v2234_v18 = vmul.f32 %v2201_v8, %v2186_v51  ;;  %4185 = vrot.lane.b32.xlu1 %v7953_v27, %s7844_s5  ;;  %4187 = vrot.lane.b32.xlu0 %v8001_v36, %s7844_s5  ;;  %v11691_v8 = vld [vmem:[#allocation79_spill] sm:$0xff]  ;;  %v2742_v51 = vsel %vm845_vm2, %v9399_v14, 0.0  ;;  %v3328_v14 = vsel %vm845_vm2, %v9714_v54, 0.0  ;;  %v3337_v54 = vsel %vm845_vm2, %v9733_v15, 0.0 }
 0xbe6   : > { %v2395_v52 = vadd.f32 %v11690_v48, %v2234_v18  ;;  %v11693_v48 = vld [vmem:[#allocation86_spill] sm:$0xff] }
 0xbe7   : > { %v2206_v53 = vpop.permute.xlu1 %2205 }
 0xbe8   : > { %2403 = vst.msk [vmem:[#allocation4 + $0x88] sm:$0xff] %vm586_vm0, %v2395_v52  ;;  %v2235_v58 = vmul.f32 %v2206_v53, %v2187_v2  ;;  %4191 = vrot.lane.b32.xlu1 %v8011_v40, %s7844_s5  ;;  %4189 = vrot.lane.b32.xlu0 %v8005_v37, %s7844_s5  ;;  %v11694_v52 = vsub.f32 %v11692_v28, %v11693_v48  ;;  %v11713_v48 = vld [vmem:[#allocation105_spill] sm:$0xff] }
 0xbea   : > { %v2396_v60 = vadd.f32 %v11691_v8, %v2235_v58  ;;  %v2638_v15 = vmul.f32 1.442695, %v11694_v52  ;;  %v11695_v58 = vld [vmem:[#allocation85_spill] sm:$0xff]  ;;  %v11696_v8 = vld [vmem:[#allocation87_spill] sm:$0xff]  ;;  %v11714_v52 = vld [vmem:[#allocation106_spill] sm:$0xff] }
 0xbeb   : > { %v4023_v16 = vpop.permute.xlu1 %4022 }
 0xbec   : > { %2404 = vst.msk [vmem:[#allocation4 + $0x90] sm:$0xff] %vm586_vm0, %v2396_v60  ;;  %4195 = vrot.lane.b32.xlu1 %v8021_v44, %s7844_s5  ;;  %4193 = vrot.lane.b32.xlu0 %v8015_v41, %s7844_s5  ;;  %v11697_v60 = vsub.f32 %v11695_v58, %v11696_v8 }
 0xbed   : > { %7163 = vmatprep.subr.mxu0 %v4023_v16 }
 0xbee   : > { %7164 = vmatpush3.msra.mxu0 %v4023_v16  ;;  %v2636_v49 = vmul.f32 1.442695, %v11697_v60 }
 0xbef   : > { %7165 = vmatprep.subr.mxu0 %v4021_v9 }
 0xbf0   : > { %4199 = vrot.lane.b32.xlu1 %v8030_v47, %s7844_s5  ;;  %4197 = vrot.lane.b32.xlu0 %v8025_v45, %s7844_s5 }
 0xbf1   : > { %7166 = vmatpush3.msra.mxu0 %v4021_v9  ;;  %v11698_v9 = vld [vmem:[#allocation88_spill] sm:$0xff] }
 0xc0f   : > { %2737 = vadd.xlane.f32.xlu0 %v2736_v29 }
 0xc13   : > { %2740 = vadd.xlane.f32.xlu0 %v2739_v61  ;;  %v11700_v61 = vld [vmem:[#allocation89_spill] sm:$0xff] }
 0xc14   : > { %2734 = vadd.xlane.f32.xlu1 %v2733_v59  ;;  %v11701_v59 = vsub.f32 %v11700_v61, %v9266_v33 }
 0xc17   : > { %2746 = vadd.xlane.f32.xlu0 %v2745_v1  ;;  %v2640_v1 = vmul.f32 1.442695, %v11701_v59 }
 0xc18   : > { %2743 = vadd.xlane.f32.xlu1 %v2742_v51 }
 0xc1b   : > { %2752 = vadd.xlane.f32.xlu0 %v2751_v34  ;;  %v11702_v34 = vld [vmem:[#allocation90_spill] sm:$0xff] }
 0xc1c   : > { %2749 = vadd.xlane.f32.xlu1 %v2748_v20  ;;  %v11703_v20 = vsub.f32 %v11702_v34, %v9291_v22  ;;  %v11708_v22 = vld [vmem:[#allocation95_spill] sm:$0xff] }
 0xc1f   : > { %3326 = vadd.xlane.f32.xlu0 %v3325_v62  ;;  %v2646_v62 = vmul.f32 1.442695, %v11703_v20 }
 0xc20   : > { %2755 = vadd.xlane.f32.xlu1 %v2754_v5 }
 0xc23   : > { %3329 = vadd.xlane.f32.xlu0 %v3328_v14  ;;  %v11704_v14 = vld [vmem:[#allocation91_spill] sm:$0xff] }
 0xc24   : > { %3323 = vadd.xlane.f32.xlu1 %v3322_v10 }
 0xc27   : > { %3335 = vadd.xlane.f32.xlu0 %v3334_v24 }
 0xc28   : > { %3332 = vadd.xlane.f32.xlu1 %v3331_v21 }
 0xc2b   : > { %3341 = vadd.xlane.f32.xlu0 %v3340_v57 }
 0xc2c   : > { %3338 = vadd.xlane.f32.xlu1 %v3337_v54  ;;  %v11707_v54 = vld [vmem:[#allocation93_spill] sm:$0xff] }
 0xc2f   : > { %v3833_v25 = vpop.permute.xlu1 %3832 }
 0xc30   : > { %v3870_v30 = vsub.f32 %v9898_v38, %v3833_v25  ;;  %3344 = vadd.xlane.f32.xlu1 %v3343_v56  ;;  %v11709_v25 = vsub.f32 %v11707_v54, %v11708_v22 }
 0xc32   : > { %v3878_v32 = vmul.f32 1.442695, %v3870_v30  ;;  %v2650_v56 = vmul.f32 1.442695, %v11709_v25  ;;  %v11710_v30 = vld [vmem:[#allocation94_spill] sm:$0xff] }
 0xc33   : > { %v4019_v18 = vpop.permute.xlu1 %4018  ;;  %v3838_v2 = vpop.permute.xlu0 %3837 }
 0xc34   : > { %7484 = vpow2.f32 %v3878_v32  ;;  %v3871_v7 = vsub.f32 %v9896_v46, %v3838_v2  ;;  %7167 = vmatprep.subr.mxu0 %v4019_v18  ;;  %v11699_v46 = vsub.f32 %v11698_v9, %v9263_v6  ;;  %v11705_v6 = vld [vmem:[#allocation92_spill] sm:$0xff]  ;;  %v11718_v9 = vld [vmem:[#allocation109_spill] sm:$0xff] }
 0xc35   : > { %7168 = vmatpush3.msra.mxu0 %v4019_v18  ;;  %v11706_v10 = vsub.f32 %v11704_v14, %v11705_v6  ;;  %v11711_v32 = vld [vmem:[#allocation96_spill] sm:$0xff] }
 0xc36   : > { %v3880_v53 = vmul.f32 1.442695, %v3871_v7  ;;  %v2642_v29 = vmul.f32 1.442695, %v11699_v46  ;;  %v11712_v18 = vsub.f32 %v11710_v30, %v11711_v32  ;;  %v11719_v46 = vsub.f32 %v11718_v9, %v9521_v26 }
 0xc37   : > { %v4017_v16 = vpop.permute.xlu0 %4016  ;;  %v4015_v38 = vpop.permute.xlu1 %4014  ;;  %v2644_v24 = vmul.f32 1.442695, %v11706_v10  ;;  %v11720_v26 = vsub.f32 %v9525_v17, %v9543_v50  ;;  %v11721_v50 = vsub.f32 %v9547_v13, %v9564_v63 }
 0xc38   : > { %7486 = vpow2.f32 %v3880_v53  ;;  %7169 = vmatprep.subr.mxu0 %v4017_v16  ;;  %v2648_v2 = vmul.f32 1.442695, %v11712_v18 }
 0xc39   : > { %7170 = vmatpush3.msra.mxu0 %v4017_v16  ;;  %7488 = vpow2.f32 %v2638_v15  ;;  %v11715_v15 = vsub.f32 %v11713_v48, %v11714_v52  ;;  %v3233_v14 = vmul.f32 1.442695, %v11720_v26 }
 0xc3a   : > { %7171 = vmatprep.subr.mxu0 %v4015_v38  ;;  %7490 = vpow2.f32 %v2636_v49 }
 0xc3b   : > { %7172 = vmatpush3.msra.mxu0 %v4015_v38  ;;  %v4013_v51 = vpop.permute.xlu0 %4012  ;;  %7492 = vpow2.f32 %v2642_v29  ;;  %v3848_v5 = vpop.permute.xlu1 %3847  ;;  %v3227_v53 = vmul.f32 1.442695, %v11715_v15  ;;  %v3229_v29 = vmul.f32 1.442695, %v11719_v46 }
 0xc3c   : > { %7173 = vmatprep.subr.mxu0 %v4013_v51  ;;  %7494 = vpow2.f32 %v2640_v1  ;;  %v3873_v33 = vsub.f32 %v9902_v11, %v3848_v5 }
 0xc3d   : > { %7174 = vmatpush3.msra.mxu0 %v4013_v51  ;;  %7496 = vpow2.f32 %v2646_v62 }
 0xc3e   : > { %7498 = vpow2.f32 %v2644_v24  ;;  %v3884_v28 = vmul.f32 1.442695, %v3873_v33 }
 0xc3f   : > { %v4011_v21 = vpop.permute.xlu0 %4010  ;;  %7500 = vpow2.f32 %v2650_v56 }
 0xc40   : > { %7175 = vmatprep.subr.mxu0 %v4011_v21  ;;  %7502 = vpow2.f32 %v2648_v2 }
 0xc41   : > { %v10179_v57 = vpop.eup %7484  ;;  %2215 = vperm.xlu1 %7355, %v10000_v19   ;;  %2220 = vperm.xlu0 %7354, %v9863_v43  }
 0xc42   : > { %7176 = vmatpush3.msra.mxu0 %v4011_v21  ;;  %7179 = vmatprep.mubr.msk.f32.mxu0 %vm845_vm2, %v10179_v57  ;;  %v3237_v21 = vmul.f32 1.442695, %v11721_v50 }
 0xc43   : > { %v3843_v7 = vpop.permute.xlu1 %3842  ;;  %v4009_v11 = vpop.permute.xlu0 %4008 }
 0xc44   : > { %v3872_v19 = vsub.f32 %v9906_v12, %v3843_v7  ;;  %7177 = vmatprep.subr.mxu0 %v4009_v11  ;;  %v11716_v12 = vld [vmem:[#allocation107_spill] sm:$0xff] }
 0xc45   : > { %v10193_v43 = vpop.eup %7486  ;;  %2225 = vperm.xlu1 %7355, %v10019_v3   ;;  %2230 = vperm.xlu0 %7354, %v10008_v23   ;;  %v11717_v60 = vsub.f32 %v9493_v0, %v11716_v12 }
 0xc46   : > { %v3882_v58 = vmul.f32 1.442695, %v3872_v19  ;;  %7178 = vmatpush3.msra.mxu0 %v4009_v11  ;;  %v10200_v8 = vpop.eup %7488 }
 0xc47   : > { %v3225_v49 = vmul.f32 1.442695, %v11717_v60  ;;  %7180 = vmatmul.mubr.msk.f32.vlgmr.msra.gmra.mxu0 %vm845_vm2, %v10193_v43  ;;  %v3858_v3 = vpop.permute.xlu1 %3857  ;;  %v4216_v16 = vpop.permute.xlu0 %4215 }
 0xc48   : > { %v10207_v23 = vpop.eup %7490  ;;  %7504 = vpow2.f32 %v3882_v58  ;;  %7191 = vmatprep.subr.msk.mxu0 %vm586_vm0, %v4216_v16  ;;  %v3875_v38 = vsub.f32 %v9910_v35, %v3858_v3 }
 0xc49   : > { %7506 = vpow2.f32 %v3884_v28  ;;  %2789 = vperm.xlu1 %7355, %v10200_v8   ;;  %2784 = vperm.xlu0 %7354, %v10207_v23   ;;  %v10214_v0 = vpop.eup %7492 }
 0xc4a   : > { %7508 = vpow2.f32 %v3227_v53  ;;  %7192 = vmatpush3.xpose.msk.msra.mxu0 %vm586_vm0, %v4216_v16  ;;  %v10219_v1 = vpop.eup %7494  ;;  %v3888_v34 = vmul.f32 1.442695, %v3875_v38  ;;  %v3914_v16 = vsel %vm845_vm2, %v10193_v43, 0.0 }
 0xc4b   : > { %7510 = vpow2.f32 %v3225_v49  ;;  %v3853_v61 = vpop.permute.xlu1 %3852  ;;  %v3863_v59 = vpop.permute.xlu0 %3862 }
 0xc4c   : > { %v3874_v35 = vsub.f32 %v9914_v42, %v3853_v61  ;;  %v3876_v51 = vsub.f32 %v9932_v31, %v3863_v59  ;;  %v10225_v5 = vpop.eup %7496  ;;  %7512 = vpow2.f32 %v3229_v29  ;;  %v3911_v61 = vsel %vm845_vm2, %v10179_v57, 0.0 }
 0xc4d   : > { %2794 = vperm.xlu1 %7355, %v10219_v1   ;;  %2799 = vperm.xlu0 %7354, %v10214_v0   ;;  %v10230_v24 = vpop.eup %7498 }
 0xc4e   : > { %v3886_v20 = vmul.f32 1.442695, %v3874_v35  ;;  %v3890_v62 = vmul.f32 1.442695, %v3876_v51  ;;  %v10237_v17 = vpop.eup %7500  ;;  %v2718_v51 = vld [vmem:[#allocation3 + $0xc8] sm:$0xff] }
 0xc4f   : > { %v4214_v6 = vpop.permute.xlu1 %4213  ;;  %v3868_v10 = vpop.permute.xlu0 %3867 }
 0xc50   : > { %7514 = vpow2.f32 %v3886_v20  ;;  %v3877_v42 = vsub.f32 %v9918_v4, %v3868_v10  ;;  %7193 = vmatprep.subr.msk.mxu0 %vm586_vm0, %v4214_v6  ;;  %v10242_v4 = vpop.eup %7502  ;;  %v11723_v10 = vld [vmem:[#allocation110_spill] sm:$0xff] }
 0xc51   : > { %7516 = vpow2.f32 %v3888_v34  ;;  %2804 = vperm.xlu1 %7355, %v10230_v24   ;;  %2809 = vperm.xlu0 %7354, %v10225_v5   ;;  %v2726_v34 = vmul.f32 %v10200_v8, %v2718_v51 }
 0xc52   : > { %7518 = vpow2.f32 %v3890_v62  ;;  %v3892_v31 = vmul.f32 1.442695, %v3877_v42  ;;  %7194 = vmatpush3.xpose.msk.msra.mxu0 %vm586_vm0, %v4214_v6  ;;  %v2719_v62 = vld [vmem:[#allocation3 + $0xd0] sm:$0xff]  ;;  %v11722_v6 = vld [vmem:[#allocation108_spill] sm:$0xff] }
 0xc53   : > { %7520 = vpow2.f32 %v3233_v14  ;;  %v4212_v33 = vpop.permute.xlu1 %4211  ;;  %v4210_v54 = vpop.permute.xlu0 %4209  ;;  %v2717_v14 = vld [vmem:[#allocation3 + $0xc0] sm:$0xff]  ;;  %v2727_v57 = vmul.f32 %v10219_v1, %v2719_v62  ;;  %v11724_v42 = vsub.f32 %v11722_v6, %v11723_v10 }
 0xc54   : > { %7522 = vpow2.f32 %v3892_v31  ;;  %7195 = vmatprep.subr.msk.mxu0 %vm586_vm0, %v4212_v33 }
 0xc55   : > { %v7505_v22 = vpop.eup %7504  ;;  %2814 = vperm.xlu1 %7355, %v10242_v4   ;;  %2819 = vperm.xlu0 %7354, %v10237_v17   ;;  %7524 = vpow2.f32 %v3237_v21  ;;  %v3231_v31 = vmul.f32 1.442695, %v11724_v42  ;;  %v2725_v21 = vmul.f32 %v10207_v23, %v2717_v14  ;;  %v2723_v23 = vld [vmem:[#allocation3 + $0xf0] sm:$0xff] }
 0xc56   : > { %v10247_v25 = vpop.eup %7506  ;;  %7196 = vmatpush3.xpose.msk.msra.mxu0 %vm586_vm0, %v4212_v33  ;;  %7182 = vmatprep.mubr.msk.f32.mxu0 %vm845_vm2, %v7505_v22  ;;  %v3917_v9 = vsel %vm845_vm2, %v7505_v22, 0.0  ;;  %v2721_v33 = vld [vmem:[#allocation3 + $0xe0] sm:$0xff] }
 0xc57   : > { %v10251_v13 = vpop.eup %7508  ;;  %7183 = vmatmul.mubr.msk.f32.gmra.mxu0 %vm845_vm2, %v10247_v25  ;;  %7197 = vmatprep.subr.msk.mxu0 %vm586_vm0, %v4210_v54  ;;  %v4208_v56 = vpop.permute.xlu1 %4207  ;;  %v3920_v43 = vsel %vm845_vm2, %v10247_v25, 0.0  ;;  %v2720_v25 = vld [vmem:[#allocation3 + $0xd8] sm:$0xff]  ;;  %7526 = vpow2.f32 %v3231_v31 }
 0xc58   : > { %v10256_v63 = vpop.eup %7510  ;;  %v4206_v30 = vpop.permute.xlu0 %4205 }
 0xc59   : > { %3378 = vperm.xlu1 %7355, %v10251_v13   ;;  %3373 = vperm.xlu0 %7354, %v10256_v63   ;;  %v10262_v32 = vpop.eup %7512 }
 0xc5a   : > { %7198 = vmatpush3.xpose.msk.msra.mxu0 %vm586_vm0, %v4210_v54 }
 0xc5b   : > { %7199 = vmatprep.subr.msk.mxu0 %vm586_vm0, %v4208_v56  ;;  %v4204_v2 = vpop.permute.xlu1 %4203 }
 0xc5c   : > { %v4202_v7 = vpop.permute.xlu0 %4201 }
 0xc5d   : > { %v7515_v18 = vpop.eup %7514  ;;  %3383 = vperm.xlu1 %7355, %v10262_v32  }
 0xc5e   : > { %v7517_v11 = vpop.eup %7516  ;;  %7200 = vmatpush3.xpose.msk.msra.mxu0 %vm586_vm0, %v4208_v56  ;;  %7185 = vmatprep.mubr.msk.f32.mxu0 %vm845_vm2, %v7515_v18  ;;  %v3923_v46 = vsel %vm845_vm2, %v7515_v18, 0.0  ;;  %v2729_v56 = vmul.f32 %v10230_v24, %v2721_v33  ;;  %v11726_v18 = vld [vmem:[#allocation112_spill] sm:$0xff]  ;;  %v11728_v24 = vld [vmem:[#allocation113_spill] sm:$0xff] }
 0xc5f   : > { %v7519_v19 = vpop.eup %7518  ;;  %7186 = vmatmul.mubr.msk.f32.gmra.mxu0 %vm845_vm2, %v7517_v11  ;;  %7201 = vmatprep.subr.msk.mxu0 %vm586_vm0, %v4206_v30  ;;  %v4186_v52 = vpop.permute.xlu1 %4185  ;;  %v3926_v59 = vsel %vm845_vm2, %v7517_v11, 0.0  ;;  %v2728_v11 = vmul.f32 %v10214_v0, %v2720_v25  ;;  %v3307_v0 = vld [vmem:[#allocation3 + $0x108] sm:$0xff] }
 0xc60   : > { %v10269_v28 = vpop.eup %7520  ;;  %7188 = vmatprep.mubr.msk.f32.mxu0 %vm845_vm2, %v7519_v19  ;;  %v4188_v15 = vpop.permute.xlu0 %4187  ;;  %v3929_v29 = vsel %vm845_vm2, %v7519_v19, 0.0 }
 0xc61   : > { %v7523_v48 = vpop.eup %7522  ;;  %3393 = vperm.xlu1 %7355, %v10269_v28  }
 0xc62   : > { %7202 = vmatpush3.xpose.msk.msra.mxu0 %vm586_vm0, %v4206_v30  ;;  %v10276_v53 = vpop.eup %7524  ;;  %v3932_v35 = vsel %vm845_vm2, %v7523_v48, 0.0  ;;  %v11725_v30 = vld [vmem:[#allocation111_spill] sm:$0xff] }
 0xc63   : > { %7189 = vmatmul.mubr.msk.f32.gmra.mxu0 %vm845_vm2, %v7523_v48  ;;  %7203 = vmatprep.subr.msk.mxu0 %vm586_vm0, %v4204_v2  ;;  %v4192_v12 = vpop.permute.xlu1 %4191  ;;  %v11727_v1 = vsub.f32 %v11725_v30, %v11726_v18 }
 0xc64   : > { %7207 = vmatprep.mubr.msk.f32.mxu0 %vm586_vm0, %v4186_v52  ;;  %v4190_v58 = vpop.permute.xlu0 %4189  ;;  %v2722_v52 = vld [vmem:[#allocation3 + $0xe8] sm:$0xff]  ;;  %v10330_v14 = vpop.eup %7526 }
 0xc65   : > { %3403 = vperm.xlu1 %7355, %v10276_v53  }
 0xc66   : > { %7204 = vmatpush3.xpose.msk.msra.mxu0 %vm586_vm0, %v4204_v2  ;;  %v3235_v2 = vmul.f32 1.442695, %v11727_v1  ;;  %v3313_v1 = vld [vmem:[#allocation3 + $0x138] sm:$0xff] }
 0xc67   : > { %7205 = vmatprep.subr.msk.mxu0 %vm586_vm0, %v4202_v7  ;;  %v4196_v49 = vpop.permute.xlu1 %4195 }
 0xc68   : > { %v4194_v60 = vpop.permute.xlu0 %4193  ;;  %7528 = vpow2.f32 %v3235_v2 }
 0xc6a   : > { %7206 = vmatpush3.xpose.msk.msra.mxu0 %vm586_vm0, %v4202_v7 }
 0xc6b   : > { %v4200_v38 = vpop.permute.xlu1 %4199 }
 0xc6c   : > { %v4198_v3 = vpop.permute.xlu0 %4197 }
 0xc6d   : > { %7208 = vmatmul.mubr.msk.f32.vlgmr.msra.gmra.mxu0 %vm586_vm0, %v4188_v15 }
 0xc6e   : > { %7210 = vmatprep.mubr.msk.f32.mxu0 %vm586_vm0, %v4190_v58  ;;  %v2731_v58 = vmul.f32 %v10242_v4, %v2723_v23 }
 0xc71   : > { %7211 = vmatmul.mubr.msk.f32.gmra.mxu0 %vm586_vm0, %v4192_v12  ;;  %v11729_v12 = vld [vmem:[#allocation114_spill] sm:$0xff] }
 0xc72   : > { %7213 = vmatprep.mubr.msk.f32.mxu0 %vm586_vm0, %v4194_v60  ;;  %v11730_v60 = vsub.f32 %v11728_v24, %v11729_v12  ;;  %v2192_v24 = vld [vmem:[#allocation4 + $0xb8] sm:$0xff]  ;;  %v11731_v12 = vld [vmem:[#allocation80_spill] sm:$0xff] }
 0xc75   : > { %7214 = vmatmul.mubr.msk.f32.gmra.mxu0 %vm586_vm0, %v4196_v49  ;;  %v3239_v49 = vmul.f32 1.442695, %v11730_v60 }
 0xc76   : > { %7216 = vmatprep.mubr.msk.f32.mxu0 %vm586_vm0, %v4198_v3 }
 0xc77   : > { %7530 = vpow2.f32 %v3239_v49  ;;  %v2191_v49 = vld [vmem:[#allocation4 + $0xb0] sm:$0xff] }
 0xc78   : > { %3915 = vadd.xlane.f32.xlu0 %v3914_v16  ;;  %v2730_v16 = vmul.f32 %v10225_v5, %v2722_v52 }
 0xc79   : > { %7217 = vmatmul.mubr.msk.f32.gmra.mxu0 %vm586_vm0, %v4200_v38 }
 0xc7c   : > { %3918 = vadd.xlane.f32.xlu0 %v3917_v9 }
 0xc80   : > { %3924 = vadd.xlane.f32.xlu0 %v3923_v46  ;;  %v2724_v46 = vld [vmem:[#allocation3 + $0xf8] sm:$0xff] }
 0xc84   : > { %3930 = vadd.xlane.f32.xlu0 %v3929_v29 }
 0xc89   : > { %3912 = vadd.xlane.f32.xlu1 %v3911_v61  ;;  %v3315_v61 = vmul.f32 %v10251_v13, %v3307_v0 }
 0xc8d   : > { %3921 = vadd.xlane.f32.xlu1 %v3920_v43  ;;  %v2732_v43 = vmul.f32 %v10237_v17, %v2724_v46  ;;  %v3309_v17 = vld [vmem:[#allocation3 + $0x118] sm:$0xff] }
 0xc91   : > { %3927 = vadd.xlane.f32.xlu1 %v3926_v59  ;;  %v3308_v59 = vld [vmem:[#allocation3 + $0x110] sm:$0xff] }
 0xc95   : > { %3933 = vadd.xlane.f32.xlu1 %v3932_v35 }
 0xc98   : > { %v2738_v20 = vpop.xlane.xlu0 %2737 }
 0xc99   : > { %v2758_v26 = vadd.f32 %v2738_v20, %v2726_v34  ;;  %v3306_v34 = vld [vmem:[#allocation3 + $0x100] sm:$0xff]  ;;  %v3316_v20 = vmul.f32 %v10262_v32, %v3308_v59  ;;  %v3317_v32 = vmul.f32 %v10330_v14, %v3309_v17  ;;  %v11734_v59 = vld [vmem:[#allocation83_spill] sm:$0xff] }
 0xc9a   : > { %v3314_v13 = vmul.f32 %v10256_v63, %v3306_v34 }
 0xc9b   : > { %2766 = vst.msk [vmem:[#allocation3 + $0xc8] sm:$0xff] %vm457_vm1, %v2758_v26  ;;  %v3310_v26 = vld [vmem:[#allocation3 + $0x120] sm:$0xff] }
 0xc9c   : > { %v2741_v50 = vpop.xlane.xlu0 %2740  ;;  %v3318_v42 = vmul.f32 %v10269_v28, %v3310_v26 }
 0xc9d   : > { %v2759_v54 = vadd.f32 %v2741_v50, %v2727_v57  ;;  %v2735_v22 = vpop.xlane.xlu1 %2734  ;;  %v3312_v50 = vld [vmem:[#allocation3 + $0x130] sm:$0xff] }
 0xc9e   : > { %v2757_v8 = vadd.f32 %v2735_v22, %v2725_v21  ;;  %v10336_v21 = vpop.eup %7528  ;;  %v3320_v25 = vmul.f32 %v10276_v53, %v3312_v50  ;;  %v2190_v53 = vld [vmem:[#allocation4 + $0xa8] sm:$0xff] }
 0xc9f   : > { %2767 = vst.msk [vmem:[#allocation3 + $0xd0] sm:$0xff] %vm457_vm1, %v2759_v54  ;;  %v3311_v54 = vld [vmem:[#allocation3 + $0x128] sm:$0xff] }
 0xca0   : > { %2765 = vst.msk [vmem:[#allocation3 + $0xc0] sm:$0xff] %vm457_vm1, %v2757_v8  ;;  %v2747_v7 = vpop.xlane.xlu0 %2746  ;;  %v3319_v28 = vmul.f32 %v10336_v21, %v3311_v54  ;;  %v2779_v50 = vld [vmem:[#allocation4 + $0xe8] sm:$0xff]  ;;  %v2778_v54 = vld [vmem:[#allocation4 + $0xe0] sm:$0xff] }
 0xca1   : > { %v2761_v19 = vadd.f32 %v2747_v7, %v2729_v56  ;;  %v2744_v48 = vpop.xlane.xlu1 %2743  ;;  %v10342_v56 = vpop.eup %7530 }
 0xca2   : > { %v2760_v15 = vadd.f32 %v2744_v48, %v2728_v11  ;;  %v3321_v7 = vmul.f32 %v10342_v56, %v3313_v1  ;;  %v2781_v1 = vld [vmem:[#allocation4 + $0xf8] sm:$0xff] }
 0xca3   : > { %2769 = vst.msk [vmem:[#allocation3 + $0xe0] sm:$0xff] %vm457_vm1, %v2761_v19  ;;  %v2189_v19 = vld [vmem:[#allocation4 + $0xa0] sm:$0xff] }
 0xca4   : > { %2768 = vst.msk [vmem:[#allocation3 + $0xd8] sm:$0xff] %vm457_vm1, %v2760_v15  ;;  %v2753_v3 = vpop.xlane.xlu0 %2752 }
 0xca5   : > { %v2763_v38 = vadd.f32 %v2753_v3, %v2731_v58  ;;  %v2750_v9 = vpop.xlane.xlu1 %2749  ;;  %v11732_v3 = vld [vmem:[#allocation81_spill] sm:$0xff] }
 0xca6   : > { %v2762_v29 = vadd.f32 %v2750_v9, %v2730_v16 }
 0xca7   : > { %2771 = vst.msk [vmem:[#allocation3 + $0xf0] sm:$0xff] %vm457_vm1, %v2763_v38 }
 0xca8   : > { %2770 = vst.msk [vmem:[#allocation3 + $0xe8] sm:$0xff] %vm457_vm1, %v2762_v29  ;;  %v3327_v4 = vpop.xlane.xlu0 %3326  ;;  %v2774_v29 = vld [vmem:[#allocation4 + $0xc0] sm:$0xff] }
 0xca9   : > { %v3347_v35 = vadd.f32 %v3327_v4, %v3315_v61  ;;  %v2756_v51 = vpop.xlane.xlu1 %2755  ;;  %v11733_v61 = vld [vmem:[#allocation82_spill] sm:$0xff] }
 0xcaa   : > { %v2764_v5 = vadd.f32 %v2756_v51, %v2732_v43  ;;  %v2775_v43 = vld [vmem:[#allocation4 + $0xc8] sm:$0xff] }
 0xcab   : > { %3355 = vst.msk [vmem:[#allocation3 + $0x108] sm:$0xff] %vm457_vm1, %v3347_v35 }
 0xcac   : > { %2772 = vst.msk [vmem:[#allocation3 + $0xf8] sm:$0xff] %vm457_vm1, %v2764_v5  ;;  %v3330_v62 = vpop.xlane.xlu0 %3329 }
 0xcad   : > { %v3348_v57 = vadd.f32 %v3330_v62, %v3316_v20  ;;  %v3324_v6 = vpop.xlane.xlu1 %3323  ;;  %v2777_v62 = vld [vmem:[#allocation4 + $0xd8] sm:$0xff] }
 0xcae   : > { %v3346_v10 = vadd.f32 %v3324_v6, %v3314_v13  ;;  %v11735_v13 = vld [vmem:[#allocation98_spill] sm:$0xff]  ;;  %v11736_v6 = vld [vmem:[#allocation97_spill] sm:$0xff] }
 0xcaf   : > { %3356 = vst.msk [vmem:[#allocation3 + $0x110] sm:$0xff] %vm457_vm1, %v3348_v57  ;;  %v2776_v57 = vld [vmem:[#allocation4 + $0xd0] sm:$0xff] }
 0xcb0   : > { %3354 = vst.msk [vmem:[#allocation3 + $0x100] sm:$0xff] %vm457_vm1, %v3346_v10  ;;  %v3336_v31 = vpop.xlane.xlu0 %3335 }
 0xcb1   : > { %v3350_v63 = vadd.f32 %v3336_v31, %v3318_v42  ;;  %v3333_v33 = vpop.xlane.xlu1 %3332 }
 0xcb2   : > { %v3349_v22 = vadd.f32 %v3333_v33, %v3317_v32 }
 0xcb3   : > { %3358 = vst.msk [vmem:[#allocation3 + $0x120] sm:$0xff] %vm457_vm1, %v3350_v63  ;;  %v11737_v63 = vld [vmem:[#allocation99_spill] sm:$0xff] }
 0xcb4   : > { %3357 = vst.msk [vmem:[#allocation3 + $0x118] sm:$0xff] %vm457_vm1, %v3349_v22  ;;  %v3342_v8 = vpop.xlane.xlu0 %3341  ;;  %v11738_v22 = vld [vmem:[#allocation100_spill] sm:$0xff] }
 0xcb5   : > { %v3352_v30 = vadd.f32 %v3342_v8, %v3320_v25  ;;  %v3339_v18 = vpop.xlane.xlu1 %3338 }
 0xcb6   : > { %v3351_v2 = vadd.f32 %v3339_v18, %v3319_v28 }
 0xcb7   : > { %3360 = vst.msk [vmem:[#allocation3 + $0x130] sm:$0xff] %vm457_vm1, %v3352_v30 }
 0xcb8   : > { %3359 = vst.msk [vmem:[#allocation3 + $0x128] sm:$0xff] %vm457_vm1, %v3351_v2  ;;  %v11739_v2 = vld [vmem:[#allocation101_spill] sm:$0xff] }
 0xcb9   : > { %v3345_v11 = vpop.xlane.xlu1 %3344 }
 0xcba   : > { %v3353_v23 = vadd.f32 %v3345_v11, %v3321_v7  ;;  %v2780_v11 = vld [vmem:[#allocation4 + $0xf0] sm:$0xff] }
 0xcbc   : > { %3361 = vst.msk [vmem:[#allocation3 + $0x138] sm:$0xff] %vm457_vm1, %v3353_v23  ;;  %v2221_v48 = vpop.permute.xlu0 %2220  ;;  %v11740_v23 = vld [vmem:[#allocation102_spill] sm:$0xff] }
 0xcbd   : > { %v2238_v52 = vmul.f32 %v2221_v48, %v2190_v53  ;;  %v2216_v15 = vpop.permute.xlu1 %2215 }
 0xcbe   : > { %v2237_v58 = vmul.f32 %v2216_v15, %v2189_v19 }
 0xcbf   : > { %v2399_v60 = vadd.f32 %v11731_v12, %v2238_v52 }
 0xcc0   : > { %v2398_v16 = vadd.f32 %v11732_v3, %v2237_v58  ;;  %v2231_v0 = vpop.permute.xlu0 %2230  ;;  %v3363_v58 = vld [vmem:[#allocation4 + $0x100] sm:$0xff] }
 0xcc1   : > { %2407 = vst.msk [vmem:[#allocation4 + $0xa8] sm:$0xff] %vm586_vm0, %v2399_v60  ;;  %v2240_v38 = vmul.f32 %v2231_v0, %v2192_v24  ;;  %v2226_v9 = vpop.permute.xlu1 %2225  ;;  %v11741_v24 = vld [vmem:[#allocation103_spill] sm:$0xff]  ;;  %v3364_v60 = vld [vmem:[#allocation4 + $0x108] sm:$0xff] }
 0xcc2   : > { %2406 = vst.msk [vmem:[#allocation4 + $0xa0] sm:$0xff] %vm586_vm0, %v2398_v16  ;;  %v2239_v46 = vmul.f32 %v2226_v9, %v2191_v49  ;;  %v11742_v49 = vld [vmem:[#allocation104_spill] sm:$0xff] }
 0xcc3   : > { %v2401_v4 = vadd.f32 %v11733_v61, %v2240_v38 }
 0xcc4   : > { %v2400_v35 = vadd.f32 %v11734_v59, %v2239_v46  ;;  %v2785_v51 = vpop.permute.xlu0 %2784  ;;  %v3367_v59 = vld [vmem:[#allocation4 + $0x120] sm:$0xff] }
 0xcc5   : > { %2409 = vst.msk [vmem:[#allocation4 + $0xb8] sm:$0xff] %vm586_vm0, %v2401_v4  ;;  %v2822_v34 = vmul.f32 %v2785_v51, %v2774_v29  ;;  %v2790_v5 = vpop.permute.xlu1 %2789  ;;  %v3365_v29 = vld [vmem:[#allocation4 + $0x110] sm:$0xff] }
 0xcc6   : > { %2408 = vst.msk [vmem:[#allocation4 + $0xb0] sm:$0xff] %vm586_vm0, %v2400_v35  ;;  %v2823_v20 = vmul.f32 %v2790_v5, %v2775_v43  ;;  %v11743_v35 = vld [vmem:[#allocation69_spill] sm:$0xff] }
 0xcc7   : > { %v2983_v26 = vadd.f32 %v11735_v13, %v2822_v34 }
 0xcc8   : > { %v2984_v17 = vadd.f32 %v11736_v6, %v2823_v20  ;;  %v2800_v10 = vpop.permute.xlu0 %2799  ;;  %v3369_v20 = vld [vmem:[#allocation4 + $0x130] sm:$0xff]  ;;  %v11746_v6 = vld [vmem:[#allocation32_spill] sm:$0xff] }
 0xcc9   : > { %2991 = vst.msk [vmem:[#allocation4 + $0xc0] sm:$0xff] %vm586_vm0, %v2983_v26  ;;  %v2825_v42 = vmul.f32 %v2800_v10, %v2777_v62  ;;  %v2795_v31 = vpop.permute.xlu1 %2794  ;;  %v11744_v62 = vld [vmem:[#allocation17_spill] sm:$0xff]  ;;  %v11745_v26 = vld [vmem:[#allocation19_spill] sm:$0xff] }
 0xcca   : > { %2992 = vst.msk [vmem:[#allocation4 + $0xc8] sm:$0xff] %vm586_vm0, %v2984_v17  ;;  %v2824_v32 = vmul.f32 %v2795_v31, %v2776_v57  ;;  %v11747_v17 = vld [vmem:[#allocation37_spill] sm:$0xff] }
 0xccb   : > { %v2986_v33 = vadd.f32 %v11737_v63, %v2825_v42  ;;  %v11748_v10 = vsub.f32 %v11746_v6, %v11747_v17  ;;  %v11749_v31 = vld [vmem:[#allocation9_spill] sm:$0xff]  ;;  %v3895_v6 = vld [vmem:[#allocation3 + $0x140] sm:$0xff] }
 0xccc   : > { %v2985_v25 = vadd.f32 %v11738_v22, %v2824_v32  ;;  %v2810_v8 = vpop.permute.xlu0 %2809  ;;  %v11750_v32 = vld [vmem:[#allocation11_spill] sm:$0xff] }
 0xccd   : > { %2994 = vst.msk [vmem:[#allocation4 + $0xd8] sm:$0xff] %vm586_vm0, %v2986_v33  ;;  %v2827_v28 = vmul.f32 %v2810_v8, %v2779_v50  ;;  %v2805_v30 = vpop.permute.xlu1 %2804  ;;  %v3816_v42 = vmul.f32 1.442695, %v11748_v10  ;;  %v11751_v50 = vsub.f32 %v11749_v31, %v11750_v32  ;;  %v11752_v33 = vld [vmem:[#allocation12_spill] sm:$0xff]  ;;  %v3898_v31 = vld [vmem:[#allocation3 + $0x158] sm:$0xff] }
 0xcce   : > { %2993 = vst.msk [vmem:[#allocation4 + $0xd0] sm:$0xff] %vm586_vm0, %v2985_v25  ;;  %v2826_v18 = vmul.f32 %v2805_v30, %v2778_v54  ;;  %v11753_v54 = vld [vmem:[#allocation14_spill] sm:$0xff]  ;;  %v11755_v8 = vld [vmem:[#allocation16_spill] sm:$0xff] }
 0xccf   : > { %v2988_v7 = vadd.f32 %v11739_v2, %v2827_v28  ;;  %7532 = vpow2.f32 %v3816_v42  ;;  %v3818_v63 = vmul.f32 1.442695, %v11751_v50  ;;  %v11754_v22 = vsub.f32 %v11752_v33, %v11753_v54  ;;  %v11756_v28 = vld [vmem:[#allocation18_spill] sm:$0xff]  ;;  %v11758_v2 = vld [vmem:[#allocation20_spill] sm:$0xff] }
 0xcd0   : > { %v2987_v53 = vadd.f32 %v11740_v23, %v2826_v18  ;;  %v2820_v19 = vpop.permute.xlu0 %2819  ;;  %v11757_v30 = vsub.f32 %v11755_v8, %v11756_v28 }
 0xcd1   : > { %2996 = vst.msk [vmem:[#allocation4 + $0xe8] sm:$0xff] %vm586_vm0, %v2988_v7  ;;  %v2829_v48 = vmul.f32 %v2820_v19, %v2781_v1  ;;  %v2815_v52 = vpop.permute.xlu1 %2814  ;;  %7534 = vpow2.f32 %v3818_v63  ;;  %v3822_v25 = vmul.f32 1.442695, %v11754_v22  ;;  %v11759_v7 = vld [vmem:[#allocation30_spill] sm:$0xff]  ;;  %v3900_v22 = vld [vmem:[#allocation3 + $0x168] sm:$0xff] }
 0xcd2   : > { %2995 = vst.msk [vmem:[#allocation4 + $0xe0] sm:$0xff] %vm586_vm0, %v2987_v53  ;;  %v2828_v15 = vmul.f32 %v2815_v52, %v2780_v11  ;;  %v3826_v18 = vmul.f32 1.442695, %v11757_v30  ;;  %v11760_v11 = vsub.f32 %v11758_v2, %v11759_v7  ;;  %v3896_v53 = vld [vmem:[#allocation3 + $0x148] sm:$0xff]  ;;  %v3902_v7 = vld [vmem:[#allocation3 + $0x178] sm:$0xff] }
 0xcd3   : > { %v2990_v12 = vadd.f32 %v11741_v24, %v2829_v48  ;;  %7536 = vpow2.f32 %v3822_v25  ;;  %v11761_v52 = vld [vmem:[#allocation73_spill] sm:$0xff] }
 0xcd4   : > { %v2989_v3 = vadd.f32 %v11742_v49, %v2828_v15  ;;  %v3374_v16 = vpop.permute.xlu0 %3373  ;;  %7538 = vpow2.f32 %v3826_v18  ;;  %v3814_v23 = vmul.f32 1.442695, %v11760_v11  ;;  %v11762_v15 = vld [vmem:[#allocation33_spill] sm:$0xff] }
 0xcd5   : > { %2998 = vst.msk [vmem:[#allocation4 + $0xf8] sm:$0xff] %vm586_vm0, %v2990_v12  ;;  %v3411_v0 = vmul.f32 %v3374_v16, %v3363_v58  ;;  %v3379_v38 = vpop.permute.xlu1 %3378  ;;  %v11763_v58 = vsub.f32 %v11761_v52, %v11762_v15 }
 0xcd6   : > { %2997 = vst.msk [vmem:[#allocation4 + $0xf0] sm:$0xff] %vm586_vm0, %v2989_v3  ;;  %v3412_v9 = vmul.f32 %v3379_v38, %v3364_v60  ;;  %7540 = vpow2.f32 %v3814_v23  ;;  %v3897_v60 = vld [vmem:[#allocation3 + $0x150] sm:$0xff]  ;;  %v11765_v38 = vld [vmem:[#allocation39_spill] sm:$0xff] }
 0xcd7   : > { %v3572_v46 = vadd.f32 %v9882_v55, %v3411_v0  ;;  %v3820_v24 = vmul.f32 1.442695, %v11763_v58  ;;  %v11764_v0 = vld [vmem:[#allocation35_spill] sm:$0xff] }
 0xcd8   : > { %v3573_v61 = vadd.f32 %v9880_v39, %v3412_v9  ;;  %v11766_v9 = vsub.f32 %v11764_v0, %v11765_v38 }
 0xcd9   : > { %3580 = vst.msk [vmem:[#allocation4 + $0x100] sm:$0xff] %vm586_vm0, %v3572_v46  ;;  %v3384_v4 = vpop.permute.xlu1 %3383  ;;  %7542 = vpow2.f32 %v3820_v24 }
 0xcda   : > { %3581 = vst.msk [vmem:[#allocation4 + $0x108] sm:$0xff] %vm586_vm0, %v3573_v61  ;;  %v3413_v43 = vmul.f32 %v3384_v4, %v3365_v29  ;;  %v3824_v46 = vmul.f32 1.442695, %v11766_v9  ;;  %v3899_v61 = vld [vmem:[#allocation3 + $0x160] sm:$0xff] }
 0xcdc   : > { %v3574_v51 = vadd.f32 %v11743_v35, %v3413_v43  ;;  %v10394_v1 = vpop.eup %7532  ;;  %7544 = vpow2.f32 %v3824_v46  ;;  %v11767_v35 = vld [vmem:[#allocation8_spill] sm:$0xff] }
 0xcdd   : > { %v3394_v34 = vpop.permute.xlu1 %3393  ;;  %v3904_v19 = vmul.f32 %v10394_v1, %v3896_v53 }
 0xcde   : > { %3582 = vst.msk [vmem:[#allocation4 + $0x110] sm:$0xff] %vm586_vm0, %v3574_v51  ;;  %v3415_v5 = vmul.f32 %v3394_v34, %v3367_v59  ;;  %v10400_v48 = vpop.eup %7534  ;;  %v11768_v51 = vld [vmem:[#allocation10_spill] sm:$0xff] }
 0xcdf   : > { %v3905_v3 = vmul.f32 %v10400_v48, %v3897_v60  ;;  %v11769_v34 = vsub.f32 %v11767_v35, %v11768_v51 }
 0xce0   : > { %v3576_v13 = vadd.f32 %v11744_v62, %v3415_v5  ;;  %v10407_v16 = vpop.eup %7536  ;;  %v3901_v62 = vld [vmem:[#allocation3 + $0x170] sm:$0xff] }
 0xce1   : > { %v3404_v55 = vpop.permute.xlu1 %3403  ;;  %v3907_v43 = vmul.f32 %v10407_v16, %v3899_v61  ;;  %v10414_v59 = vpop.eup %7538  ;;  %v3828_v5 = vmul.f32 1.442695, %v11769_v34 }
 0xce2   : > { %3584 = vst.msk [vmem:[#allocation4 + $0x120] sm:$0xff] %vm586_vm0, %v3576_v13  ;;  %v3417_v39 = vmul.f32 %v3404_v55, %v3369_v20  ;;  %v3909_v55 = vmul.f32 %v10414_v59, %v3901_v62  ;;  %v10516_v62 = vld [vmem:[#allocation2 + $0x188] sm:$0xff] }
 0xce3   : > { %7546 = vpow2.f32 %v3828_v5  ;;  %v7785_v5 = vld [vmem:[%s7935_s25 + $0x38] sm:$0xff] }
 0xce4   : > { %v3578_v57 = vadd.f32 %v11745_v26, %v3417_v39  ;;  %v7541_v26 = vpop.eup %7540 }
 0xce5   : > { %v3903_v17 = vmul.f32 %v7541_v26, %v3895_v6 }
 0xce6   : > { %3586 = vst.msk [vmem:[#allocation4 + $0x130] sm:$0xff] %vm586_vm0, %v3578_v57  ;;  %v7543_v10 = vpop.eup %7542 }
 0xce7   : > { %v3906_v63 = vmul.f32 %v7543_v10, %v3898_v31 }
 0xce9   : > { %v7545_v33 = vpop.eup %7544 }
 0xcea   : > { %v3908_v30 = vmul.f32 %v7545_v33, %v3900_v22 }
 0xcf0   : > { %v10430_v18 = vpop.eup %7546 }
 0xcf1   : > { %v3910_v53 = vmul.f32 %v10430_v18, %v3902_v7 }
 0xd01   : > { %v3916_v12 = vpop.xlane.xlu0 %3915 }
 0xd02   : > { %v3936_v49 = vadd.f32 %v3916_v12, %v3904_v19 }
 0xd04   : > { %3944 = vst.msk [vmem:[#allocation3 + $0x148] sm:$0xff] %vm457_vm1, %v3936_v49 }
 0xd05   : > { %v3919_v29 = vpop.xlane.xlu0 %3918 }
 0xd06   : > { %v3937_v4 = vadd.f32 %v3919_v29, %v3905_v3 }
 0xd07   : > { %v10422_v32 = vpop.f32.mrf.mxu0 }
 0xd08   : > { %3945 = vst.msk [vmem:[#allocation3 + $0x150] sm:$0xff] %vm457_vm1, %v3937_v4 }
 0xd09   : > { %v3925_v20 = vpop.xlane.xlu0 %3924  ;;  %v10425_v25 = vpop.f32.mrf.mxu0 }
 0xd0a   : > { %v3939_v13 = vadd.f32 %v3925_v20, %v3907_v43  ;;  %v10473_v43 = vld [vmem:[%s8453_s26 + $0x30] sm:$0xff]  ;;  %v10512_v20 = vld [vmem:[%s8453_s26 + $0x38] sm:$0xff] }
 0xd0c   : > { %3947 = vst.msk [vmem:[#allocation3 + $0x160] sm:$0xff] %vm457_vm1, %v3939_v13 }
 0xd0d   : > { %v3931_v39 = vpop.xlane.xlu0 %3930 }
 0xd0e   : > { %v3941_v57 = vadd.f32 %v3931_v39, %v3909_v55  ;;  %v10521_v39 = vld [vmem:[#allocation2 + $0x180] sm:$0xff] }
 0xd10   : > { %3949 = vst.msk [vmem:[#allocation3 + $0x170] sm:$0xff] %vm457_vm1, %v3941_v57 }
 0xd12   : > { %v3913_v42 = vpop.xlane.xlu1 %3912 }
 0xd13   : > { %v3935_v50 = vadd.f32 %v3913_v42, %v3903_v17  ;;  %v10531_v17 = vld [vmem:[#allocation2 + $0x198] sm:$0xff] }
 0xd15   : > { %3943 = vst.msk [vmem:[#allocation3 + $0x140] sm:$0xff] %vm457_vm1, %v3935_v50 }
 0xd16   : > { %v3922_v54 = vpop.xlane.xlu1 %3921 }
 0xd17   : > { %v3938_v8 = vadd.f32 %v3922_v54, %v3906_v63  ;;  %v10428_v28 = vpop.f32.mrf.mxu0  ;;  %v10546_v54 = vld [vmem:[#allocation2 + $0x190] sm:$0xff] }
 0xd19   : > { %3946 = vst.msk [vmem:[#allocation3 + $0x158] sm:$0xff] %vm457_vm1, %v3938_v8  ;;  %v10432_v23 = vpop.f32.mrf.mxu0  ;;  %v10553_v8 = vld [vmem:[%s8453_s26 + $0x28] sm:$0xff] }
 0xd1a   : > { %v3928_v2 = vpop.xlane.xlu1 %3927 }
 0xd1b   : > { %v3940_v11 = vadd.f32 %v3928_v2, %v3908_v30  ;;  %v3370_v30 = vld [vmem:[#allocation4 + $0x138] sm:$0xff] }
 0xd1d   : > { %3948 = vst.msk [vmem:[#allocation3 + $0x168] sm:$0xff] %vm457_vm1, %v3940_v11  ;;  %v3953_v11 = vld [vmem:[#allocation4 + $0x148] sm:$0xff] }
 0xd1e   : > { %v3934_v19 = vpop.xlane.xlu1 %3933 }
 0xd1f   : > { %v3942_v52 = vadd.f32 %v3934_v19, %v3910_v53  ;;  %v10436_v15 = vpop.f32.mrf.mxu0  ;;  %v3366_v53 = vld [vmem:[#allocation4 + $0x118] sm:$0xff] }
 0xd21   : > { %3950 = vst.msk [vmem:[#allocation3 + $0x178] sm:$0xff] %vm457_vm1, %v3942_v52  ;;  %v10439_v58 = vpop.f32.mrf.mxu0  ;;  %v10569_v52 = vld [vmem:[%s8453_s26 + $0x18] sm:$0xff] }
 0xd23   : > { %v10441_v24 = vpop.f32.mrf.mxu0 }
 0xd25   : > { %v10443_v12 = vpop.f32.mrf.mxu0 }
 0xd2d   : > { %v10445_v60 = vpop.f32.mrf.mxu0 }
 0xd2e   : > { %v4366_v49 = vsel %vm845_vm2, %v10445_v60, -inf }
 0xd2f   : > { %4367 = vmax.xlane.f32.xlu1 %v4366_v49  ;;  %v10449_v3 = vpop.f32.mrf.mxu0 }
 0xd30   : > { %v4363_v38 = vsel %vm845_vm2, %v10449_v3, -inf }
 0xd31   : > { %v10451_v0 = vpop.f32.mrf.mxu0 }
 0xd32   : > { %v4372_v46 = vsel %vm845_vm2, %v10451_v0, -inf }
 0xd33   : > { %4364 = vmax.xlane.f32.xlu1 %v4363_v38  ;;  %v10455_v9 = vpop.f32.mrf.mxu0 }
 0xd34   : > { %v4369_v4 = vsel %vm845_vm2, %v10455_v9, -inf }
 0xd35   : > { %v10459_v29 = vpop.f32.mrf.mxu0 }
 0xd36   : > { %v4378_v61 = vsel %vm845_vm2, %v10459_v29, -inf }
 0xd37   : > { %4373 = vmax.xlane.f32.xlu1 %v4372_v46  ;;  %4379 = vmax.xlane.f32.xlu0 %v4378_v61 }
 0xd3b   : > { %4370 = vmax.xlane.f32.xlu1 %v4369_v4  ;;  %v3954_v4 = vld [vmem:[#allocation4 + $0x150] sm:$0xff] }
 0xd4c   : > { %3967 = vperm.xlu1 %7355, %v10394_v1   ;;  %v10493_v1 = vld [vmem:[%s8453_s26] sm:$0xff] }
 0xd4d   : > { %3388 = vperm.xlu0 %7354, %v10330_v14   ;;  %v10478_v14 = vld [vmem:[%s8453_s26 + $0x20] sm:$0xff] }
 0xd50   : > { %3972 = vperm.xlu1 %7355, %v10400_v48   ;;  %v10497_v48 = vpop.f32.mrf.mxu0 }
 0xd51   : > { %3398 = vperm.xlu0 %7354, %v10336_v21   ;;  %v10483_v21 = vld [vmem:[%s8453_s26 + $0x10] sm:$0xff] }
 0xd54   : > { %3977 = vperm.xlu1 %7355, %v7543_v10   ;;  %v10533_v10 = vld [vmem:[#allocation2 + $0x1a8] sm:$0xff] }
 0xd55   : > { %3408 = vperm.xlu0 %7354, %v10342_v56   ;;  %v10488_v56 = vld [vmem:[%s8453_s26 + $0x8] sm:$0xff] }
 0xd58   : > { %3987 = vperm.xlu1 %7355, %v7545_v33  }
 0xd59   : > { %3962 = vperm.xlu0 %7354, %v7541_v26  }
 0xd5c   : > { %3992 = vperm.xlu1 %7355, %v10414_v59   ;;  %v10501_v59 = vpop.f32.mrf.mxu0 }
 0xd5d   : > { %3982 = vperm.xlu0 %7354, %v10407_v16   ;;  %v4375_v16 = vsel %vm845_vm2, %v10497_v48, -inf  ;;  %v4384_v35 = vsel %vm845_vm2, %v10501_v59, -inf }
 0xd5e   : > { %v10505_v51 = vpop.f32.mrf.mxu0 }
 0xd5f   : > { %v4381_v34 = vsel %vm845_vm2, %v10505_v51, -inf }
 0xd61   : > { %4609 = vrot.lane.b32.xlu0 %v10473_v43, %s7844_s5 }
 0xd65   : > { %4605 = vrot.lane.b32.xlu0 %v10478_v14, %s7844_s5 }
 0xd69   : > { %4601 = vrot.lane.b32.xlu0 %v10483_v21, %s7844_s5 }
 0xd6d   : > { %4599 = vrot.lane.b32.xlu0 %v10488_v56, %s7844_s5 }
 0xd71   : > { %4597 = vrot.lane.b32.xlu0 %v10493_v1, %s7844_s5 }
 0xd75   : > { %4804 = vrot.lane.b32.xlu0 %v7785_v5, %s7845_s6 }
 0xd80   : > { %4376 = vmax.xlane.f32.xlu1 %v4375_v16  ;;  %v3368_v16 = vld [vmem:[#allocation4 + $0x128] sm:$0xff] }
 0xd84   : > { %4385 = vmax.xlane.f32.xlu1 %v4384_v35 }
 0xd88   : > { %4382 = vmax.xlane.f32.xlu1 %v4381_v34  ;;  %v11770_v34 = vld [vmem:[#allocation13_spill] sm:$0xff] }
 0xd99   : > { %4611 = vrot.lane.b32.xlu1 %v10512_v20, %s7844_s5 }
 0xdb8   : > { %v4368_v13 = vpop.xlane.xlu1 %4367 }
 0xdb9   : > { %v10519_v55 = vmax.f32 %v10516_v62, %v4368_v13 }
 0xdbb   : > { %v4396_v26 = vsub.f32 %v10516_v62, %v10519_v55  ;;  %4767 = vst.msk [vmem:[#allocation2 + $0x188] sm:$0xff] %vm457_vm1, %v10519_v55  ;;  %4426 = vperm.xlu1 %7355, %v10519_v55  }
 0xdbc   : > { %v4365_v57 = vpop.xlane.xlu1 %4364 }
 0xdbd   : > { %v10529_v6 = vmax.f32 %v10521_v39, %v4365_v57 }
 0xdbf   : > { %v4395_v42 = vsub.f32 %v10521_v39, %v10529_v6  ;;  %4766 = vst.msk [vmem:[#allocation2 + $0x180] sm:$0xff] %vm457_vm1, %v10529_v6  ;;  %4421 = vperm.xlu1 %7355, %v10529_v6  }
 0xdc0   : > { %v4374_v31 = vpop.xlane.xlu1 %4373  ;;  %v4380_v50 = vpop.xlane.xlu0 %4379 }
 0xdc1   : > { %v10541_v63 = vmax.f32 %v10531_v17, %v4374_v31  ;;  %v10544_v33 = vmax.f32 %v10533_v10, %v4380_v50 }
 0xdc3   : > { %v4398_v22 = vsub.f32 %v10531_v17, %v10541_v63  ;;  %4769 = vst.msk [vmem:[#allocation2 + $0x198] sm:$0xff] %vm457_vm1, %v10541_v63  ;;  %4607 = vrot.lane.b32.xlu1 %v10553_v8, %s7844_s5  ;;  %4771 = vst.msk [vmem:[#allocation2 + $0x1a8] sm:$0xff] %vm457_vm1, %v10544_v33 }
 0xdc4   : > { %v4371_v2 = vpop.xlane.xlu1 %4370 }
 0xdc5   : > { %v10562_v7 = vmax.f32 %v10546_v54, %v4371_v2  ;;  %v3955_v2 = vld [vmem:[#allocation4 + $0x158] sm:$0xff] }
 0xdc7   : > { %v4397_v19 = vsub.f32 %v10546_v54, %v10562_v7  ;;  %4768 = vst.msk [vmem:[#allocation2 + $0x190] sm:$0xff] %vm457_vm1, %v10562_v7  ;;  %4603 = vrot.lane.b32.xlu1 %v10569_v52, %s7844_s5 }
 0xdc8   : > { %v3968_v49 = vpop.permute.xlu1 %3967  ;;  %v3389_v38 = vpop.permute.xlu0 %3388 }
 0xdc9   : > { %v4001_v46 = vmul.f32 %v3968_v49, %v3953_v11  ;;  %v3414_v61 = vmul.f32 %v3389_v38, %v3366_v53  ;;  %v11771_v53 = vld [vmem:[#allocation15_spill] sm:$0xff] }
 0xdcb   : > { %v4162_v35 = vadd.f32 %v10422_v32, %v4001_v46  ;;  %v3575_v5 = vadd.f32 %v11770_v34, %v3414_v61  ;;  %4436 = vperm.xlu1 %7355, %v10541_v63   ;;  %v3952_v34 = vld [vmem:[#allocation4 + $0x140] sm:$0xff] }
 0xdcc   : > { %v3973_v13 = vpop.permute.xlu1 %3972  ;;  %v3399_v57 = vpop.permute.xlu0 %3398 }
 0xdcd   : > { %4170 = vst.msk [vmem:[#allocation4 + $0x148] sm:$0xff] %vm586_vm0, %v4162_v35  ;;  %3583 = vst.msk [vmem:[#allocation4 + $0x118] sm:$0xff] %vm586_vm0, %v3575_v5  ;;  %v4002_v31 = vmul.f32 %v3973_v13, %v3954_v4  ;;  %v3416_v50 = vmul.f32 %v3399_v57, %v3368_v16  ;;  %v3957_v35 = vld [vmem:[#allocation4 + $0x168] sm:$0xff]  ;;  %v11772_v16 = vld [vmem:[#allocation71_spill] sm:$0xff] }
 0xdcf   : > { %v4163_v11 = vadd.f32 %v10432_v23, %v4002_v31  ;;  %v3577_v49 = vadd.f32 %v11771_v53, %v3416_v50  ;;  %4431 = vperm.xlu1 %7355, %v10562_v7   ;;  %v3958_v50 = vld [vmem:[#allocation4 + $0x170] sm:$0xff] }
 0xdd0   : > { %v3978_v32 = vpop.permute.xlu1 %3977  ;;  %v3409_v38 = vpop.permute.xlu0 %3408 }
 0xdd1   : > { %4171 = vst.msk [vmem:[#allocation4 + $0x150] sm:$0xff] %vm586_vm0, %v4163_v11  ;;  %3585 = vst.msk [vmem:[#allocation4 + $0x128] sm:$0xff] %vm586_vm0, %v3577_v49  ;;  %v4003_v46 = vmul.f32 %v3978_v32, %v3955_v2  ;;  %v3418_v61 = vmul.f32 %v3409_v38, %v3370_v30  ;;  %v3956_v11 = vld [vmem:[#allocation4 + $0x160] sm:$0xff] }
 0xdd3   : > { %v4164_v4 = vadd.f32 %v10428_v28, %v4003_v46  ;;  %v3579_v5 = vadd.f32 %v11772_v16, %v3418_v61  ;;  %4446 = vperm.xlu1 %7355, %v10544_v33  }
 0xdd4   : > { %v3988_v23 = vpop.permute.xlu1 %3987  ;;  %v3963_v13 = vpop.permute.xlu0 %3962 }
 0xdd5   : > { %4172 = vst.msk [vmem:[#allocation4 + $0x158] sm:$0xff] %vm586_vm0, %v4164_v4  ;;  %3587 = vst.msk [vmem:[#allocation4 + $0x138] sm:$0xff] %vm586_vm0, %v3579_v5  ;;  %v4005_v57 = vmul.f32 %v3988_v23, %v3957_v35  ;;  %v4000_v31 = vmul.f32 %v3963_v13, %v3952_v34  ;;  %v10596_v35 = vld [vmem:[#allocation2 + $0x1b8] sm:$0xff]  ;;  %v7790_v23 = vld [vmem:[%s7935_s25 + $0x28] sm:$0xff] }
 0xdd7   : > { %v4166_v30 = vadd.f32 %v10436_v15, %v4005_v57  ;;  %v4161_v2 = vadd.f32 %v10425_v25, %v4000_v31  ;;  %v4359_v15 = vld [vmem:[#allocation2 + $0x1a0] sm:$0xff]  ;;  %v7791_v57 = vld [vmem:[%s7935_s25 + $0x18] sm:$0xff] }
 0xdd8   : > { %v3993_v53 = vpop.permute.xlu1 %3992  ;;  %v3983_v28 = vpop.permute.xlu0 %3982 }
 0xdd9   : > { %4174 = vst.msk [vmem:[#allocation4 + $0x168] sm:$0xff] %vm586_vm0, %v4166_v30  ;;  %4169 = vst.msk [vmem:[#allocation4 + $0x140] sm:$0xff] %vm586_vm0, %v4161_v2  ;;  %v4006_v49 = vmul.f32 %v3993_v53, %v3958_v50  ;;  %v4004_v32 = vmul.f32 %v3983_v28, %v3956_v11  ;;  %v7792_v50 = vld [vmem:[%s7935_s25 + $0x20] sm:$0xff]  ;;  %v7793_v11 = vld [vmem:[%s7935_s25 + $0x8] sm:$0xff] }
 0xdda   : > { %v7794_v30 = vld [vmem:[%s7935_s25 + $0x10] sm:$0xff]  ;;  %v7795_v2 = vld [vmem:[%s7935_s25] sm:$0xff] }
 0xddb   : > { %v4167_v38 = vadd.f32 %v10443_v12, %v4006_v49  ;;  %v4165_v46 = vadd.f32 %v10439_v58, %v4004_v32  ;;  %v4361_v12 = vld [vmem:[#allocation2 + $0x1b0] sm:$0xff] }
 0xddc   : > { %v7789_v58 = vld [vmem:[%s7935_s25 + $0x30] sm:$0xff]  ;;  %v4610_v31 = vpop.permute.xlu0 %4609 }
 0xddd   : > { %4175 = vst.msk [vmem:[#allocation4 + $0x170] sm:$0xff] %vm586_vm0, %v4167_v38  ;;  %4173 = vst.msk [vmem:[#allocation4 + $0x160] sm:$0xff] %vm586_vm0, %v4165_v46 }
 0xde0   : > { %v4606_v62 = vpop.permute.xlu0 %4605 }
 0xe09   : > { %v4377_v25 = vpop.xlane.xlu1 %4376 }
 0xe0a   : > { %v4391_v61 = vmax.f32 %v4359_v15, %v4377_v25 }
 0xe0c   : > { %4770 = vst.msk [vmem:[#allocation2 + $0x1a0] sm:$0xff] %vm457_vm1, %v4391_v61  ;;  %4441 = vperm.xlu1 %7355, %v4391_v61  }
 0xe0d   : > { %v4386_v34 = vpop.xlane.xlu1 %4385 }
 0xe0e   : > { %v10600_v4 = vmax.f32 %v10596_v35, %v4386_v34 }
 0xe10   : > { %4773 = vst.msk [vmem:[#allocation2 + $0x1b8] sm:$0xff] %vm457_vm1, %v10600_v4  ;;  %4802 = vrot.lane.b32.xlu1 %v7789_v58, %s7845_s6  ;;  %v4402_v39 = vsub.f32 %v10596_v35, %v10600_v4 }
 0xe11   : > { %v4383_v16 = vpop.xlane.xlu1 %4382 }
 0xe12   : > { %v4393_v5 = vmax.f32 %v4361_v12, %v4383_v16  ;;  %v4417_v63 = vmul.f32 1.442695, %v4402_v39 }
 0xe14   : > { %4772 = vst.msk [vmem:[#allocation2 + $0x1b0] sm:$0xff] %vm457_vm1, %v4393_v5  ;;  %4451 = vperm.xlu0 %7354, %v4393_v5   ;;  %4800 = vrot.lane.b32.xlu1 %v7790_v23, %s7845_s6 }
 0xe15   : > { %v4612_v13 = vpop.permute.xlu1 %4611 }
 0xe16   : > { %7219 = vmatprep.subr.mxu1 %v4612_v13 }
 0xe17   : > { %7220 = vmatpush3.msra.mxu1 %v4612_v13 }
 0xe18   : > { %4456 = vperm.xlu0 %7354, %v10600_v4   ;;  %4796 = vrot.lane.b32.xlu1 %v7791_v57, %s7845_s6 }
 0xe19   : > { %7221 = vmatprep.subr.mxu1 %v4610_v31 }
 0xe1a   : > { %7222 = vmatpush3.msra.mxu1 %v4610_v31 }
 0xe1c   : > { %4798 = vrot.lane.b32.xlu0 %v7792_v50, %s7845_s6  ;;  %4792 = vrot.lane.b32.xlu1 %v7793_v11, %s7845_s6 }
 0xe20   : > { %4794 = vrot.lane.b32.xlu0 %v7794_v30, %s7845_s6  ;;  %4774 = vrot.lane.b32.xlu1 %v7953_v27, %s7845_s6  ;;  %v4403_v27 = vmul.f32 1.442695, %v4395_v42 }
 0xe22   : > { %7548 = vpow2.f32 %v4403_v27 }
 0xe24   : > { %4790 = vrot.lane.b32.xlu0 %v7795_v2, %s7845_s6  ;;  %4778 = vrot.lane.b32.xlu1 %v8005_v37, %s7845_s6  ;;  %v4409_v37 = vmul.f32 1.442695, %v4398_v22 }
 0xe28   : > { %4776 = vrot.lane.b32.xlu0 %v8001_v36, %s7845_s6  ;;  %4782 = vrot.lane.b32.xlu1 %v8015_v41, %s7845_s6  ;;  %v4405_v36 = vmul.f32 1.442695, %v4396_v26  ;;  %v4407_v41 = vmul.f32 1.442695, %v4397_v19 }
 0xe2a   : > { %7550 = vpow2.f32 %v4405_v36 }
 0xe2b   : > { %7552 = vpow2.f32 %v4409_v37 }
 0xe2c   : > { %4780 = vrot.lane.b32.xlu0 %v8011_v40, %s7845_s6  ;;  %4786 = vrot.lane.b32.xlu1 %v8025_v45, %s7845_s6  ;;  %v4399_v40 = vsub.f32 %v4359_v15, %v4391_v61  ;;  %v4401_v45 = vsub.f32 %v4361_v12, %v4393_v5  ;;  %7554 = vpow2.f32 %v4407_v41 }
 0xe2e   : > { %v4415_v26 = vmul.f32 1.442695, %v4401_v45 }
 0xe30   : > { %4784 = vrot.lane.b32.xlu0 %v8021_v44, %s7845_s6  ;;  %3997 = vperm.xlu1 %7355, %v10430_v18   ;;  %v4411_v44 = vmul.f32 1.442695, %v4399_v40 }
 0xe32   : > { %7556 = vpow2.f32 %v4411_v44 }
 0xe34   : > { %4788 = vrot.lane.b32.xlu0 %v8030_v47, %s7845_s6  ;;  %5188 = vrot.lane.b32.xlu1 %v10488_v56, %s7845_s6  ;;  %v11773_v47 = vsub.f32 %v10533_v10, %v10544_v33  ;;  %v10666_v33 = vpop.eup %7548 }
 0xe36   : > { %v4427_v18 = vpop.permute.xlu1 %4426  ;;  %v4413_v56 = vmul.f32 1.442695, %v11773_v47 }
 0xe37   : > { %v4460_v55 = vsub.f32 %v10445_v60, %v4427_v18 }
 0xe38   : > { %5186 = vrot.lane.b32.xlu0 %v10493_v1, %s7845_s6  ;;  %5192 = vrot.lane.b32.xlu1 %v10569_v52, %s7845_s6  ;;  %v4602_v1 = vpop.permute.xlu0 %4601  ;;  %7558 = vpow2.f32 %v4413_v56 }
 0xe39   : > { %v4469_v10 = vmul.f32 1.442695, %v4460_v55  ;;  %7560 = vpow2.f32 %v4415_v26 }
 0xe3a   : > { %v4422_v6 = vpop.permute.xlu1 %4421 }
 0xe3b   : > { %v4459_v17 = vsub.f32 %v10449_v3, %v4422_v6  ;;  %v10671_v3 = vpop.eup %7550 }
 0xe3c   : > { %5190 = vrot.lane.b32.xlu0 %v10483_v21, %s7845_s6  ;;  %5196 = vrot.lane.b32.xlu1 %v10553_v8, %s7845_s6  ;;  %v4600_v54 = vpop.permute.xlu0 %4599  ;;  %v10673_v22 = vpop.eup %7552 }
 0xe3d   : > { %v4467_v42 = vmul.f32 1.442695, %v4459_v17  ;;  %v10677_v8 = vpop.eup %7554 }
 0xe3e   : > { %v4608_v60 = vpop.permute.xlu1 %4607 }
 0xe3f   : > { %7562 = vpow2.f32 %v4467_v42  ;;  %7223 = vmatprep.subr.mxu1 %v4608_v60  ;;  %v10679_v7 = vpop.eup %7556  ;;  %v3959_v42 = vld [vmem:[#allocation4 + $0x178] sm:$0xff] }
 0xe40   : > { %5194 = vrot.lane.b32.xlu0 %v10478_v14, %s7845_s6  ;;  %4551 = vperm.xlu1 %7355, %v10666_v33   ;;  %7564 = vpow2.f32 %v4469_v10  ;;  %v4598_v52 = vpop.permute.xlu0 %4597 }
 0xe41   : > { %7224 = vmatpush3.msra.mxu1 %v4608_v60  ;;  %7566 = vpow2.f32 %v4417_v63 }
 0xe42   : > { %v4604_v21 = vpop.permute.xlu1 %4603  ;;  %7225 = vmatprep.subr.mxu1 %v4606_v62 }
 0xe43   : > { %7226 = vmatpush3.msra.mxu1 %v4606_v62 }
 0xe44   : > { %4556 = vperm.xlu0 %7354, %v10671_v3   ;;  %4566 = vperm.xlu1 %7355, %v10673_v22  }
 0xe45   : > { %7227 = vmatprep.subr.mxu1 %v4604_v21  ;;  %v10684_v53 = vpop.eup %7558 }
 0xe46   : > { %v4437_v14 = vpop.permute.xlu1 %4436  ;;  %7228 = vmatpush3.msra.mxu1 %v4604_v21  ;;  %v10686_v49 = vpop.eup %7560 }
 0xe47   : > { %7229 = vmatprep.subr.mxu1 %v4602_v1  ;;  %v4462_v19 = vsub.f32 %v10451_v0, %v4437_v14  ;;  %v4805_v0 = vpop.permute.xlu0 %4804 }
 0xe48   : > { %4571 = vperm.xlu0 %7354, %v10679_v7   ;;  %4561 = vperm.xlu1 %7355, %v10677_v8  }
 0xe49   : > { %7230 = vmatpush3.msra.mxu1 %v4602_v1  ;;  %v4473_v46 = vmul.f32 1.442695, %v4462_v19 }
 0xe4a   : > { %v4432_v28 = vpop.permute.xlu1 %4431  ;;  %7231 = vmatprep.subr.mxu1 %v4600_v54 }
 0xe4b   : > { %v4461_v32 = vsub.f32 %v10455_v9, %v4432_v28  ;;  %7232 = vmatpush3.msra.mxu1 %v4600_v54 }
 0xe4c   : > { %v7563_v38 = vpop.eup %7562  ;;  %4581 = vperm.xlu0 %7354, %v10686_v49   ;;  %4576 = vperm.xlu1 %7355, %v10684_v53  }
 0xe4d   : > { %v4471_v15 = vmul.f32 1.442695, %v4461_v32  ;;  %7233 = vmatprep.subr.mxu1 %v4598_v52  ;;  %7235 = vmatprep.mubr.msk.f32.mxu1 %vm845_vm2, %v7563_v38  ;;  %v7565_v25 = vpop.eup %7564  ;;  %v4500_v58 = vsel %vm845_vm2, %v7563_v38, 0.0 }
 0xe4e   : > { %7234 = vmatpush3.msra.mxu1 %v4598_v52  ;;  %v10692_v61 = vpop.eup %7566  ;;  %v4447_v9 = vpop.permute.xlu1 %4446  ;;  %v4503_v13 = vsel %vm845_vm2, %v7565_v25, 0.0 }
 0xe4f   : > { %7568 = vpow2.f32 %v4471_v15  ;;  %7236 = vmatmul.mubr.msk.f32.vlgmr.msra.gmra.mxu1 %vm845_vm2, %v7565_v25  ;;  %7247 = vmatprep.subr.msk.mxu1 %vm586_vm0, %v4805_v0  ;;  %v4464_v4 = vsub.f32 %v10459_v29, %v4447_v9 }
 0xe50   : > { %7570 = vpow2.f32 %v4473_v46  ;;  %4586 = vperm.xlu1 %7355, %v10692_v61   ;;  %7248 = vmatpush3.xpose.msk.msra.mxu1 %vm586_vm0, %v4805_v0 }
 0xe51   : > { %v4477_v12 = vmul.f32 1.442695, %v4464_v4  ;;  %v4484_v4 = vld [vmem:[#allocation3 + $0x180] sm:$0xff] }
 0xe53   : > { %7572 = vpow2.f32 %v4477_v12 }
 0xe5c   : > { %v7569_v35 = vpop.eup %7568 }
 0xe5d   : > { %v7571_v34 = vpop.eup %7570  ;;  %7238 = vmatprep.mubr.msk.f32.mxu1 %vm845_vm2, %v7569_v35  ;;  %v4506_v5 = vsel %vm845_vm2, %v7569_v35, 0.0 }
 0xe5e   : > { %7239 = vmatmul.mubr.msk.f32.gmra.mxu1 %vm845_vm2, %v7571_v34  ;;  %v4509_v16 = vsel %vm845_vm2, %v7571_v34, 0.0 }
 0xe60   : > { %v7573_v23 = vpop.eup %7572 }
 0xe61   : > { %v4515_v57 = vsel %vm845_vm2, %v7573_v23, 0.0 }
 0xe6b   : > { %4501 = vadd.xlane.f32.xlu0 %v4500_v58  ;;  %v4492_v58 = vmul.f32 %v10666_v33, %v4484_v4 }
 0xe6f   : > { %4510 = vadd.xlane.f32.xlu0 %v4509_v16 }
 0xe73   : > { %4507 = vadd.xlane.f32.xlu0 %v4506_v5  ;;  %v4487_v5 = vld [vmem:[#allocation3 + $0x198] sm:$0xff] }
 0xe74   : > { %4504 = vadd.xlane.f32.xlu1 %v4503_v13  ;;  %v4495_v13 = vmul.f32 %v10673_v22, %v4487_v5 }
 0xe77   : > { %4516 = vadd.xlane.f32.xlu0 %v4515_v57 }
 0xe87   : > { %v4442_v29 = vpop.permute.xlu1 %4441 }
 0xe88   : > { %v4463_v31 = vsub.f32 %v10497_v48, %v4442_v29  ;;  %v4486_v29 = vld [vmem:[#allocation3 + $0x190] sm:$0xff] }
 0xe8a   : > { %v4475_v50 = vmul.f32 1.442695, %v4463_v31 }
 0xe8b   : > { %v4803_v11 = vpop.permute.xlu1 %4802 }
 0xe8c   : > { %7574 = vpow2.f32 %v4475_v50  ;;  %7249 = vmatprep.subr.msk.mxu1 %vm586_vm0, %v4803_v11 }
 0xe8d   : > { %7250 = vmatpush3.xpose.msk.msra.mxu1 %vm586_vm0, %v4803_v11  ;;  %v4485_v11 = vld [vmem:[#allocation3 + $0x188] sm:$0xff] }
 0xe8e   : > { %v4493_v33 = vmul.f32 %v10671_v3, %v4485_v11 }
 0xe8f   : > { %v4801_v30 = vpop.permute.xlu1 %4800  ;;  %v4452_v2 = vpop.permute.xlu0 %4451 }
 0xe90   : > { %v4465_v27 = vsub.f32 %v10505_v51, %v4452_v2  ;;  %7251 = vmatprep.subr.msk.mxu1 %vm586_vm0, %v4801_v30 }
 0xe91   : > { %7252 = vmatpush3.xpose.msk.msra.mxu1 %vm586_vm0, %v4801_v30  ;;  %v4494_v30 = vmul.f32 %v10677_v8, %v4486_v29 }
 0xe92   : > { %v4479_v36 = vmul.f32 1.442695, %v4465_v27  ;;  %v4489_v27 = vld [vmem:[#allocation3 + $0x1a8] sm:$0xff] }
 0xe93   : > { %v4797_v37 = vpop.permute.xlu1 %4796  ;;  %v4457_v40 = vpop.permute.xlu0 %4456  ;;  %v4497_v22 = vmul.f32 %v10684_v53, %v4489_v27  ;;  %v4543_v53 = vld [vmem:[#allocation4 + $0x190] sm:$0xff] }
 0xe94   : > { %7576 = vpow2.f32 %v4479_v36  ;;  %v4466_v48 = vsub.f32 %v10501_v59, %v4457_v40 }
 0xe96   : > { %v4481_v41 = vmul.f32 1.442695, %v4466_v48 }
 0xe97   : > { %v4793_v44 = vpop.permute.xlu1 %4792  ;;  %v4799_v45 = vpop.permute.xlu0 %4798 }
 0xe98   : > { %7578 = vpow2.f32 %v4481_v41  ;;  %7253 = vmatprep.subr.msk.mxu1 %vm586_vm0, %v4799_v45 }
 0xe99   : > { %v7575_v18 = vpop.eup %7574  ;;  %7254 = vmatpush3.xpose.msk.msra.mxu1 %vm586_vm0, %v4799_v45  ;;  %v4541_v45 = vld [vmem:[#allocation4 + $0x180] sm:$0xff] }
 0xe9a   : > { %7241 = vmatprep.mubr.msk.f32.mxu1 %vm845_vm2, %v7575_v18  ;;  %v4512_v51 = vsel %vm845_vm2, %v7575_v18, 0.0  ;;  %7255 = vmatprep.subr.msk.mxu1 %vm586_vm0, %v4797_v37 }
 0xe9b   : > { %v4775_v62 = vpop.permute.xlu1 %4774  ;;  %4513 = vadd.xlane.f32.xlu1 %v4512_v51  ;;  %7242 = vmatmul.mubr.msk.f32.gmra.mxu1 %vm845_vm2, %v7573_v23  ;;  %v4795_v59 = vpop.permute.xlu0 %4794 }
 0xe9d   : > { %7256 = vmatpush3.xpose.msk.msra.mxu1 %vm586_vm0, %v4797_v37 }
 0xe9e   : > { %7257 = vmatprep.subr.msk.mxu1 %vm586_vm0, %v4795_v59 }
 0xe9f   : > { %v4779_v47 = vpop.permute.xlu1 %4778  ;;  %v4791_v56 = vpop.permute.xlu0 %4790 }
 0xea1   : > { %v7577_v55 = vpop.eup %7576  ;;  %7258 = vmatpush3.xpose.msk.msra.mxu1 %vm586_vm0, %v4795_v59 }
 0xea2   : > { %7244 = vmatprep.mubr.msk.f32.mxu1 %vm845_vm2, %v7577_v55  ;;  %v4518_v39 = vsel %vm845_vm2, %v7577_v55, 0.0  ;;  %7259 = vmatprep.subr.msk.mxu1 %vm586_vm0, %v4793_v44 }
 0xea3   : > { %v4783_v26 = vpop.permute.xlu1 %4782  ;;  %4519 = vadd.xlane.f32.xlu1 %v4518_v39  ;;  %v4777_v17 = vpop.permute.xlu0 %4776 }
 0xea5   : > { %v7579_v6 = vpop.eup %7578  ;;  %7260 = vmatpush3.xpose.msk.msra.mxu1 %vm586_vm0, %v4793_v44  ;;  %v4542_v44 = vld [vmem:[#allocation4 + $0x188] sm:$0xff] }
 0xea6   : > { %7245 = vmatmul.mubr.msk.f32.gmra.mxu1 %vm845_vm2, %v7579_v6  ;;  %v4521_v1 = vsel %vm845_vm2, %v7579_v6, 0.0  ;;  %7261 = vmatprep.subr.msk.mxu1 %vm586_vm0, %v4791_v56 }
 0xea7   : > { %v4787_v10 = vpop.permute.xlu1 %4786  ;;  %4522 = vadd.xlane.f32.xlu0 %v4521_v1  ;;  %7263 = vmatprep.mubr.msk.f32.mxu1 %vm586_vm0, %v4775_v62  ;;  %v4781_v63 = vpop.permute.xlu0 %4780 }
 0xea9   : > { %7262 = vmatpush3.xpose.msk.msra.mxu1 %vm586_vm0, %v4791_v56 }
 0xeab   : > { %v3998_v60 = vpop.permute.xlu1 %3997  ;;  %v4785_v14 = vpop.permute.xlu0 %4784 }
 0xeac   : > { %v4007_v21 = vmul.f32 %v3998_v60, %v3959_v42  ;;  %7264 = vmatmul.mubr.msk.f32.vlgmr.msra.gmra.mxu1 %vm586_vm0, %v4777_v17  ;;  %v4488_v17 = vld [vmem:[#allocation3 + $0x1a0] sm:$0xff]  ;;  %v4490_v60 = vld [vmem:[#allocation3 + $0x1b0] sm:$0xff] }
 0xead   : > { %7266 = vmatprep.mubr.msk.f32.mxu1 %vm586_vm0, %v4779_v47  ;;  %v4544_v47 = vld [vmem:[#allocation4 + $0x198] sm:$0xff] }
 0xeae   : > { %v4168_v54 = vadd.f32 %v10441_v24, %v4007_v21  ;;  %v4498_v21 = vmul.f32 %v10686_v49, %v4490_v60 }
 0xeaf   : > { %v4789_v19 = vpop.permute.xlu0 %4788  ;;  %v10740_v52 = vpop.permute.xlu1 %5188 }
 0xeb0   : > { %4176 = vst.msk [vmem:[#allocation4 + $0x178] sm:$0xff] %vm586_vm0, %v4168_v54  ;;  %7267 = vmatmul.mubr.msk.f32.gmra.mxu1 %vm586_vm0, %v4781_v63 }
 0xeb1   : > { %7269 = vmatprep.mubr.msk.f32.mxu1 %vm586_vm0, %v4783_v26 }
 0xeb3   : > { %v10742_v28 = vpop.permute.xlu0 %5186  ;;  %v10744_v32 = vpop.permute.xlu1 %5192 }
 0xeb4   : > { %7270 = vmatmul.mubr.msk.f32.gmra.mxu1 %vm586_vm0, %v4785_v14  ;;  %v4491_v14 = vld [vmem:[#allocation3 + $0x1b8] sm:$0xff] }
 0xeb5   : > { %7272 = vmatprep.mubr.msk.f32.mxu1 %vm586_vm0, %v4787_v10  ;;  %v4496_v10 = vmul.f32 %v10679_v7, %v4488_v17  ;;  %v4545_v7 = vld [vmem:[#allocation4 + $0x1a0] sm:$0xff] }
 0xeb7   : > { %v10746_v24 = vpop.permute.xlu0 %5190  ;;  %v10748_v38 = vpop.permute.xlu1 %5196 }
 0xeb8   : > { %7273 = vmatmul.mubr.msk.f32.gmra.mxu1 %vm586_vm0, %v4789_v19 }
 0xebb   : > { %v10750_v46 = vpop.permute.xlu0 %5194  ;;  %v4552_v0 = vpop.permute.xlu1 %4551 }
 0xebc   : > { %v4589_v51 = vmul.f32 %v4552_v0, %v4541_v45  ;;  %v4499_v0 = vmul.f32 %v10692_v61, %v4491_v14  ;;  %v4547_v61 = vld [vmem:[#allocation4 + $0x1b0] sm:$0xff]  ;;  %v5441_v14 = vld [vmem:[#allocation3 + $0x58] sm:$0xff] }
 0xebf   : > { %v4557_v15 = vpop.permute.xlu0 %4556  ;;  %v4567_v25 = vpop.permute.xlu1 %4566 }
 0xec0   : > { %v4590_v8 = vmul.f32 %v4557_v15, %v4542_v44  ;;  %v4592_v56 = vmul.f32 %v4567_v25, %v4544_v47  ;;  %v5369_v44 = vld [vmem:[#allocation3 + $0x18] sm:$0xff] }
 0xec3   : > { %v10752_v9 = vpop.permute.xlu0 %4571  ;;  %v4562_v35 = vpop.permute.xlu1 %4561 }
 0xec4   : > { %v4591_v39 = vmul.f32 %v4562_v35, %v4543_v53  ;;  %v4546_v35 = vld [vmem:[#allocation4 + $0x1a8] sm:$0xff]  ;;  %v5438_v53 = vld [vmem:[#allocation3 + $0x40] sm:$0xff] }
 0xec7   : > { %v10754_v34 = vpop.permute.xlu0 %4581  ;;  %v10756_v12 = vpop.permute.xlu1 %4576 }
 0xec8   : > { %v4594_v4 = vmul.f32 %v10756_v12, %v4546_v35 }
 0xecb   : > { %v10761_v31 = vpop.permute.xlu1 %4586 }
 0xef4   : > { %v4502_v16 = vpop.xlane.xlu0 %4501 }
 0xef5   : > { %v4524_v23 = vadd.f32 %v4502_v16, %v4492_v58  ;;  %v4593_v16 = vmul.f32 %v10752_v9, %v4545_v7  ;;  %v10824_v7 = vld [vmem:[#allocation2 + $0x1c8] sm:$0xff] }
 0xef7   : > { %4532 = vst.msk [vmem:[#allocation3 + $0x180] sm:$0xff] %vm457_vm1, %v4524_v23 }
 0xef8   : > { %v4511_v57 = vpop.xlane.xlu0 %4510 }
 0xef9   : > { %v4527_v50 = vadd.f32 %v4511_v57, %v4495_v13  ;;  %v4548_v13 = vld [vmem:[#allocation4 + $0x1b8] sm:$0xff] }
 0xefa   : > { %v4596_v57 = vmul.f32 %v10761_v31, %v4548_v13 }
 0xefb   : > { %4535 = vst.msk [vmem:[#allocation3 + $0x198] sm:$0xff] %vm457_vm1, %v4527_v50  ;;  %v4595_v50 = vmul.f32 %v10754_v34, %v4547_v61 }
 0xefc   : > { %v4508_v2 = vpop.xlane.xlu0 %4507 }
 0xefd   : > { %v4526_v36 = vadd.f32 %v4508_v2, %v4494_v30  ;;  %v4505_v37 = vpop.xlane.xlu1 %4504 }
 0xefe   : > { %v4525_v40 = vadd.f32 %v4505_v37, %v4493_v33 }
 0xeff   : > { %4534 = vst.msk [vmem:[#allocation3 + $0x190] sm:$0xff] %vm457_vm1, %v4526_v36 }
 0xf00   : > { %4533 = vst.msk [vmem:[#allocation3 + $0x188] sm:$0xff] %vm457_vm1, %v4525_v40  ;;  %v4517_v48 = vpop.xlane.xlu0 %4516 }
 0xf01   : > { %v4529_v41 = vadd.f32 %v4517_v48, %v4497_v22 }
 0xf03   : > { %4537 = vst.msk [vmem:[#allocation3 + $0x1a8] sm:$0xff] %vm457_vm1, %v4529_v41  ;;  %v5367_v41 = vld [vmem:[#allocation3 + $0x8] sm:$0xff] }
 0xf04   : > { %7580 = vrcp.f32 %v5367_v41 }
 0xf05   : > { %7582 = vrcp.f32 %v5369_v44 }
 0xf0f   : > { %v7237_v18 = vpop.f32.mrf.mxu1 }
 0xf10   : > { %v4751_v3 = vadd.f32 %v7237_v18, %v4590_v8  ;;  %v5366_v18 = vld [vmem:[#allocation3] sm:$0xff] }
 0xf11   : > { %v4711_v62 = vpop.f32.mrf.mxu1  ;;  %v7581_v8 = vpop.eup %7580  ;;  %7584 = vrcp.f32 %v5366_v18  ;;  %v10891_v18 = vld [vmem:[#allocation2 + $0x1f8] sm:$0xff] }
 0xf12   : > { %4759 = vst.msk [vmem:[#allocation4 + $0x188] sm:$0xff] %vm586_vm0, %v4751_v3  ;;  %v4750_v59 = vadd.f32 %v4711_v62, %v4589_v51  ;;  %v7583_v51 = vpop.eup %7582  ;;  %v5368_v3 = vld [vmem:[#allocation3 + $0x10] sm:$0xff]  ;;  %v5370_v62 = vld [vmem:[#allocation3 + $0x20] sm:$0xff] }
 0xf13   : > { %7586 = vrcp.f32 %v5368_v3 }
 0xf14   : > { %4758 = vst.msk [vmem:[#allocation4 + $0x180] sm:$0xff] %vm586_vm0, %v4750_v59  ;;  %7588 = vrcp.f32 %v5370_v62  ;;  %v5372_v59 = vld [vmem:[#allocation3 + $0x30] sm:$0xff] }
 0xf15   : > { %7590 = vrcp.f32 %v5372_v59  ;;  %v5515_v59 = vld [vmem:[#allocation3 + $0xa8] sm:$0xff] }
 0xf16   : > { %7592 = vrcp.f32 %v5438_v53 }
 0xf1e   : > { %v7240_v55 = vpop.f32.mrf.mxu1  ;;  %v7585_v47 = vpop.eup %7584 }
 0xf1f   : > { %v4753_v26 = vadd.f32 %v7240_v55, %v4592_v56  ;;  %v5440_v55 = vld [vmem:[#allocation3 + $0x50] sm:$0xff] }
 0xf20   : > { %v4721_v6 = vpop.f32.mrf.mxu1  ;;  %v7587_v56 = vpop.eup %7586  ;;  %7594 = vrcp.f32 %v5440_v55 }
 0xf21   : > { %4761 = vst.msk [vmem:[#allocation4 + $0x198] sm:$0xff] %vm586_vm0, %v4753_v26  ;;  %v4752_v1 = vadd.f32 %v4721_v6, %v4591_v39  ;;  %v7589_v39 = vpop.eup %7588  ;;  %v5442_v26 = vld [vmem:[#allocation3 + $0x60] sm:$0xff] }
 0xf22   : > { %7596 = vrcp.f32 %v5442_v26  ;;  %v7591_v6 = vpop.eup %7590 }
 0xf23   : > { %4760 = vst.msk [vmem:[#allocation4 + $0x190] sm:$0xff] %vm586_vm0, %v4752_v1  ;;  %v7593_v17 = vpop.eup %7592 }
 0xf24   : > { %v4514_v42 = vpop.xlane.xlu1 %4513 }
 0xf25   : > { %v4528_v63 = vadd.f32 %v4514_v42, %v4496_v10 }
 0xf27   : > { %4536 = vst.msk [vmem:[#allocation3 + $0x1a0] sm:$0xff] %vm457_vm1, %v4528_v63  ;;  %v5371_v63 = vld [vmem:[#allocation3 + $0x28] sm:$0xff] }
 0xf28   : > { %7598 = vrcp.f32 %v5371_v63  ;;  %v5589_v63 = vld [vmem:[#allocation3 + $0xf8] sm:$0xff] }
 0xf2c   : > { %v4520_v54 = vpop.xlane.xlu1 %4519 }
 0xf2d   : > { %v4530_v19 = vadd.f32 %v4520_v54, %v4498_v21  ;;  %v7595_v10 = vpop.eup %7594  ;;  %v5373_v21 = vld [vmem:[#allocation3 + $0x38] sm:$0xff]  ;;  %v5439_v54 = vld [vmem:[#allocation3 + $0x48] sm:$0xff] }
 0xf2e   : > { %7600 = vrcp.f32 %v5373_v21 }
 0xf2f   : > { %4538 = vst.msk [vmem:[#allocation3 + $0x1b0] sm:$0xff] %vm457_vm1, %v4530_v19  ;;  %v7597_v60 = vpop.eup %7596  ;;  %7602 = vrcp.f32 %v5439_v54  ;;  %v5655_v54 = vld [vmem:[#allocation3 + $0x108] sm:$0xff] }
 0xf30   : > { %v4523_v15 = vpop.xlane.xlu0 %4522  ;;  %7604 = vrcp.f32 %v5441_v14 }
 0xf31   : > { %v4531_v25 = vadd.f32 %v4523_v15, %v4499_v0  ;;  %v5443_v0 = vld [vmem:[#allocation3 + $0x68] sm:$0xff]  ;;  %v5444_v15 = vld [vmem:[#allocation3 + $0x70] sm:$0xff] }
 0xf32   : > { %7606 = vrcp.f32 %v5443_v0  ;;  %v5657_v0 = vld [vmem:[#allocation3 + $0x118] sm:$0xff] }
 0xf33   : > { %4539 = vst.msk [vmem:[#allocation3 + $0x1b8] sm:$0xff] %vm457_vm1, %v4531_v25  ;;  %7608 = vrcp.f32 %v5444_v15  ;;  %v5510_v15 = vld [vmem:[#allocation3 + $0x80] sm:$0xff] }
 0xf35   : > { %v7599_v19 = vpop.eup %7598 }
 0xf3b   : > { %v7601_v25 = vpop.eup %7600 }
 0xf3c   : > { %v7603_v35 = vpop.eup %7602 }
 0xf5b   : > { %v7243_v58 = vpop.f32.mrf.mxu1 }
 0xf5c   : > { %v4755_v5 = vadd.f32 %v7243_v58, %v4594_v4  ;;  %v10826_v58 = vld [vmem:[#allocation2 + $0x1c0] sm:$0xff] }
 0xf5d   : > { %v4731_v49 = vpop.f32.mrf.mxu1 }
 0xf5e   : > { %4763 = vst.msk [vmem:[#allocation4 + $0x1a8] sm:$0xff] %vm586_vm0, %v4755_v5  ;;  %v4754_v23 = vadd.f32 %v4731_v49, %v4593_v16  ;;  %v7605_v16 = vpop.eup %7604 }
 0xf60   : > { %4762 = vst.msk [vmem:[#allocation4 + $0x1a0] sm:$0xff] %vm586_vm0, %v4754_v23 }
 0xf66   : > { %v7246_v29 = vpop.f32.mrf.mxu1 }
 0xf67   : > { %v4757_v11 = vadd.f32 %v7246_v29, %v4596_v57  ;;  %v10839_v57 = vld [vmem:[#allocation2 + $0x1d8] sm:$0xff]  ;;  %v7607_v29 = vpop.eup %7606 }
 0xf68   : > { %v4741_v30 = vpop.f32.mrf.mxu1 }
 0xf69   : > { %4765 = vst.msk [vmem:[#allocation4 + $0x1b8] sm:$0xff] %vm586_vm0, %v4757_v11  ;;  %v4756_v12 = vadd.f32 %v4741_v30, %v4595_v50  ;;  %v7609_v11 = vpop.eup %7608 }
 0xf6b   : > { %4764 = vst.msk [vmem:[#allocation4 + $0x1b0] sm:$0xff] %vm586_vm0, %v4756_v12 }
 0xf6c   : > { %v10788_v9 = vpop.f32.mrf.mxu1 }
 0xf6d   : > { %v4955_v2 = vsel %vm845_vm2, %v10788_v9, -inf }
 0xf6e   : > { %4956 = vmax.xlane.f32.xlu1 %v4955_v2  ;;  %v10792_v33 = vpop.f32.mrf.mxu1  ;;  %v10848_v2 = vld [vmem:[#allocation2 + $0x1d0] sm:$0xff] }
 0xf6f   : > { %v4952_v31 = vsel %vm845_vm2, %v10792_v33, -inf }
 0xf70   : > { %4953 = vmax.xlane.f32.xlu0 %v4952_v31  ;;  %v10796_v34 = vpop.f32.mrf.mxu1 }
 0xf71   : > { %v4961_v27 = vsel %vm845_vm2, %v10796_v34, -inf }
 0xf72   : > { %v10800_v36 = vpop.f32.mrf.mxu1 }
 0xf73   : > { %v4958_v37 = vsel %vm845_vm2, %v10800_v36, -inf }
 0xf74   : > { %4962 = vmax.xlane.f32.xlu0 %v4961_v27  ;;  %v10808_v40 = vpop.f32.mrf.mxu1 }
 0xf76   : > { %v10810_v22 = vpop.f32.mrf.mxu1 }
 0xf77   : > { %v4964_v48 = vsel %vm845_vm2, %v10810_v22, -inf }
 0xf78   : > { %4959 = vmax.xlane.f32.xlu0 %v4958_v37  ;;  %v10814_v45 = vpop.f32.mrf.mxu1 }
 0xf7a   : > { %v10820_v1 = vpop.f32.mrf.mxu1 }
 0xf7b   : > { %v4970_v42 = vsel %vm845_vm2, %v10820_v1, -inf }
 0xf7f   : > { %5200 = vrot.lane.b32.xlu1 %v10512_v20, %s7845_s6  ;;  %v4967_v20 = vsel %vm845_vm2, %v10808_v40, -inf }
 0xf8e   : > { %5198 = vrot.lane.b32.xlu0 %v10473_v43, %s7845_s6  ;;  %v4973_v43 = vsel %vm845_vm2, %v10814_v45, -inf }
 0xfa3   : > { %4965 = vmax.xlane.f32.xlu1 %v4964_v48 }
 0xfad   : > { %4968 = vmax.xlane.f32.xlu0 %v4967_v20  ;;  %v10886_v20 = vld [vmem:[#allocation2 + $0x1e8] sm:$0xff] }
 0xfb1   : > { %4974 = vmax.xlane.f32.xlu0 %v4973_v43 }
 0xfb4   : > { %5397 = vperm.xlu1 %7355, %v7581_v8   ;;  %v5513_v8 = vld [vmem:[#allocation3 + $0x98] sm:$0xff] }
 0xfb8   : > { %5407 = vperm.xlu1 %7355, %v7583_v51  }
 0xfc7   : > { %5392 = vperm.xlu0 %7354, %v7585_v47  }
 0xfcb   : > { %5402 = vperm.xlu0 %7354, %v7587_v56   ;;  %v5517_v56 = vld [vmem:[#allocation3 + $0xb8] sm:$0xff] }
 0xfcf   : > { %5412 = vperm.xlu0 %7354, %v7589_v39   ;;  %v5583_v39 = vld [vmem:[#allocation3 + $0xc8] sm:$0xff] }
 0xfd3   : > { %5422 = vperm.xlu0 %7354, %v7591_v6   ;;  %v5585_v6 = vld [vmem:[#allocation3 + $0xd8] sm:$0xff] }
 0xfd7   : > { %5464 = vperm.xlu0 %7354, %v7593_v17  }
 0xfdb   : > { %5474 = vperm.xlu0 %7354, %v7595_v10   ;;  %v5587_v10 = vld [vmem:[#allocation3 + $0xe8] sm:$0xff] }
 0xfdc   : > { %4971 = vmax.xlane.f32.xlu1 %v4970_v42 }
 0xfdf   : > { %5484 = vperm.xlu0 %7354, %v7597_v60  }
 0xfed   : > { %5417 = vperm.xlu1 %7355, %v7599_v19  }
 0xff1   : > { %5427 = vperm.xlu1 %7355, %v7601_v25  }
 0xff5   : > { %5469 = vperm.xlu1 %7355, %v7603_v35  }
 0xff7   : > { %v4957_v4 = vpop.xlane.xlu1 %4956 }
 0xff8   : > { %v10829_v5 = vmax.f32 %v10824_v7, %v4957_v4  ;;  %v5659_v4 = vld [vmem:[#allocation3 + $0x128] sm:$0xff] }
 0xff9   : > { %5479 = vperm.xlu1 %7355, %v7605_v16   ;;  %v4954_v49 = vpop.xlane.xlu0 %4953 }
 0xffa   : > { %v4985_v23 = vsub.f32 %v10824_v7, %v10829_v5  ;;  %5356 = vst.msk [vmem:[#allocation2 + $0x1c8] sm:$0xff] %vm457_vm1, %v10829_v5  ;;  %v10836_v13 = vmax.f32 %v10826_v58, %v4954_v49  ;;  %5015 = vperm.xlu0 %7354, %v10829_v5   ;;  %v5512_v49 = vld [vmem:[#allocation3 + $0x90] sm:$0xff] }
 0xffb   : > { %v5201_v61 = vpop.permute.xlu1 %5200 }
 0xffc   : > { %v4984_v50 = vsub.f32 %v10826_v58, %v10836_v13  ;;  %5355 = vst.msk [vmem:[#allocation2 + $0x1c0] sm:$0xff] %vm457_vm1, %v10836_v13  ;;  %7275 = vmatprep.subr.mxu0 %v5201_v61 }
 0xffd   : > { %7276 = vmatpush3.msra.mxu0 %v5201_v61  ;;  %5489 = vperm.xlu1 %7355, %v7607_v29   ;;  %v4963_v30 = vpop.xlane.xlu0 %4962  ;;  %v5661_v29 = vld [vmem:[#allocation3 + $0x138] sm:$0xff] }
 0xffe   : > { %v10846_v12 = vmax.f32 %v10839_v57, %v4963_v30  ;;  %5494 = vperm.xlu0 %7354, %v7609_v11  }
0x1000   : > { %v4987_v31 = vsub.f32 %v10839_v57, %v10846_v12  ;;  %5358 = vst.msk [vmem:[#allocation2 + $0x1d8] sm:$0xff] %vm457_vm1, %v10846_v12 }
0x1001   : > { %5010 = vperm.xlu1 %7355, %v10836_v13   ;;  %v4960_v27 = vpop.xlane.xlu0 %4959 }
0x1002   : > { %v10856_v37 = vmax.f32 %v10848_v2, %v4960_v27  ;;  %v5514_v27 = vld [vmem:[#allocation3 + $0xa0] sm:$0xff] }
0x1004   : > { %v4986_v48 = vsub.f32 %v10848_v2, %v10856_v37  ;;  %5357 = vst.msk [vmem:[#allocation2 + $0x1d0] sm:$0xff] %vm457_vm1, %v10856_v37 }
0x1005   : > { %5025 = vperm.xlu1 %7355, %v10846_v12   ;;  %v5199_v41 = vpop.permute.xlu0 %5198 }
0x1006   : > { %7277 = vmatprep.subr.mxu0 %v5199_v41  ;;  %v4996_v57 = vmul.f32 1.442695, %v4986_v48 }
0x1007   : > { %7278 = vmatpush3.msra.mxu0 %v5199_v41  ;;  %v10918_v41 = vld [vmem:[#allocation2 + $0x1f0] sm:$0xff] }
0x1008   : > { %7279 = vmatprep.subr.mxu0 %v10748_v38 }
0x1009   : > { %5020 = vperm.xlu1 %7355, %v10856_v37   ;;  %7280 = vmatpush3.msra.mxu0 %v10748_v38  ;;  %v10876_v38 = vld [vmem:[#allocation2 + $0x1e0] sm:$0xff] }
0x100a   : > { %7281 = vmatprep.subr.mxu0 %v10750_v46  ;;  %v5730_v37 = vld [vmem:[#allocation3 + $0x160] sm:$0xff] }
0x100b   : > { %7282 = vmatpush3.msra.mxu0 %v10750_v46 }
0x100c   : > { %7283 = vmatprep.subr.mxu0 %v10744_v32 }
0x100d   : > { %7284 = vmatpush3.msra.mxu0 %v10744_v32 }
0x100e   : > { %7285 = vmatprep.subr.mxu0 %v10746_v24 }
0x100f   : > { %7286 = vmatpush3.msra.mxu0 %v10746_v24  ;;  %v5445_v24 = vld [vmem:[#allocation3 + $0x78] sm:$0xff] }
0x1010   : > { %7287 = vmatprep.subr.mxu0 %v10740_v52  ;;  %7610 = vrcp.f32 %v5445_v24  ;;  %v5727_v24 = vld [vmem:[#allocation3 + $0x148] sm:$0xff] }
0x1011   : > { %7288 = vmatpush3.msra.mxu0 %v10740_v52  ;;  %v5511_v52 = vld [vmem:[#allocation3 + $0x88] sm:$0xff] }
0x1012   : > { %7289 = vmatprep.subr.mxu0 %v10742_v28  ;;  %7612 = vrcp.f32 %v5511_v52 }
0x1013   : > { %7290 = vmatpush3.msra.mxu0 %v10742_v28  ;;  %7614 = vrcp.f32 %v5513_v8  ;;  %v5516_v8 = vld [vmem:[#allocation3 + $0xb0] sm:$0xff] }
0x1014   : > { %7616 = vrcp.f32 %v5515_v59  ;;  %v5729_v59 = vld [vmem:[#allocation3 + $0x158] sm:$0xff] }
0x1015   : > { %7618 = vrcp.f32 %v5517_v56 }
0x1016   : > { %7620 = vrcp.f32 %v5583_v39 }
0x1017   : > { %7622 = vrcp.f32 %v5585_v6 }
0x1018   : > { %7624 = vrcp.f32 %v5587_v10 }
0x1019   : > { %7626 = vrcp.f32 %v5589_v63 }
0x101a   : > { %7628 = vrcp.f32 %v5655_v54 }
0x101b   : > { %7630 = vrcp.f32 %v5657_v0 }
0x101c   : > { %7632 = vrcp.f32 %v5510_v15 }
0x101d   : > { %v7611_v53 = vpop.eup %7610  ;;  %7634 = vrcp.f32 %v5659_v4 }
0x101e   : > { %7636 = vrcp.f32 %v5512_v49  ;;  %v5799_v49 = vld [vmem:[#allocation3 + $0x188] sm:$0xff] }
0x101f   : > { %v7613_v55 = vpop.eup %7612  ;;  %7638 = vrcp.f32 %v5661_v29 }
0x1020   : > { %v7615_v26 = vpop.eup %7614  ;;  %7640 = vrcp.f32 %v5514_v27 }
0x1021   : > { %v7617_v17 = vpop.eup %7616  ;;  %7642 = vrcp.f32 %v5727_v24 }
0x1022   : > { %v7619_v42 = vpop.eup %7618  ;;  %7644 = vrcp.f32 %v5516_v8 }
0x1023   : > { %v7621_v21 = vpop.eup %7620  ;;  %7646 = vrcp.f32 %v5729_v59 }
0x1024   : > { %v7623_v19 = vpop.eup %7622 }
0x1025   : > { %v7625_v35 = vpop.eup %7624 }
0x1026   : > { %v7627_v61 = vpop.eup %7626 }
0x102c   : > { %v4966_v44 = vpop.xlane.xlu1 %4965 }
0x102d   : > { %v10879_v46 = vmax.f32 %v10876_v38, %v4966_v44  ;;  %v7629_v44 = vpop.eup %7628 }
0x102f   : > { %v4988_v32 = vsub.f32 %v10876_v38, %v10879_v46  ;;  %5359 = vst.msk [vmem:[#allocation2 + $0x1e0] sm:$0xff] %vm457_vm1, %v10879_v46  ;;  %5030 = vperm.xlu0 %7354, %v10879_v46  }
0x1030   : > { %v10910_v25 = vpop.permute.xlu1 %5397 }
0x1034   : > { %v10914_v11 = vpop.permute.xlu1 %5407 }
0x1036   : > { %v4969_v28 = vpop.xlane.xlu0 %4968 }
0x1037   : > { %v10889_v43 = vmax.f32 %v10886_v20, %v4969_v28 }
0x1039   : > { %v4989_v51 = vsub.f32 %v10886_v20, %v10889_v43  ;;  %5360 = vst.msk [vmem:[#allocation2 + $0x1e8] sm:$0xff] %vm457_vm1, %v10889_v43  ;;  %5035 = vperm.xlu1 %7355, %v10889_v43  }
0x103a   : > { %v4975_v3 = vpop.xlane.xlu0 %4974 }
0x103b   : > { %v10899_v62 = vmax.f32 %v10891_v18, %v4975_v3  ;;  %v7631_v3 = vpop.eup %7630 }
0x103c   : > { %v7633_v39 = vpop.eup %7632 }
0x103d   : > { %v4991_v47 = vsub.f32 %v10891_v18, %v10899_v62  ;;  %5362 = vst.msk [vmem:[#allocation2 + $0x1f8] sm:$0xff] %vm457_vm1, %v10899_v62  ;;  %5045 = vperm.xlu1 %7355, %v10899_v62   ;;  %v7635_v6 = vpop.eup %7634  ;;  %v5798_v62 = vld [vmem:[#allocation3 + $0x180] sm:$0xff] }
0x103e   : > { %v7637_v63 = vpop.eup %7636 }
0x103f   : > { %v7639_v54 = vpop.eup %7638  ;;  %v5006_v48 = vmul.f32 1.442695, %v4991_v47 }
0x1040   : > { %v7641_v15 = vpop.eup %7640 }
0x1041   : > { %5499 = vperm.xlu1 %7355, %v7611_v53   ;;  %v7643_v4 = vpop.eup %7642 }
0x1042   : > { %v10906_v60 = vpop.permute.xlu0 %5392  ;;  %v7645_v27 = vpop.eup %7644 }
0x1043   : > { %v7647_v24 = vpop.eup %7646 }
0x1045   : > { %5541 = vperm.xlu1 %7355, %v7613_v55  }
0x1046   : > { %v10908_v14 = vpop.permute.xlu0 %5402 }
0x1049   : > { %5551 = vperm.xlu1 %7355, %v7615_v26   ;;  %v5582_v26 = vld [vmem:[#allocation3 + $0xc0] sm:$0xff] }
0x104a   : > { %v10912_v16 = vpop.permute.xlu0 %5412  ;;  %7648 = vrcp.f32 %v5582_v26 }
0x104d   : > { %5561 = vperm.xlu1 %7355, %v7617_v17   ;;  %v5731_v17 = vld [vmem:[#allocation3 + $0x168] sm:$0xff] }
0x104e   : > { %v10916_v30 = vpop.permute.xlu0 %5422  ;;  %7650 = vrcp.f32 %v5731_v17  ;;  %v5803_v17 = vld [vmem:[#allocation3 + $0x1a8] sm:$0xff] }
0x1051   : > { %5571 = vperm.xlu1 %7355, %v7619_v42  }
0x1052   : > { %v10923_v53 = vpop.permute.xlu0 %5464 }
0x1055   : > { %5613 = vperm.xlu1 %7355, %v7621_v21   ;;  %v5584_v21 = vld [vmem:[#allocation3 + $0xd0] sm:$0xff] }
0x1056   : > { %v10934_v42 = vpop.permute.xlu0 %5474  ;;  %7652 = vrcp.f32 %v5584_v21 }
0x1057   : > { %v7649_v59 = vpop.eup %7648 }
0x1059   : > { %5623 = vperm.xlu1 %7355, %v7623_v19   ;;  %v5733_v19 = vld [vmem:[#allocation3 + $0x178] sm:$0xff] }
0x105a   : > { %7654 = vrcp.f32 %v5733_v19 }
0x105d   : > { %5633 = vperm.xlu1 %7355, %v7625_v35   ;;  %v5586_v35 = vld [vmem:[#allocation3 + $0xe0] sm:$0xff] }
0x105e   : > { %7656 = vrcp.f32 %v5586_v35 }
0x105f   : > { %7658 = vrcp.f32 %v5799_v49 }
0x1061   : > { %5643 = vperm.xlu1 %7355, %v7627_v61   ;;  %v10938_v61 = vpop.permute.xlu0 %5484 }
0x1065   : > { %v4972_v52 = vpop.xlane.xlu1 %4971  ;;  %5685 = vperm.xlu1 %7355, %v7629_v44   ;;  %v5588_v44 = vld [vmem:[#allocation3 + $0xf0] sm:$0xff] }
0x1066   : > { %v10921_v28 = vmax.f32 %v10918_v41, %v4972_v52  ;;  %v5801_v52 = vld [vmem:[#allocation3 + $0x198] sm:$0xff]  ;;  %7660 = vrcp.f32 %v5588_v44  ;;  %v5658_v44 = vld [vmem:[#allocation3 + $0x120] sm:$0xff] }
0x1067   : > { %7662 = vrcp.f32 %v5801_v52 }
0x1068   : > { %v4990_v56 = vsub.f32 %v10918_v41, %v10921_v28  ;;  %5361 = vst.msk [vmem:[#allocation2 + $0x1f0] sm:$0xff] %vm457_vm1, %v10921_v28  ;;  %5040 = vperm.xlu0 %7354, %v10921_v28  }
0x1069   : > { %v10930_v55 = vpop.permute.xlu1 %5417  ;;  %5695 = vperm.xlu1 %7355, %v7631_v3  }
0x106a   : > { %v5004_v7 = vmul.f32 1.442695, %v4990_v56 }
0x106c   : > { %5536 = vperm.xlu0 %7354, %v7633_v39   ;;  %v5654_v39 = vld [vmem:[#allocation3 + $0x100] sm:$0xff] }
0x106d   : > { %v10932_v10 = vpop.permute.xlu1 %5427  ;;  %5705 = vperm.xlu1 %7355, %v7635_v6   ;;  %v7651_v6 = vpop.eup %7650  ;;  %7664 = vrcp.f32 %v5654_v39 }
0x106e   : > { %7666 = vrcp.f32 %v5803_v17 }
0x1070   : > { %5546 = vperm.xlu0 %7354, %v7637_v63   ;;  %v5656_v63 = vld [vmem:[#allocation3 + $0x110] sm:$0xff] }
0x1071   : > { %v10936_v0 = vpop.permute.xlu1 %5469  ;;  %5715 = vperm.xlu1 %7355, %v7639_v54   ;;  %v5805_v54 = vld [vmem:[#allocation3 + $0x1b8] sm:$0xff]  ;;  %7668 = vrcp.f32 %v5656_v63 }
0x1072   : > { %7670 = vrcp.f32 %v5805_v54  ;;  %v5002_v54 = vmul.f32 1.442695, %v4989_v51 }
0x1074   : > { %5556 = vperm.xlu0 %7354, %v7641_v15   ;;  %v7653_v15 = vpop.eup %7652 }
0x1075   : > { %v10940_v29 = vpop.permute.xlu1 %5479  ;;  %5757 = vperm.xlu1 %7355, %v7643_v4   ;;  %v5016_v8 = vpop.permute.xlu0 %5015 }
0x1076   : > { %v5049_v26 = vsub.f32 %v10788_v9, %v5016_v8  ;;  %v7655_v4 = vpop.eup %7654  ;;  %v5660_v8 = vld [vmem:[#allocation3 + $0x130] sm:$0xff] }
0x1077   : > { %v7657_v9 = vpop.eup %7656 }
0x1078   : > { %5566 = vperm.xlu0 %7354, %v7645_v27   ;;  %v5058_v35 = vmul.f32 1.442695, %v5049_v26  ;;  %v7659_v52 = vpop.eup %7658 }
0x1079   : > { %v10942_v3 = vpop.permute.xlu1 %5489  ;;  %5767 = vperm.xlu1 %7355, %v7647_v24   ;;  %v4992_v24 = vmul.f32 1.442695, %v4984_v50  ;;  %v5726_v50 = vld [vmem:[#allocation3 + $0x140] sm:$0xff] }
0x107c   : > { %5608 = vperm.xlu0 %7354, %v7649_v59   ;;  %v4998_v59 = vmul.f32 1.442695, %v4987_v31 }
0x107d   : > { %v5011_v21 = vpop.permute.xlu1 %5010  ;;  %5777 = vperm.xlu1 %7355, %v7651_v6   ;;  %v7661_v6 = vpop.eup %7660 }
0x107e   : > { %v5048_v19 = vsub.f32 %v10792_v33, %v5011_v21  ;;  %v7663_v58 = vpop.eup %7662  ;;  %v5728_v21 = vld [vmem:[#allocation3 + $0x150] sm:$0xff] }
0x1080   : > { %v5056_v49 = vmul.f32 1.442695, %v5048_v19  ;;  %5618 = vperm.xlu0 %7354, %v7653_v15  }
0x1081   : > { %v5026_v27 = vpop.permute.xlu1 %5025  ;;  %5787 = vperm.xlu1 %7355, %v7655_v4  }
0x1082   : > { %7672 = vpow2.f32 %v5056_v49  ;;  %v5051_v33 = vsub.f32 %v10796_v34, %v5026_v27  ;;  %v7665_v34 = vpop.eup %7664  ;;  %v5800_v27 = vld [vmem:[#allocation3 + $0x190] sm:$0xff] }
0x1083   : > { %7674 = vpow2.f32 %v5058_v35  ;;  %v7667_v12 = vpop.eup %7666  ;;  %v5732_v35 = vld [vmem:[#allocation3 + $0x170] sm:$0xff] }
0x1084   : > { %5628 = vperm.xlu0 %7354, %v7657_v9   ;;  %7676 = vrcp.f32 %v5658_v44  ;;  %v5062_v17 = vmul.f32 1.442695, %v5051_v33 }
0x1085   : > { %v5021_v39 = vpop.permute.xlu1 %5020  ;;  %5829 = vperm.xlu1 %7355, %v7659_v52   ;;  %7678 = vpow2.f32 %v4992_v24  ;;  %v5802_v24 = vld [vmem:[#allocation3 + $0x1a0] sm:$0xff]  ;;  %v10994_v52 = vpop.permute.xlu0 %5494 }
0x1086   : > { %v5050_v26 = vsub.f32 %v10800_v36, %v5021_v39  ;;  %7680 = vrcp.f32 %v5660_v8  ;;  %v7669_v36 = vpop.eup %7668  ;;  %v4994_v39 = vmul.f32 1.442695, %v4985_v23 }
0x1087   : > { %7682 = vpow2.f32 %v4998_v59  ;;  %v7671_v31 = vpop.eup %7670  ;;  %v5804_v59 = vld [vmem:[#allocation3 + $0x1b0] sm:$0xff] }
0x1088   : > { %v5060_v13 = vmul.f32 1.442695, %v5050_v26  ;;  %5638 = vperm.xlu0 %7354, %v7661_v6  }
0x1089   : > { %5839 = vperm.xlu1 %7355, %v7663_v58  }
0x108a   : > { %7684 = vpow2.f32 %v5060_v13  ;;  %v5000_v13 = vmul.f32 1.442695, %v4988_v32 }
0x108b   : > { %7686 = vpow2.f32 %v5062_v17 }
0x108c   : > { %5680 = vperm.xlu0 %7354, %v7665_v34   ;;  %7688 = vrcp.f32 %v5726_v50 }
0x108d   : > { %5849 = vperm.xlu1 %7355, %v7667_v12   ;;  %7690 = vpow2.f32 %v4996_v57 }
0x108e   : > { %7692 = vrcp.f32 %v5728_v21 }
0x108f   : > { %v10957_v63 = vpop.eup %7672  ;;  %7694 = vpow2.f32 %v5002_v54 }
0x1090   : > { %v10962_v19 = vpop.eup %7674  ;;  %5690 = vperm.xlu0 %7354, %v7669_v36   ;;  %7291 = vmatprep.mubr.msk.f32.mxu0 %vm845_vm2, %v10957_v63  ;;  %7696 = vrcp.f32 %v5730_v37 }
0x1091   : > { %5859 = vperm.xlu1 %7355, %v7671_v31   ;;  %7292 = vmatmul.mubr.msk.f32.vlgmr.msra.gmra.mxu0 %vm845_vm2, %v10962_v19  ;;  %v7677_v2 = vpop.eup %7676  ;;  %7698 = vpow2.f32 %v5006_v48  ;;  %v5092_v31 = vsel %vm845_vm2, %v10962_v19, 0.0  ;;  %v5089_v19 = vsel %vm845_vm2, %v10957_v63, 0.0 }
0x1092   : > { %v10971_v20 = vpop.eup %7678  ;;  %7700 = vrcp.f32 %v5732_v35 }
0x1093   : > { %v7681_v43 = vpop.eup %7680  ;;  %7702 = vrcp.f32 %v5798_v62 }
0x1094   : > { %5700 = vperm.xlu0 %7354, %v7677_v2   ;;  %v10974_v51 = vpop.eup %7682  ;;  %7704 = vrcp.f32 %v5800_v27 }
0x1095   : > { %5140 = vperm.xlu1 %7355, %v10971_v20   ;;  %7706 = vrcp.f32 %v5802_v24 }
0x1096   : > { %7708 = vrcp.f32 %v5804_v59 }
0x1097   : > { %v10976_v15 = vpop.eup %7684  ;;  %7710 = vpow2.f32 %v4994_v39 }
0x1098   : > { %v10978_v4 = vpop.eup %7686  ;;  %5710 = vperm.xlu0 %7354, %v7681_v43   ;;  %7294 = vmatprep.mubr.msk.f32.mxu0 %vm845_vm2, %v10976_v15 }
0x1099   : > { %5155 = vperm.xlu1 %7355, %v10974_v51   ;;  %7295 = vmatmul.mubr.msk.f32.gmra.mxu0 %vm845_vm2, %v10978_v4  ;;  %v7689_v18 = vpop.eup %7688 }
0x109a   : > { %v10985_v47 = vpop.eup %7690 }
0x109b   : > { %v7693_v49 = vpop.eup %7692 }
0x109c   : > { %5752 = vperm.xlu0 %7354, %v7689_v18   ;;  %v10988_v9 = vpop.eup %7694 }
0x109d   : > { %5150 = vperm.xlu1 %7355, %v10985_v47   ;;  %v7697_v44 = vpop.eup %7696 }
0x109e   : > { %v10991_v33 = vpop.eup %7698 }
0x109f   : > { %v7701_v8 = vpop.eup %7700 }
0x10a0   : > { %5762 = vperm.xlu0 %7354, %v7693_v49   ;;  %v7703_v6 = vpop.eup %7702 }
0x10a1   : > { %5165 = vperm.xlu1 %7355, %v10988_v9   ;;  %v7705_v34 = vpop.eup %7704 }
0x10a2   : > { %v7707_v5 = vpop.eup %7706 }
0x10a3   : > { %v7709_v50 = vpop.eup %7708 }
0x10a4   : > { %5772 = vperm.xlu0 %7354, %v7697_v44   ;;  %v11007_v38 = vpop.eup %7710  ;;  %v5098_v44 = vsel %vm845_vm2, %v10978_v4, 0.0 }
0x10a5   : > { %5175 = vperm.xlu1 %7355, %v10991_v33  }
0x10a8   : > { %5782 = vperm.xlu0 %7354, %v7701_v8   ;;  %v5095_v8 = vsel %vm845_vm2, %v10976_v15, 0.0 }
0x10aa   : > { %v5031_v26 = vpop.permute.xlu0 %5030 }
0x10ab   : > { %v5052_v17 = vsub.f32 %v10810_v22, %v5031_v26 }
0x10ac   : > { %5824 = vperm.xlu0 %7354, %v7703_v6  }
0x10ad   : > { %v5064_v58 = vmul.f32 1.442695, %v5052_v17 }
0x10af   : > { %7712 = vpow2.f32 %v5064_v58 }
0x10b0   : > { %5834 = vperm.xlu0 %7354, %v7705_v34   ;;  %7714 = vpow2.f32 %v5000_v13 }
0x10b1   : > { %7716 = vpow2.f32 %v5004_v7 }
0x10b4   : > { %5844 = vperm.xlu0 %7354, %v7707_v5   ;;  %v5036_v23 = vpop.permute.xlu1 %5035 }
0x10b5   : > { %v5053_v22 = vsub.f32 %v10808_v40, %v5036_v23 }
0x10b7   : > { %v5066_v57 = vmul.f32 1.442695, %v5053_v22 }
0x10b8   : > { %5854 = vperm.xlu0 %7354, %v7709_v50   ;;  %v5046_v12 = vpop.permute.xlu1 %5045  ;;  %v5455_v50 = vld [vmem:[#allocation4 + $0x48] sm:$0xff] }
0x10b9   : > { %7718 = vpow2.f32 %v5066_v57  ;;  %v5055_v48 = vsub.f32 %v10814_v45, %v5046_v12  ;;  %v5454_v57 = vld [vmem:[#allocation4 + $0x40] sm:$0xff]  ;;  %v5503_v12 = vmul.f32 %v10936_v0, %v5455_v50  ;;  %v5459_v0 = vld [vmem:[#allocation4 + $0x68] sm:$0xff] }
0x10bb   : > { %v5070_v35 = vmul.f32 1.442695, %v5055_v48  ;;  %v5456_v48 = vld [vmem:[#allocation4 + $0x50] sm:$0xff] }
0x10bc   : > { %v7713_v46 = vpop.eup %7712  ;;  %5145 = vperm.xlu0 %7354, %v11007_v38   ;;  %v11010_v32 = vpop.permute.xlu1 %5499 }
0x10bd   : > { %7297 = vmatprep.mubr.msk.f32.mxu0 %vm845_vm2, %v7713_v46  ;;  %v11013_v41 = vpop.eup %7714  ;;  %v5101_v54 = vsel %vm845_vm2, %v7713_v46, 0.0  ;;  %7720 = vpow2.f32 %v5070_v35 }
0x10be   : > { %v11018_v28 = vpop.eup %7716 }
0x10c0   : > { %5160 = vperm.xlu0 %7354, %v11013_v41   ;;  %v11016_v40 = vpop.permute.xlu1 %5541 }
0x10c4   : > { %5170 = vperm.xlu0 %7354, %v11018_v28   ;;  %v11021_v56 = vpop.permute.xlu1 %5551 }
0x10c6   : > { %v7719_v36 = vpop.eup %7718 }
0x10c7   : > { %7298 = vmatmul.mubr.msk.f32.gmra.mxu0 %vm845_vm2, %v7719_v36  ;;  %v5104_v63 = vsel %vm845_vm2, %v7719_v36, 0.0  ;;  %v5502_v36 = vmul.f32 %v10923_v53, %v5454_v57  ;;  %v5458_v53 = vld [vmem:[#allocation4 + $0x60] sm:$0xff] }
0x10c8   : > { %v11026_v21 = vpop.permute.xlu1 %5561 }
0x10c9   : > { %5093 = vadd.xlane.f32.xlu1 %v5092_v31 }
0x10ca   : > { %v7721_v26 = vpop.eup %7720 }
0x10cb   : > { %v5110_v4 = vsel %vm845_vm2, %v7721_v26, 0.0 }
0x10cc   : > { %v11029_v2 = vpop.permute.xlu1 %5571 }
0x10cd   : > { %5102 = vadd.xlane.f32.xlu1 %v5101_v54  ;;  %v5457_v54 = vld [vmem:[#allocation4 + $0x58] sm:$0xff] }
0x10ce   : > { %v5505_v35 = vmul.f32 %v10940_v29, %v5457_v54  ;;  %v5531_v54 = vld [vmem:[#allocation4 + $0xa8] sm:$0xff] }
0x10d0   : > { %v11031_v37 = vpop.permute.xlu1 %5613 }
0x10d4   : > { %v11034_v43 = vpop.permute.xlu1 %5623 }
0x10d8   : > { %v11036_v18 = vpop.permute.xlu1 %5633 }
0x10dc   : > { %v11043_v45 = vpop.permute.xlu1 %5643 }
0x10e0   : > { %v11047_v39 = vpop.permute.xlu1 %5685 }
0x10e3   : > { %5090 = vadd.xlane.f32.xlu0 %v5089_v19  ;;  %v5041_v62 = vpop.permute.xlu0 %5040  ;;  %v5504_v19 = vmul.f32 %v10934_v42, %v5456_v48  ;;  %v5460_v42 = vld [vmem:[#allocation4 + $0x70] sm:$0xff] }
0x10e4   : > { %v5054_v49 = vsub.f32 %v10820_v1, %v5041_v62  ;;  %v11055_v17 = vpop.permute.xlu1 %5695 }
0x10e6   : > { %v5068_v27 = vmul.f32 1.442695, %v5054_v49 }
0x10e7   : > { %5099 = vadd.xlane.f32.xlu0 %v5098_v44  ;;  %v5537_v24 = vpop.permute.xlu0 %5536  ;;  %v5506_v44 = vmul.f32 %v10938_v61, %v5458_v53 }
0x10e8   : > { %7722 = vpow2.f32 %v5068_v27  ;;  %v11062_v34 = vpop.permute.xlu1 %5705  ;;  %v5507_v27 = vmul.f32 %v10942_v3, %v5459_v0  ;;  %v5526_v3 = vld [vmem:[#allocation4 + $0x80] sm:$0xff]  ;;  %v5533_v0 = vld [vmem:[#allocation4 + $0xb8] sm:$0xff] }
0x10eb   : > { %5096 = vadd.xlane.f32.xlu0 %v5095_v8  ;;  %v5547_v59 = vpop.permute.xlu0 %5546  ;;  %v5461_v8 = vld [vmem:[#allocation4 + $0x78] sm:$0xff] }
0x10ec   : > { %v11068_v23 = vpop.permute.xlu1 %5715 }
0x10ef   : > { %5105 = vadd.xlane.f32.xlu0 %v5104_v63  ;;  %v11050_v1 = vpop.permute.xlu0 %5556  ;;  %v5509_v63 = vmul.f32 %v11010_v32, %v5461_v8  ;;  %v5529_v32 = vld [vmem:[#allocation4 + $0x98] sm:$0xff]  ;;  %v5598_v8 = vld [vmem:[#allocation4 + $0xc0] sm:$0xff] }
0x10f0   : > { %v11073_v46 = vpop.permute.xlu1 %5757 }
0x10f3   : > { %5111 = vadd.xlane.f32.xlu0 %v5110_v4  ;;  %v11053_v6 = vpop.permute.xlu0 %5566  ;;  %v5508_v4 = vmul.f32 %v10994_v52, %v5460_v42  ;;  %v5577_v52 = vmul.f32 %v11021_v56, %v5529_v32  ;;  %v5581_v56 = vmul.f32 %v11029_v2, %v5533_v0  ;;  %v5601_v2 = vld [vmem:[#allocation4 + $0xd8] sm:$0xff]  ;;  %v5131_v0 = vld [vmem:[#allocation4 + $0x1c8] sm:$0xff] }
0x10f4   : > { %v11084_v49 = vpop.permute.xlu1 %5767 }
0x10f5   : > { %v7723_v58 = vpop.eup %7722 }
0x10f6   : > { %7300 = vmatprep.mubr.msk.f32.mxu0 %vm845_vm2, %v7723_v58  ;;  %v5107_v15 = vsel %vm845_vm2, %v7723_v58, 0.0  ;;  %v5527_v58 = vld [vmem:[#allocation4 + $0x88] sm:$0xff] }
0x10f7   : > { %7301 = vmatmul.mubr.msk.f32.gmra.mxu0 %vm845_vm2, %v7721_v26  ;;  %5108 = vadd.xlane.f32.xlu1 %v5107_v15  ;;  %v11060_v13 = vpop.permute.xlu0 %5608  ;;  %v5575_v61 = vmul.f32 %v11016_v40, %v5527_v58  ;;  %v5574_v15 = vmul.f32 %v5537_v24, %v5526_v3  ;;  %v5579_v40 = vmul.f32 %v11026_v21, %v5531_v54  ;;  %v5530_v24 = vld [vmem:[#allocation4 + $0xa0] sm:$0xff]  ;;  %v5599_v21 = vld [vmem:[#allocation4 + $0xc8] sm:$0xff] }
0x10f8   : > { %v11095_v26 = vpop.permute.xlu1 %5777  ;;  %v5646_v42 = vmul.f32 %v11060_v13, %v5598_v8  ;;  %v5602_v3 = vld [vmem:[#allocation4 + $0xe0] sm:$0xff] }
0x10fb   : > { %v11064_v7 = vpop.permute.xlu0 %5618 }
0x10fc   : > { %v11103_v57 = vpop.permute.xlu1 %5787 }
0x10ff   : > { %v11066_v5 = vpop.permute.xlu0 %5628 }
0x1103   : > { %v11070_v22 = vpop.permute.xlu0 %5638 }
0x1107   : > { %v11076_v31 = vpop.permute.xlu0 %5680 }
0x1108   : > { %5952 = vrot.lane.b32.xlu1 %v5503_v12, %s7845_s6  ;;  %v5528_v12 = vld [vmem:[#allocation4 + $0x90] sm:$0xff] }
0x1109   : > { %5950 = vrot.lane.b32.xlu0 %v5502_v36, %s7845_s6  ;;  %v5576_v36 = vmul.f32 %v5547_v59, %v5528_v12  ;;  %v5532_v59 = vld [vmem:[#allocation4 + $0xb0] sm:$0xff] }
0x110a   : > { %v5580_v53 = vmul.f32 %v11053_v6, %v5532_v59  ;;  %v5649_v6 = vmul.f32 %v11034_v43, %v5601_v2  ;;  %v5604_v43 = vld [vmem:[#allocation4 + $0xf0] sm:$0xff] }
0x110b   : > { %v11082_v62 = vpop.permute.xlu0 %5690 }
0x110c   : > { %5956 = vrot.lane.b32.xlu1 %v5505_v35, %s7845_s6  ;;  %v11113_v35 = vpop.permute.xlu1 %5829 }
0x110d   : > { %5954 = vrot.lane.b32.xlu0 %v5504_v19, %s7845_s6  ;;  %v5578_v19 = vmul.f32 %v11050_v1, %v5530_v24  ;;  %v5647_v1 = vmul.f32 %v11031_v37, %v5599_v21  ;;  %v5603_v37 = vld [vmem:[#allocation4 + $0xe8] sm:$0xff] }
0x110e   : > { %v5651_v13 = vmul.f32 %v11036_v18, %v5603_v37 }
0x110f   : > { %v11091_v29 = vpop.permute.xlu0 %5700 }
0x1110   : > { %5960 = vrot.lane.b32.xlu1 %v5507_v27, %s7845_s6 }
0x1111   : > { %5958 = vrot.lane.b32.xlu0 %v5506_v44, %s7845_s6  ;;  %v11122_v44 = vpop.permute.xlu1 %5839 }
0x1113   : > { %v11101_v50 = vpop.permute.xlu0 %5710 }
0x1114   : > { %5964 = vrot.lane.b32.xlu1 %v5509_v63, %s7845_s6 }
0x1115   : > { %5962 = vrot.lane.b32.xlu0 %v5508_v4, %s7845_s6  ;;  %v5600_v4 = vld [vmem:[#allocation4 + $0xd0] sm:$0xff]  ;;  %v11133_v58 = vpop.permute.xlu1 %5849 }
0x1117   : > { %v11109_v48 = vpop.permute.xlu0 %5752 }
0x1118   : > { %5984 = vrot.lane.b32.xlu1 %v5575_v61, %s7844_s5  ;;  %v5648_v61 = vmul.f32 %v11064_v7, %v5600_v4  ;;  %v5652_v7 = vmul.f32 %v11070_v22, %v5604_v43  ;;  %v5074_v22 = vld [vmem:[#allocation3 + $0x1c8] sm:$0xff]  ;;  %v5077_v4 = vld [vmem:[#allocation3 + $0x1e0] sm:$0xff] }
0x1119   : > { %5982 = vrot.lane.b32.xlu0 %v5574_v15, %s7844_s5  ;;  %v5650_v15 = vmul.f32 %v11066_v5, %v5602_v3  ;;  %v5082_v8 = vmul.f32 %v11007_v38, %v5074_v22  ;;  %v5133_v3 = vld [vmem:[#allocation4 + $0x1d8] sm:$0xff] }
0x111b   : > { %v11120_v27 = vpop.permute.xlu0 %5762 }
0x111c   : > { %5988 = vrot.lane.b32.xlu1 %v5577_v52, %s7844_s5  ;;  %v11142_v52 = vpop.permute.xlu1 %5859 }
0x111d   : > { %5986 = vrot.lane.b32.xlu0 %v5576_v36, %s7844_s5 }
0x111f   : > { %v11129_v63 = vpop.permute.xlu0 %5772 }
0x1120   : > { %5992 = vrot.lane.b32.xlu1 %v5579_v40, %s7844_s5  ;;  %v5141_v36 = vpop.permute.xlu1 %5140 }
0x1121   : > { %5990 = vrot.lane.b32.xlu0 %v5578_v19, %s7844_s5 }
0x1123   : > { %v11140_v32 = vpop.permute.xlu0 %5782 }
0x1124   : > { %5996 = vrot.lane.b32.xlu1 %v5581_v56, %s7844_s5  ;;  %v5156_v54 = vpop.permute.xlu1 %5155 }
0x1125   : > { %5994 = vrot.lane.b32.xlu0 %v5580_v53, %s7844_s5  ;;  %v5130_v53 = vld [vmem:[#allocation4 + $0x1c0] sm:$0xff]  ;;  %v5181_v38 = vmul.f32 %v5156_v54, %v5133_v3 }
0x1127   : > { %v11147_v12 = vpop.permute.xlu0 %5824 }
0x1128   : > { %6016 = vrot.lane.b32.xlu1 %v5647_v1, %s7843_s4  ;;  %v5151_v40 = vpop.permute.xlu1 %5150 }
0x1129   : > { %6014 = vrot.lane.b32.xlu0 %v5646_v42, %s7843_s4  ;;  %v5178_v42 = vmul.f32 %v5141_v36, %v5130_v53 }
0x112b   : > { %v11150_v18 = vpop.permute.xlu0 %5834 }
0x112c   : > { %6020 = vrot.lane.b32.xlu1 %v5649_v6, %s7843_s4  ;;  %v11156_v19 = vpop.permute.xlu1 %5165 }
0x112d   : > { %6018 = vrot.lane.b32.xlu0 %v5648_v61, %s7843_s4 }
0x112f   : > { %v11152_v5 = vpop.permute.xlu0 %5844 }
0x1130   : > { %6024 = vrot.lane.b32.xlu1 %v5651_v13, %s7843_s4  ;;  %v11158_v59 = vpop.permute.xlu1 %5175 }
0x1131   : > { %6022 = vrot.lane.b32.xlu0 %v5650_v15, %s7843_s4  ;;  %v5085_v15 = vmul.f32 %v11013_v41, %v5077_v4  ;;  %v5076_v4 = vld [vmem:[#allocation3 + $0x1d8] sm:$0xff] }
0x1133   : > { %v11154_v24 = vpop.permute.xlu0 %5854 }
0x1135   : > { %6026 = vrot.lane.b32.xlu0 %v5652_v7, %s7843_s4  ;;  %v5132_v7 = vld [vmem:[#allocation4 + $0x1d0] sm:$0xff] }
0x1137   : > { %v5146_v56 = vpop.permute.xlu0 %5145 }
0x1138   : > { %v5179_v21 = vmul.f32 %v5146_v56, %v5131_v0  ;;  %v5180_v56 = vmul.f32 %v5151_v40, %v5132_v7  ;;  %v5078_v7 = vld [vmem:[#allocation3 + $0x1e8] sm:$0xff] }
0x113b   : > { %v5161_v41 = vpop.permute.xlu0 %5160 }
0x1151   : > { %v7293_v1 = vpop.f32.mrf.mxu0 }
0x1152   : > { %v5340_v2 = vadd.f32 %v7293_v1, %v5179_v21  ;;  %v5094_v6 = vpop.xlane.xlu1 %5093 }
0x1153   : > { %v5114_v61 = vadd.f32 %v5094_v6, %v5082_v8  ;;  %v5300_v37 = vpop.f32.mrf.mxu0  ;;  %v11168_v8 = vpop.permute.xlu0 %5170 }
0x1154   : > { %5348 = vst.msk [vmem:[#allocation4 + $0x1c8] sm:$0xff] %vm586_vm0, %v5340_v2  ;;  %v5339_v13 = vadd.f32 %v5300_v37, %v5178_v42  ;;  %v5073_v42 = vld [vmem:[#allocation3 + $0x1c0] sm:$0xff] }
0x1155   : > { %5122 = vst.msk [vmem:[#allocation3 + $0x1c8] sm:$0xff] %vm457_vm1, %v5114_v61  ;;  %v5081_v54 = vmul.f32 %v10971_v20, %v5073_v42  ;;  %v5084_v61 = vmul.f32 %v10974_v51, %v5076_v4  ;;  %v5086_v20 = vmul.f32 %v10988_v9, %v5078_v7 }
0x1156   : > { %5347 = vst.msk [vmem:[#allocation4 + $0x1c0] sm:$0xff] %vm586_vm0, %v5339_v13  ;;  %v5103_v43 = vpop.xlane.xlu1 %5102  ;;  %v5075_v13 = vld [vmem:[#allocation3 + $0x1d0] sm:$0xff] }
0x1157   : > { %v5117_v0 = vadd.f32 %v5103_v43, %v5085_v15  ;;  %v5083_v15 = vmul.f32 %v10985_v47, %v5075_v13  ;;  %v5079_v47 = vld [vmem:[#allocation3 + $0x1f0] sm:$0xff] }
0x1159   : > { %5125 = vst.msk [vmem:[#allocation3 + $0x1e0] sm:$0xff] %vm457_vm1, %v5117_v0  ;;  %v7296_v36 = vpop.f32.mrf.mxu0 }
0x115a   : > { %v5342_v22 = vadd.f32 %v7296_v36, %v5181_v38 }
0x115b   : > { %v5310_v53 = vpop.f32.mrf.mxu0 }
0x115c   : > { %v5871_v21 = vld [vmem:[#allocation3 + $0x1c8] sm:$0xff]  ;;  %5350 = vst.msk [vmem:[#allocation4 + $0x1d8] sm:$0xff] %vm586_vm0, %v5342_v22  ;;  %v5341_v1 = vadd.f32 %v5310_v53, %v5180_v56  ;;  %v5080_v56 = vld [vmem:[#allocation3 + $0x1f8] sm:$0xff] }
0x115d   : > { %7724 = vrcp.f32 %v5871_v21  ;;  %v5088_v53 = vmul.f32 %v10991_v33, %v5080_v56 }
0x115e   : > { %5349 = vst.msk [vmem:[#allocation4 + $0x1d0] sm:$0xff] %vm586_vm0, %v5341_v1 }
0x116a   : > { %v7725_v2 = vpop.eup %7724 }
0x116b   : > { %5901 = vperm.xlu1 %7355, %v7725_v2   ;;  %v5874_v2 = vld [vmem:[#allocation3 + $0x1e0] sm:$0xff] }
0x116c   : > { %v5091_v6 = vpop.xlane.xlu0 %5090 }
0x116d   : > { %v5113_v40 = vadd.f32 %v5091_v6, %v5081_v54  ;;  %v5087_v54 = vmul.f32 %v11018_v28, %v5079_v47  ;;  %v5382_v47 = vld [vmem:[#allocation4] sm:$0xff] }
0x116f   : > { %5121 = vst.msk [vmem:[#allocation3 + $0x1c0] sm:$0xff] %vm457_vm1, %v5113_v40 }
0x1170   : > { %v5100_v37 = vpop.xlane.xlu0 %5099 }
0x1171   : > { %v5116_v3 = vadd.f32 %v5100_v37, %v5084_v61  ;;  %v5135_v61 = vld [vmem:[#allocation4 + $0x1e8] sm:$0xff] }
0x1173   : > { %5124 = vst.msk [vmem:[#allocation3 + $0x1d8] sm:$0xff] %vm457_vm1, %v5116_v3  ;;  %v5134_v3 = vld [vmem:[#allocation4 + $0x1e0] sm:$0xff] }
0x1174   : > { %v5097_v43 = vpop.xlane.xlu0 %5096 }
0x1175   : > { %v5115_v0 = vadd.f32 %v5097_v43, %v5083_v15  ;;  %v5183_v15 = vmul.f32 %v11156_v19, %v5135_v61 }
0x1176   : > { %v5870_v38 = vld [vmem:[#allocation3 + $0x1c0] sm:$0xff] }
0x1177   : > { %7726 = vrcp.f32 %v5870_v38  ;;  %5123 = vst.msk [vmem:[#allocation3 + $0x1d0] sm:$0xff] %vm457_vm1, %v5115_v0  ;;  %v5182_v0 = vmul.f32 %v5161_v41, %v5134_v3 }
0x1178   : > { %v5106_v36 = vpop.xlane.xlu0 %5105 }
0x1179   : > { %v5118_v22 = vadd.f32 %v5106_v36, %v5086_v20 }
0x117a   : > { %v5873_v51 = vld [vmem:[#allocation3 + $0x1d8] sm:$0xff] }
0x117b   : > { %7728 = vrcp.f32 %v5873_v51  ;;  %5126 = vst.msk [vmem:[#allocation3 + $0x1e8] sm:$0xff] %vm457_vm1, %v5118_v22 }
0x117c   : > { %v5112_v21 = vpop.xlane.xlu0 %5111 }
0x117d   : > { %v5120_v1 = vadd.f32 %v5112_v21, %v5088_v53 }
0x117e   : > { %v5872_v42 = vld [vmem:[#allocation3 + $0x1d0] sm:$0xff] }
0x117f   : > { %7730 = vrcp.f32 %v5872_v42  ;;  %5128 = vst.msk [vmem:[#allocation3 + $0x1f8] sm:$0xff] %vm457_vm1, %v5120_v1  ;;  %v5430_v1 = vmul.f32 %v10906_v60, %v5382_v47 }
0x1180   : > { %v5109_v9 = vpop.xlane.xlu1 %5108  ;;  %v5951_v6 = vpop.permute.xlu0 %5950  ;;  %7732 = vrcp.f32 %v5874_v2 }
0x1181   : > { %v5119_v4 = vadd.f32 %v5109_v9, %v5087_v54  ;;  %v6166_v2 = vsel %vm586_vm0, %v5430_v1, %v5951_v6  ;;  %v5385_v6 = vld [vmem:[#allocation4 + $0x18] sm:$0xff] }
0x1182   : > { %v5875_v40 = vld [vmem:[#allocation3 + $0x1e8] sm:$0xff] }
0x1183   : > { %7734 = vrcp.f32 %v5875_v40  ;;  %5127 = vst.msk [vmem:[#allocation3 + $0x1f0] sm:$0xff] %vm457_vm1, %v5119_v4  ;;  %v5383_v4 = vld [vmem:[#allocation4 + $0x8] sm:$0xff]  ;;  %v5384_v40 = vld [vmem:[#allocation4 + $0x10] sm:$0xff] }
0x1184   : > { %v7727_v33 = vpop.eup %7726  ;;  %v5953_v37 = vpop.permute.xlu1 %5952  ;;  %v5432_v3 = vmul.f32 %v10908_v14, %v5384_v40 }
0x1185   : > { %v5955_v13 = vpop.permute.xlu0 %5954  ;;  %5896 = vperm.xlu0 %7354, %v7727_v33   ;;  %v5431_v33 = vmul.f32 %v10910_v25, %v5383_v4  ;;  %v5670_v4 = vld [vmem:[#allocation4 + $0x100] sm:$0xff] }
0x1186   : > { %v5877_v43 = vld [vmem:[#allocation3 + $0x1f8] sm:$0xff] }
0x1187   : > { %7736 = vrcp.f32 %v5877_v43  ;;  %v7299_v7 = vpop.f32.mrf.mxu0  ;;  %v6167_v60 = vsel %vm586_vm0, %v5431_v33, %v5953_v37  ;;  %v6168_v43 = vsel %vm586_vm0, %v5432_v3, %v5955_v13 }
0x1188   : > { %v7729_v28 = vpop.eup %7728  ;;  %v5344_v38 = vadd.f32 %v7299_v7, %v5183_v15  ;;  %v5957_v20 = vpop.permute.xlu1 %5956 }
0x1189   : > { %v5959_v36 = vpop.permute.xlu0 %5958  ;;  %v5320_v56 = vpop.f32.mrf.mxu0  ;;  %5911 = vperm.xlu1 %7355, %v7729_v28  }
0x118a   : > { %v5876_v22 = vld [vmem:[#allocation3 + $0x1f0] sm:$0xff]  ;;  %5352 = vst.msk [vmem:[#allocation4 + $0x1e8] sm:$0xff] %vm586_vm0, %v5344_v38  ;;  %v5343_v51 = vadd.f32 %v5320_v56, %v5182_v0  ;;  %v5386_v0 = vld [vmem:[#allocation4 + $0x20] sm:$0xff] }
0x118b   : > { %7738 = vrcp.f32 %v5876_v22  ;;  %v5433_v22 = vmul.f32 %v10914_v11, %v5385_v6  ;;  %v5434_v25 = vmul.f32 %v10912_v16, %v5386_v0 }
0x118c   : > { %v7731_v53 = vpop.eup %7730  ;;  %5351 = vst.msk [vmem:[#allocation4 + $0x1e0] sm:$0xff] %vm586_vm0, %v5343_v51  ;;  %v5961_v21 = vpop.permute.xlu1 %5960  ;;  %v5605_v51 = vld [vmem:[#allocation4 + $0xf8] sm:$0xff] }
0x118d   : > { %v5963_v19 = vpop.permute.xlu0 %5962  ;;  %5906 = vperm.xlu0 %7354, %v7731_v53   ;;  %v7733_v41 = vpop.eup %7732  ;;  %v5653_v14 = vmul.f32 %v11043_v45, %v5605_v51  ;;  %v6169_v37 = vsel %vm586_vm0, %v5433_v22, %v5957_v20  ;;  %v6170_v13 = vsel %vm586_vm0, %v5434_v25, %v5959_v36  ;;  %v5671_v45 = vld [vmem:[#allocation4 + $0x108] sm:$0xff]  ;;  %v5718_v36 = vmul.f32 %v11076_v31, %v5670_v4  ;;  %v5674_v25 = vld [vmem:[#allocation4 + $0x120] sm:$0xff] }
0x118e   : > { %v5719_v20 = vmul.f32 %v11047_v39, %v5671_v45  ;;  %v5672_v39 = vld [vmem:[#allocation4 + $0x110] sm:$0xff] }
0x1190   : > { %v7735_v42 = vpop.eup %7734  ;;  %v5965_v54 = vpop.permute.xlu1 %5964 }
0x1191   : > { %v5983_v9 = vpop.permute.xlu0 %5982  ;;  %5916 = vperm.xlu0 %7354, %v7733_v41   ;;  %5921 = vperm.xlu1 %7355, %v7735_v42   ;;  %v5388_v41 = vld [vmem:[#allocation4 + $0x30] sm:$0xff]  ;;  %v5387_v42 = vld [vmem:[#allocation4 + $0x28] sm:$0xff] }
0x1192   : > { %v6175_v61 = vsel %vm6174_vm3, %v6166_v2, %v5983_v9  ;;  %v5436_v16 = vmul.f32 %v10916_v30, %v5388_v41  ;;  %v5435_v11 = vmul.f32 %v10930_v55, %v5387_v42  ;;  %v5673_v55 = vld [vmem:[#allocation4 + $0x118] sm:$0xff]  ;;  %v5742_v41 = vld [vmem:[#allocation4 + $0x140] sm:$0xff] }
0x1193   : > { %v5721_v31 = vmul.f32 %v11055_v17, %v5673_v55  ;;  %v5814_v55 = vld [vmem:[#allocation4 + $0x180] sm:$0xff] }
0x1194   : > { %v7737_v15 = vpop.eup %7736  ;;  %v5985_v7 = vpop.permute.xlu1 %5984  ;;  %v6171_v40 = vsel %vm586_vm0, %v5435_v11, %v5961_v21  ;;  %v6172_v33 = vsel %vm586_vm0, %v5436_v16, %v5963_v19  ;;  %v5720_v21 = vmul.f32 %v11082_v62, %v5672_v39  ;;  %v5722_v62 = vmul.f32 %v11091_v29, %v5674_v25 }
0x1195   : > { %v5987_v28 = vpop.permute.xlu0 %5986  ;;  %v6176_v38 = vsel %vm6174_vm3, %v6167_v60, %v5985_v7  ;;  %5931 = vperm.xlu1 %7355, %v7737_v15   ;;  %v5389_v60 = vld [vmem:[#allocation4 + $0x38] sm:$0xff] }
0x1196   : > { %v6177_v56 = vsel %vm6174_vm3, %v6168_v43, %v5987_v28  ;;  %v5437_v30 = vmul.f32 %v10932_v10, %v5389_v60  ;;  %v5675_v10 = vld [vmem:[#allocation4 + $0x128] sm:$0xff] }
0x1197   : > { %v5723_v17 = vmul.f32 %v11062_v34, %v5675_v10  ;;  %v5820_v10 = vld [vmem:[#allocation4 + $0x1b0] sm:$0xff] }
0x1198   : > { %v7739_v53 = vpop.eup %7738  ;;  %v5989_v47 = vpop.permute.xlu1 %5988  ;;  %v6173_v19 = vsel %vm586_vm0, %v5437_v30, %v5965_v54 }
0x1199   : > { %v5991_v1 = vpop.permute.xlu0 %5990  ;;  %v6178_v2 = vsel %vm6174_vm3, %v6169_v37, %v5989_v47  ;;  %5926 = vperm.xlu0 %7354, %v7739_v53   ;;  %6028 = vrot.lane.b32.xlu1 %v5653_v14, %s7843_s4  ;;  %v5676_v37 = vld [vmem:[#allocation4 + $0x130] sm:$0xff] }
0x119a   : > { %v6179_v9 = vsel %vm6174_vm3, %v6170_v13, %v5991_v1  ;;  %v5724_v34 = vmul.f32 %v11101_v50, %v5676_v37 }
0x119c   : > { %v5993_v3 = vpop.permute.xlu1 %5992 }
0x119d   : > { %v5995_v15 = vpop.permute.xlu0 %5994  ;;  %v6180_v43 = vsel %vm6174_vm3, %v6171_v40, %v5993_v3  ;;  %6046 = vrot.lane.b32.xlu0 %v5718_v36, %s7842_s30  ;;  %6048 = vrot.lane.b32.xlu1 %v5719_v20, %s7842_s30  ;;  %v5137_v36 = vld [vmem:[#allocation4 + $0x1f8] sm:$0xff]  ;;  %v5136_v40 = vld [vmem:[#allocation4 + $0x1f0] sm:$0xff] }
0x119e   : > { %v11210_v7 = vsel %vm6174_vm3, %v6172_v33, %v5995_v15  ;;  %v5749_v33 = vld [vmem:[#allocation4 + $0x178] sm:$0xff] }
0x119f   : > { %v5797_v3 = vmul.f32 %v11103_v57, %v5749_v33  ;;  %v5862_v57 = vmul.f32 %v11147_v12, %v5814_v55 }
0x11a0   : > { %v5997_v28 = vpop.permute.xlu1 %5996 }
0x11a1   : > { %v6015_v6 = vpop.permute.xlu0 %6014  ;;  %v11219_v0 = vsel %vm6174_vm3, %v6173_v19, %v5997_v28  ;;  %6050 = vrot.lane.b32.xlu0 %v5720_v21, %s7842_s30  ;;  %6052 = vrot.lane.b32.xlu1 %v5721_v31, %s7842_s30  ;;  %v5819_v19 = vld [vmem:[#allocation4 + $0x1a8] sm:$0xff] }
0x11a2   : > { %v11222_v22 = vsel %vm6183_vm4, %v6175_v61, %v6015_v6  ;;  %v5677_v61 = vld [vmem:[#allocation4 + $0x138] sm:$0xff]  ;;  %v5867_v12 = vmul.f32 %v11133_v58, %v5819_v19 }
0x11a3   : > { %v5725_v13 = vmul.f32 %v11068_v23, %v5677_v61  ;;  %v5790_v23 = vmul.f32 %v11109_v48, %v5742_v41  ;;  %v5746_v48 = vld [vmem:[#allocation4 + $0x160] sm:$0xff]  ;;  %v5821_v6 = vld [vmem:[#allocation4 + $0x1b8] sm:$0xff] }
0x11a4   : > { %v6017_v51 = vpop.permute.xlu1 %6016  ;;  %v5794_v20 = vmul.f32 %v11129_v63, %v5746_v48  ;;  %v5815_v63 = vld [vmem:[#allocation4 + $0x188] sm:$0xff]  ;;  %v5889_v61 = vld [vmem:[#allocation4 + $0x1d8] sm:$0xff] }
0x11a5   : > { %v6019_v54 = vpop.permute.xlu0 %6018  ;;  %v11229_v14 = vsel %vm6183_vm4, %v6176_v38, %v6017_v51  ;;  %6054 = vrot.lane.b32.xlu0 %v5722_v62, %s7842_s30  ;;  %6056 = vrot.lane.b32.xlu1 %v5723_v17, %s7842_s30  ;;  %v5887_v17 = vld [vmem:[#allocation4 + $0x1c8] sm:$0xff] }
0x11a6   : > { %v11232_v53 = vsel %vm6183_vm4, %v6177_v56, %v6019_v54  ;;  %v5743_v56 = vld [vmem:[#allocation4 + $0x148] sm:$0xff] }
0x11a7   : > { %v5791_v42 = vmul.f32 %v11073_v46, %v5743_v56  ;;  %v5747_v46 = vld [vmem:[#allocation4 + $0x168] sm:$0xff]  ;;  %v5890_v56 = vld [vmem:[#allocation4 + $0x1e0] sm:$0xff] }
0x11a8   : > { %v6021_v47 = vpop.permute.xlu1 %6020  ;;  %v5795_v4 = vmul.f32 %v11095_v26, %v5747_v46 }
0x11a9   : > { %v6023_v29 = vpop.permute.xlu0 %6022  ;;  %v11239_v1 = vsel %vm6183_vm4, %v6178_v2, %v6021_v47  ;;  %6058 = vrot.lane.b32.xlu0 %v5724_v34, %s7842_s30  ;;  %6060 = vrot.lane.b32.xlu1 %v5725_v13, %s7842_s30  ;;  %v5745_v2 = vld [vmem:[#allocation4 + $0x158] sm:$0xff]  ;;  %v5891_v47 = vld [vmem:[#allocation4 + $0x1e8] sm:$0xff] }
0x11aa   : > { %v11242_v38 = vsel %vm6183_vm4, %v6179_v9, %v6023_v29  ;;  %v5744_v9 = vld [vmem:[#allocation4 + $0x150] sm:$0xff]  ;;  %v5793_v11 = vmul.f32 %v11084_v49, %v5745_v2  ;;  %v5185_v49 = vmul.f32 %v11158_v59, %v5137_v36  ;;  %v5863_v59 = vmul.f32 %v11113_v35, %v5815_v63  ;;  %v5818_v35 = vld [vmem:[#allocation4 + $0x1a0] sm:$0xff] }
0x11ab   : > { %v5792_v45 = vmul.f32 %v11120_v27, %v5744_v9  ;;  %v5748_v27 = vld [vmem:[#allocation4 + $0x170] sm:$0xff]  ;;  %v5866_v28 = vmul.f32 %v11152_v5, %v5818_v35  ;;  %v5886_v5 = vld [vmem:[#allocation4 + $0x1c0] sm:$0xff] }
0x11ac   : > { %v6025_v16 = vpop.permute.xlu1 %6024  ;;  %v5796_v15 = vmul.f32 %v11140_v32, %v5748_v27  ;;  %v5817_v32 = vld [vmem:[#allocation4 + $0x198] sm:$0xff] }
0x11ad   : > { %v11249_v50 = vsel %vm6183_vm4, %v6180_v43, %v6025_v16  ;;  %6078 = vrot.lane.b32.xlu0 %v5790_v23, %s7841_s29  ;;  %6080 = vrot.lane.b32.xlu1 %v5791_v42, %s7841_s29  ;;  %v5184_v43 = vmul.f32 %v11168_v8, %v5136_v40  ;;  %v5816_v8 = vld [vmem:[#allocation4 + $0x190] sm:$0xff]  ;;  %v5865_v31 = vmul.f32 %v11122_v44, %v5817_v32  ;;  %v11286_v58 = vpop.permute.xlu0 %6026 }
0x11ae   : > { %v5864_v21 = vmul.f32 %v11150_v18, %v5816_v8  ;;  %v5869_v44 = vmul.f32 %v11142_v52, %v5821_v6  ;;  %v5868_v18 = vmul.f32 %v11154_v24, %v5820_v10  ;;  %v5888_v24 = vld [vmem:[#allocation4 + $0x1d0] sm:$0xff] }
0x11b1   : > { %6082 = vrot.lane.b32.xlu0 %v5792_v45, %s7841_s29  ;;  %6084 = vrot.lane.b32.xlu1 %v5793_v11, %s7841_s29 }
0x11b5   : > { %6086 = vrot.lane.b32.xlu0 %v5794_v20, %s7841_s29  ;;  %6088 = vrot.lane.b32.xlu1 %v5795_v4, %s7841_s29 }
0x11b7   : > { %v7302_v60 = vpop.f32.mrf.mxu0 }
0x11b8   : > { %v5346_v26 = vadd.f32 %v7302_v60, %v5185_v49 }
0x11b9   : > { %v5330_v30 = vpop.f32.mrf.mxu0  ;;  %6090 = vrot.lane.b32.xlu0 %v5796_v15, %s7841_s29  ;;  %6092 = vrot.lane.b32.xlu1 %v5797_v3, %s7841_s29 }
0x11ba   : > { %5354 = vst.msk [vmem:[#allocation4 + $0x1f8] sm:$0xff] %vm586_vm0, %v5346_v26  ;;  %v5345_v39 = vadd.f32 %v5330_v30, %v5184_v43 }
0x11bc   : > { %5353 = vst.msk [vmem:[#allocation4 + $0x1f0] sm:$0xff] %vm586_vm0, %v5345_v39 }
0x11bd   : > { %6110 = vrot.lane.b32.xlu0 %v5862_v57, %s7840_s28  ;;  %6112 = vrot.lane.b32.xlu1 %v5863_v59, %s7840_s28 }
0x11c1   : > { %6114 = vrot.lane.b32.xlu0 %v5864_v21, %s7840_s28  ;;  %6116 = vrot.lane.b32.xlu1 %v5865_v31, %s7840_s28  ;;  %v5893_v16 = vld [vmem:[#allocation4 + $0x1f8] sm:$0xff] }
0x11c3   : > { %v5892_v45 = vld [vmem:[#allocation4 + $0x1f0] sm:$0xff] }
0x11c5   : > { %6118 = vrot.lane.b32.xlu0 %v5866_v28, %s7840_s28  ;;  %6120 = vrot.lane.b32.xlu1 %v5867_v12, %s7840_s28 }
0x11c9   : > { %6122 = vrot.lane.b32.xlu0 %v5868_v18, %s7840_s28  ;;  %6124 = vrot.lane.b32.xlu1 %v5869_v44, %s7840_s28 }
0x11e6   : > { %v5902_v25 = vpop.permute.xlu1 %5901 }
0x11e7   : > { %v5935_v62 = vmul.f32 %v5902_v25, %v5887_v17 }
0x11e9   : > { %6144 = vrot.lane.b32.xlu1 %v5935_v62, %s7839_s27 }
0x1200   : > { %v5897_v51 = vpop.permute.xlu0 %5896 }
0x1201   : > { %v5934_v54 = vmul.f32 %v5897_v51, %v5886_v5 }
0x1203   : > { %6142 = vrot.lane.b32.xlu0 %v5934_v54, %s7839_s27 }
0x1204   : > { %v5912_v52 = vpop.permute.xlu1 %5911 }
0x1205   : > { %v5937_v37 = vmul.f32 %v5912_v52, %v5889_v61 }
0x1207   : > { %6148 = vrot.lane.b32.xlu1 %v5937_v37, %s7839_s27 }
0x1208   : > { %v5907_v13 = vpop.permute.xlu0 %5906 }
0x1209   : > { %v5936_v34 = vmul.f32 %v5907_v13, %v5888_v24 }
0x120b   : > { %6146 = vrot.lane.b32.xlu0 %v5936_v34, %s7839_s27 }
0x120c   : > { %v5922_v29 = vpop.permute.xlu1 %5921  ;;  %v5917_v41 = vpop.permute.xlu0 %5916 }
0x120d   : > { %v5939_v42 = vmul.f32 %v5922_v29, %v5891_v47  ;;  %v5938_v23 = vmul.f32 %v5917_v41, %v5890_v56 }
0x120f   : > { %6152 = vrot.lane.b32.xlu1 %v5939_v42, %s7839_s27  ;;  %6150 = vrot.lane.b32.xlu0 %v5938_v23, %s7839_s27 }
0x1210   : > { %v5932_v2 = vpop.permute.xlu1 %5931 }
0x1211   : > { %v5941_v9 = vmul.f32 %v5932_v2, %v5893_v16 }
0x1213   : > { %6156 = vrot.lane.b32.xlu1 %v5941_v9, %s7839_s27 }
0x1214   : > { %v6029_v11 = vpop.permute.xlu1 %6028  ;;  %v5927_v46 = vpop.permute.xlu0 %5926 }
0x1215   : > { %v6191_v48 = vsel %vm6183_vm4, %v11219_v0, %v6029_v11  ;;  %v5940_v4 = vmul.f32 %v5927_v46, %v5892_v45  ;;  %v6190_v45 = vsel %vm6183_vm4, %v11210_v7, %v11286_v58 }
0x1217   : > { %6154 = vrot.lane.b32.xlu0 %v5940_v4, %s7839_s27 }
0x1218   : > { %v6049_v20 = vpop.permute.xlu1 %6048  ;;  %v6047_v0 = vpop.permute.xlu0 %6046 }
0x1219   : > { %v6193_v31 = vsel %vm845_vm2, %v11229_v14, %v6049_v20  ;;  %v6192_v18 = vsel %vm845_vm2, %v11222_v22, %v6047_v0 }
0x121c   : > { %v6053_v36 = vpop.permute.xlu1 %6052  ;;  %v6051_v43 = vpop.permute.xlu0 %6050 }
0x121d   : > { %v6195_v40 = vsel %vm845_vm2, %v11239_v1, %v6053_v36  ;;  %v6194_v37 = vsel %vm845_vm2, %v11232_v53, %v6051_v43 }
0x1220   : > { %v6057_v33 = vpop.permute.xlu1 %6056  ;;  %v6055_v30 = vpop.permute.xlu0 %6054 }
0x1221   : > { %v6197_v49 = vsel %vm845_vm2, %v11249_v50, %v6057_v33  ;;  %v6196_v47 = vsel %vm845_vm2, %v11242_v38, %v6055_v30 }
0x1224   : > { %v6061_v27 = vpop.permute.xlu1 %6060  ;;  %v6059_v55 = vpop.permute.xlu0 %6058 }
0x1225   : > { %v11302_v3 = vsel %vm845_vm2, %v6191_v48, %v6061_v27  ;;  %v6198_v48 = vsel %vm845_vm2, %v6190_v45, %v6059_v55 }
0x1228   : > { %v6081_v15 = vpop.permute.xlu1 %6080  ;;  %v6079_v1 = vpop.permute.xlu0 %6078 }
0x1229   : > { %v6202_v19 = vsel %vm6200_vm5, %v6193_v31, %v6081_v15  ;;  %v6201_v25 = vsel %vm6200_vm5, %v6192_v18, %v6079_v1 }
0x122c   : > { %v6085_v60 = vpop.permute.xlu1 %6084  ;;  %v6083_v57 = vpop.permute.xlu0 %6082 }
0x122d   : > { %v6204_v51 = vsel %vm6200_vm5, %v6195_v40, %v6085_v60  ;;  %v6203_v22 = vsel %vm6200_vm5, %v6194_v37, %v6083_v57 }
0x1230   : > { %v6089_v26 = vpop.permute.xlu1 %6088  ;;  %v6087_v50 = vpop.permute.xlu0 %6086 }
0x1231   : > { %v6206_v29 = vsel %vm6200_vm5, %v6197_v49, %v6089_v26  ;;  %v6205_v56 = vsel %vm6200_vm5, %v6196_v47, %v6087_v50 }
0x1234   : > { %v6093_v63 = vpop.permute.xlu1 %6092  ;;  %v6091_v21 = vpop.permute.xlu0 %6090 }
0x1235   : > { %v6208_v38 = vsel %vm6200_vm5, %v11302_v3, %v6093_v63  ;;  %v6207_v4 = vsel %vm6200_vm5, %v6198_v48, %v6091_v21 }
0x1238   : > { %v6113_v39 = vpop.permute.xlu1 %6112  ;;  %v6111_v6 = vpop.permute.xlu0 %6110 }
0x1239   : > { %v6211_v35 = vsel %vm6209_vm6, %v6202_v19, %v6113_v39  ;;  %v6210_v17 = vsel %vm6209_vm6, %v6201_v25, %v6111_v6 }
0x123c   : > { %v6117_v59 = vpop.permute.xlu1 %6116  ;;  %v6115_v14 = vpop.permute.xlu0 %6114 }
0x123d   : > { %v6213_v54 = vsel %vm6209_vm6, %v6204_v51, %v6117_v59  ;;  %v6212_v24 = vsel %vm6209_vm6, %v6203_v22, %v6115_v14 }
0x1240   : > { %v6121_v32 = vpop.permute.xlu1 %6120  ;;  %v6119_v10 = vpop.permute.xlu0 %6118 }
0x1241   : > { %v6215_v53 = vsel %vm6209_vm6, %v6206_v29, %v6121_v32  ;;  %v6214_v41 = vsel %vm6209_vm6, %v6205_v56, %v6119_v10 }
0x1244   : > { %v6125_v8 = vpop.permute.xlu1 %6124  ;;  %v6123_v44 = vpop.permute.xlu0 %6122 }
0x1245   : > { %v6217_v9 = vsel %vm6209_vm6, %v6208_v38, %v6125_v8  ;;  %v6216_v20 = vsel %vm6209_vm6, %v6207_v4, %v6123_v44 }
0x125b   : > { %v6145_v12 = vpop.permute.xlu1 %6144 }
0x125c   : > { %v6220_v28 = vsel %vm6218_vm7, %v6211_v35, %v6145_v12 }
0x125d   : > { %6228 = vst [vmem:[%s11312_s10 + $0x8] sm:$0xff] %v6220_v28 }
0x1275   : > { %v6143_v62 = vpop.permute.xlu0 %6142 }
0x1276   : > { %v6219_v5 = vsel %vm6218_vm7, %v6210_v17, %v6143_v62 }
0x1277   : > { %6227 = vst [vmem:[%s11312_s10] sm:$0xff] %v6219_v5 }
0x1279   : > { %v6149_v61 = vpop.permute.xlu1 %6148 }
0x127a   : > { %v6222_v52 = vsel %vm6218_vm7, %v6213_v54, %v6149_v61 }
0x127b   : > { %6230 = vst [vmem:[%s11312_s10 + $0x18] sm:$0xff] %v6222_v52 }
0x127d   : > { %v6147_v13 = vpop.permute.xlu0 %6146 }
0x127e   : > { %v6221_v34 = vsel %vm6218_vm7, %v6212_v24, %v6147_v13 }
0x127f   : > { %6229 = vst [vmem:[%s11312_s10 + $0x10] sm:$0xff] %v6221_v34 }
0x1281   : > { %v6153_v42 = vpop.permute.xlu1 %6152  ;;  %v6151_v23 = vpop.permute.xlu0 %6150 }
0x1282   : > { %v6224_v16 = vsel %vm6218_vm7, %v6215_v53, %v6153_v42  ;;  %v6223_v2 = vsel %vm6218_vm7, %v6214_v41, %v6151_v23 }
0x1283   : > { %6232 = vst [vmem:[%s11312_s10 + $0x28] sm:$0xff] %v6224_v16  ;;  %6231 = vst [vmem:[%s11312_s10 + $0x20] sm:$0xff] %v6223_v2 }
0x1285   : > { %v6157_v11 = vpop.permute.xlu1 %6156 }
0x1286   : > { %v6226_v46 = vsel %vm6218_vm7, %v6217_v9, %v6157_v11 }
0x1287   : > { %6234 = vst [vmem:[%s11312_s10 + $0x38] sm:$0xff] %v6226_v46 }
0x1289   : > { %v6155_v36 = vpop.permute.xlu0 %6154 }
0x128a   : > { %v6225_v40 = vsel %vm6218_vm7, %v6216_v20, %v6155_v36 }
0x128b   : > { %6233 = vst [vmem:[%s11312_s10 + $0x30] sm:$0xff] %v6225_v40 }
0x128c PF: > { %s13_s16 = sadd.s32 1, %s7834_s16   ;;  %s11774_s12 = smov %s7822_s13 }
0x128d   : > { %p10_p10 = scmp.ge.s32.totalorder %s13_s16, 4   ;;  %s11775_s13 = smov %s7905_s21 }
0x128e   : > { %s11776_s14 = smov %s7830_s15  ;;  %s11777_s15 = smov %s11779_s17 }
0x128f   :  { %12 = sbr.rel (!%p10_p10) target bundleno = 3 (0x3), region = 226 }

</bundles_post_ra>
